<compile_context>
chip_gen: v7x
topology: tpu7x:2x2x1
jax: 0.10.0
libtpu: 0.0.40
codegen_flags: <defaults>
</compile_context>

<pallas_src>
import functools
import math

import numpy as np
import jax
import jax.numpy as jnp
from jax import lax
from jax.experimental import pallas as pl
from jax.experimental.pallas import tpu as pltpu


# -----------------------------------------------------------------------------
# Deterministic Gabor filter bank (mirrors how V1/pcbc.py builds SumGabor filters)
# -----------------------------------------------------------------------------
def _gabor(ksize, sig, theta, lam, gamma, phi):
    half = ksize // 2
    ys, xs = np.meshgrid(np.arange(-half, half + 1, dtype=np.float64),
                         np.arange(-half, half + 1, dtype=np.float64), indexing="ij")
    xt = xs * np.cos(theta) + ys * np.sin(theta)
    yt = -xs * np.sin(theta) + ys * np.cos(theta)
    return (np.exp(-(xt ** 2 + (gamma ** 2) * yt ** 2) / (2.0 * sig ** 2))
            * np.cos(2.0 * np.pi * xt / lam + phi))


def build_sum_gabor_filters(ksize, channels, sig=2.0, lam=4.0, psi=5000.0):
    """32 'on' Gabor filters (8 orientations x 4 phases), replicated over input channels."""
    filters = []
    gamma = 0.71
    for theta in np.arange(0, np.pi, np.pi / 8):
        for phi in np.arange(0, np.pi, np.pi / 4):
            kern = _gabor(ksize, sig, theta, lam, gamma, phi)
            on_k = np.maximum(0.0, kern)
            off_k = np.maximum(0.0, -kern)
            total = on_k.sum() + off_k.sum()
            w = on_k * psi / total
            filters.append(np.broadcast_to(w, (channels, ksize, ksize)))
    return np.stack(filters, axis=0).astype(np.float32)           # (32, C, k, k)


# -----------------------------------------------------------------------------
# Pallas kernel: one (batch, row-band) grid step.  Static indexing only.
# -----------------------------------------------------------------------------
def _sum_gabor_kernel(xa_ref, xb_ref, w_ref, m_ref, o_ref, slab_ref, *,
                      W, K, Ceff, TH, PAD):
    # xa_ref : (1, Ceff, TH*W)  bf16  this band's flat (row-major) image lanes
    # xb_ref : (1, Ceff, TH*W)  bf16  the next flat block (bottom-halo source)
    # w_ref  : (O, K*K*Ceff)    bf16  host K-folded filters, already output-oriented
    # m_ref  : (K, TH*W)        bf16  per-kx horizontal 'same'-padding masks (0/1)
    # o_ref  : (1, O, TH*W)     f32   lane-dense flat output block
    # slab   : (K*K*Ceff, TH*W) bf16  im2col slab (contraction dim on sublanes)
    THW = TH * W
    for c in range(Ceff):
        for ky in range(K):
            for kx in range(K):
                s = ky * W + kx                      # static flat shift of this tap
                t = (ky * K + kx) * Ceff + c         # slab / weight row
                masked = PAD > 0 and kx != PAD
                n1 = THW - s
                if n1 > 0:                           # head: taken from this band's block
                    p1 = xa_ref[0, c:c + 1, s:THW]
                    if masked:
                        p1 = p1 * m_ref[kx:kx + 1, 0:n1]
                    slab_ref[t:t + 1, 0:n1] = p1
                if s > 0:                            # tail: spills into the next block
                    p2 = xb_ref[0, c:c + 1, 0:s]
                    if masked:
                        p2 = p2 * m_ref[kx:kx + 1, n1:THW]
                    slab_ref[t:t + 1, n1:THW] = p2
    # Single K-folded MXU contraction; the result is already (O, TH*W): no transpose,
    # unmasked lane-dense output stores, f32 accumulation over bf16 operands.
    o_ref[0, :, :] = jnp.dot(w_ref[...], slab_ref[...],
                             preferred_element_type=jnp.float32)


# -----------------------------------------------------------------------------
# Band-size / VMEM planning
# -----------------------------------------------------------------------------
def _round_up(n, m):
    return ((n + m - 1) // m) * m


def _vmem_estimate(TH, W, Ceff, K, O):
    """Per-grid-step VMEM bytes incl. physical lane/sublane padding and default
    double-buffering of all pallas-managed blocks."""
    THW = TH * W
    KKC = K * K * Ceff
    lanes = lambda n: _round_up(n, 128)
    x_blk = _round_up(Ceff, 16) * lanes(THW) * 2          # bf16 band block (x2 inputs)
    m_blk = _round_up(K, 16) * lanes(THW) * 2
    w_blk = _round_up(O, 16) * lanes(KKC) * 2
    o_blk = _round_up(O, 8) * lanes(THW) * 4              # f32 output block
    slab = _round_up(KKC, 16) * lanes(THW) * 2            # scratch (single buffer)
    return 2 * (2 * x_blk + m_blk + w_blk + o_blk) + slab


def _choose_band_rows(H, W, Ceff, K, O, budget_bytes):
    """Rows per band: TH*W is always a multiple of 128 (tile-aligned, lane-dense blocks),
    the band covers its own flat halo (two-block scheme), TH need not divide H (the last
    partial band is masked), and the footprint stays inside the VMEM budget."""
    unit = 128 // math.gcd(W, 128)                 # smallest TH with TH*W % 128 == 0
    halo = (K - 1) * (W + 1)                       # flat halo length of one band
    th_min = unit
    while th_min * W < halo:
        th_min += unit
    max_thw = 32768                                # keep unrolled tap code reasonable
    cap_rows = max(th_min, ((max_thw // W) // unit) * unit)
    th_cap = max(min(_round_up(H, unit), cap_rows), th_min)
    best = th_min
    th = th_min
    while th <= th_cap:
        if _vmem_estimate(th, W, Ceff, K, O) <= budget_bytes:
            best = th
        th += unit
    n_bands = max(1, -(-H // best))
    return best, n_bands


# -----------------------------------------------------------------------------
# Wrapper
# -----------------------------------------------------------------------------
class SumGaborPallas:
    """Pallas TPU implementation of V1/pcbc.py::SumGabor:
       forward(x) = conv2d(x, filters, bias=None, stride=1, padding=ksize // 2)."""

    def __init__(self, ksize, filters):
        filters = np.asarray(filters, np.float32)            # (O, C, k, k)
        O, C, kh, kw = filters.shape
        assert kh == ksize and kw == ksize
        self.ksize = ksize
        self.padding = ksize // 2
        self.out_ch = O
        self.in_ch = C
        # SumGabor replicates the identical spatial filter across all input channels; when
        # that holds, sum x over channels and contract over K*K only (C-fold less work).
        self.channels_replicated = C > 1 and all(
            np.allclose(filters[:, c], filters[:, 0]) for c in range(1, C))
        if self.channels_replicated:
            self.c_eff = 1
            wf = filters[:, 0].reshape(O, ksize * ksize)                         # (O, K*K)
        else:
            self.c_eff = C
            wf = np.transpose(filters, (0, 2, 3, 1)).reshape(O, ksize * ksize * C)
        # Host K-fold, already in output orientation; bf16 weights, f32 MXU accumulation.
        self.w_folded = jnp.asarray(wf, dtype=jnp.bfloat16)

        try:
            self._vmem_cap = int(pltpu.get_tpu_info().vmem_capacity_bytes)
        except Exception:
            self._vmem_cap = 64 * 1024 * 1024                 # conservative (v7x per-core)

    def __call__(self, x_nchw):
        B, C, H, W = x_nchw.shape
        assert C == self.in_ch
        K, PAD, O, Ceff = self.ksize, self.padding, self.out_ch, self.c_eff
        KKC = K * K * Ceff

        x = x_nchw.astype(jnp.float32)
        x_eff = jnp.sum(x, axis=1, keepdims=True) if self.channels_replicated else x

        budget = int(self._vmem_cap * 0.55)                   # headroom for Mosaic scratch
        TH, n_bands = _choose_band_rows(H, W, Ceff, K, O, budget)
        THW = TH * W
        HPAD = n_bands * TH + K - 1                           # halos + phantom band rows
        LTOT = (n_bands + 1) * THW                            # +1 block for the bottom halo

        # Vertical zero padding, row flattening, PAD zero lanes in front, zero tail up to
        # LTOT: every (ky, kx) tap window of a band is a contiguous TH*W-lane slice split
        # across the band's own block and the next block (static offsets only).
        xp = jnp.pad(x_eff, ((0, 0), (0, 0), (PAD, HPAD - PAD - H), (0, 0)))
        xf = xp.reshape(B, Ceff, HPAD * W)
        xf = jnp.pad(xf, ((0, 0), (0, 0), (PAD, LTOT - PAD - HPAD * W)))
        xf = xf.astype(jnp.bfloat16)

        # Horizontal 'same'-padding masks, one row per kx (0/1 in bf16).
        col = np.arange(W)
        mask_np = np.zeros((K, THW), np.float32)
        for kx in range(K):
            valid = (col >= PAD - kx) & (col < W + PAD - kx)
            mask_np[kx] = np.tile(valid.astype(np.float32), TH)
        masks = jnp.asarray(mask_np, dtype=jnp.bfloat16)

        kern = functools.partial(_sum_gabor_kernel, W=W, K=K, Ceff=Ceff, TH=TH, PAD=PAD)

        y = pl.pallas_call(
            kern,
            out_shape=jax.ShapeDtypeStruct((B, O, H * W), jnp.float32),
            grid_spec=pltpu.PrefetchScalarGridSpec(
                num_scalar_prefetch=0,
                grid=(B, n_bands),
                in_specs=[
                    pl.BlockSpec((1, Ceff, THW), lambda b, r: (b, 0, r)),       # band
                    pl.BlockSpec((1, Ceff, THW), lambda b, r: (b, 0, r + 1)),   # halo block
                    pl.BlockSpec((O, KKC), lambda b, r: (0, 0)),                # weights
                    pl.BlockSpec((K, THW), lambda b, r: (0, 0)),                # masks
                ],
                out_specs=pl.BlockSpec((1, O, THW), lambda b, r: (b, 0, r)),
                scratch_shapes=[pltpu.VMEM((KKC, THW), jnp.bfloat16)],          # im2col slab
            ),
            compiler_params=pltpu.CompilerParams(
                dimension_semantics=("parallel", "parallel"),
                vmem_limit_bytes=int(self._vmem_cap * 0.8)),
        )(xf, xf, self.w_folded, masks)

        return y.reshape(B, O, H, W)                          # NCHW, no post-kernel transpose


if __name__ == "__main__":
    ksize = 9
    B, C, H, W = 2, 4, 16, 16

    key = jax.random.PRNGKey(0)
    x = jax.random.uniform(key, (B, C, H, W), dtype=jnp.float32)

    def conv_ref(x_in, filt):
        return lax.conv_general_dilated(
            x_in, jnp.asarray(filt), window_strides=(1, 1), padding="SAME",
            dimension_numbers=("NCHW", "OIHW", "NCHW"),
            precision=lax.Precision.HIGHEST)

    # 1) SumGabor filter bank (channel-replicated -> channel-summed fast path).
    filters = build_sum_gabor_filters(ksize, C)               # (32, 4, 9, 9), deterministic
    model = SumGaborPallas(ksize, filters)
    y = jax.block_until_ready(model(x))
    assert y.shape == (B, filters.shape[0], H, W), y.shape
    assert bool(jnp.all(jnp.isfinite(y)))
    y_ref = conv_ref(x, filters)
    rel = float(jnp.max(jnp.abs(y - y_ref)) / (jnp.max(jnp.abs(y_ref)) + 1e-6))
    assert rel < 2e-2, rel           # bf16 slab/weights, f32 accumulation

    # 2) Generic (non-replicated) filters exercise the full K*K*C contraction path.
    gen_filters = np.asarray(jax.random.normal(jax.random.PRNGKey(1),
                                               (8, C, ksize, ksize), jnp.float32))
    model2 = SumGaborPallas(ksize, gen_filters)
    y2 = jax.block_until_ready(model2(x))
    y2_ref = conv_ref(x, gen_filters)
    rel2 = float(jnp.max(jnp.abs(y2 - y2_ref)) / (jnp.max(jnp.abs(y2_ref)) + 1e-6))
    assert rel2 < 2e-2, rel2

    print("KERNEL_OK")
</pallas_src>

<mosaic_0001>
module attributes {stable_mosaic.version = 11 : i64} {
  func.func @_sum_gabor_kernel(%arg0: i32, %arg1: i32, %arg2: memref<1x1x256xbf16, #tpu.memory_space<vmem>>, %arg3: memref<1x1x256xbf16, #tpu.memory_space<vmem>>, %arg4: memref<32x81xbf16, #tpu.memory_space<vmem>>, %arg5: memref<9x256xbf16, #tpu.memory_space<vmem>>, %arg6: memref<1x32x256xf32, #tpu.memory_space<vmem>>, %arg7: memref<81x256xbf16, #tpu.memory_space<vmem>>) attributes {dimension_semantics = [#tpu.dimension_semantics<parallel>, #tpu.dimension_semantics<parallel>], iteration_bounds = array<i64: 2, 1>, scalar_prefetch = 0 : i64, scratch_operands = 1 : i64, tpu.core_type = #tpu.core_type<tc>, window_params = [{transform_indices = @transform_0, window_bounds = array<i64: 1, 1, 256>}, {transform_indices = @transform_1, window_bounds = array<i64: 1, 1, 256>}, {pipeline_mode = #tpu.pipeline_mode<synchronous>, transform_indices = @transform_2, window_bounds = array<i64: 32, 81>}, {pipeline_mode = #tpu.pipeline_mode<synchronous>, transform_indices = @transform_3, window_bounds = array<i64: 9, 256>}, {transform_indices = @transform_4, window_bounds = array<i64: 1, 32, 256>}]} {
    %c0 = arith.constant 0 : index
    %c0_0 = arith.constant 0 : index
    %c0_1 = arith.constant 0 : index
    %0 = vector.load %arg2[%c0, %c0_0, %c0_1] : memref<1x1x256xbf16, #tpu.memory_space<vmem>>, vector<1x1x256xbf16>
    %1 = vector.shape_cast %0 : vector<1x1x256xbf16> to vector<1x256xbf16>
    %c0_2 = arith.constant 0 : index
    %c0_3 = arith.constant 0 : index
    %2 = vector.load %arg5[%c0_2, %c0_3] : memref<9x256xbf16, #tpu.memory_space<vmem>>, vector<1x256xbf16>
    %3 = arith.mulf %1, %2 : vector<1x256xbf16>
    %c0_4 = arith.constant 0 : index
    %c0_5 = arith.constant 0 : index
    %4 = vector.load %arg7[%c0_4, %c0_5] : memref<81x256xbf16, #tpu.memory_space<vmem>>, vector<1x256xbf16>
    tpu.vector_store %arg7[%c0_4, %c0_5], %3 {strides = array<i32>} : memref<81x256xbf16, #tpu.memory_space<vmem>>, vector<1x256xbf16>,
    %c0_6 = arith.constant 0 : index
    %c0_7 = arith.constant 0 : index
    %c1 = arith.constant 1 : index
    %5 = vector.load %arg2[%c0_6, %c0_7, %c1] : memref<1x1x256xbf16, #tpu.memory_space<vmem>>, vector<1x1x255xbf16>
    %6 = vector.shape_cast %5 : vector<1x1x255xbf16> to vector<1x255xbf16>
    %c1_8 = arith.constant 1 : index
    %c0_9 = arith.constant 0 : index
    %7 = vector.load %arg5[%c1_8, %c0_9] : memref<9x256xbf16, #tpu.memory_space<vmem>>, vector<1x255xbf16>
    %8 = arith.mulf %6, %7 : vector<1x255xbf16>
    %c1_10 = arith.constant 1 : index
    %c0_11 = arith.constant 0 : index
    %9 = vector.load %arg7[%c1_10, %c0_11] : memref<81x256xbf16, #tpu.memory_space<vmem>>, vector<1x255xbf16>
    tpu.vector_store %arg7[%c1_10, %c0_11], %8 {strides = array<i32>} : memref<81x256xbf16, #tpu.memory_space<vmem>>, vector<1x255xbf16>,
    %c0_12 = arith.constant 0 : index
    %c0_13 = arith.constant 0 : index
    %c0_14 = arith.constant 0 : index
    %10 = vector.load %arg3[%c0_12, %c0_13, %c0_14] : memref<1x1x256xbf16, #tpu.memory_space<vmem>>, vector<1x1x1xbf16>
    %11 = vector.shape_cast %10 : vector<1x1x1xbf16> to vector<1x1xbf16>
    %c1_15 = arith.constant 1 : index
    %c255 = arith.constant 255 : index
    %12 = vector.load %arg5[%c1_15, %c255] : memref<9x256xbf16, #tpu.memory_space<vmem>>, vector<1x1xbf16>
    %13 = arith.mulf %11, %12 : vector<1x1xbf16>
    %c1_16 = arith.constant 1 : index
    %c255_17 = arith.constant 255 : index
    %14 = vector.load %arg7[%c1_16, %c255_17] : memref<81x256xbf16, #tpu.memory_space<vmem>>, vector<1x1xbf16>
    tpu.vector_store %arg7[%c1_16, %c255_17], %13 {strides = array<i32>} : memref<81x256xbf16, #tpu.memory_space<vmem>>, vector<1x1xbf16>,
    %c0_18 = arith.constant 0 : index
    %c0_19 = arith.constant 0 : index
    %c2 = arith.constant 2 : index
    %15 = vector.load %arg2[%c0_18, %c0_19, %c2] : memref<1x1x256xbf16, #tpu.memory_space<vmem>>, vector<1x1x254xbf16>
    %16 = vector.shape_cast %15 : vector<1x1x254xbf16> to vector<1x254xbf16>
    %c2_20 = arith.constant 2 : index
    %c0_21 = arith.constant 0 : index
    %17 = vector.load %arg5[%c2_20, %c0_21] : memref<9x256xbf16, #tpu.memory_space<vmem>>, vector<1x254xbf16>
    %18 = arith.mulf %16, %17 : vector<1x254xbf16>
    %c2_22 = arith.constant 2 : index
    %c0_23 = arith.constant 0 : index
    %19 = vector.load %arg7[%c2_22, %c0_23] : memref<81x256xbf16, #tpu.memory_space<vmem>>, vector<1x254xbf16>
    tpu.vector_store %arg7[%c2_22, %c0_23], %18 {strides = array<i32>} : memref<81x256xbf16, #tpu.memory_space<vmem>>, vector<1x254xbf16>,
    %c0_24 = arith.constant 0 : index
    %c0_25 = arith.constant 0 : index
    %c0_26 = arith.constant 0 : index
    %20 = vector.load %arg3[%c0_24, %c0_25, %c0_26] : memref<1x1x256xbf16, #tpu.memory_space<vmem>>, vector<1x1x2xbf16>
    %21 = vector.shape_cast %20 : vector<1x1x2xbf16> to vector<1x2xbf16>
    %c2_27 = arith.constant 2 : index
    %c254 = arith.constant 254 : index
    %22 = vector.load %arg5[%c2_27, %c254] : memref<9x256xbf16, #tpu.memory_space<vmem>>, vector<1x2xbf16>
    %23 = arith.mulf %21, %22 : vector<1x2xbf16>
    %c2_28 = arith.constant 2 : index
    %c254_29 = arith.constant 254 : index
    %24 = vector.load %arg7[%c2_28, %c254_29] : memref<81x256xbf16, #tpu.memory_space<vmem>>, vector<1x2xbf16>
    tpu.vector_store %arg7[%c2_28, %c254_29], %23 {strides = array<i32>} : memref<81x256xbf16, #tpu.memory_space<vmem>>, vector<1x2xbf16>,
    %c0_30 = arith.constant 0 : index
    %c0_31 = arith.constant 0 : index
    %c3 = arith.constant 3 : index
    %25 = vector.load %arg2[%c0_30, %c0_31, %c3] : memref<1x1x256xbf16, #tpu.memory_space<vmem>>, vector<1x1x253xbf16>
    %26 = vector.shape_cast %25 : vector<1x1x253xbf16> to vector<1x253xbf16>
    %c3_32 = arith.constant 3 : index
    %c0_33 = arith.constant 0 : index
    %27 = vector.load %arg5[%c3_32, %c0_33] : memref<9x256xbf16, #tpu.memory_space<vmem>>, vector<1x253xbf16>
    %28 = arith.mulf %26, %27 : vector<1x253xbf16>
    %c3_34 = arith.constant 3 : index
    %c0_35 = arith.constant 0 : index
    %29 = vector.load %arg7[%c3_34, %c0_35] : memref<81x256xbf16, #tpu.memory_space<vmem>>, vector<1x253xbf16>
    tpu.vector_store %arg7[%c3_34, %c0_35], %28 {strides = array<i32>} : memref<81x256xbf16, #tpu.memory_space<vmem>>, vector<1x253xbf16>,
    %c0_36 = arith.constant 0 : index
    %c0_37 = arith.constant 0 : index
    %c0_38 = arith.constant 0 : index
    %30 = vector.load %arg3[%c0_36, %c0_37, %c0_38] : memref<1x1x256xbf16, #tpu.memory_space<vmem>>, vector<1x1x3xbf16>
    %31 = vector.shape_cast %30 : vector<1x1x3xbf16> to vector<1x3xbf16>
    %c3_39 = arith.constant 3 : index
    %c253 = arith.constant 253 : index
    %32 = vector.load %arg5[%c3_39, %c253] : memref<9x256xbf16, #tpu.memory_space<vmem>>, vector<1x3xbf16>
    %33 = arith.mulf %31, %32 : vector<1x3xbf16>
    %c3_40 = arith.constant 3 : index
    %c253_41 = arith.constant 253 : index
    %34 = vector.load %arg7[%c3_40, %c253_41] : memref<81x256xbf16, #tpu.memory_space<vmem>>, vector<1x3xbf16>
    tpu.vector_store %arg7[%c3_40, %c253_41], %33 {strides = array<i32>} : memref<81x256xbf16, #tpu.memory_space<vmem>>, vector<1x3xbf16>,
    %c0_42 = arith.constant 0 : index
    %c0_43 = arith.constant 0 : index
    %c4 = arith.constant 4 : index
    %35 = vector.load %arg2[%c0_42, %c0_43, %c4] : memref<1x1x256xbf16, #tpu.memory_space<vmem>>, vector<1x1x252xbf16>
    %36 = vector.shape_cast %35 : vector<1x1x252xbf16> to vector<1x252xbf16>
    %c4_44 = arith.constant 4 : index
    %c0_45 = arith.constant 0 : index
    %37 = vector.load %arg7[%c4_44, %c0_45] : memref<81x256xbf16, #tpu.memory_space<vmem>>, vector<1x252xbf16>
    tpu.vector_store %arg7[%c4_44, %c0_45], %36 {strides = array<i32>} : memref<81x256xbf16, #tpu.memory_space<vmem>>, vector<1x252xbf16>,
    %c0_46 = arith.constant 0 : index
    %c0_47 = arith.constant 0 : index
    %c0_48 = arith.constant 0 : index
    %38 = vector.load %arg3[%c0_46, %c0_47, %c0_48] : memref<1x1x256xbf16, #tpu.memory_space<vmem>>, vector<1x1x4xbf16>
    %39 = vector.shape_cast %38 : vector<1x1x4xbf16> to vector<1x4xbf16>
    %c4_49 = arith.constant 4 : index
    %c252 = arith.constant 252 : index
    %40 = vector.load %arg7[%c4_49, %c252] : memref<81x256xbf16, #tpu.memory_space<vmem>>, vector<1x4xbf16>
    tpu.vector_store %arg7[%c4_49, %c252], %39 {strides = array<i32>} : memref<81x256xbf16, #tpu.memory_space<vmem>>, vector<1x4xbf16>,
    %c0_50 = arith.constant 0 : index
    %c0_51 = arith.constant 0 : index
    %c5 = arith.constant 5 : index
    %41 = vector.load %arg2[%c0_50, %c0_51, %c5] : memref<1x1x256xbf16, #tpu.memory_space<vmem>>, vector<1x1x251xbf16>
    %42 = vector.shape_cast %41 : vector<1x1x251xbf16> to vector<1x251xbf16>
    %c5_52 = arith.constant 5 : index
    %c0_53 = arith.constant 0 : index
    %43 = vector.load %arg5[%c5_52, %c0_53] : memref<9x256xbf16, #tpu.memory_space<vmem>>, vector<1x251xbf16>
    %44 = arith.mulf %42, %43 : vector<1x251xbf16>
    %c5_54 = arith.constant 5 : index
    %c0_55 = arith.constant 0 : index
    %45 = vector.load %arg7[%c5_54, %c0_55] : memref<81x256xbf16, #tpu.memory_space<vmem>>, vector<1x251xbf16>
    tpu.vector_store %arg7[%c5_54, %c0_55], %44 {strides = array<i32>} : memref<81x256xbf16, #tpu.memory_space<vmem>>, vector<1x251xbf16>,
    %c0_56 = arith.constant 0 : index
    %c0_57 = arith.constant 0 : index
    %c0_58 = arith.constant 0 : index
    %46 = vector.load %arg3[%c0_56, %c0_57, %c0_58] : memref<1x1x256xbf16, #tpu.memory_space<vmem>>, vector<1x1x5xbf16>
    %47 = vector.shape_cast %46 : vector<1x1x5xbf16> to vector<1x5xbf16>
    %c5_59 = arith.constant 5 : index
    %c251 = arith.constant 251 : index
    %48 = vector.load %arg5[%c5_59, %c251] : memref<9x256xbf16, #tpu.memory_space<vmem>>, vector<1x5xbf16>
    %49 = arith.mulf %47, %48 : vector<1x5xbf16>
    %c5_60 = arith.constant 5 : index
    %c251_61 = arith.constant 251 : index
    %50 = vector.load %arg7[%c5_60, %c251_61] : memref<81x256xbf16, #tpu.memory_space<vmem>>, vector<1x5xbf16>
    tpu.vector_store %arg7[%c5_60, %c251_61], %49 {strides = array<i32>} : memref<81x256xbf16, #tpu.memory_space<vmem>>, vector<1x5xbf16>,
    %c0_62 = arith.constant 0 : index
    %c0_63 = arith.constant 0 : index
    %c6 = arith.constant 6 : index
    %51 = vector.load %arg2[%c0_62, %c0_63, %c6] : memref<1x1x256xbf16, #tpu.memory_space<vmem>>, vector<1x1x250xbf16>
    %52 = vector.shape_cast %51 : vector<1x1x250xbf16> to vector<1x250xbf16>
    %c6_64 = arith.constant 6 : index
    %c0_65 = arith.constant 0 : index
    %53 = vector.load %arg5[%c6_64, %c0_65] : memref<9x256xbf16, #tpu.memory_space<vmem>>, vector<1x250xbf16>
    %54 = arith.mulf %52, %53 : vector<1x250xbf16>
    %c6_66 = arith.constant 6 : index
    %c0_67 = arith.constant 0 : index
    %55 = vector.load %arg7[%c6_66, %c0_67] : memref<81x256xbf16, #tpu.memory_space<vmem>>, vector<1x250xbf16>
    tpu.vector_store %arg7[%c6_66, %c0_67], %54 {strides = array<i32>} : memref<81x256xbf16, #tpu.memory_space<vmem>>, vector<1x250xbf16>,
    %c0_68 = arith.constant 0 : index
    %c0_69 = arith.constant 0 : index
    %c0_70 = arith.constant 0 : index
    %56 = vector.load %arg3[%c0_68, %c0_69, %c0_70] : memref<1x1x256xbf16, #tpu.memory_space<vmem>>, vector<1x1x6xbf16>
    %57 = vector.shape_cast %56 : vector<1x1x6xbf16> to vector<1x6xbf16>
    %c6_71 = arith.constant 6 : index
    %c250 = arith.constant 250 : index
    %58 = vector.load %arg5[%c6_71, %c250] : memref<9x256xbf16, #tpu.memory_space<vmem>>, vector<1x6xbf16>
    %59 = arith.mulf %57, %58 : vector<1x6xbf16>
    %c6_72 = arith.constant 6 : index
    %c250_73 = arith.constant 250 : index
    %60 = vector.load %arg7[%c6_72, %c250_73] : memref<81x256xbf16, #tpu.memory_space<vmem>>, vector<1x6xbf16>
    tpu.vector_store %arg7[%c6_72, %c250_73], %59 {strides = array<i32>} : memref<81x256xbf16, #tpu.memory_space<vmem>>, vector<1x6xbf16>,
    %c0_74 = arith.constant 0 : index
    %c0_75 = arith.constant 0 : index
    %c7 = arith.constant 7 : index
    %61 = vector.load %arg2[%c0_74, %c0_75, %c7] : memref<1x1x256xbf16, #tpu.memory_space<vmem>>, vector<1x1x249xbf16>
    %62 = vector.shape_cast %61 : vector<1x1x249xbf16> to vector<1x249xbf16>
    %c7_76 = arith.constant 7 : index
    %c0_77 = arith.constant 0 : index
    %63 = vector.load %arg5[%c7_76, %c0_77] : memref<9x256xbf16, #tpu.memory_space<vmem>>, vector<1x249xbf16>
    %64 = arith.mulf %62, %63 : vector<1x249xbf16>
    %c7_78 = arith.constant 7 : index
    %c0_79 = arith.constant 0 : index
    %65 = vector.load %arg7[%c7_78, %c0_79] : memref<81x256xbf16, #tpu.memory_space<vmem>>, vector<1x249xbf16>
    tpu.vector_store %arg7[%c7_78, %c0_79], %64 {strides = array<i32>} : memref<81x256xbf16, #tpu.memory_space<vmem>>, vector<1x249xbf16>,
    %c0_80 = arith.constant 0 : index
    %c0_81 = arith.constant 0 : index
    %c0_82 = arith.constant 0 : index
    %66 = vector.load %arg3[%c0_80, %c0_81, %c0_82] : memref<1x1x256xbf16, #tpu.memory_space<vmem>>, vector<1x1x7xbf16>
    %67 = vector.shape_cast %66 : vector<1x1x7xbf16> to vector<1x7xbf16>
    %c7_83 = arith.constant 7 : index
    %c249 = arith.constant 249 : index
    %68 = vector.load %arg5[%c7_83, %c249] : memref<9x256xbf16, #tpu.memory_space<vmem>>, vector<1x7xbf16>
    %69 = arith.mulf %67, %68 : vector<1x7xbf16>
    %c7_84 = arith.constant 7 : index
    %c249_85 = arith.constant 249 : index
    %70 = vector.load %arg7[%c7_84, %c249_85] : memref<81x256xbf16, #tpu.memory_space<vmem>>, vector<1x7xbf16>
    tpu.vector_store %arg7[%c7_84, %c249_85], %69 {strides = array<i32>} : memref<81x256xbf16, #tpu.memory_space<vmem>>, vector<1x7xbf16>,
    %c0_86 = arith.constant 0 : index
    %c0_87 = arith.constant 0 : index
    %c8 = arith.constant 8 : index
    %71 = vector.load %arg2[%c0_86, %c0_87, %c8] : memref<1x1x256xbf16, #tpu.memory_space<vmem>>, vector<1x1x248xbf16>
    %72 = vector.shape_cast %71 : vector<1x1x248xbf16> to vector<1x248xbf16>
    %c8_88 = arith.constant 8 : index
    %c0_89 = arith.constant 0 : index
    %73 = vector.load %arg5[%c8_88, %c0_89] : memref<9x256xbf16, #tpu.memory_space<vmem>>, vector<1x248xbf16>
    %74 = arith.mulf %72, %73 : vector<1x248xbf16>
    %c8_90 = arith.constant 8 : index
    %c0_91 = arith.constant 0 : index
    %75 = vector.load %arg7[%c8_90, %c0_91] : memref<81x256xbf16, #tpu.memory_space<vmem>>, vector<1x248xbf16>
    tpu.vector_store %arg7[%c8_90, %c0_91], %74 {strides = array<i32>} : memref<81x256xbf16, #tpu.memory_space<vmem>>, vector<1x248xbf16>,
    %c0_92 = arith.constant 0 : index
    %c0_93 = arith.constant 0 : index
    %c0_94 = arith.constant 0 : index
    %76 = vector.load %arg3[%c0_92, %c0_93, %c0_94] : memref<1x1x256xbf16, #tpu.memory_space<vmem>>, vector<1x1x8xbf16>
    %77 = vector.shape_cast %76 : vector<1x1x8xbf16> to vector<1x8xbf16>
    %c8_95 = arith.constant 8 : index
    %c248 = arith.constant 248 : index
    %78 = vector.load %arg5[%c8_95, %c248] : memref<9x256xbf16, #tpu.memory_space<vmem>>, vector<1x8xbf16>
    %79 = arith.mulf %77, %78 : vector<1x8xbf16>
    %c8_96 = arith.constant 8 : index
    %c248_97 = arith.constant 248 : index
    %80 = vector.load %arg7[%c8_96, %c248_97] : memref<81x256xbf16, #tpu.memory_space<vmem>>, vector<1x8xbf16>
    tpu.vector_store %arg7[%c8_96, %c248_97], %79 {strides = array<i32>} : memref<81x256xbf16, #tpu.memory_space<vmem>>, vector<1x8xbf16>,
    %c0_98 = arith.constant 0 : index
    %c0_99 = arith.constant 0 : index
    %c16 = arith.constant 16 : index
    %81 = vector.load %arg2[%c0_98, %c0_99, %c16] : memref<1x1x256xbf16, #tpu.memory_space<vmem>>, vector<1x1x240xbf16>
    %82 = vector.shape_cast %81 : vector<1x1x240xbf16> to vector<1x240xbf16>
    %c0_100 = arith.constant 0 : index
    %c0_101 = arith.constant 0 : index
    %83 = vector.load %arg5[%c0_100, %c0_101] : memref<9x256xbf16, #tpu.memory_space<vmem>>, vector<1x240xbf16>
    %84 = arith.mulf %82, %83 : vector<1x240xbf16>
    %c9 = arith.constant 9 : index
    %c0_102 = arith.constant 0 : index
    %85 = vector.load %arg7[%c9, %c0_102] : memref<81x256xbf16, #tpu.memory_space<vmem>>, vector<1x240xbf16>
    tpu.vector_store %arg7[%c9, %c0_102], %84 {strides = array<i32>} : memref<81x256xbf16, #tpu.memory_space<vmem>>, vector<1x240xbf16>,
    %c0_103 = arith.constant 0 : index
    %c0_104 = arith.constant 0 : index
    %c0_105 = arith.constant 0 : index
    %86 = vector.load %arg3[%c0_103, %c0_104, %c0_105] : memref<1x1x256xbf16, #tpu.memory_space<vmem>>, vector<1x1x16xbf16>
    %87 = vector.shape_cast %86 : vector<1x1x16xbf16> to vector<1x16xbf16>
    %c0_106 = arith.constant 0 : index
    %c240 = arith.constant 240 : index
    %88 = vector.load %arg5[%c0_106, %c240] : memref<9x256xbf16, #tpu.memory_space<vmem>>, vector<1x16xbf16>
    %89 = arith.mulf %87, %88 : vector<1x16xbf16>
    %c9_107 = arith.constant 9 : index
    %c240_108 = arith.constant 240 : index
    %90 = vector.load %arg7[%c9_107, %c240_108] : memref<81x256xbf16, #tpu.memory_space<vmem>>, vector<1x16xbf16>
    tpu.vector_store %arg7[%c9_107, %c240_108], %89 {strides = array<i32>} : memref<81x256xbf16, #tpu.memory_space<vmem>>, vector<1x16xbf16>,
    %c0_109 = arith.constant 0 : index
    %c0_110 = arith.constant 0 : index
    %c17 = arith.constant 17 : index
    %91 = vector.load %arg2[%c0_109, %c0_110, %c17] : memref<1x1x256xbf16, #tpu.memory_space<vmem>>, vector<1x1x239xbf16>
    %92 = vector.shape_cast %91 : vector<1x1x239xbf16> to vector<1x239xbf16>
    %c1_111 = arith.constant 1 : index
    %c0_112 = arith.constant 0 : index
    %93 = vector.load %arg5[%c1_111, %c0_112] : memref<9x256xbf16, #tpu.memory_space<vmem>>, vector<1x239xbf16>
    %94 = arith.mulf %92, %93 : vector<1x239xbf16>
    %c10 = arith.constant 10 : index
    %c0_113 = arith.constant 0 : index
    %95 = vector.load %arg7[%c10, %c0_113] : memref<81x256xbf16, #tpu.memory_space<vmem>>, vector<1x239xbf16>
    tpu.vector_store %arg7[%c10, %c0_113], %94 {strides = array<i32>} : memref<81x256xbf16, #tpu.memory_space<vmem>>, vector<1x239xbf16>,
    %c0_114 = arith.constant 0 : index
    %c0_115 = arith.constant 0 : index
    %c0_116 = arith.constant 0 : index
    %96 = vector.load %arg3[%c0_114, %c0_115, %c0_116] : memref<1x1x256xbf16, #tpu.memory_space<vmem>>, vector<1x1x17xbf16>
    %97 = vector.shape_cast %96 : vector<1x1x17xbf16> to vector<1x17xbf16>
    %c1_117 = arith.constant 1 : index
    %c239 = arith.constant 239 : index
    %98 = vector.load %arg5[%c1_117, %c239] : memref<9x256xbf16, #tpu.memory_space<vmem>>, vector<1x17xbf16>
    %99 = arith.mulf %97, %98 : vector<1x17xbf16>
    %c10_118 = arith.constant 10 : index
    %c239_119 = arith.constant 239 : index
    %100 = vector.load %arg7[%c10_118, %c239_119] : memref<81x256xbf16, #tpu.memory_space<vmem>>, vector<1x17xbf16>
    tpu.vector_store %arg7[%c10_118, %c239_119], %99 {strides = array<i32>} : memref<81x256xbf16, #tpu.memory_space<vmem>>, vector<1x17xbf16>,
    %c0_120 = arith.constant 0 : index
    %c0_121 = arith.constant 0 : index
    %c18 = arith.constant 18 : index
    %101 = vector.load %arg2[%c0_120, %c0_121, %c18] : memref<1x1x256xbf16, #tpu.memory_space<vmem>>, vector<1x1x238xbf16>
    %102 = vector.shape_cast %101 : vector<1x1x238xbf16> to vector<1x238xbf16>
    %c2_122 = arith.constant 2 : index
    %c0_123 = arith.constant 0 : index
    %103 = vector.load %arg5[%c2_122, %c0_123] : memref<9x256xbf16, #tpu.memory_space<vmem>>, vector<1x238xbf16>
    %104 = arith.mulf %102, %103 : vector<1x238xbf16>
    %c11 = arith.constant 11 : index
    %c0_124 = arith.constant 0 : index
    %105 = vector.load %arg7[%c11, %c0_124] : memref<81x256xbf16, #tpu.memory_space<vmem>>, vector<1x238xbf16>
    tpu.vector_store %arg7[%c11, %c0_124], %104 {strides = array<i32>} : memref<81x256xbf16, #tpu.memory_space<vmem>>, vector<1x238xbf16>,
    %c0_125 = arith.constant 0 : index
    %c0_126 = arith.constant 0 : index
    %c0_127 = arith.constant 0 : index
    %106 = vector.load %arg3[%c0_125, %c0_126, %c0_127] : memref<1x1x256xbf16, #tpu.memory_space<vmem>>, vector<1x1x18xbf16>
    %107 = vector.shape_cast %106 : vector<1x1x18xbf16> to vector<1x18xbf16>
    %c2_128 = arith.constant 2 : index
    %c238 = arith.constant 238 : index
    %108 = vector.load %arg5[%c2_128, %c238] : memref<9x256xbf16, #tpu.memory_space<vmem>>, vector<1x18xbf16>
    %109 = arith.mulf %107, %108 : vector<1x18xbf16>
    %c11_129 = arith.constant 11 : index
    %c238_130 = arith.constant 238 : index
    %110 = vector.load %arg7[%c11_129, %c238_130] : memref<81x256xbf16, #tpu.memory_space<vmem>>, vector<1x18xbf16>
    tpu.vector_store %arg7[%c11_129, %c238_130], %109 {strides = array<i32>} : memref<81x256xbf16, #tpu.memory_space<vmem>>, vector<1x18xbf16>,
    %c0_131 = arith.constant 0 : index
    %c0_132 = arith.constant 0 : index
    %c19 = arith.constant 19 : index
    %111 = vector.load %arg2[%c0_131, %c0_132, %c19] : memref<1x1x256xbf16, #tpu.memory_space<vmem>>, vector<1x1x237xbf16>
    %112 = vector.shape_cast %111 : vector<1x1x237xbf16> to vector<1x237xbf16>
    %c3_133 = arith.constant 3 : index
    %c0_134 = arith.constant 0 : index
    %113 = vector.load %arg5[%c3_133, %c0_134] : memref<9x256xbf16, #tpu.memory_space<vmem>>, vector<1x237xbf16>
    %114 = arith.mulf %112, %113 : vector<1x237xbf16>
    %c12 = arith.constant 12 : index
    %c0_135 = arith.constant 0 : index
    %115 = vector.load %arg7[%c12, %c0_135] : memref<81x256xbf16, #tpu.memory_space<vmem>>, vector<1x237xbf16>
    tpu.vector_store %arg7[%c12, %c0_135], %114 {strides = array<i32>} : memref<81x256xbf16, #tpu.memory_space<vmem>>, vector<1x237xbf16>,
    %c0_136 = arith.constant 0 : index
    %c0_137 = arith.constant 0 : index
    %c0_138 = arith.constant 0 : index
    %116 = vector.load %arg3[%c0_136, %c0_137, %c0_138] : memref<1x1x256xbf16, #tpu.memory_space<vmem>>, vector<1x1x19xbf16>
    %117 = vector.shape_cast %116 : vector<1x1x19xbf16> to vector<1x19xbf16>
    %c3_139 = arith.constant 3 : index
    %c237 = arith.constant 237 : index
    %118 = vector.load %arg5[%c3_139, %c237] : memref<9x256xbf16, #tpu.memory_space<vmem>>, vector<1x19xbf16>
    %119 = arith.mulf %117, %118 : vector<1x19xbf16>
    %c12_140 = arith.constant 12 : index
    %c237_141 = arith.constant 237 : index
    %120 = vector.load %arg7[%c12_140, %c237_141] : memref<81x256xbf16, #tpu.memory_space<vmem>>, vector<1x19xbf16>
    tpu.vector_store %arg7[%c12_140, %c237_141], %119 {strides = array<i32>} : memref<81x256xbf16, #tpu.memory_space<vmem>>, vector<1x19xbf16>,
    %c0_142 = arith.constant 0 : index
    %c0_143 = arith.constant 0 : index
    %c20 = arith.constant 20 : index
    %121 = vector.load %arg2[%c0_142, %c0_143, %c20] : memref<1x1x256xbf16, #tpu.memory_space<vmem>>, vector<1x1x236xbf16>
    %122 = vector.shape_cast %121 : vector<1x1x236xbf16> to vector<1x236xbf16>
    %c13 = arith.constant 13 : index
    %c0_144 = arith.constant 0 : index
    %123 = vector.load %arg7[%c13, %c0_144] : memref<81x256xbf16, #tpu.memory_space<vmem>>, vector<1x236xbf16>
    tpu.vector_store %arg7[%c13, %c0_144], %122 {strides = array<i32>} : memref<81x256xbf16, #tpu.memory_space<vmem>>, vector<1x236xbf16>,
    %c0_145 = arith.constant 0 : index
    %c0_146 = arith.constant 0 : index
    %c0_147 = arith.constant 0 : index
    %124 = vector.load %arg3[%c0_145, %c0_146, %c0_147] : memref<1x1x256xbf16, #tpu.memory_space<vmem>>, vector<1x1x20xbf16>
    %125 = vector.shape_cast %124 : vector<1x1x20xbf16> to vector<1x20xbf16>
    %c13_148 = arith.constant 13 : index
    %c236 = arith.constant 236 : index
    %126 = vector.load %arg7[%c13_148, %c236] : memref<81x256xbf16, #tpu.memory_space<vmem>>, vector<1x20xbf16>
    tpu.vector_store %arg7[%c13_148, %c236], %125 {strides = array<i32>} : memref<81x256xbf16, #tpu.memory_space<vmem>>, vector<1x20xbf16>,
    %c0_149 = arith.constant 0 : index
    %c0_150 = arith.constant 0 : index
    %c21 = arith.constant 21 : index
    %127 = vector.load %arg2[%c0_149, %c0_150, %c21] : memref<1x1x256xbf16, #tpu.memory_space<vmem>>, vector<1x1x235xbf16>
    %128 = vector.shape_cast %127 : vector<1x1x235xbf16> to vector<1x235xbf16>
    %c5_151 = arith.constant 5 : index
    %c0_152 = arith.constant 0 : index
    %129 = vector.load %arg5[%c5_151, %c0_152] : memref<9x256xbf16, #tpu.memory_space<vmem>>, vector<1x235xbf16>
    %130 = arith.mulf %128, %129 : vector<1x235xbf16>
    %c14 = arith.constant 14 : index
    %c0_153 = arith.constant 0 : index
    %131 = vector.load %arg7[%c14, %c0_153] : memref<81x256xbf16, #tpu.memory_space<vmem>>, vector<1x235xbf16>
    tpu.vector_store %arg7[%c14, %c0_153], %130 {strides = array<i32>} : memref<81x256xbf16, #tpu.memory_space<vmem>>, vector<1x235xbf16>,
    %c0_154 = arith.constant 0 : index
    %c0_155 = arith.constant 0 : index
    %c0_156 = arith.constant 0 : index
    %132 = vector.load %arg3[%c0_154, %c0_155, %c0_156] : memref<1x1x256xbf16, #tpu.memory_space<vmem>>, vector<1x1x21xbf16>
    %133 = vector.shape_cast %132 : vector<1x1x21xbf16> to vector<1x21xbf16>
    %c5_157 = arith.constant 5 : index
    %c235 = arith.constant 235 : index
    %134 = vector.load %arg5[%c5_157, %c235] : memref<9x256xbf16, #tpu.memory_space<vmem>>, vector<1x21xbf16>
    %135 = arith.mulf %133, %134 : vector<1x21xbf16>
    %c14_158 = arith.constant 14 : index
    %c235_159 = arith.constant 235 : index
    %136 = vector.load %arg7[%c14_158, %c235_159] : memref<81x256xbf16, #tpu.memory_space<vmem>>, vector<1x21xbf16>
    tpu.vector_store %arg7[%c14_158, %c235_159], %135 {strides = array<i32>} : memref<81x256xbf16, #tpu.memory_space<vmem>>, vector<1x21xbf16>,
    %c0_160 = arith.constant 0 : index
    %c0_161 = arith.constant 0 : index
    %c22 = arith.constant 22 : index
    %137 = vector.load %arg2[%c0_160, %c0_161, %c22] : memref<1x1x256xbf16, #tpu.memory_space<vmem>>, vector<1x1x234xbf16>
    %138 = vector.shape_cast %137 : vector<1x1x234xbf16> to vector<1x234xbf16>
    %c6_162 = arith.constant 6 : index
    %c0_163 = arith.constant 0 : index
    %139 = vector.load %arg5[%c6_162, %c0_163] : memref<9x256xbf16, #tpu.memory_space<vmem>>, vector<1x234xbf16>
    %140 = arith.mulf %138, %139 : vector<1x234xbf16>
    %c15 = arith.constant 15 : index
    %c0_164 = arith.constant 0 : index
    %141 = vector.load %arg7[%c15, %c0_164] : memref<81x256xbf16, #tpu.memory_space<vmem>>, vector<1x234xbf16>
    tpu.vector_store %arg7[%c15, %c0_164], %140 {strides = array<i32>} : memref<81x256xbf16, #tpu.memory_space<vmem>>, vector<1x234xbf16>,
    %c0_165 = arith.constant 0 : index
    %c0_166 = arith.constant 0 : index
    %c0_167 = arith.constant 0 : index
    %142 = vector.load %arg3[%c0_165, %c0_166, %c0_167] : memref<1x1x256xbf16, #tpu.memory_space<vmem>>, vector<1x1x22xbf16>
    %143 = vector.shape_cast %142 : vector<1x1x22xbf16> to vector<1x22xbf16>
    %c6_168 = arith.constant 6 : index
    %c234 = arith.constant 234 : index
    %144 = vector.load %arg5[%c6_168, %c234] : memref<9x256xbf16, #tpu.memory_space<vmem>>, vector<1x22xbf16>
    %145 = arith.mulf %143, %144 : vector<1x22xbf16>
    %c15_169 = arith.constant 15 : index
    %c234_170 = arith.constant 234 : index
    %146 = vector.load %arg7[%c15_169, %c234_170] : memref<81x256xbf16, #tpu.memory_space<vmem>>, vector<1x22xbf16>
    tpu.vector_store %arg7[%c15_169, %c234_170], %145 {strides = array<i32>} : memref<81x256xbf16, #tpu.memory_space<vmem>>, vector<1x22xbf16>,
    %c0_171 = arith.constant 0 : index
    %c0_172 = arith.constant 0 : index
    %c23 = arith.constant 23 : index
    %147 = vector.load %arg2[%c0_171, %c0_172, %c23] : memref<1x1x256xbf16, #tpu.memory_space<vmem>>, vector<1x1x233xbf16>
    %148 = vector.shape_cast %147 : vector<1x1x233xbf16> to vector<1x233xbf16>
    %c7_173 = arith.constant 7 : index
    %c0_174 = arith.constant 0 : index
    %149 = vector.load %arg5[%c7_173, %c0_174] : memref<9x256xbf16, #tpu.memory_space<vmem>>, vector<1x233xbf16>
    %150 = arith.mulf %148, %149 : vector<1x233xbf16>
    %c16_175 = arith.constant 16 : index
    %c0_176 = arith.constant 0 : index
    %151 = vector.load %arg7[%c16_175, %c0_176] : memref<81x256xbf16, #tpu.memory_space<vmem>>, vector<1x233xbf16>
    tpu.vector_store %arg7[%c16_175, %c0_176], %150 {strides = array<i32>} : memref<81x256xbf16, #tpu.memory_space<vmem>>, vector<1x233xbf16>,
    %c0_177 = arith.constant 0 : index
    %c0_178 = arith.constant 0 : index
    %c0_179 = arith.constant 0 : index
    %152 = vector.load %arg3[%c0_177, %c0_178, %c0_179] : memref<1x1x256xbf16, #tpu.memory_space<vmem>>, vector<1x1x23xbf16>
    %153 = vector.shape_cast %152 : vector<1x1x23xbf16> to vector<1x23xbf16>
    %c7_180 = arith.constant 7 : index
    %c233 = arith.constant 233 : index
    %154 = vector.load %arg5[%c7_180, %c233] : memref<9x256xbf16, #tpu.memory_space<vmem>>, vector<1x23xbf16>
    %155 = arith.mulf %153, %154 : vector<1x23xbf16>
    %c16_181 = arith.constant 16 : index
    %c233_182 = arith.constant 233 : index
    %156 = vector.load %arg7[%c16_181, %c233_182] : memref<81x256xbf16, #tpu.memory_space<vmem>>, vector<1x23xbf16>
    tpu.vector_store %arg7[%c16_181, %c233_182], %155 {strides = array<i32>} : memref<81x256xbf16, #tpu.memory_space<vmem>>, vector<1x23xbf16>,
    %c0_183 = arith.constant 0 : index
    %c0_184 = arith.constant 0 : index
    %c24 = arith.constant 24 : index
    %157 = vector.load %arg2[%c0_183, %c0_184, %c24] : memref<1x1x256xbf16, #tpu.memory_space<vmem>>, vector<1x1x232xbf16>
    %158 = vector.shape_cast %157 : vector<1x1x232xbf16> to vector<1x232xbf16>
    %c8_185 = arith.constant 8 : index
    %c0_186 = arith.constant 0 : index
    %159 = vector.load %arg5[%c8_185, %c0_186] : memref<9x256xbf16, #tpu.memory_space<vmem>>, vector<1x232xbf16>
    %160 = arith.mulf %158, %159 : vector<1x232xbf16>
    %c17_187 = arith.constant 17 : index
    %c0_188 = arith.constant 0 : index
    %161 = vector.load %arg7[%c17_187, %c0_188] : memref<81x256xbf16, #tpu.memory_space<vmem>>, vector<1x232xbf16>
    tpu.vector_store %arg7[%c17_187, %c0_188], %160 {strides = array<i32>} : memref<81x256xbf16, #tpu.memory_space<vmem>>, vector<1x232xbf16>,
    %c0_189 = arith.constant 0 : index
    %c0_190 = arith.constant 0 : index
    %c0_191 = arith.constant 0 : index
    %162 = vector.load %arg3[%c0_189, %c0_190, %c0_191] : memref<1x1x256xbf16, #tpu.memory_space<vmem>>, vector<1x1x24xbf16>
    %163 = vector.shape_cast %162 : vector<1x1x24xbf16> to vector<1x24xbf16>
    %c8_192 = arith.constant 8 : index
    %c232 = arith.constant 232 : index
    %164 = vector.load %arg5[%c8_192, %c232] : memref<9x256xbf16, #tpu.memory_space<vmem>>, vector<1x24xbf16>
    %165 = arith.mulf %163, %164 : vector<1x24xbf16>
    %c17_193 = arith.constant 17 : index
    %c232_194 = arith.constant 232 : index
    %166 = vector.load %arg7[%c17_193, %c232_194] : memref<81x256xbf16, #tpu.memory_space<vmem>>, vector<1x24xbf16>
    tpu.vector_store %arg7[%c17_193, %c232_194], %165 {strides = array<i32>} : memref<81x256xbf16, #tpu.memory_space<vmem>>, vector<1x24xbf16>,
    %c0_195 = arith.constant 0 : index
    %c0_196 = arith.constant 0 : index
    %c32 = arith.constant 32 : index
    %167 = vector.load %arg2[%c0_195, %c0_196, %c32] : memref<1x1x256xbf16, #tpu.memory_space<vmem>>, vector<1x1x224xbf16>
    %168 = vector.shape_cast %167 : vector<1x1x224xbf16> to vector<1x224xbf16>
    %c0_197 = arith.constant 0 : index
    %c0_198 = arith.constant 0 : index
    %169 = vector.load %arg5[%c0_197, %c0_198] : memref<9x256xbf16, #tpu.memory_space<vmem>>, vector<1x224xbf16>
    %170 = arith.mulf %168, %169 : vector<1x224xbf16>
    %c18_199 = arith.constant 18 : index
    %c0_200 = arith.constant 0 : index
    %171 = vector.load %arg7[%c18_199, %c0_200] : memref<81x256xbf16, #tpu.memory_space<vmem>>, vector<1x224xbf16>
    tpu.vector_store %arg7[%c18_199, %c0_200], %170 {strides = array<i32>} : memref<81x256xbf16, #tpu.memory_space<vmem>>, vector<1x224xbf16>,
    %c0_201 = arith.constant 0 : index
    %c0_202 = arith.constant 0 : index
    %c0_203 = arith.constant 0 : index
    %172 = vector.load %arg3[%c0_201, %c0_202, %c0_203] : memref<1x1x256xbf16, #tpu.memory_space<vmem>>, vector<1x1x32xbf16>
    %173 = vector.shape_cast %172 : vector<1x1x32xbf16> to vector<1x32xbf16>
    %c0_204 = arith.constant 0 : index
    %c224 = arith.constant 224 : index
    %174 = vector.load %arg5[%c0_204, %c224] : memref<9x256xbf16, #tpu.memory_space<vmem>>, vector<1x32xbf16>
    %175 = arith.mulf %173, %174 : vector<1x32xbf16>
    %c18_205 = arith.constant 18 : index
    %c224_206 = arith.constant 224 : index
    %176 = vector.load %arg7[%c18_205, %c224_206] : memref<81x256xbf16, #tpu.memory_space<vmem>>, vector<1x32xbf16>
    tpu.vector_store %arg7[%c18_205, %c224_206], %175 {strides = array<i32>} : memref<81x256xbf16, #tpu.memory_space<vmem>>, vector<1x32xbf16>,
    %c0_207 = arith.constant 0 : index
    %c0_208 = arith.constant 0 : index
    %c33 = arith.constant 33 : index
    %177 = vector.load %arg2[%c0_207, %c0_208, %c33] : memref<1x1x256xbf16, #tpu.memory_space<vmem>>, vector<1x1x223xbf16>
    %178 = vector.shape_cast %177 : vector<1x1x223xbf16> to vector<1x223xbf16>
    %c1_209 = arith.constant 1 : index
    %c0_210 = arith.constant 0 : index
    %179 = vector.load %arg5[%c1_209, %c0_210] : memref<9x256xbf16, #tpu.memory_space<vmem>>, vector<1x223xbf16>
    %180 = arith.mulf %178, %179 : vector<1x223xbf16>
    %c19_211 = arith.constant 19 : index
    %c0_212 = arith.constant 0 : index
    %181 = vector.load %arg7[%c19_211, %c0_212] : memref<81x256xbf16, #tpu.memory_space<vmem>>, vector<1x223xbf16>
    tpu.vector_store %arg7[%c19_211, %c0_212], %180 {strides = array<i32>} : memref<81x256xbf16, #tpu.memory_space<vmem>>, vector<1x223xbf16>,
    %c0_213 = arith.constant 0 : index
    %c0_214 = arith.constant 0 : index
    %c0_215 = arith.constant 0 : index
    %182 = vector.load %arg3[%c0_213, %c0_214, %c0_215] : memref<1x1x256xbf16, #tpu.memory_space<vmem>>, vector<1x1x33xbf16>
    %183 = vector.shape_cast %182 : vector<1x1x33xbf16> to vector<1x33xbf16>
    %c1_216 = arith.constant 1 : index
    %c223 = arith.constant 223 : index
    %184 = vector.load %arg5[%c1_216, %c223] : memref<9x256xbf16, #tpu.memory_space<vmem>>, vector<1x33xbf16>
    %185 = arith.mulf %183, %184 : vector<1x33xbf16>
    %c19_217 = arith.constant 19 : index
    %c223_218 = arith.constant 223 : index
    %186 = vector.load %arg7[%c19_217, %c223_218] : memref<81x256xbf16, #tpu.memory_space<vmem>>, vector<1x33xbf16>
    tpu.vector_store %arg7[%c19_217, %c223_218], %185 {strides = array<i32>} : memref<81x256xbf16, #tpu.memory_space<vmem>>, vector<1x33xbf16>,
    %c0_219 = arith.constant 0 : index
    %c0_220 = arith.constant 0 : index
    %c34 = arith.constant 34 : index
    %187 = vector.load %arg2[%c0_219, %c0_220, %c34] : memref<1x1x256xbf16, #tpu.memory_space<vmem>>, vector<1x1x222xbf16>
    %188 = vector.shape_cast %187 : vector<1x1x222xbf16> to vector<1x222xbf16>
    %c2_221 = arith.constant 2 : index
    %c0_222 = arith.constant 0 : index
    %189 = vector.load %arg5[%c2_221, %c0_222] : memref<9x256xbf16, #tpu.memory_space<vmem>>, vector<1x222xbf16>
    %190 = arith.mulf %188, %189 : vector<1x222xbf16>
    %c20_223 = arith.constant 20 : index
    %c0_224 = arith.constant 0 : index
    %191 = vector.load %arg7[%c20_223, %c0_224] : memref<81x256xbf16, #tpu.memory_space<vmem>>, vector<1x222xbf16>
    tpu.vector_store %arg7[%c20_223, %c0_224], %190 {strides = array<i32>} : memref<81x256xbf16, #tpu.memory_space<vmem>>, vector<1x222xbf16>,
    %c0_225 = arith.constant 0 : index
    %c0_226 = arith.constant 0 : index
    %c0_227 = arith.constant 0 : index
    %192 = vector.load %arg3[%c0_225, %c0_226, %c0_227] : memref<1x1x256xbf16, #tpu.memory_space<vmem>>, vector<1x1x34xbf16>
    %193 = vector.shape_cast %192 : vector<1x1x34xbf16> to vector<1x34xbf16>
    %c2_228 = arith.constant 2 : index
    %c222 = arith.constant 222 : index
    %194 = vector.load %arg5[%c2_228, %c222] : memref<9x256xbf16, #tpu.memory_space<vmem>>, vector<1x34xbf16>
    %195 = arith.mulf %193, %194 : vector<1x34xbf16>
    %c20_229 = arith.constant 20 : index
    %c222_230 = arith.constant 222 : index
    %196 = vector.load %arg7[%c20_229, %c222_230] : memref<81x256xbf16, #tpu.memory_space<vmem>>, vector<1x34xbf16>
    tpu.vector_store %arg7[%c20_229, %c222_230], %195 {strides = array<i32>} : memref<81x256xbf16, #tpu.memory_space<vmem>>, vector<1x34xbf16>,
    %c0_231 = arith.constant 0 : index
    %c0_232 = arith.constant 0 : index
    %c35 = arith.constant 35 : index
    %197 = vector.load %arg2[%c0_231, %c0_232, %c35] : memref<1x1x256xbf16, #tpu.memory_space<vmem>>, vector<1x1x221xbf16>
    %198 = vector.shape_cast %197 : vector<1x1x221xbf16> to vector<1x221xbf16>
    %c3_233 = arith.constant 3 : index
    %c0_234 = arith.constant 0 : index
    %199 = vector.load %arg5[%c3_233, %c0_234] : memref<9x256xbf16, #tpu.memory_space<vmem>>, vector<1x221xbf16>
    %200 = arith.mulf %198, %199 : vector<1x221xbf16>
    %c21_235 = arith.constant 21 : index
    %c0_236 = arith.constant 0 : index
    %201 = vector.load %arg7[%c21_235, %c0_236] : memref<81x256xbf16, #tpu.memory_space<vmem>>, vector<1x221xbf16>
    tpu.vector_store %arg7[%c21_235, %c0_236], %200 {strides = array<i32>} : memref<81x256xbf16, #tpu.memory_space<vmem>>, vector<1x221xbf16>,
    %c0_237 = arith.constant 0 : index
    %c0_238 = arith.constant 0 : index
    %c0_239 = arith.constant 0 : index
    %202 = vector.load %arg3[%c0_237, %c0_238, %c0_239] : memref<1x1x256xbf16, #tpu.memory_space<vmem>>, vector<1x1x35xbf16>
    %203 = vector.shape_cast %202 : vector<1x1x35xbf16> to vector<1x35xbf16>
    %c3_240 = arith.constant 3 : index
    %c221 = arith.constant 221 : index
    %204 = vector.load %arg5[%c3_240, %c221] : memref<9x256xbf16, #tpu.memory_space<vmem>>, vector<1x35xbf16>
    %205 = arith.mulf %203, %204 : vector<1x35xbf16>
    %c21_241 = arith.constant 21 : index
    %c221_242 = arith.constant 221 : index
    %206 = vector.load %arg7[%c21_241, %c221_242] : memref<81x256xbf16, #tpu.memory_space<vmem>>, vector<1x35xbf16>
    tpu.vector_store %arg7[%c21_241, %c221_242], %205 {strides = array<i32>} : memref<81x256xbf16, #tpu.memory_space<vmem>>, vector<1x35xbf16>,
    %c0_243 = arith.constant 0 : index
    %c0_244 = arith.constant 0 : index
    %c36 = arith.constant 36 : index
    %207 = vector.load %arg2[%c0_243, %c0_244, %c36] : memref<1x1x256xbf16, #tpu.memory_space<vmem>>, vector<1x1x220xbf16>
    %208 = vector.shape_cast %207 : vector<1x1x220xbf16> to vector<1x220xbf16>
    %c22_245 = arith.constant 22 : index
    %c0_246 = arith.constant 0 : index
    %209 = vector.load %arg7[%c22_245, %c0_246] : memref<81x256xbf16, #tpu.memory_space<vmem>>, vector<1x220xbf16>
    tpu.vector_store %arg7[%c22_245, %c0_246], %208 {strides = array<i32>} : memref<81x256xbf16, #tpu.memory_space<vmem>>, vector<1x220xbf16>,
    %c0_247 = arith.constant 0 : index
    %c0_248 = arith.constant 0 : index
    %c0_249 = arith.constant 0 : index
    %210 = vector.load %arg3[%c0_247, %c0_248, %c0_249] : memref<1x1x256xbf16, #tpu.memory_space<vmem>>, vector<1x1x36xbf16>
    %211 = vector.shape_cast %210 : vector<1x1x36xbf16> to vector<1x36xbf16>
    %c22_250 = arith.constant 22 : index
    %c220 = arith.constant 220 : index
    %212 = vector.load %arg7[%c22_250, %c220] : memref<81x256xbf16, #tpu.memory_space<vmem>>, vector<1x36xbf16>
    tpu.vector_store %arg7[%c22_250, %c220], %211 {strides = array<i32>} : memref<81x256xbf16, #tpu.memory_space<vmem>>, vector<1x36xbf16>,
    %c0_251 = arith.constant 0 : index
    %c0_252 = arith.constant 0 : index
    %c37 = arith.constant 37 : index
    %213 = vector.load %arg2[%c0_251, %c0_252, %c37] : memref<1x1x256xbf16, #tpu.memory_space<vmem>>, vector<1x1x219xbf16>
    %214 = vector.shape_cast %213 : vector<1x1x219xbf16> to vector<1x219xbf16>
    %c5_253 = arith.constant 5 : index
    %c0_254 = arith.constant 0 : index
    %215 = vector.load %arg5[%c5_253, %c0_254] : memref<9x256xbf16, #tpu.memory_space<vmem>>, vector<1x219xbf16>
    %216 = arith.mulf %214, %215 : vector<1x219xbf16>
    %c23_255 = arith.constant 23 : index
    %c0_256 = arith.constant 0 : index
    %217 = vector.load %arg7[%c23_255, %c0_256] : memref<81x256xbf16, #tpu.memory_space<vmem>>, vector<1x219xbf16>
    tpu.vector_store %arg7[%c23_255, %c0_256], %216 {strides = array<i32>} : memref<81x256xbf16, #tpu.memory_space<vmem>>, vector<1x219xbf16>,
    %c0_257 = arith.constant 0 : index
    %c0_258 = arith.constant 0 : index
    %c0_259 = arith.constant 0 : index
    %218 = vector.load %arg3[%c0_257, %c0_258, %c0_259] : memref<1x1x256xbf16, #tpu.memory_space<vmem>>, vector<1x1x37xbf16>
    %219 = vector.shape_cast %218 : vector<1x1x37xbf16> to vector<1x37xbf16>
    %c5_260 = arith.constant 5 : index
    %c219 = arith.constant 219 : index
    %220 = vector.load %arg5[%c5_260, %c219] : memref<9x256xbf16, #tpu.memory_space<vmem>>, vector<1x37xbf16>
    %221 = arith.mulf %219, %220 : vector<1x37xbf16>
    %c23_261 = arith.constant 23 : index
    %c219_262 = arith.constant 219 : index
    %222 = vector.load %arg7[%c23_261, %c219_262] : memref<81x256xbf16, #tpu.memory_space<vmem>>, vector<1x37xbf16>
    tpu.vector_store %arg7[%c23_261, %c219_262], %221 {strides = array<i32>} : memref<81x256xbf16, #tpu.memory_space<vmem>>, vector<1x37xbf16>,
    %c0_263 = arith.constant 0 : index
    %c0_264 = arith.constant 0 : index
    %c38 = arith.constant 38 : index
    %223 = vector.load %arg2[%c0_263, %c0_264, %c38] : memref<1x1x256xbf16, #tpu.memory_space<vmem>>, vector<1x1x218xbf16>
    %224 = vector.shape_cast %223 : vector<1x1x218xbf16> to vector<1x218xbf16>
    %c6_265 = arith.constant 6 : index
    %c0_266 = arith.constant 0 : index
    %225 = vector.load %arg5[%c6_265, %c0_266] : memref<9x256xbf16, #tpu.memory_space<vmem>>, vector<1x218xbf16>
    %226 = arith.mulf %224, %225 : vector<1x218xbf16>
    %c24_267 = arith.constant 24 : index
    %c0_268 = arith.constant 0 : index
    %227 = vector.load %arg7[%c24_267, %c0_268] : memref<81x256xbf16, #tpu.memory_space<vmem>>, vector<1x218xbf16>
    tpu.vector_store %arg7[%c24_267, %c0_268], %226 {strides = array<i32>} : memref<81x256xbf16, #tpu.memory_space<vmem>>, vector<1x218xbf16>,
    %c0_269 = arith.constant 0 : index
    %c0_270 = arith.constant 0 : index
    %c0_271 = arith.constant 0 : index
    %228 = vector.load %arg3[%c0_269, %c0_270, %c0_271] : memref<1x1x256xbf16, #tpu.memory_space<vmem>>, vector<1x1x38xbf16>
    %229 = vector.shape_cast %228 : vector<1x1x38xbf16> to vector<1x38xbf16>
    %c6_272 = arith.constant 6 : index
    %c218 = arith.constant 218 : index
    %230 = vector.load %arg5[%c6_272, %c218] : memref<9x256xbf16, #tpu.memory_space<vmem>>, vector<1x38xbf16>
    %231 = arith.mulf %229, %230 : vector<1x38xbf16>
    %c24_273 = arith.constant 24 : index
    %c218_274 = arith.constant 218 : index
    %232 = vector.load %arg7[%c24_273, %c218_274] : memref<81x256xbf16, #tpu.memory_space<vmem>>, vector<1x38xbf16>
    tpu.vector_store %arg7[%c24_273, %c218_274], %231 {strides = array<i32>} : memref<81x256xbf16, #tpu.memory_space<vmem>>, vector<1x38xbf16>,
    %c0_275 = arith.constant 0 : index
    %c0_276 = arith.constant 0 : index
    %c39 = arith.constant 39 : index
    %233 = vector.load %arg2[%c0_275, %c0_276, %c39] : memref<1x1x256xbf16, #tpu.memory_space<vmem>>, vector<1x1x217xbf16>
    %234 = vector.shape_cast %233 : vector<1x1x217xbf16> to vector<1x217xbf16>
    %c7_277 = arith.constant 7 : index
    %c0_278 = arith.constant 0 : index
    %235 = vector.load %arg5[%c7_277, %c0_278] : memref<9x256xbf16, #tpu.memory_space<vmem>>, vector<1x217xbf16>
    %236 = arith.mulf %234, %235 : vector<1x217xbf16>
    %c25 = arith.constant 25 : index
    %c0_279 = arith.constant 0 : index
    %237 = vector.load %arg7[%c25, %c0_279] : memref<81x256xbf16, #tpu.memory_space<vmem>>, vector<1x217xbf16>
    tpu.vector_store %arg7[%c25, %c0_279], %236 {strides = array<i32>} : memref<81x256xbf16, #tpu.memory_space<vmem>>, vector<1x217xbf16>,
    %c0_280 = arith.constant 0 : index
    %c0_281 = arith.constant 0 : index
    %c0_282 = arith.constant 0 : index
    %238 = vector.load %arg3[%c0_280, %c0_281, %c0_282] : memref<1x1x256xbf16, #tpu.memory_space<vmem>>, vector<1x1x39xbf16>
    %239 = vector.shape_cast %238 : vector<1x1x39xbf16> to vector<1x39xbf16>
    %c7_283 = arith.constant 7 : index
    %c217 = arith.constant 217 : index
    %240 = vector.load %arg5[%c7_283, %c217] : memref<9x256xbf16, #tpu.memory_space<vmem>>, vector<1x39xbf16>
    %241 = arith.mulf %239, %240 : vector<1x39xbf16>
    %c25_284 = arith.constant 25 : index
    %c217_285 = arith.constant 217 : index
    %242 = vector.load %arg7[%c25_284, %c217_285] : memref<81x256xbf16, #tpu.memory_space<vmem>>, vector<1x39xbf16>
    tpu.vector_store %arg7[%c25_284, %c217_285], %241 {strides = array<i32>} : memref<81x256xbf16, #tpu.memory_space<vmem>>, vector<1x39xbf16>,
    %c0_286 = arith.constant 0 : index
    %c0_287 = arith.constant 0 : index
    %c40 = arith.constant 40 : index
    %243 = vector.load %arg2[%c0_286, %c0_287, %c40] : memref<1x1x256xbf16, #tpu.memory_space<vmem>>, vector<1x1x216xbf16>
    %244 = vector.shape_cast %243 : vector<1x1x216xbf16> to vector<1x216xbf16>
    %c8_288 = arith.constant 8 : index
    %c0_289 = arith.constant 0 : index
    %245 = vector.load %arg5[%c8_288, %c0_289] : memref<9x256xbf16, #tpu.memory_space<vmem>>, vector<1x216xbf16>
    %246 = arith.mulf %244, %245 : vector<1x216xbf16>
    %c26 = arith.constant 26 : index
    %c0_290 = arith.constant 0 : index
    %247 = vector.load %arg7[%c26, %c0_290] : memref<81x256xbf16, #tpu.memory_space<vmem>>, vector<1x216xbf16>
    tpu.vector_store %arg7[%c26, %c0_290], %246 {strides = array<i32>} : memref<81x256xbf16, #tpu.memory_space<vmem>>, vector<1x216xbf16>,
    %c0_291 = arith.constant 0 : index
    %c0_292 = arith.constant 0 : index
    %c0_293 = arith.constant 0 : index
    %248 = vector.load %arg3[%c0_291, %c0_292, %c0_293] : memref<1x1x256xbf16, #tpu.memory_space<vmem>>, vector<1x1x40xbf16>
    %249 = vector.shape_cast %248 : vector<1x1x40xbf16> to vector<1x40xbf16>
    %c8_294 = arith.constant 8 : index
    %c216 = arith.constant 216 : index
    %250 = vector.load %arg5[%c8_294, %c216] : memref<9x256xbf16, #tpu.memory_space<vmem>>, vector<1x40xbf16>
    %251 = arith.mulf %249, %250 : vector<1x40xbf16>
    %c26_295 = arith.constant 26 : index
    %c216_296 = arith.constant 216 : index
    %252 = vector.load %arg7[%c26_295, %c216_296] : memref<81x256xbf16, #tpu.memory_space<vmem>>, vector<1x40xbf16>
    tpu.vector_store %arg7[%c26_295, %c216_296], %251 {strides = array<i32>} : memref<81x256xbf16, #tpu.memory_space<vmem>>, vector<1x40xbf16>,
    %c0_297 = arith.constant 0 : index
    %c0_298 = arith.constant 0 : index
    %c48 = arith.constant 48 : index
    %253 = vector.load %arg2[%c0_297, %c0_298, %c48] : memref<1x1x256xbf16, #tpu.memory_space<vmem>>, vector<1x1x208xbf16>
    %254 = vector.shape_cast %253 : vector<1x1x208xbf16> to vector<1x208xbf16>
    %c0_299 = arith.constant 0 : index
    %c0_300 = arith.constant 0 : index
    %255 = vector.load %arg5[%c0_299, %c0_300] : memref<9x256xbf16, #tpu.memory_space<vmem>>, vector<1x208xbf16>
    %256 = arith.mulf %254, %255 : vector<1x208xbf16>
    %c27 = arith.constant 27 : index
    %c0_301 = arith.constant 0 : index
    %257 = vector.load %arg7[%c27, %c0_301] : memref<81x256xbf16, #tpu.memory_space<vmem>>, vector<1x208xbf16>
    tpu.vector_store %arg7[%c27, %c0_301], %256 {strides = array<i32>} : memref<81x256xbf16, #tpu.memory_space<vmem>>, vector<1x208xbf16>,
    %c0_302 = arith.constant 0 : index
    %c0_303 = arith.constant 0 : index
    %c0_304 = arith.constant 0 : index
    %258 = vector.load %arg3[%c0_302, %c0_303, %c0_304] : memref<1x1x256xbf16, #tpu.memory_space<vmem>>, vector<1x1x48xbf16>
    %259 = vector.shape_cast %258 : vector<1x1x48xbf16> to vector<1x48xbf16>
    %c0_305 = arith.constant 0 : index
    %c208 = arith.constant 208 : index
    %260 = vector.load %arg5[%c0_305, %c208] : memref<9x256xbf16, #tpu.memory_space<vmem>>, vector<1x48xbf16>
    %261 = arith.mulf %259, %260 : vector<1x48xbf16>
    %c27_306 = arith.constant 27 : index
    %c208_307 = arith.constant 208 : index
    %262 = vector.load %arg7[%c27_306, %c208_307] : memref<81x256xbf16, #tpu.memory_space<vmem>>, vector<1x48xbf16>
    tpu.vector_store %arg7[%c27_306, %c208_307], %261 {strides = array<i32>} : memref<81x256xbf16, #tpu.memory_space<vmem>>, vector<1x48xbf16>,
    %c0_308 = arith.constant 0 : index
    %c0_309 = arith.constant 0 : index
    %c49 = arith.constant 49 : index
    %263 = vector.load %arg2[%c0_308, %c0_309, %c49] : memref<1x1x256xbf16, #tpu.memory_space<vmem>>, vector<1x1x207xbf16>
    %264 = vector.shape_cast %263 : vector<1x1x207xbf16> to vector<1x207xbf16>
    %c1_310 = arith.constant 1 : index
    %c0_311 = arith.constant 0 : index
    %265 = vector.load %arg5[%c1_310, %c0_311] : memref<9x256xbf16, #tpu.memory_space<vmem>>, vector<1x207xbf16>
    %266 = arith.mulf %264, %265 : vector<1x207xbf16>
    %c28 = arith.constant 28 : index
    %c0_312 = arith.constant 0 : index
    %267 = vector.load %arg7[%c28, %c0_312] : memref<81x256xbf16, #tpu.memory_space<vmem>>, vector<1x207xbf16>
    tpu.vector_store %arg7[%c28, %c0_312], %266 {strides = array<i32>} : memref<81x256xbf16, #tpu.memory_space<vmem>>, vector<1x207xbf16>,
    %c0_313 = arith.constant 0 : index
    %c0_314 = arith.constant 0 : index
    %c0_315 = arith.constant 0 : index
    %268 = vector.load %arg3[%c0_313, %c0_314, %c0_315] : memref<1x1x256xbf16, #tpu.memory_space<vmem>>, vector<1x1x49xbf16>
    %269 = vector.shape_cast %268 : vector<1x1x49xbf16> to vector<1x49xbf16>
    %c1_316 = arith.constant 1 : index
    %c207 = arith.constant 207 : index
    %270 = vector.load %arg5[%c1_316, %c207] : memref<9x256xbf16, #tpu.memory_space<vmem>>, vector<1x49xbf16>
    %271 = arith.mulf %269, %270 : vector<1x49xbf16>
    %c28_317 = arith.constant 28 : index
    %c207_318 = arith.constant 207 : index
    %272 = vector.load %arg7[%c28_317, %c207_318] : memref<81x256xbf16, #tpu.memory_space<vmem>>, vector<1x49xbf16>
    tpu.vector_store %arg7[%c28_317, %c207_318], %271 {strides = array<i32>} : memref<81x256xbf16, #tpu.memory_space<vmem>>, vector<1x49xbf16>,
    %c0_319 = arith.constant 0 : index
    %c0_320 = arith.constant 0 : index
    %c50 = arith.constant 50 : index
    %273 = vector.load %arg2[%c0_319, %c0_320, %c50] : memref<1x1x256xbf16, #tpu.memory_space<vmem>>, vector<1x1x206xbf16>
    %274 = vector.shape_cast %273 : vector<1x1x206xbf16> to vector<1x206xbf16>
    %c2_321 = arith.constant 2 : index
    %c0_322 = arith.constant 0 : index
    %275 = vector.load %arg5[%c2_321, %c0_322] : memref<9x256xbf16, #tpu.memory_space<vmem>>, vector<1x206xbf16>
    %276 = arith.mulf %274, %275 : vector<1x206xbf16>
    %c29 = arith.constant 29 : index
    %c0_323 = arith.constant 0 : index
    %277 = vector.load %arg7[%c29, %c0_323] : memref<81x256xbf16, #tpu.memory_space<vmem>>, vector<1x206xbf16>
    tpu.vector_store %arg7[%c29, %c0_323], %276 {strides = array<i32>} : memref<81x256xbf16, #tpu.memory_space<vmem>>, vector<1x206xbf16>,
    %c0_324 = arith.constant 0 : index
    %c0_325 = arith.constant 0 : index
    %c0_326 = arith.constant 0 : index
    %278 = vector.load %arg3[%c0_324, %c0_325, %c0_326] : memref<1x1x256xbf16, #tpu.memory_space<vmem>>, vector<1x1x50xbf16>
    %279 = vector.shape_cast %278 : vector<1x1x50xbf16> to vector<1x50xbf16>
    %c2_327 = arith.constant 2 : index
    %c206 = arith.constant 206 : index
    %280 = vector.load %arg5[%c2_327, %c206] : memref<9x256xbf16, #tpu.memory_space<vmem>>, vector<1x50xbf16>
    %281 = arith.mulf %279, %280 : vector<1x50xbf16>
    %c29_328 = arith.constant 29 : index
    %c206_329 = arith.constant 206 : index
    %282 = vector.load %arg7[%c29_328, %c206_329] : memref<81x256xbf16, #tpu.memory_space<vmem>>, vector<1x50xbf16>
    tpu.vector_store %arg7[%c29_328, %c206_329], %281 {strides = array<i32>} : memref<81x256xbf16, #tpu.memory_space<vmem>>, vector<1x50xbf16>,
    %c0_330 = arith.constant 0 : index
    %c0_331 = arith.constant 0 : index
    %c51 = arith.constant 51 : index
    %283 = vector.load %arg2[%c0_330, %c0_331, %c51] : memref<1x1x256xbf16, #tpu.memory_space<vmem>>, vector<1x1x205xbf16>
    %284 = vector.shape_cast %283 : vector<1x1x205xbf16> to vector<1x205xbf16>
    %c3_332 = arith.constant 3 : index
    %c0_333 = arith.constant 0 : index
    %285 = vector.load %arg5[%c3_332, %c0_333] : memref<9x256xbf16, #tpu.memory_space<vmem>>, vector<1x205xbf16>
    %286 = arith.mulf %284, %285 : vector<1x205xbf16>
    %c30 = arith.constant 30 : index
    %c0_334 = arith.constant 0 : index
    %287 = vector.load %arg7[%c30, %c0_334] : memref<81x256xbf16, #tpu.memory_space<vmem>>, vector<1x205xbf16>
    tpu.vector_store %arg7[%c30, %c0_334], %286 {strides = array<i32>} : memref<81x256xbf16, #tpu.memory_space<vmem>>, vector<1x205xbf16>,
    %c0_335 = arith.constant 0 : index
    %c0_336 = arith.constant 0 : index
    %c0_337 = arith.constant 0 : index
    %288 = vector.load %arg3[%c0_335, %c0_336, %c0_337] : memref<1x1x256xbf16, #tpu.memory_space<vmem>>, vector<1x1x51xbf16>
    %289 = vector.shape_cast %288 : vector<1x1x51xbf16> to vector<1x51xbf16>
    %c3_338 = arith.constant 3 : index
    %c205 = arith.constant 205 : index
    %290 = vector.load %arg5[%c3_338, %c205] : memref<9x256xbf16, #tpu.memory_space<vmem>>, vector<1x51xbf16>
    %291 = arith.mulf %289, %290 : vector<1x51xbf16>
    %c30_339 = arith.constant 30 : index
    %c205_340 = arith.constant 205 : index
    %292 = vector.load %arg7[%c30_339, %c205_340] : memref<81x256xbf16, #tpu.memory_space<vmem>>, vector<1x51xbf16>
    tpu.vector_store %arg7[%c30_339, %c205_340], %291 {strides = array<i32>} : memref<81x256xbf16, #tpu.memory_space<vmem>>, vector<1x51xbf16>,
    %c0_341 = arith.constant 0 : index
    %c0_342 = arith.constant 0 : index
    %c52 = arith.constant 52 : index
    %293 = vector.load %arg2[%c0_341, %c0_342, %c52] : memref<1x1x256xbf16, #tpu.memory_space<vmem>>, vector<1x1x204xbf16>
    %294 = vector.shape_cast %293 : vector<1x1x204xbf16> to vector<1x204xbf16>
    %c31 = arith.constant 31 : index
    %c0_343 = arith.constant 0 : index
    %295 = vector.load %arg7[%c31, %c0_343] : memref<81x256xbf16, #tpu.memory_space<vmem>>, vector<1x204xbf16>
    tpu.vector_store %arg7[%c31, %c0_343], %294 {strides = array<i32>} : memref<81x256xbf16, #tpu.memory_space<vmem>>, vector<1x204xbf16>,
    %c0_344 = arith.constant 0 : index
    %c0_345 = arith.constant 0 : index
    %c0_346 = arith.constant 0 : index
    %296 = vector.load %arg3[%c0_344, %c0_345, %c0_346] : memref<1x1x256xbf16, #tpu.memory_space<vmem>>, vector<1x1x52xbf16>
    %297 = vector.shape_cast %296 : vector<1x1x52xbf16> to vector<1x52xbf16>
    %c31_347 = arith.constant 31 : index
    %c204 = arith.constant 204 : index
    %298 = vector.load %arg7[%c31_347, %c204] : memref<81x256xbf16, #tpu.memory_space<vmem>>, vector<1x52xbf16>
    tpu.vector_store %arg7[%c31_347, %c204], %297 {strides = array<i32>} : memref<81x256xbf16, #tpu.memory_space<vmem>>, vector<1x52xbf16>,
    %c0_348 = arith.constant 0 : index
    %c0_349 = arith.constant 0 : index
    %c53 = arith.constant 53 : index
    %299 = vector.load %arg2[%c0_348, %c0_349, %c53] : memref<1x1x256xbf16, #tpu.memory_space<vmem>>, vector<1x1x203xbf16>
    %300 = vector.shape_cast %299 : vector<1x1x203xbf16> to vector<1x203xbf16>
    %c5_350 = arith.constant 5 : index
    %c0_351 = arith.constant 0 : index
    %301 = vector.load %arg5[%c5_350, %c0_351] : memref<9x256xbf16, #tpu.memory_space<vmem>>, vector<1x203xbf16>
    %302 = arith.mulf %300, %301 : vector<1x203xbf16>
    %c32_352 = arith.constant 32 : index
    %c0_353 = arith.constant 0 : index
    %303 = vector.load %arg7[%c32_352, %c0_353] : memref<81x256xbf16, #tpu.memory_space<vmem>>, vector<1x203xbf16>
    tpu.vector_store %arg7[%c32_352, %c0_353], %302 {strides = array<i32>} : memref<81x256xbf16, #tpu.memory_space<vmem>>, vector<1x203xbf16>,
    %c0_354 = arith.constant 0 : index
    %c0_355 = arith.constant 0 : index
    %c0_356 = arith.constant 0 : index
    %304 = vector.load %arg3[%c0_354, %c0_355, %c0_356] : memref<1x1x256xbf16, #tpu.memory_space<vmem>>, vector<1x1x53xbf16>
    %305 = vector.shape_cast %304 : vector<1x1x53xbf16> to vector<1x53xbf16>
    %c5_357 = arith.constant 5 : index
    %c203 = arith.constant 203 : index
    %306 = vector.load %arg5[%c5_357, %c203] : memref<9x256xbf16, #tpu.memory_space<vmem>>, vector<1x53xbf16>
    %307 = arith.mulf %305, %306 : vector<1x53xbf16>
    %c32_358 = arith.constant 32 : index
    %c203_359 = arith.constant 203 : index
    %308 = vector.load %arg7[%c32_358, %c203_359] : memref<81x256xbf16, #tpu.memory_space<vmem>>, vector<1x53xbf16>
    tpu.vector_store %arg7[%c32_358, %c203_359], %307 {strides = array<i32>} : memref<81x256xbf16, #tpu.memory_space<vmem>>, vector<1x53xbf16>,
    %c0_360 = arith.constant 0 : index
    %c0_361 = arith.constant 0 : index
    %c54 = arith.constant 54 : index
    %309 = vector.load %arg2[%c0_360, %c0_361, %c54] : memref<1x1x256xbf16, #tpu.memory_space<vmem>>, vector<1x1x202xbf16>
    %310 = vector.shape_cast %309 : vector<1x1x202xbf16> to vector<1x202xbf16>
    %c6_362 = arith.constant 6 : index
    %c0_363 = arith.constant 0 : index
    %311 = vector.load %arg5[%c6_362, %c0_363] : memref<9x256xbf16, #tpu.memory_space<vmem>>, vector<1x202xbf16>
    %312 = arith.mulf %310, %311 : vector<1x202xbf16>
    %c33_364 = arith.constant 33 : index
    %c0_365 = arith.constant 0 : index
    %313 = vector.load %arg7[%c33_364, %c0_365] : memref<81x256xbf16, #tpu.memory_space<vmem>>, vector<1x202xbf16>
    tpu.vector_store %arg7[%c33_364, %c0_365], %312 {strides = array<i32>} : memref<81x256xbf16, #tpu.memory_space<vmem>>, vector<1x202xbf16>,
    %c0_366 = arith.constant 0 : index
    %c0_367 = arith.constant 0 : index
    %c0_368 = arith.constant 0 : index
    %314 = vector.load %arg3[%c0_366, %c0_367, %c0_368] : memref<1x1x256xbf16, #tpu.memory_space<vmem>>, vector<1x1x54xbf16>
    %315 = vector.shape_cast %314 : vector<1x1x54xbf16> to vector<1x54xbf16>
    %c6_369 = arith.constant 6 : index
    %c202 = arith.constant 202 : index
    %316 = vector.load %arg5[%c6_369, %c202] : memref<9x256xbf16, #tpu.memory_space<vmem>>, vector<1x54xbf16>
    %317 = arith.mulf %315, %316 : vector<1x54xbf16>
    %c33_370 = arith.constant 33 : index
    %c202_371 = arith.constant 202 : index
    %318 = vector.load %arg7[%c33_370, %c202_371] : memref<81x256xbf16, #tpu.memory_space<vmem>>, vector<1x54xbf16>
    tpu.vector_store %arg7[%c33_370, %c202_371], %317 {strides = array<i32>} : memref<81x256xbf16, #tpu.memory_space<vmem>>, vector<1x54xbf16>,
    %c0_372 = arith.constant 0 : index
    %c0_373 = arith.constant 0 : index
    %c55 = arith.constant 55 : index
    %319 = vector.load %arg2[%c0_372, %c0_373, %c55] : memref<1x1x256xbf16, #tpu.memory_space<vmem>>, vector<1x1x201xbf16>
    %320 = vector.shape_cast %319 : vector<1x1x201xbf16> to vector<1x201xbf16>
    %c7_374 = arith.constant 7 : index
    %c0_375 = arith.constant 0 : index
    %321 = vector.load %arg5[%c7_374, %c0_375] : memref<9x256xbf16, #tpu.memory_space<vmem>>, vector<1x201xbf16>
    %322 = arith.mulf %320, %321 : vector<1x201xbf16>
    %c34_376 = arith.constant 34 : index
    %c0_377 = arith.constant 0 : index
    %323 = vector.load %arg7[%c34_376, %c0_377] : memref<81x256xbf16, #tpu.memory_space<vmem>>, vector<1x201xbf16>
    tpu.vector_store %arg7[%c34_376, %c0_377], %322 {strides = array<i32>} : memref<81x256xbf16, #tpu.memory_space<vmem>>, vector<1x201xbf16>,
    %c0_378 = arith.constant 0 : index
    %c0_379 = arith.constant 0 : index
    %c0_380 = arith.constant 0 : index
    %324 = vector.load %arg3[%c0_378, %c0_379, %c0_380] : memref<1x1x256xbf16, #tpu.memory_space<vmem>>, vector<1x1x55xbf16>
    %325 = vector.shape_cast %324 : vector<1x1x55xbf16> to vector<1x55xbf16>
    %c7_381 = arith.constant 7 : index
    %c201 = arith.constant 201 : index
    %326 = vector.load %arg5[%c7_381, %c201] : memref<9x256xbf16, #tpu.memory_space<vmem>>, vector<1x55xbf16>
    %327 = arith.mulf %325, %326 : vector<1x55xbf16>
    %c34_382 = arith.constant 34 : index
    %c201_383 = arith.constant 201 : index
    %328 = vector.load %arg7[%c34_382, %c201_383] : memref<81x256xbf16, #tpu.memory_space<vmem>>, vector<1x55xbf16>
    tpu.vector_store %arg7[%c34_382, %c201_383], %327 {strides = array<i32>} : memref<81x256xbf16, #tpu.memory_space<vmem>>, vector<1x55xbf16>,
    %c0_384 = arith.constant 0 : index
    %c0_385 = arith.constant 0 : index
    %c56 = arith.constant 56 : index
    %329 = vector.load %arg2[%c0_384, %c0_385, %c56] : memref<1x1x256xbf16, #tpu.memory_space<vmem>>, vector<1x1x200xbf16>
    %330 = vector.shape_cast %329 : vector<1x1x200xbf16> to vector<1x200xbf16>
    %c8_386 = arith.constant 8 : index
    %c0_387 = arith.constant 0 : index
    %331 = vector.load %arg5[%c8_386, %c0_387] : memref<9x256xbf16, #tpu.memory_space<vmem>>, vector<1x200xbf16>
    %332 = arith.mulf %330, %331 : vector<1x200xbf16>
    %c35_388 = arith.constant 35 : index
    %c0_389 = arith.constant 0 : index
    %333 = vector.load %arg7[%c35_388, %c0_389] : memref<81x256xbf16, #tpu.memory_space<vmem>>, vector<1x200xbf16>
    tpu.vector_store %arg7[%c35_388, %c0_389], %332 {strides = array<i32>} : memref<81x256xbf16, #tpu.memory_space<vmem>>, vector<1x200xbf16>,
    %c0_390 = arith.constant 0 : index
    %c0_391 = arith.constant 0 : index
    %c0_392 = arith.constant 0 : index
    %334 = vector.load %arg3[%c0_390, %c0_391, %c0_392] : memref<1x1x256xbf16, #tpu.memory_space<vmem>>, vector<1x1x56xbf16>
    %335 = vector.shape_cast %334 : vector<1x1x56xbf16> to vector<1x56xbf16>
    %c8_393 = arith.constant 8 : index
    %c200 = arith.constant 200 : index
    %336 = vector.load %arg5[%c8_393, %c200] : memref<9x256xbf16, #tpu.memory_space<vmem>>, vector<1x56xbf16>
    %337 = arith.mulf %335, %336 : vector<1x56xbf16>
    %c35_394 = arith.constant 35 : index
    %c200_395 = arith.constant 200 : index
    %338 = vector.load %arg7[%c35_394, %c200_395] : memref<81x256xbf16, #tpu.memory_space<vmem>>, vector<1x56xbf16>
    tpu.vector_store %arg7[%c35_394, %c200_395], %337 {strides = array<i32>} : memref<81x256xbf16, #tpu.memory_space<vmem>>, vector<1x56xbf16>,
    %c0_396 = arith.constant 0 : index
    %c0_397 = arith.constant 0 : index
    %c64 = arith.constant 64 : index
    %339 = vector.load %arg2[%c0_396, %c0_397, %c64] : memref<1x1x256xbf16, #tpu.memory_space<vmem>>, vector<1x1x192xbf16>
    %340 = vector.shape_cast %339 : vector<1x1x192xbf16> to vector<1x192xbf16>
    %c0_398 = arith.constant 0 : index
    %c0_399 = arith.constant 0 : index
    %341 = vector.load %arg5[%c0_398, %c0_399] : memref<9x256xbf16, #tpu.memory_space<vmem>>, vector<1x192xbf16>
    %342 = arith.mulf %340, %341 : vector<1x192xbf16>
    %c36_400 = arith.constant 36 : index
    %c0_401 = arith.constant 0 : index
    %343 = vector.load %arg7[%c36_400, %c0_401] : memref<81x256xbf16, #tpu.memory_space<vmem>>, vector<1x192xbf16>
    tpu.vector_store %arg7[%c36_400, %c0_401], %342 {strides = array<i32>} : memref<81x256xbf16, #tpu.memory_space<vmem>>, vector<1x192xbf16>,
    %c0_402 = arith.constant 0 : index
    %c0_403 = arith.constant 0 : index
    %c0_404 = arith.constant 0 : index
    %344 = vector.load %arg3[%c0_402, %c0_403, %c0_404] : memref<1x1x256xbf16, #tpu.memory_space<vmem>>, vector<1x1x64xbf16>
    %345 = vector.shape_cast %344 : vector<1x1x64xbf16> to vector<1x64xbf16>
    %c0_405 = arith.constant 0 : index
    %c192 = arith.constant 192 : index
    %346 = vector.load %arg5[%c0_405, %c192] : memref<9x256xbf16, #tpu.memory_space<vmem>>, vector<1x64xbf16>
    %347 = arith.mulf %345, %346 : vector<1x64xbf16>
    %c36_406 = arith.constant 36 : index
    %c192_407 = arith.constant 192 : index
    %348 = vector.load %arg7[%c36_406, %c192_407] : memref<81x256xbf16, #tpu.memory_space<vmem>>, vector<1x64xbf16>
    tpu.vector_store %arg7[%c36_406, %c192_407], %347 {strides = array<i32>} : memref<81x256xbf16, #tpu.memory_space<vmem>>, vector<1x64xbf16>,
    %c0_408 = arith.constant 0 : index
    %c0_409 = arith.constant 0 : index
    %c65 = arith.constant 65 : index
    %349 = vector.load %arg2[%c0_408, %c0_409, %c65] : memref<1x1x256xbf16, #tpu.memory_space<vmem>>, vector<1x1x191xbf16>
    %350 = vector.shape_cast %349 : vector<1x1x191xbf16> to vector<1x191xbf16>
    %c1_410 = arith.constant 1 : index
    %c0_411 = arith.constant 0 : index
    %351 = vector.load %arg5[%c1_410, %c0_411] : memref<9x256xbf16, #tpu.memory_space<vmem>>, vector<1x191xbf16>
    %352 = arith.mulf %350, %351 : vector<1x191xbf16>
    %c37_412 = arith.constant 37 : index
    %c0_413 = arith.constant 0 : index
    %353 = vector.load %arg7[%c37_412, %c0_413] : memref<81x256xbf16, #tpu.memory_space<vmem>>, vector<1x191xbf16>
    tpu.vector_store %arg7[%c37_412, %c0_413], %352 {strides = array<i32>} : memref<81x256xbf16, #tpu.memory_space<vmem>>, vector<1x191xbf16>,
    %c0_414 = arith.constant 0 : index
    %c0_415 = arith.constant 0 : index
    %c0_416 = arith.constant 0 : index
    %354 = vector.load %arg3[%c0_414, %c0_415, %c0_416] : memref<1x1x256xbf16, #tpu.memory_space<vmem>>, vector<1x1x65xbf16>
    %355 = vector.shape_cast %354 : vector<1x1x65xbf16> to vector<1x65xbf16>
    %c1_417 = arith.constant 1 : index
    %c191 = arith.constant 191 : index
    %356 = vector.load %arg5[%c1_417, %c191] : memref<9x256xbf16, #tpu.memory_space<vmem>>, vector<1x65xbf16>
    %357 = arith.mulf %355, %356 : vector<1x65xbf16>
    %c37_418 = arith.constant 37 : index
    %c191_419 = arith.constant 191 : index
    %358 = vector.load %arg7[%c37_418, %c191_419] : memref<81x256xbf16, #tpu.memory_space<vmem>>, vector<1x65xbf16>
    tpu.vector_store %arg7[%c37_418, %c191_419], %357 {strides = array<i32>} : memref<81x256xbf16, #tpu.memory_space<vmem>>, vector<1x65xbf16>,
    %c0_420 = arith.constant 0 : index
    %c0_421 = arith.constant 0 : index
    %c66 = arith.constant 66 : index
    %359 = vector.load %arg2[%c0_420, %c0_421, %c66] : memref<1x1x256xbf16, #tpu.memory_space<vmem>>, vector<1x1x190xbf16>
    %360 = vector.shape_cast %359 : vector<1x1x190xbf16> to vector<1x190xbf16>
    %c2_422 = arith.constant 2 : index
    %c0_423 = arith.constant 0 : index
    %361 = vector.load %arg5[%c2_422, %c0_423] : memref<9x256xbf16, #tpu.memory_space<vmem>>, vector<1x190xbf16>
    %362 = arith.mulf %360, %361 : vector<1x190xbf16>
    %c38_424 = arith.constant 38 : index
    %c0_425 = arith.constant 0 : index
    %363 = vector.load %arg7[%c38_424, %c0_425] : memref<81x256xbf16, #tpu.memory_space<vmem>>, vector<1x190xbf16>
    tpu.vector_store %arg7[%c38_424, %c0_425], %362 {strides = array<i32>} : memref<81x256xbf16, #tpu.memory_space<vmem>>, vector<1x190xbf16>,
    %c0_426 = arith.constant 0 : index
    %c0_427 = arith.constant 0 : index
    %c0_428 = arith.constant 0 : index
    %364 = vector.load %arg3[%c0_426, %c0_427, %c0_428] : memref<1x1x256xbf16, #tpu.memory_space<vmem>>, vector<1x1x66xbf16>
    %365 = vector.shape_cast %364 : vector<1x1x66xbf16> to vector<1x66xbf16>
    %c2_429 = arith.constant 2 : index
    %c190 = arith.constant 190 : index
    %366 = vector.load %arg5[%c2_429, %c190] : memref<9x256xbf16, #tpu.memory_space<vmem>>, vector<1x66xbf16>
    %367 = arith.mulf %365, %366 : vector<1x66xbf16>
    %c38_430 = arith.constant 38 : index
    %c190_431 = arith.constant 190 : index
    %368 = vector.load %arg7[%c38_430, %c190_431] : memref<81x256xbf16, #tpu.memory_space<vmem>>, vector<1x66xbf16>
    tpu.vector_store %arg7[%c38_430, %c190_431], %367 {strides = array<i32>} : memref<81x256xbf16, #tpu.memory_space<vmem>>, vector<1x66xbf16>,
    %c0_432 = arith.constant 0 : index
    %c0_433 = arith.constant 0 : index
    %c67 = arith.constant 67 : index
    %369 = vector.load %arg2[%c0_432, %c0_433, %c67] : memref<1x1x256xbf16, #tpu.memory_space<vmem>>, vector<1x1x189xbf16>
    %370 = vector.shape_cast %369 : vector<1x1x189xbf16> to vector<1x189xbf16>
    %c3_434 = arith.constant 3 : index
    %c0_435 = arith.constant 0 : index
    %371 = vector.load %arg5[%c3_434, %c0_435] : memref<9x256xbf16, #tpu.memory_space<vmem>>, vector<1x189xbf16>
    %372 = arith.mulf %370, %371 : vector<1x189xbf16>
    %c39_436 = arith.constant 39 : index
    %c0_437 = arith.constant 0 : index
    %373 = vector.load %arg7[%c39_436, %c0_437] : memref<81x256xbf16, #tpu.memory_space<vmem>>, vector<1x189xbf16>
    tpu.vector_store %arg7[%c39_436, %c0_437], %372 {strides = array<i32>} : memref<81x256xbf16, #tpu.memory_space<vmem>>, vector<1x189xbf16>,
    %c0_438 = arith.constant 0 : index
    %c0_439 = arith.constant 0 : index
    %c0_440 = arith.constant 0 : index
    %374 = vector.load %arg3[%c0_438, %c0_439, %c0_440] : memref<1x1x256xbf16, #tpu.memory_space<vmem>>, vector<1x1x67xbf16>
    %375 = vector.shape_cast %374 : vector<1x1x67xbf16> to vector<1x67xbf16>
    %c3_441 = arith.constant 3 : index
    %c189 = arith.constant 189 : index
    %376 = vector.load %arg5[%c3_441, %c189] : memref<9x256xbf16, #tpu.memory_space<vmem>>, vector<1x67xbf16>
    %377 = arith.mulf %375, %376 : vector<1x67xbf16>
    %c39_442 = arith.constant 39 : index
    %c189_443 = arith.constant 189 : index
    %378 = vector.load %arg7[%c39_442, %c189_443] : memref<81x256xbf16, #tpu.memory_space<vmem>>, vector<1x67xbf16>
    tpu.vector_store %arg7[%c39_442, %c189_443], %377 {strides = array<i32>} : memref<81x256xbf16, #tpu.memory_space<vmem>>, vector<1x67xbf16>,
    %c0_444 = arith.constant 0 : index
    %c0_445 = arith.constant 0 : index
    %c68 = arith.constant 68 : index
    %379 = vector.load %arg2[%c0_444, %c0_445, %c68] : memref<1x1x256xbf16, #tpu.memory_space<vmem>>, vector<1x1x188xbf16>
    %380 = vector.shape_cast %379 : vector<1x1x188xbf16> to vector<1x188xbf16>
    %c40_446 = arith.constant 40 : index
    %c0_447 = arith.constant 0 : index
    %381 = vector.load %arg7[%c40_446, %c0_447] : memref<81x256xbf16, #tpu.memory_space<vmem>>, vector<1x188xbf16>
    tpu.vector_store %arg7[%c40_446, %c0_447], %380 {strides = array<i32>} : memref<81x256xbf16, #tpu.memory_space<vmem>>, vector<1x188xbf16>,
    %c0_448 = arith.constant 0 : index
    %c0_449 = arith.constant 0 : index
    %c0_450 = arith.constant 0 : index
    %382 = vector.load %arg3[%c0_448, %c0_449, %c0_450] : memref<1x1x256xbf16, #tpu.memory_space<vmem>>, vector<1x1x68xbf16>
    %383 = vector.shape_cast %382 : vector<1x1x68xbf16> to vector<1x68xbf16>
    %c40_451 = arith.constant 40 : index
    %c188 = arith.constant 188 : index
    %384 = vector.load %arg7[%c40_451, %c188] : memref<81x256xbf16, #tpu.memory_space<vmem>>, vector<1x68xbf16>
    tpu.vector_store %arg7[%c40_451, %c188], %383 {strides = array<i32>} : memref<81x256xbf16, #tpu.memory_space<vmem>>, vector<1x68xbf16>,
    %c0_452 = arith.constant 0 : index
    %c0_453 = arith.constant 0 : index
    %c69 = arith.constant 69 : index
    %385 = vector.load %arg2[%c0_452, %c0_453, %c69] : memref<1x1x256xbf16, #tpu.memory_space<vmem>>, vector<1x1x187xbf16>
    %386 = vector.shape_cast %385 : vector<1x1x187xbf16> to vector<1x187xbf16>
    %c5_454 = arith.constant 5 : index
    %c0_455 = arith.constant 0 : index
    %387 = vector.load %arg5[%c5_454, %c0_455] : memref<9x256xbf16, #tpu.memory_space<vmem>>, vector<1x187xbf16>
    %388 = arith.mulf %386, %387 : vector<1x187xbf16>
    %c41 = arith.constant 41 : index
    %c0_456 = arith.constant 0 : index
    %389 = vector.load %arg7[%c41, %c0_456] : memref<81x256xbf16, #tpu.memory_space<vmem>>, vector<1x187xbf16>
    tpu.vector_store %arg7[%c41, %c0_456], %388 {strides = array<i32>} : memref<81x256xbf16, #tpu.memory_space<vmem>>, vector<1x187xbf16>,
    %c0_457 = arith.constant 0 : index
    %c0_458 = arith.constant 0 : index
    %c0_459 = arith.constant 0 : index
    %390 = vector.load %arg3[%c0_457, %c0_458, %c0_459] : memref<1x1x256xbf16, #tpu.memory_space<vmem>>, vector<1x1x69xbf16>
    %391 = vector.shape_cast %390 : vector<1x1x69xbf16> to vector<1x69xbf16>
    %c5_460 = arith.constant 5 : index
    %c187 = arith.constant 187 : index
    %392 = vector.load %arg5[%c5_460, %c187] : memref<9x256xbf16, #tpu.memory_space<vmem>>, vector<1x69xbf16>
    %393 = arith.mulf %391, %392 : vector<1x69xbf16>
    %c41_461 = arith.constant 41 : index
    %c187_462 = arith.constant 187 : index
    %394 = vector.load %arg7[%c41_461, %c187_462] : memref<81x256xbf16, #tpu.memory_space<vmem>>, vector<1x69xbf16>
    tpu.vector_store %arg7[%c41_461, %c187_462], %393 {strides = array<i32>} : memref<81x256xbf16, #tpu.memory_space<vmem>>, vector<1x69xbf16>,
    %c0_463 = arith.constant 0 : index
    %c0_464 = arith.constant 0 : index
    %c70 = arith.constant 70 : index
    %395 = vector.load %arg2[%c0_463, %c0_464, %c70] : memref<1x1x256xbf16, #tpu.memory_space<vmem>>, vector<1x1x186xbf16>
    %396 = vector.shape_cast %395 : vector<1x1x186xbf16> to vector<1x186xbf16>
    %c6_465 = arith.constant 6 : index
    %c0_466 = arith.constant 0 : index
    %397 = vector.load %arg5[%c6_465, %c0_466] : memref<9x256xbf16, #tpu.memory_space<vmem>>, vector<1x186xbf16>
    %398 = arith.mulf %396, %397 : vector<1x186xbf16>
    %c42 = arith.constant 42 : index
    %c0_467 = arith.constant 0 : index
    %399 = vector.load %arg7[%c42, %c0_467] : memref<81x256xbf16, #tpu.memory_space<vmem>>, vector<1x186xbf16>
    tpu.vector_store %arg7[%c42, %c0_467], %398 {strides = array<i32>} : memref<81x256xbf16, #tpu.memory_space<vmem>>, vector<1x186xbf16>,
    %c0_468 = arith.constant 0 : index
    %c0_469 = arith.constant 0 : index
    %c0_470 = arith.constant 0 : index
    %400 = vector.load %arg3[%c0_468, %c0_469, %c0_470] : memref<1x1x256xbf16, #tpu.memory_space<vmem>>, vector<1x1x70xbf16>
    %401 = vector.shape_cast %400 : vector<1x1x70xbf16> to vector<1x70xbf16>
    %c6_471 = arith.constant 6 : index
    %c186 = arith.constant 186 : index
    %402 = vector.load %arg5[%c6_471, %c186] : memref<9x256xbf16, #tpu.memory_space<vmem>>, vector<1x70xbf16>
    %403 = arith.mulf %401, %402 : vector<1x70xbf16>
    %c42_472 = arith.constant 42 : index
    %c186_473 = arith.constant 186 : index
    %404 = vector.load %arg7[%c42_472, %c186_473] : memref<81x256xbf16, #tpu.memory_space<vmem>>, vector<1x70xbf16>
    tpu.vector_store %arg7[%c42_472, %c186_473], %403 {strides = array<i32>} : memref<81x256xbf16, #tpu.memory_space<vmem>>, vector<1x70xbf16>,
    %c0_474 = arith.constant 0 : index
    %c0_475 = arith.constant 0 : index
    %c71 = arith.constant 71 : index
    %405 = vector.load %arg2[%c0_474, %c0_475, %c71] : memref<1x1x256xbf16, #tpu.memory_space<vmem>>, vector<1x1x185xbf16>
    %406 = vector.shape_cast %405 : vector<1x1x185xbf16> to vector<1x185xbf16>
    %c7_476 = arith.constant 7 : index
    %c0_477 = arith.constant 0 : index
    %407 = vector.load %arg5[%c7_476, %c0_477] : memref<9x256xbf16, #tpu.memory_space<vmem>>, vector<1x185xbf16>
    %408 = arith.mulf %406, %407 : vector<1x185xbf16>
    %c43 = arith.constant 43 : index
    %c0_478 = arith.constant 0 : index
    %409 = vector.load %arg7[%c43, %c0_478] : memref<81x256xbf16, #tpu.memory_space<vmem>>, vector<1x185xbf16>
    tpu.vector_store %arg7[%c43, %c0_478], %408 {strides = array<i32>} : memref<81x256xbf16, #tpu.memory_space<vmem>>, vector<1x185xbf16>,
    %c0_479 = arith.constant 0 : index
    %c0_480 = arith.constant 0 : index
    %c0_481 = arith.constant 0 : index
    %410 = vector.load %arg3[%c0_479, %c0_480, %c0_481] : memref<1x1x256xbf16, #tpu.memory_space<vmem>>, vector<1x1x71xbf16>
    %411 = vector.shape_cast %410 : vector<1x1x71xbf16> to vector<1x71xbf16>
    %c7_482 = arith.constant 7 : index
    %c185 = arith.constant 185 : index
    %412 = vector.load %arg5[%c7_482, %c185] : memref<9x256xbf16, #tpu.memory_space<vmem>>, vector<1x71xbf16>
    %413 = arith.mulf %411, %412 : vector<1x71xbf16>
    %c43_483 = arith.constant 43 : index
    %c185_484 = arith.constant 185 : index
    %414 = vector.load %arg7[%c43_483, %c185_484] : memref<81x256xbf16, #tpu.memory_space<vmem>>, vector<1x71xbf16>
    tpu.vector_store %arg7[%c43_483, %c185_484], %413 {strides = array<i32>} : memref<81x256xbf16, #tpu.memory_space<vmem>>, vector<1x71xbf16>,
    %c0_485 = arith.constant 0 : index
    %c0_486 = arith.constant 0 : index
    %c72 = arith.constant 72 : index
    %415 = vector.load %arg2[%c0_485, %c0_486, %c72] : memref<1x1x256xbf16, #tpu.memory_space<vmem>>, vector<1x1x184xbf16>
    %416 = vector.shape_cast %415 : vector<1x1x184xbf16> to vector<1x184xbf16>
    %c8_487 = arith.constant 8 : index
    %c0_488 = arith.constant 0 : index
    %417 = vector.load %arg5[%c8_487, %c0_488] : memref<9x256xbf16, #tpu.memory_space<vmem>>, vector<1x184xbf16>
    %418 = arith.mulf %416, %417 : vector<1x184xbf16>
    %c44 = arith.constant 44 : index
    %c0_489 = arith.constant 0 : index
    %419 = vector.load %arg7[%c44, %c0_489] : memref<81x256xbf16, #tpu.memory_space<vmem>>, vector<1x184xbf16>
    tpu.vector_store %arg7[%c44, %c0_489], %418 {strides = array<i32>} : memref<81x256xbf16, #tpu.memory_space<vmem>>, vector<1x184xbf16>,
    %c0_490 = arith.constant 0 : index
    %c0_491 = arith.constant 0 : index
    %c0_492 = arith.constant 0 : index
    %420 = vector.load %arg3[%c0_490, %c0_491, %c0_492] : memref<1x1x256xbf16, #tpu.memory_space<vmem>>, vector<1x1x72xbf16>
    %421 = vector.shape_cast %420 : vector<1x1x72xbf16> to vector<1x72xbf16>
    %c8_493 = arith.constant 8 : index
    %c184 = arith.constant 184 : index
    %422 = vector.load %arg5[%c8_493, %c184] : memref<9x256xbf16, #tpu.memory_space<vmem>>, vector<1x72xbf16>
    %423 = arith.mulf %421, %422 : vector<1x72xbf16>
    %c44_494 = arith.constant 44 : index
    %c184_495 = arith.constant 184 : index
    %424 = vector.load %arg7[%c44_494, %c184_495] : memref<81x256xbf16, #tpu.memory_space<vmem>>, vector<1x72xbf16>
    tpu.vector_store %arg7[%c44_494, %c184_495], %423 {strides = array<i32>} : memref<81x256xbf16, #tpu.memory_space<vmem>>, vector<1x72xbf16>,
    %c0_496 = arith.constant 0 : index
    %c0_497 = arith.constant 0 : index
    %c80 = arith.constant 80 : index
    %425 = vector.load %arg2[%c0_496, %c0_497, %c80] : memref<1x1x256xbf16, #tpu.memory_space<vmem>>, vector<1x1x176xbf16>
    %426 = vector.shape_cast %425 : vector<1x1x176xbf16> to vector<1x176xbf16>
    %c0_498 = arith.constant 0 : index
    %c0_499 = arith.constant 0 : index
    %427 = vector.load %arg5[%c0_498, %c0_499] : memref<9x256xbf16, #tpu.memory_space<vmem>>, vector<1x176xbf16>
    %428 = arith.mulf %426, %427 : vector<1x176xbf16>
    %c45 = arith.constant 45 : index
    %c0_500 = arith.constant 0 : index
    %429 = vector.load %arg7[%c45, %c0_500] : memref<81x256xbf16, #tpu.memory_space<vmem>>, vector<1x176xbf16>
    tpu.vector_store %arg7[%c45, %c0_500], %428 {strides = array<i32>} : memref<81x256xbf16, #tpu.memory_space<vmem>>, vector<1x176xbf16>,
    %c0_501 = arith.constant 0 : index
    %c0_502 = arith.constant 0 : index
    %c0_503 = arith.constant 0 : index
    %430 = vector.load %arg3[%c0_501, %c0_502, %c0_503] : memref<1x1x256xbf16, #tpu.memory_space<vmem>>, vector<1x1x80xbf16>
    %431 = vector.shape_cast %430 : vector<1x1x80xbf16> to vector<1x80xbf16>
    %c0_504 = arith.constant 0 : index
    %c176 = arith.constant 176 : index
    %432 = vector.load %arg5[%c0_504, %c176] : memref<9x256xbf16, #tpu.memory_space<vmem>>, vector<1x80xbf16>
    %433 = arith.mulf %431, %432 : vector<1x80xbf16>
    %c45_505 = arith.constant 45 : index
    %c176_506 = arith.constant 176 : index
    %434 = vector.load %arg7[%c45_505, %c176_506] : memref<81x256xbf16, #tpu.memory_space<vmem>>, vector<1x80xbf16>
    tpu.vector_store %arg7[%c45_505, %c176_506], %433 {strides = array<i32>} : memref<81x256xbf16, #tpu.memory_space<vmem>>, vector<1x80xbf16>,
    %c0_507 = arith.constant 0 : index
    %c0_508 = arith.constant 0 : index
    %c81 = arith.constant 81 : index
    %435 = vector.load %arg2[%c0_507, %c0_508, %c81] : memref<1x1x256xbf16, #tpu.memory_space<vmem>>, vector<1x1x175xbf16>
    %436 = vector.shape_cast %435 : vector<1x1x175xbf16> to vector<1x175xbf16>
    %c1_509 = arith.constant 1 : index
    %c0_510 = arith.constant 0 : index
    %437 = vector.load %arg5[%c1_509, %c0_510] : memref<9x256xbf16, #tpu.memory_space<vmem>>, vector<1x175xbf16>
    %438 = arith.mulf %436, %437 : vector<1x175xbf16>
    %c46 = arith.constant 46 : index
    %c0_511 = arith.constant 0 : index
    %439 = vector.load %arg7[%c46, %c0_511] : memref<81x256xbf16, #tpu.memory_space<vmem>>, vector<1x175xbf16>
    tpu.vector_store %arg7[%c46, %c0_511], %438 {strides = array<i32>} : memref<81x256xbf16, #tpu.memory_space<vmem>>, vector<1x175xbf16>,
    %c0_512 = arith.constant 0 : index
    %c0_513 = arith.constant 0 : index
    %c0_514 = arith.constant 0 : index
    %440 = vector.load %arg3[%c0_512, %c0_513, %c0_514] : memref<1x1x256xbf16, #tpu.memory_space<vmem>>, vector<1x1x81xbf16>
    %441 = vector.shape_cast %440 : vector<1x1x81xbf16> to vector<1x81xbf16>
    %c1_515 = arith.constant 1 : index
    %c175 = arith.constant 175 : index
    %442 = vector.load %arg5[%c1_515, %c175] : memref<9x256xbf16, #tpu.memory_space<vmem>>, vector<1x81xbf16>
    %443 = arith.mulf %441, %442 : vector<1x81xbf16>
    %c46_516 = arith.constant 46 : index
    %c175_517 = arith.constant 175 : index
    %444 = vector.load %arg7[%c46_516, %c175_517] : memref<81x256xbf16, #tpu.memory_space<vmem>>, vector<1x81xbf16>
    tpu.vector_store %arg7[%c46_516, %c175_517], %443 {strides = array<i32>} : memref<81x256xbf16, #tpu.memory_space<vmem>>, vector<1x81xbf16>,
    %c0_518 = arith.constant 0 : index
    %c0_519 = arith.constant 0 : index
    %c82 = arith.constant 82 : index
    %445 = vector.load %arg2[%c0_518, %c0_519, %c82] : memref<1x1x256xbf16, #tpu.memory_space<vmem>>, vector<1x1x174xbf16>
    %446 = vector.shape_cast %445 : vector<1x1x174xbf16> to vector<1x174xbf16>
    %c2_520 = arith.constant 2 : index
    %c0_521 = arith.constant 0 : index
    %447 = vector.load %arg5[%c2_520, %c0_521] : memref<9x256xbf16, #tpu.memory_space<vmem>>, vector<1x174xbf16>
    %448 = arith.mulf %446, %447 : vector<1x174xbf16>
    %c47 = arith.constant 47 : index
    %c0_522 = arith.constant 0 : index
    %449 = vector.load %arg7[%c47, %c0_522] : memref<81x256xbf16, #tpu.memory_space<vmem>>, vector<1x174xbf16>
    tpu.vector_store %arg7[%c47, %c0_522], %448 {strides = array<i32>} : memref<81x256xbf16, #tpu.memory_space<vmem>>, vector<1x174xbf16>,
    %c0_523 = arith.constant 0 : index
    %c0_524 = arith.constant 0 : index
    %c0_525 = arith.constant 0 : index
    %450 = vector.load %arg3[%c0_523, %c0_524, %c0_525] : memref<1x1x256xbf16, #tpu.memory_space<vmem>>, vector<1x1x82xbf16>
    %451 = vector.shape_cast %450 : vector<1x1x82xbf16> to vector<1x82xbf16>
    %c2_526 = arith.constant 2 : index
    %c174 = arith.constant 174 : index
    %452 = vector.load %arg5[%c2_526, %c174] : memref<9x256xbf16, #tpu.memory_space<vmem>>, vector<1x82xbf16>
    %453 = arith.mulf %451, %452 : vector<1x82xbf16>
    %c47_527 = arith.constant 47 : index
    %c174_528 = arith.constant 174 : index
    %454 = vector.load %arg7[%c47_527, %c174_528] : memref<81x256xbf16, #tpu.memory_space<vmem>>, vector<1x82xbf16>
    tpu.vector_store %arg7[%c47_527, %c174_528], %453 {strides = array<i32>} : memref<81x256xbf16, #tpu.memory_space<vmem>>, vector<1x82xbf16>,
    %c0_529 = arith.constant 0 : index
    %c0_530 = arith.constant 0 : index
    %c83 = arith.constant 83 : index
    %455 = vector.load %arg2[%c0_529, %c0_530, %c83] : memref<1x1x256xbf16, #tpu.memory_space<vmem>>, vector<1x1x173xbf16>
    %456 = vector.shape_cast %455 : vector<1x1x173xbf16> to vector<1x173xbf16>
    %c3_531 = arith.constant 3 : index
    %c0_532 = arith.constant 0 : index
    %457 = vector.load %arg5[%c3_531, %c0_532] : memref<9x256xbf16, #tpu.memory_space<vmem>>, vector<1x173xbf16>
    %458 = arith.mulf %456, %457 : vector<1x173xbf16>
    %c48_533 = arith.constant 48 : index
    %c0_534 = arith.constant 0 : index
    %459 = vector.load %arg7[%c48_533, %c0_534] : memref<81x256xbf16, #tpu.memory_space<vmem>>, vector<1x173xbf16>
    tpu.vector_store %arg7[%c48_533, %c0_534], %458 {strides = array<i32>} : memref<81x256xbf16, #tpu.memory_space<vmem>>, vector<1x173xbf16>,
    %c0_535 = arith.constant 0 : index
    %c0_536 = arith.constant 0 : index
    %c0_537 = arith.constant 0 : index
    %460 = vector.load %arg3[%c0_535, %c0_536, %c0_537] : memref<1x1x256xbf16, #tpu.memory_space<vmem>>, vector<1x1x83xbf16>
    %461 = vector.shape_cast %460 : vector<1x1x83xbf16> to vector<1x83xbf16>
    %c3_538 = arith.constant 3 : index
    %c173 = arith.constant 173 : index
    %462 = vector.load %arg5[%c3_538, %c173] : memref<9x256xbf16, #tpu.memory_space<vmem>>, vector<1x83xbf16>
    %463 = arith.mulf %461, %462 : vector<1x83xbf16>
    %c48_539 = arith.constant 48 : index
    %c173_540 = arith.constant 173 : index
    %464 = vector.load %arg7[%c48_539, %c173_540] : memref<81x256xbf16, #tpu.memory_space<vmem>>, vector<1x83xbf16>
    tpu.vector_store %arg7[%c48_539, %c173_540], %463 {strides = array<i32>} : memref<81x256xbf16, #tpu.memory_space<vmem>>, vector<1x83xbf16>,
    %c0_541 = arith.constant 0 : index
    %c0_542 = arith.constant 0 : index
    %c84 = arith.constant 84 : index
    %465 = vector.load %arg2[%c0_541, %c0_542, %c84] : memref<1x1x256xbf16, #tpu.memory_space<vmem>>, vector<1x1x172xbf16>
    %466 = vector.shape_cast %465 : vector<1x1x172xbf16> to vector<1x172xbf16>
    %c49_543 = arith.constant 49 : index
    %c0_544 = arith.constant 0 : index
    %467 = vector.load %arg7[%c49_543, %c0_544] : memref<81x256xbf16, #tpu.memory_space<vmem>>, vector<1x172xbf16>
    tpu.vector_store %arg7[%c49_543, %c0_544], %466 {strides = array<i32>} : memref<81x256xbf16, #tpu.memory_space<vmem>>, vector<1x172xbf16>,
    %c0_545 = arith.constant 0 : index
    %c0_546 = arith.constant 0 : index
    %c0_547 = arith.constant 0 : index
    %468 = vector.load %arg3[%c0_545, %c0_546, %c0_547] : memref<1x1x256xbf16, #tpu.memory_space<vmem>>, vector<1x1x84xbf16>
    %469 = vector.shape_cast %468 : vector<1x1x84xbf16> to vector<1x84xbf16>
    %c49_548 = arith.constant 49 : index
    %c172 = arith.constant 172 : index
    %470 = vector.load %arg7[%c49_548, %c172] : memref<81x256xbf16, #tpu.memory_space<vmem>>, vector<1x84xbf16>
    tpu.vector_store %arg7[%c49_548, %c172], %469 {strides = array<i32>} : memref<81x256xbf16, #tpu.memory_space<vmem>>, vector<1x84xbf16>,
    %c0_549 = arith.constant 0 : index
    %c0_550 = arith.constant 0 : index
    %c85 = arith.constant 85 : index
    %471 = vector.load %arg2[%c0_549, %c0_550, %c85] : memref<1x1x256xbf16, #tpu.memory_space<vmem>>, vector<1x1x171xbf16>
    %472 = vector.shape_cast %471 : vector<1x1x171xbf16> to vector<1x171xbf16>
    %c5_551 = arith.constant 5 : index
    %c0_552 = arith.constant 0 : index
    %473 = vector.load %arg5[%c5_551, %c0_552] : memref<9x256xbf16, #tpu.memory_space<vmem>>, vector<1x171xbf16>
    %474 = arith.mulf %472, %473 : vector<1x171xbf16>
    %c50_553 = arith.constant 50 : index
    %c0_554 = arith.constant 0 : index
    %475 = vector.load %arg7[%c50_553, %c0_554] : memref<81x256xbf16, #tpu.memory_space<vmem>>, vector<1x171xbf16>
    tpu.vector_store %arg7[%c50_553, %c0_554], %474 {strides = array<i32>} : memref<81x256xbf16, #tpu.memory_space<vmem>>, vector<1x171xbf16>,
    %c0_555 = arith.constant 0 : index
    %c0_556 = arith.constant 0 : index
    %c0_557 = arith.constant 0 : index
    %476 = vector.load %arg3[%c0_555, %c0_556, %c0_557] : memref<1x1x256xbf16, #tpu.memory_space<vmem>>, vector<1x1x85xbf16>
    %477 = vector.shape_cast %476 : vector<1x1x85xbf16> to vector<1x85xbf16>
    %c5_558 = arith.constant 5 : index
    %c171 = arith.constant 171 : index
    %478 = vector.load %arg5[%c5_558, %c171] : memref<9x256xbf16, #tpu.memory_space<vmem>>, vector<1x85xbf16>
    %479 = arith.mulf %477, %478 : vector<1x85xbf16>
    %c50_559 = arith.constant 50 : index
    %c171_560 = arith.constant 171 : index
    %480 = vector.load %arg7[%c50_559, %c171_560] : memref<81x256xbf16, #tpu.memory_space<vmem>>, vector<1x85xbf16>
    tpu.vector_store %arg7[%c50_559, %c171_560], %479 {strides = array<i32>} : memref<81x256xbf16, #tpu.memory_space<vmem>>, vector<1x85xbf16>,
    %c0_561 = arith.constant 0 : index
    %c0_562 = arith.constant 0 : index
    %c86 = arith.constant 86 : index
    %481 = vector.load %arg2[%c0_561, %c0_562, %c86] : memref<1x1x256xbf16, #tpu.memory_space<vmem>>, vector<1x1x170xbf16>
    %482 = vector.shape_cast %481 : vector<1x1x170xbf16> to vector<1x170xbf16>
    %c6_563 = arith.constant 6 : index
    %c0_564 = arith.constant 0 : index
    %483 = vector.load %arg5[%c6_563, %c0_564] : memref<9x256xbf16, #tpu.memory_space<vmem>>, vector<1x170xbf16>
    %484 = arith.mulf %482, %483 : vector<1x170xbf16>
    %c51_565 = arith.constant 51 : index
    %c0_566 = arith.constant 0 : index
    %485 = vector.load %arg7[%c51_565, %c0_566] : memref<81x256xbf16, #tpu.memory_space<vmem>>, vector<1x170xbf16>
    tpu.vector_store %arg7[%c51_565, %c0_566], %484 {strides = array<i32>} : memref<81x256xbf16, #tpu.memory_space<vmem>>, vector<1x170xbf16>,
    %c0_567 = arith.constant 0 : index
    %c0_568 = arith.constant 0 : index
    %c0_569 = arith.constant 0 : index
    %486 = vector.load %arg3[%c0_567, %c0_568, %c0_569] : memref<1x1x256xbf16, #tpu.memory_space<vmem>>, vector<1x1x86xbf16>
    %487 = vector.shape_cast %486 : vector<1x1x86xbf16> to vector<1x86xbf16>
    %c6_570 = arith.constant 6 : index
    %c170 = arith.constant 170 : index
    %488 = vector.load %arg5[%c6_570, %c170] : memref<9x256xbf16, #tpu.memory_space<vmem>>, vector<1x86xbf16>
    %489 = arith.mulf %487, %488 : vector<1x86xbf16>
    %c51_571 = arith.constant 51 : index
    %c170_572 = arith.constant 170 : index
    %490 = vector.load %arg7[%c51_571, %c170_572] : memref<81x256xbf16, #tpu.memory_space<vmem>>, vector<1x86xbf16>
    tpu.vector_store %arg7[%c51_571, %c170_572], %489 {strides = array<i32>} : memref<81x256xbf16, #tpu.memory_space<vmem>>, vector<1x86xbf16>,
    %c0_573 = arith.constant 0 : index
    %c0_574 = arith.constant 0 : index
    %c87 = arith.constant 87 : index
    %491 = vector.load %arg2[%c0_573, %c0_574, %c87] : memref<1x1x256xbf16, #tpu.memory_space<vmem>>, vector<1x1x169xbf16>
    %492 = vector.shape_cast %491 : vector<1x1x169xbf16> to vector<1x169xbf16>
    %c7_575 = arith.constant 7 : index
    %c0_576 = arith.constant 0 : index
    %493 = vector.load %arg5[%c7_575, %c0_576] : memref<9x256xbf16, #tpu.memory_space<vmem>>, vector<1x169xbf16>
    %494 = arith.mulf %492, %493 : vector<1x169xbf16>
    %c52_577 = arith.constant 52 : index
    %c0_578 = arith.constant 0 : index
    %495 = vector.load %arg7[%c52_577, %c0_578] : memref<81x256xbf16, #tpu.memory_space<vmem>>, vector<1x169xbf16>
    tpu.vector_store %arg7[%c52_577, %c0_578], %494 {strides = array<i32>} : memref<81x256xbf16, #tpu.memory_space<vmem>>, vector<1x169xbf16>,
    %c0_579 = arith.constant 0 : index
    %c0_580 = arith.constant 0 : index
    %c0_581 = arith.constant 0 : index
    %496 = vector.load %arg3[%c0_579, %c0_580, %c0_581] : memref<1x1x256xbf16, #tpu.memory_space<vmem>>, vector<1x1x87xbf16>
    %497 = vector.shape_cast %496 : vector<1x1x87xbf16> to vector<1x87xbf16>
    %c7_582 = arith.constant 7 : index
    %c169 = arith.constant 169 : index
    %498 = vector.load %arg5[%c7_582, %c169] : memref<9x256xbf16, #tpu.memory_space<vmem>>, vector<1x87xbf16>
    %499 = arith.mulf %497, %498 : vector<1x87xbf16>
    %c52_583 = arith.constant 52 : index
    %c169_584 = arith.constant 169 : index
    %500 = vector.load %arg7[%c52_583, %c169_584] : memref<81x256xbf16, #tpu.memory_space<vmem>>, vector<1x87xbf16>
    tpu.vector_store %arg7[%c52_583, %c169_584], %499 {strides = array<i32>} : memref<81x256xbf16, #tpu.memory_space<vmem>>, vector<1x87xbf16>,
    %c0_585 = arith.constant 0 : index
    %c0_586 = arith.constant 0 : index
    %c88 = arith.constant 88 : index
    %501 = vector.load %arg2[%c0_585, %c0_586, %c88] : memref<1x1x256xbf16, #tpu.memory_space<vmem>>, vector<1x1x168xbf16>
    %502 = vector.shape_cast %501 : vector<1x1x168xbf16> to vector<1x168xbf16>
    %c8_587 = arith.constant 8 : index
    %c0_588 = arith.constant 0 : index
    %503 = vector.load %arg5[%c8_587, %c0_588] : memref<9x256xbf16, #tpu.memory_space<vmem>>, vector<1x168xbf16>
    %504 = arith.mulf %502, %503 : vector<1x168xbf16>
    %c53_589 = arith.constant 53 : index
    %c0_590 = arith.constant 0 : index
    %505 = vector.load %arg7[%c53_589, %c0_590] : memref<81x256xbf16, #tpu.memory_space<vmem>>, vector<1x168xbf16>
    tpu.vector_store %arg7[%c53_589, %c0_590], %504 {strides = array<i32>} : memref<81x256xbf16, #tpu.memory_space<vmem>>, vector<1x168xbf16>,
    %c0_591 = arith.constant 0 : index
    %c0_592 = arith.constant 0 : index
    %c0_593 = arith.constant 0 : index
    %506 = vector.load %arg3[%c0_591, %c0_592, %c0_593] : memref<1x1x256xbf16, #tpu.memory_space<vmem>>, vector<1x1x88xbf16>
    %507 = vector.shape_cast %506 : vector<1x1x88xbf16> to vector<1x88xbf16>
    %c8_594 = arith.constant 8 : index
    %c168 = arith.constant 168 : index
    %508 = vector.load %arg5[%c8_594, %c168] : memref<9x256xbf16, #tpu.memory_space<vmem>>, vector<1x88xbf16>
    %509 = arith.mulf %507, %508 : vector<1x88xbf16>
    %c53_595 = arith.constant 53 : index
    %c168_596 = arith.constant 168 : index
    %510 = vector.load %arg7[%c53_595, %c168_596] : memref<81x256xbf16, #tpu.memory_space<vmem>>, vector<1x88xbf16>
    tpu.vector_store %arg7[%c53_595, %c168_596], %509 {strides = array<i32>} : memref<81x256xbf16, #tpu.memory_space<vmem>>, vector<1x88xbf16>,
    %c0_597 = arith.constant 0 : index
    %c0_598 = arith.constant 0 : index
    %c96 = arith.constant 96 : index
    %511 = vector.load %arg2[%c0_597, %c0_598, %c96] : memref<1x1x256xbf16, #tpu.memory_space<vmem>>, vector<1x1x160xbf16>
    %512 = vector.shape_cast %511 : vector<1x1x160xbf16> to vector<1x160xbf16>
    %c0_599 = arith.constant 0 : index
    %c0_600 = arith.constant 0 : index
    %513 = vector.load %arg5[%c0_599, %c0_600] : memref<9x256xbf16, #tpu.memory_space<vmem>>, vector<1x160xbf16>
    %514 = arith.mulf %512, %513 : vector<1x160xbf16>
    %c54_601 = arith.constant 54 : index
    %c0_602 = arith.constant 0 : index
    %515 = vector.load %arg7[%c54_601, %c0_602] : memref<81x256xbf16, #tpu.memory_space<vmem>>, vector<1x160xbf16>
    tpu.vector_store %arg7[%c54_601, %c0_602], %514 {strides = array<i32>} : memref<81x256xbf16, #tpu.memory_space<vmem>>, vector<1x160xbf16>,
    %c0_603 = arith.constant 0 : index
    %c0_604 = arith.constant 0 : index
    %c0_605 = arith.constant 0 : index
    %516 = vector.load %arg3[%c0_603, %c0_604, %c0_605] : memref<1x1x256xbf16, #tpu.memory_space<vmem>>, vector<1x1x96xbf16>
    %517 = vector.shape_cast %516 : vector<1x1x96xbf16> to vector<1x96xbf16>
    %c0_606 = arith.constant 0 : index
    %c160 = arith.constant 160 : index
    %518 = vector.load %arg5[%c0_606, %c160] : memref<9x256xbf16, #tpu.memory_space<vmem>>, vector<1x96xbf16>
    %519 = arith.mulf %517, %518 : vector<1x96xbf16>
    %c54_607 = arith.constant 54 : index
    %c160_608 = arith.constant 160 : index
    %520 = vector.load %arg7[%c54_607, %c160_608] : memref<81x256xbf16, #tpu.memory_space<vmem>>, vector<1x96xbf16>
    tpu.vector_store %arg7[%c54_607, %c160_608], %519 {strides = array<i32>} : memref<81x256xbf16, #tpu.memory_space<vmem>>, vector<1x96xbf16>,
    %c0_609 = arith.constant 0 : index
    %c0_610 = arith.constant 0 : index
    %c97 = arith.constant 97 : index
    %521 = vector.load %arg2[%c0_609, %c0_610, %c97] : memref<1x1x256xbf16, #tpu.memory_space<vmem>>, vector<1x1x159xbf16>
    %522 = vector.shape_cast %521 : vector<1x1x159xbf16> to vector<1x159xbf16>
    %c1_611 = arith.constant 1 : index
    %c0_612 = arith.constant 0 : index
    %523 = vector.load %arg5[%c1_611, %c0_612] : memref<9x256xbf16, #tpu.memory_space<vmem>>, vector<1x159xbf16>
    %524 = arith.mulf %522, %523 : vector<1x159xbf16>
    %c55_613 = arith.constant 55 : index
    %c0_614 = arith.constant 0 : index
    %525 = vector.load %arg7[%c55_613, %c0_614] : memref<81x256xbf16, #tpu.memory_space<vmem>>, vector<1x159xbf16>
    tpu.vector_store %arg7[%c55_613, %c0_614], %524 {strides = array<i32>} : memref<81x256xbf16, #tpu.memory_space<vmem>>, vector<1x159xbf16>,
    %c0_615 = arith.constant 0 : index
    %c0_616 = arith.constant 0 : index
    %c0_617 = arith.constant 0 : index
    %526 = vector.load %arg3[%c0_615, %c0_616, %c0_617] : memref<1x1x256xbf16, #tpu.memory_space<vmem>>, vector<1x1x97xbf16>
    %527 = vector.shape_cast %526 : vector<1x1x97xbf16> to vector<1x97xbf16>
    %c1_618 = arith.constant 1 : index
    %c159 = arith.constant 159 : index
    %528 = vector.load %arg5[%c1_618, %c159] : memref<9x256xbf16, #tpu.memory_space<vmem>>, vector<1x97xbf16>
    %529 = arith.mulf %527, %528 : vector<1x97xbf16>
    %c55_619 = arith.constant 55 : index
    %c159_620 = arith.constant 159 : index
    %530 = vector.load %arg7[%c55_619, %c159_620] : memref<81x256xbf16, #tpu.memory_space<vmem>>, vector<1x97xbf16>
    tpu.vector_store %arg7[%c55_619, %c159_620], %529 {strides = array<i32>} : memref<81x256xbf16, #tpu.memory_space<vmem>>, vector<1x97xbf16>,
    %c0_621 = arith.constant 0 : index
    %c0_622 = arith.constant 0 : index
    %c98 = arith.constant 98 : index
    %531 = vector.load %arg2[%c0_621, %c0_622, %c98] : memref<1x1x256xbf16, #tpu.memory_space<vmem>>, vector<1x1x158xbf16>
    %532 = vector.shape_cast %531 : vector<1x1x158xbf16> to vector<1x158xbf16>
    %c2_623 = arith.constant 2 : index
    %c0_624 = arith.constant 0 : index
    %533 = vector.load %arg5[%c2_623, %c0_624] : memref<9x256xbf16, #tpu.memory_space<vmem>>, vector<1x158xbf16>
    %534 = arith.mulf %532, %533 : vector<1x158xbf16>
    %c56_625 = arith.constant 56 : index
    %c0_626 = arith.constant 0 : index
    %535 = vector.load %arg7[%c56_625, %c0_626] : memref<81x256xbf16, #tpu.memory_space<vmem>>, vector<1x158xbf16>
    tpu.vector_store %arg7[%c56_625, %c0_626], %534 {strides = array<i32>} : memref<81x256xbf16, #tpu.memory_space<vmem>>, vector<1x158xbf16>,
    %c0_627 = arith.constant 0 : index
    %c0_628 = arith.constant 0 : index
    %c0_629 = arith.constant 0 : index
    %536 = vector.load %arg3[%c0_627, %c0_628, %c0_629] : memref<1x1x256xbf16, #tpu.memory_space<vmem>>, vector<1x1x98xbf16>
    %537 = vector.shape_cast %536 : vector<1x1x98xbf16> to vector<1x98xbf16>
    %c2_630 = arith.constant 2 : index
    %c158 = arith.constant 158 : index
    %538 = vector.load %arg5[%c2_630, %c158] : memref<9x256xbf16, #tpu.memory_space<vmem>>, vector<1x98xbf16>
    %539 = arith.mulf %537, %538 : vector<1x98xbf16>
    %c56_631 = arith.constant 56 : index
    %c158_632 = arith.constant 158 : index
    %540 = vector.load %arg7[%c56_631, %c158_632] : memref<81x256xbf16, #tpu.memory_space<vmem>>, vector<1x98xbf16>
    tpu.vector_store %arg7[%c56_631, %c158_632], %539 {strides = array<i32>} : memref<81x256xbf16, #tpu.memory_space<vmem>>, vector<1x98xbf16>,
    %c0_633 = arith.constant 0 : index
    %c0_634 = arith.constant 0 : index
    %c99 = arith.constant 99 : index
    %541 = vector.load %arg2[%c0_633, %c0_634, %c99] : memref<1x1x256xbf16, #tpu.memory_space<vmem>>, vector<1x1x157xbf16>
    %542 = vector.shape_cast %541 : vector<1x1x157xbf16> to vector<1x157xbf16>
    %c3_635 = arith.constant 3 : index
    %c0_636 = arith.constant 0 : index
    %543 = vector.load %arg5[%c3_635, %c0_636] : memref<9x256xbf16, #tpu.memory_space<vmem>>, vector<1x157xbf16>
    %544 = arith.mulf %542, %543 : vector<1x157xbf16>
    %c57 = arith.constant 57 : index
    %c0_637 = arith.constant 0 : index
    %545 = vector.load %arg7[%c57, %c0_637] : memref<81x256xbf16, #tpu.memory_space<vmem>>, vector<1x157xbf16>
    tpu.vector_store %arg7[%c57, %c0_637], %544 {strides = array<i32>} : memref<81x256xbf16, #tpu.memory_space<vmem>>, vector<1x157xbf16>,
    %c0_638 = arith.constant 0 : index
    %c0_639 = arith.constant 0 : index
    %c0_640 = arith.constant 0 : index
    %546 = vector.load %arg3[%c0_638, %c0_639, %c0_640] : memref<1x1x256xbf16, #tpu.memory_space<vmem>>, vector<1x1x99xbf16>
    %547 = vector.shape_cast %546 : vector<1x1x99xbf16> to vector<1x99xbf16>
    %c3_641 = arith.constant 3 : index
    %c157 = arith.constant 157 : index
    %548 = vector.load %arg5[%c3_641, %c157] : memref<9x256xbf16, #tpu.memory_space<vmem>>, vector<1x99xbf16>
    %549 = arith.mulf %547, %548 : vector<1x99xbf16>
    %c57_642 = arith.constant 57 : index
    %c157_643 = arith.constant 157 : index
    %550 = vector.load %arg7[%c57_642, %c157_643] : memref<81x256xbf16, #tpu.memory_space<vmem>>, vector<1x99xbf16>
    tpu.vector_store %arg7[%c57_642, %c157_643], %549 {strides = array<i32>} : memref<81x256xbf16, #tpu.memory_space<vmem>>, vector<1x99xbf16>,
    %c0_644 = arith.constant 0 : index
    %c0_645 = arith.constant 0 : index
    %c100 = arith.constant 100 : index
    %551 = vector.load %arg2[%c0_644, %c0_645, %c100] : memref<1x1x256xbf16, #tpu.memory_space<vmem>>, vector<1x1x156xbf16>
    %552 = vector.shape_cast %551 : vector<1x1x156xbf16> to vector<1x156xbf16>
    %c58 = arith.constant 58 : index
    %c0_646 = arith.constant 0 : index
    %553 = vector.load %arg7[%c58, %c0_646] : memref<81x256xbf16, #tpu.memory_space<vmem>>, vector<1x156xbf16>
    tpu.vector_store %arg7[%c58, %c0_646], %552 {strides = array<i32>} : memref<81x256xbf16, #tpu.memory_space<vmem>>, vector<1x156xbf16>,
    %c0_647 = arith.constant 0 : index
    %c0_648 = arith.constant 0 : index
    %c0_649 = arith.constant 0 : index
    %554 = vector.load %arg3[%c0_647, %c0_648, %c0_649] : memref<1x1x256xbf16, #tpu.memory_space<vmem>>, vector<1x1x100xbf16>
    %555 = vector.shape_cast %554 : vector<1x1x100xbf16> to vector<1x100xbf16>
    %c58_650 = arith.constant 58 : index
    %c156 = arith.constant 156 : index
    %556 = vector.load %arg7[%c58_650, %c156] : memref<81x256xbf16, #tpu.memory_space<vmem>>, vector<1x100xbf16>
    tpu.vector_store %arg7[%c58_650, %c156], %555 {strides = array<i32>} : memref<81x256xbf16, #tpu.memory_space<vmem>>, vector<1x100xbf16>,
    %c0_651 = arith.constant 0 : index
    %c0_652 = arith.constant 0 : index
    %c101 = arith.constant 101 : index
    %557 = vector.load %arg2[%c0_651, %c0_652, %c101] : memref<1x1x256xbf16, #tpu.memory_space<vmem>>, vector<1x1x155xbf16>
    %558 = vector.shape_cast %557 : vector<1x1x155xbf16> to vector<1x155xbf16>
    %c5_653 = arith.constant 5 : index
    %c0_654 = arith.constant 0 : index
    %559 = vector.load %arg5[%c5_653, %c0_654] : memref<9x256xbf16, #tpu.memory_space<vmem>>, vector<1x155xbf16>
    %560 = arith.mulf %558, %559 : vector<1x155xbf16>
    %c59 = arith.constant 59 : index
    %c0_655 = arith.constant 0 : index
    %561 = vector.load %arg7[%c59, %c0_655] : memref<81x256xbf16, #tpu.memory_space<vmem>>, vector<1x155xbf16>
    tpu.vector_store %arg7[%c59, %c0_655], %560 {strides = array<i32>} : memref<81x256xbf16, #tpu.memory_space<vmem>>, vector<1x155xbf16>,
    %c0_656 = arith.constant 0 : index
    %c0_657 = arith.constant 0 : index
    %c0_658 = arith.constant 0 : index
    %562 = vector.load %arg3[%c0_656, %c0_657, %c0_658] : memref<1x1x256xbf16, #tpu.memory_space<vmem>>, vector<1x1x101xbf16>
    %563 = vector.shape_cast %562 : vector<1x1x101xbf16> to vector<1x101xbf16>
    %c5_659 = arith.constant 5 : index
    %c155 = arith.constant 155 : index
    %564 = vector.load %arg5[%c5_659, %c155] : memref<9x256xbf16, #tpu.memory_space<vmem>>, vector<1x101xbf16>
    %565 = arith.mulf %563, %564 : vector<1x101xbf16>
    %c59_660 = arith.constant 59 : index
    %c155_661 = arith.constant 155 : index
    %566 = vector.load %arg7[%c59_660, %c155_661] : memref<81x256xbf16, #tpu.memory_space<vmem>>, vector<1x101xbf16>
    tpu.vector_store %arg7[%c59_660, %c155_661], %565 {strides = array<i32>} : memref<81x256xbf16, #tpu.memory_space<vmem>>, vector<1x101xbf16>,
    %c0_662 = arith.constant 0 : index
    %c0_663 = arith.constant 0 : index
    %c102 = arith.constant 102 : index
    %567 = vector.load %arg2[%c0_662, %c0_663, %c102] : memref<1x1x256xbf16, #tpu.memory_space<vmem>>, vector<1x1x154xbf16>
    %568 = vector.shape_cast %567 : vector<1x1x154xbf16> to vector<1x154xbf16>
    %c6_664 = arith.constant 6 : index
    %c0_665 = arith.constant 0 : index
    %569 = vector.load %arg5[%c6_664, %c0_665] : memref<9x256xbf16, #tpu.memory_space<vmem>>, vector<1x154xbf16>
    %570 = arith.mulf %568, %569 : vector<1x154xbf16>
    %c60 = arith.constant 60 : index
    %c0_666 = arith.constant 0 : index
    %571 = vector.load %arg7[%c60, %c0_666] : memref<81x256xbf16, #tpu.memory_space<vmem>>, vector<1x154xbf16>
    tpu.vector_store %arg7[%c60, %c0_666], %570 {strides = array<i32>} : memref<81x256xbf16, #tpu.memory_space<vmem>>, vector<1x154xbf16>,
    %c0_667 = arith.constant 0 : index
    %c0_668 = arith.constant 0 : index
    %c0_669 = arith.constant 0 : index
    %572 = vector.load %arg3[%c0_667, %c0_668, %c0_669] : memref<1x1x256xbf16, #tpu.memory_space<vmem>>, vector<1x1x102xbf16>
    %573 = vector.shape_cast %572 : vector<1x1x102xbf16> to vector<1x102xbf16>
    %c6_670 = arith.constant 6 : index
    %c154 = arith.constant 154 : index
    %574 = vector.load %arg5[%c6_670, %c154] : memref<9x256xbf16, #tpu.memory_space<vmem>>, vector<1x102xbf16>
    %575 = arith.mulf %573, %574 : vector<1x102xbf16>
    %c60_671 = arith.constant 60 : index
    %c154_672 = arith.constant 154 : index
    %576 = vector.load %arg7[%c60_671, %c154_672] : memref<81x256xbf16, #tpu.memory_space<vmem>>, vector<1x102xbf16>
    tpu.vector_store %arg7[%c60_671, %c154_672], %575 {strides = array<i32>} : memref<81x256xbf16, #tpu.memory_space<vmem>>, vector<1x102xbf16>,
    %c0_673 = arith.constant 0 : index
    %c0_674 = arith.constant 0 : index
    %c103 = arith.constant 103 : index
    %577 = vector.load %arg2[%c0_673, %c0_674, %c103] : memref<1x1x256xbf16, #tpu.memory_space<vmem>>, vector<1x1x153xbf16>
    %578 = vector.shape_cast %577 : vector<1x1x153xbf16> to vector<1x153xbf16>
    %c7_675 = arith.constant 7 : index
    %c0_676 = arith.constant 0 : index
    %579 = vector.load %arg5[%c7_675, %c0_676] : memref<9x256xbf16, #tpu.memory_space<vmem>>, vector<1x153xbf16>
    %580 = arith.mulf %578, %579 : vector<1x153xbf16>
    %c61 = arith.constant 61 : index
    %c0_677 = arith.constant 0 : index
    %581 = vector.load %arg7[%c61, %c0_677] : memref<81x256xbf16, #tpu.memory_space<vmem>>, vector<1x153xbf16>
    tpu.vector_store %arg7[%c61, %c0_677], %580 {strides = array<i32>} : memref<81x256xbf16, #tpu.memory_space<vmem>>, vector<1x153xbf16>,
    %c0_678 = arith.constant 0 : index
    %c0_679 = arith.constant 0 : index
    %c0_680 = arith.constant 0 : index
    %582 = vector.load %arg3[%c0_678, %c0_679, %c0_680] : memref<1x1x256xbf16, #tpu.memory_space<vmem>>, vector<1x1x103xbf16>
    %583 = vector.shape_cast %582 : vector<1x1x103xbf16> to vector<1x103xbf16>
    %c7_681 = arith.constant 7 : index
    %c153 = arith.constant 153 : index
    %584 = vector.load %arg5[%c7_681, %c153] : memref<9x256xbf16, #tpu.memory_space<vmem>>, vector<1x103xbf16>
    %585 = arith.mulf %583, %584 : vector<1x103xbf16>
    %c61_682 = arith.constant 61 : index
    %c153_683 = arith.constant 153 : index
    %586 = vector.load %arg7[%c61_682, %c153_683] : memref<81x256xbf16, #tpu.memory_space<vmem>>, vector<1x103xbf16>
    tpu.vector_store %arg7[%c61_682, %c153_683], %585 {strides = array<i32>} : memref<81x256xbf16, #tpu.memory_space<vmem>>, vector<1x103xbf16>,
    %c0_684 = arith.constant 0 : index
    %c0_685 = arith.constant 0 : index
    %c104 = arith.constant 104 : index
    %587 = vector.load %arg2[%c0_684, %c0_685, %c104] : memref<1x1x256xbf16, #tpu.memory_space<vmem>>, vector<1x1x152xbf16>
    %588 = vector.shape_cast %587 : vector<1x1x152xbf16> to vector<1x152xbf16>
    %c8_686 = arith.constant 8 : index
    %c0_687 = arith.constant 0 : index
    %589 = vector.load %arg5[%c8_686, %c0_687] : memref<9x256xbf16, #tpu.memory_space<vmem>>, vector<1x152xbf16>
    %590 = arith.mulf %588, %589 : vector<1x152xbf16>
    %c62 = arith.constant 62 : index
    %c0_688 = arith.constant 0 : index
    %591 = vector.load %arg7[%c62, %c0_688] : memref<81x256xbf16, #tpu.memory_space<vmem>>, vector<1x152xbf16>
    tpu.vector_store %arg7[%c62, %c0_688], %590 {strides = array<i32>} : memref<81x256xbf16, #tpu.memory_space<vmem>>, vector<1x152xbf16>,
    %c0_689 = arith.constant 0 : index
    %c0_690 = arith.constant 0 : index
    %c0_691 = arith.constant 0 : index
    %592 = vector.load %arg3[%c0_689, %c0_690, %c0_691] : memref<1x1x256xbf16, #tpu.memory_space<vmem>>, vector<1x1x104xbf16>
    %593 = vector.shape_cast %592 : vector<1x1x104xbf16> to vector<1x104xbf16>
    %c8_692 = arith.constant 8 : index
    %c152 = arith.constant 152 : index
    %594 = vector.load %arg5[%c8_692, %c152] : memref<9x256xbf16, #tpu.memory_space<vmem>>, vector<1x104xbf16>
    %595 = arith.mulf %593, %594 : vector<1x104xbf16>
    %c62_693 = arith.constant 62 : index
    %c152_694 = arith.constant 152 : index
    %596 = vector.load %arg7[%c62_693, %c152_694] : memref<81x256xbf16, #tpu.memory_space<vmem>>, vector<1x104xbf16>
    tpu.vector_store %arg7[%c62_693, %c152_694], %595 {strides = array<i32>} : memref<81x256xbf16, #tpu.memory_space<vmem>>, vector<1x104xbf16>,
    %c0_695 = arith.constant 0 : index
    %c0_696 = arith.constant 0 : index
    %c112 = arith.constant 112 : index
    %597 = vector.load %arg2[%c0_695, %c0_696, %c112] : memref<1x1x256xbf16, #tpu.memory_space<vmem>>, vector<1x1x144xbf16>
    %598 = vector.shape_cast %597 : vector<1x1x144xbf16> to vector<1x144xbf16>
    %c0_697 = arith.constant 0 : index
    %c0_698 = arith.constant 0 : index
    %599 = vector.load %arg5[%c0_697, %c0_698] : memref<9x256xbf16, #tpu.memory_space<vmem>>, vector<1x144xbf16>
    %600 = arith.mulf %598, %599 : vector<1x144xbf16>
    %c63 = arith.constant 63 : index
    %c0_699 = arith.constant 0 : index
    %601 = vector.load %arg7[%c63, %c0_699] : memref<81x256xbf16, #tpu.memory_space<vmem>>, vector<1x144xbf16>
    tpu.vector_store %arg7[%c63, %c0_699], %600 {strides = array<i32>} : memref<81x256xbf16, #tpu.memory_space<vmem>>, vector<1x144xbf16>,
    %c0_700 = arith.constant 0 : index
    %c0_701 = arith.constant 0 : index
    %c0_702 = arith.constant 0 : index
    %602 = vector.load %arg3[%c0_700, %c0_701, %c0_702] : memref<1x1x256xbf16, #tpu.memory_space<vmem>>, vector<1x1x112xbf16>
    %603 = vector.shape_cast %602 : vector<1x1x112xbf16> to vector<1x112xbf16>
    %c0_703 = arith.constant 0 : index
    %c144 = arith.constant 144 : index
    %604 = vector.load %arg5[%c0_703, %c144] : memref<9x256xbf16, #tpu.memory_space<vmem>>, vector<1x112xbf16>
    %605 = arith.mulf %603, %604 : vector<1x112xbf16>
    %c63_704 = arith.constant 63 : index
    %c144_705 = arith.constant 144 : index
    %606 = vector.load %arg7[%c63_704, %c144_705] : memref<81x256xbf16, #tpu.memory_space<vmem>>, vector<1x112xbf16>
    tpu.vector_store %arg7[%c63_704, %c144_705], %605 {strides = array<i32>} : memref<81x256xbf16, #tpu.memory_space<vmem>>, vector<1x112xbf16>,
    %c0_706 = arith.constant 0 : index
    %c0_707 = arith.constant 0 : index
    %c113 = arith.constant 113 : index
    %607 = vector.load %arg2[%c0_706, %c0_707, %c113] : memref<1x1x256xbf16, #tpu.memory_space<vmem>>, vector<1x1x143xbf16>
    %608 = vector.shape_cast %607 : vector<1x1x143xbf16> to vector<1x143xbf16>
    %c1_708 = arith.constant 1 : index
    %c0_709 = arith.constant 0 : index
    %609 = vector.load %arg5[%c1_708, %c0_709] : memref<9x256xbf16, #tpu.memory_space<vmem>>, vector<1x143xbf16>
    %610 = arith.mulf %608, %609 : vector<1x143xbf16>
    %c64_710 = arith.constant 64 : index
    %c0_711 = arith.constant 0 : index
    %611 = vector.load %arg7[%c64_710, %c0_711] : memref<81x256xbf16, #tpu.memory_space<vmem>>, vector<1x143xbf16>
    tpu.vector_store %arg7[%c64_710, %c0_711], %610 {strides = array<i32>} : memref<81x256xbf16, #tpu.memory_space<vmem>>, vector<1x143xbf16>,
    %c0_712 = arith.constant 0 : index
    %c0_713 = arith.constant 0 : index
    %c0_714 = arith.constant 0 : index
    %612 = vector.load %arg3[%c0_712, %c0_713, %c0_714] : memref<1x1x256xbf16, #tpu.memory_space<vmem>>, vector<1x1x113xbf16>
    %613 = vector.shape_cast %612 : vector<1x1x113xbf16> to vector<1x113xbf16>
    %c1_715 = arith.constant 1 : index
    %c143 = arith.constant 143 : index
    %614 = vector.load %arg5[%c1_715, %c143] : memref<9x256xbf16, #tpu.memory_space<vmem>>, vector<1x113xbf16>
    %615 = arith.mulf %613, %614 : vector<1x113xbf16>
    %c64_716 = arith.constant 64 : index
    %c143_717 = arith.constant 143 : index
    %616 = vector.load %arg7[%c64_716, %c143_717] : memref<81x256xbf16, #tpu.memory_space<vmem>>, vector<1x113xbf16>
    tpu.vector_store %arg7[%c64_716, %c143_717], %615 {strides = array<i32>} : memref<81x256xbf16, #tpu.memory_space<vmem>>, vector<1x113xbf16>,
    %c0_718 = arith.constant 0 : index
    %c0_719 = arith.constant 0 : index
    %c114 = arith.constant 114 : index
    %617 = vector.load %arg2[%c0_718, %c0_719, %c114] : memref<1x1x256xbf16, #tpu.memory_space<vmem>>, vector<1x1x142xbf16>
    %618 = vector.shape_cast %617 : vector<1x1x142xbf16> to vector<1x142xbf16>
    %c2_720 = arith.constant 2 : index
    %c0_721 = arith.constant 0 : index
    %619 = vector.load %arg5[%c2_720, %c0_721] : memref<9x256xbf16, #tpu.memory_space<vmem>>, vector<1x142xbf16>
    %620 = arith.mulf %618, %619 : vector<1x142xbf16>
    %c65_722 = arith.constant 65 : index
    %c0_723 = arith.constant 0 : index
    %621 = vector.load %arg7[%c65_722, %c0_723] : memref<81x256xbf16, #tpu.memory_space<vmem>>, vector<1x142xbf16>
    tpu.vector_store %arg7[%c65_722, %c0_723], %620 {strides = array<i32>} : memref<81x256xbf16, #tpu.memory_space<vmem>>, vector<1x142xbf16>,
    %c0_724 = arith.constant 0 : index
    %c0_725 = arith.constant 0 : index
    %c0_726 = arith.constant 0 : index
    %622 = vector.load %arg3[%c0_724, %c0_725, %c0_726] : memref<1x1x256xbf16, #tpu.memory_space<vmem>>, vector<1x1x114xbf16>
    %623 = vector.shape_cast %622 : vector<1x1x114xbf16> to vector<1x114xbf16>
    %c2_727 = arith.constant 2 : index
    %c142 = arith.constant 142 : index
    %624 = vector.load %arg5[%c2_727, %c142] : memref<9x256xbf16, #tpu.memory_space<vmem>>, vector<1x114xbf16>
    %625 = arith.mulf %623, %624 : vector<1x114xbf16>
    %c65_728 = arith.constant 65 : index
    %c142_729 = arith.constant 142 : index
    %626 = vector.load %arg7[%c65_728, %c142_729] : memref<81x256xbf16, #tpu.memory_space<vmem>>, vector<1x114xbf16>
    tpu.vector_store %arg7[%c65_728, %c142_729], %625 {strides = array<i32>} : memref<81x256xbf16, #tpu.memory_space<vmem>>, vector<1x114xbf16>,
    %c0_730 = arith.constant 0 : index
    %c0_731 = arith.constant 0 : index
    %c115 = arith.constant 115 : index
    %627 = vector.load %arg2[%c0_730, %c0_731, %c115] : memref<1x1x256xbf16, #tpu.memory_space<vmem>>, vector<1x1x141xbf16>
    %628 = vector.shape_cast %627 : vector<1x1x141xbf16> to vector<1x141xbf16>
    %c3_732 = arith.constant 3 : index
    %c0_733 = arith.constant 0 : index
    %629 = vector.load %arg5[%c3_732, %c0_733] : memref<9x256xbf16, #tpu.memory_space<vmem>>, vector<1x141xbf16>
    %630 = arith.mulf %628, %629 : vector<1x141xbf16>
    %c66_734 = arith.constant 66 : index
    %c0_735 = arith.constant 0 : index
    %631 = vector.load %arg7[%c66_734, %c0_735] : memref<81x256xbf16, #tpu.memory_space<vmem>>, vector<1x141xbf16>
    tpu.vector_store %arg7[%c66_734, %c0_735], %630 {strides = array<i32>} : memref<81x256xbf16, #tpu.memory_space<vmem>>, vector<1x141xbf16>,
    %c0_736 = arith.constant 0 : index
    %c0_737 = arith.constant 0 : index
    %c0_738 = arith.constant 0 : index
    %632 = vector.load %arg3[%c0_736, %c0_737, %c0_738] : memref<1x1x256xbf16, #tpu.memory_space<vmem>>, vector<1x1x115xbf16>
    %633 = vector.shape_cast %632 : vector<1x1x115xbf16> to vector<1x115xbf16>
    %c3_739 = arith.constant 3 : index
    %c141 = arith.constant 141 : index
    %634 = vector.load %arg5[%c3_739, %c141] : memref<9x256xbf16, #tpu.memory_space<vmem>>, vector<1x115xbf16>
    %635 = arith.mulf %633, %634 : vector<1x115xbf16>
    %c66_740 = arith.constant 66 : index
    %c141_741 = arith.constant 141 : index
    %636 = vector.load %arg7[%c66_740, %c141_741] : memref<81x256xbf16, #tpu.memory_space<vmem>>, vector<1x115xbf16>
    tpu.vector_store %arg7[%c66_740, %c141_741], %635 {strides = array<i32>} : memref<81x256xbf16, #tpu.memory_space<vmem>>, vector<1x115xbf16>,
    %c0_742 = arith.constant 0 : index
    %c0_743 = arith.constant 0 : index
    %c116 = arith.constant 116 : index
    %637 = vector.load %arg2[%c0_742, %c0_743, %c116] : memref<1x1x256xbf16, #tpu.memory_space<vmem>>, vector<1x1x140xbf16>
    %638 = vector.shape_cast %637 : vector<1x1x140xbf16> to vector<1x140xbf16>
    %c67_744 = arith.constant 67 : index
    %c0_745 = arith.constant 0 : index
    %639 = vector.load %arg7[%c67_744, %c0_745] : memref<81x256xbf16, #tpu.memory_space<vmem>>, vector<1x140xbf16>
    tpu.vector_store %arg7[%c67_744, %c0_745], %638 {strides = array<i32>} : memref<81x256xbf16, #tpu.memory_space<vmem>>, vector<1x140xbf16>,
    %c0_746 = arith.constant 0 : index
    %c0_747 = arith.constant 0 : index
    %c0_748 = arith.constant 0 : index
    %640 = vector.load %arg3[%c0_746, %c0_747, %c0_748] : memref<1x1x256xbf16, #tpu.memory_space<vmem>>, vector<1x1x116xbf16>
    %641 = vector.shape_cast %640 : vector<1x1x116xbf16> to vector<1x116xbf16>
    %c67_749 = arith.constant 67 : index
    %c140 = arith.constant 140 : index
    %642 = vector.load %arg7[%c67_749, %c140] : memref<81x256xbf16, #tpu.memory_space<vmem>>, vector<1x116xbf16>
    tpu.vector_store %arg7[%c67_749, %c140], %641 {strides = array<i32>} : memref<81x256xbf16, #tpu.memory_space<vmem>>, vector<1x116xbf16>,
    %c0_750 = arith.constant 0 : index
    %c0_751 = arith.constant 0 : index
    %c117 = arith.constant 117 : index
    %643 = vector.load %arg2[%c0_750, %c0_751, %c117] : memref<1x1x256xbf16, #tpu.memory_space<vmem>>, vector<1x1x139xbf16>
    %644 = vector.shape_cast %643 : vector<1x1x139xbf16> to vector<1x139xbf16>
    %c5_752 = arith.constant 5 : index
    %c0_753 = arith.constant 0 : index
    %645 = vector.load %arg5[%c5_752, %c0_753] : memref<9x256xbf16, #tpu.memory_space<vmem>>, vector<1x139xbf16>
    %646 = arith.mulf %644, %645 : vector<1x139xbf16>
    %c68_754 = arith.constant 68 : index
    %c0_755 = arith.constant 0 : index
    %647 = vector.load %arg7[%c68_754, %c0_755] : memref<81x256xbf16, #tpu.memory_space<vmem>>, vector<1x139xbf16>
    tpu.vector_store %arg7[%c68_754, %c0_755], %646 {strides = array<i32>} : memref<81x256xbf16, #tpu.memory_space<vmem>>, vector<1x139xbf16>,
    %c0_756 = arith.constant 0 : index
    %c0_757 = arith.constant 0 : index
    %c0_758 = arith.constant 0 : index
    %648 = vector.load %arg3[%c0_756, %c0_757, %c0_758] : memref<1x1x256xbf16, #tpu.memory_space<vmem>>, vector<1x1x117xbf16>
    %649 = vector.shape_cast %648 : vector<1x1x117xbf16> to vector<1x117xbf16>
    %c5_759 = arith.constant 5 : index
    %c139 = arith.constant 139 : index
    %650 = vector.load %arg5[%c5_759, %c139] : memref<9x256xbf16, #tpu.memory_space<vmem>>, vector<1x117xbf16>
    %651 = arith.mulf %649, %650 : vector<1x117xbf16>
    %c68_760 = arith.constant 68 : index
    %c139_761 = arith.constant 139 : index
    %652 = vector.load %arg7[%c68_760, %c139_761] : memref<81x256xbf16, #tpu.memory_space<vmem>>, vector<1x117xbf16>
    tpu.vector_store %arg7[%c68_760, %c139_761], %651 {strides = array<i32>} : memref<81x256xbf16, #tpu.memory_space<vmem>>, vector<1x117xbf16>,
    %c0_762 = arith.constant 0 : index
    %c0_763 = arith.constant 0 : index
    %c118 = arith.constant 118 : index
    %653 = vector.load %arg2[%c0_762, %c0_763, %c118] : memref<1x1x256xbf16, #tpu.memory_space<vmem>>, vector<1x1x138xbf16>
    %654 = vector.shape_cast %653 : vector<1x1x138xbf16> to vector<1x138xbf16>
    %c6_764 = arith.constant 6 : index
    %c0_765 = arith.constant 0 : index
    %655 = vector.load %arg5[%c6_764, %c0_765] : memref<9x256xbf16, #tpu.memory_space<vmem>>, vector<1x138xbf16>
    %656 = arith.mulf %654, %655 : vector<1x138xbf16>
    %c69_766 = arith.constant 69 : index
    %c0_767 = arith.constant 0 : index
    %657 = vector.load %arg7[%c69_766, %c0_767] : memref<81x256xbf16, #tpu.memory_space<vmem>>, vector<1x138xbf16>
    tpu.vector_store %arg7[%c69_766, %c0_767], %656 {strides = array<i32>} : memref<81x256xbf16, #tpu.memory_space<vmem>>, vector<1x138xbf16>,
    %c0_768 = arith.constant 0 : index
    %c0_769 = arith.constant 0 : index
    %c0_770 = arith.constant 0 : index
    %658 = vector.load %arg3[%c0_768, %c0_769, %c0_770] : memref<1x1x256xbf16, #tpu.memory_space<vmem>>, vector<1x1x118xbf16>
    %659 = vector.shape_cast %658 : vector<1x1x118xbf16> to vector<1x118xbf16>
    %c6_771 = arith.constant 6 : index
    %c138 = arith.constant 138 : index
    %660 = vector.load %arg5[%c6_771, %c138] : memref<9x256xbf16, #tpu.memory_space<vmem>>, vector<1x118xbf16>
    %661 = arith.mulf %659, %660 : vector<1x118xbf16>
    %c69_772 = arith.constant 69 : index
    %c138_773 = arith.constant 138 : index
    %662 = vector.load %arg7[%c69_772, %c138_773] : memref<81x256xbf16, #tpu.memory_space<vmem>>, vector<1x118xbf16>
    tpu.vector_store %arg7[%c69_772, %c138_773], %661 {strides = array<i32>} : memref<81x256xbf16, #tpu.memory_space<vmem>>, vector<1x118xbf16>,
    %c0_774 = arith.constant 0 : index
    %c0_775 = arith.constant 0 : index
    %c119 = arith.constant 119 : index
    %663 = vector.load %arg2[%c0_774, %c0_775, %c119] : memref<1x1x256xbf16, #tpu.memory_space<vmem>>, vector<1x1x137xbf16>
    %664 = vector.shape_cast %663 : vector<1x1x137xbf16> to vector<1x137xbf16>
    %c7_776 = arith.constant 7 : index
    %c0_777 = arith.constant 0 : index
    %665 = vector.load %arg5[%c7_776, %c0_777] : memref<9x256xbf16, #tpu.memory_space<vmem>>, vector<1x137xbf16>
    %666 = arith.mulf %664, %665 : vector<1x137xbf16>
    %c70_778 = arith.constant 70 : index
    %c0_779 = arith.constant 0 : index
    %667 = vector.load %arg7[%c70_778, %c0_779] : memref<81x256xbf16, #tpu.memory_space<vmem>>, vector<1x137xbf16>
    tpu.vector_store %arg7[%c70_778, %c0_779], %666 {strides = array<i32>} : memref<81x256xbf16, #tpu.memory_space<vmem>>, vector<1x137xbf16>,
    %c0_780 = arith.constant 0 : index
    %c0_781 = arith.constant 0 : index
    %c0_782 = arith.constant 0 : index
    %668 = vector.load %arg3[%c0_780, %c0_781, %c0_782] : memref<1x1x256xbf16, #tpu.memory_space<vmem>>, vector<1x1x119xbf16>
    %669 = vector.shape_cast %668 : vector<1x1x119xbf16> to vector<1x119xbf16>
    %c7_783 = arith.constant 7 : index
    %c137 = arith.constant 137 : index
    %670 = vector.load %arg5[%c7_783, %c137] : memref<9x256xbf16, #tpu.memory_space<vmem>>, vector<1x119xbf16>
    %671 = arith.mulf %669, %670 : vector<1x119xbf16>
    %c70_784 = arith.constant 70 : index
    %c137_785 = arith.constant 137 : index
    %672 = vector.load %arg7[%c70_784, %c137_785] : memref<81x256xbf16, #tpu.memory_space<vmem>>, vector<1x119xbf16>
    tpu.vector_store %arg7[%c70_784, %c137_785], %671 {strides = array<i32>} : memref<81x256xbf16, #tpu.memory_space<vmem>>, vector<1x119xbf16>,
    %c0_786 = arith.constant 0 : index
    %c0_787 = arith.constant 0 : index
    %c120 = arith.constant 120 : index
    %673 = vector.load %arg2[%c0_786, %c0_787, %c120] : memref<1x1x256xbf16, #tpu.memory_space<vmem>>, vector<1x1x136xbf16>
    %674 = vector.shape_cast %673 : vector<1x1x136xbf16> to vector<1x136xbf16>
    %c8_788 = arith.constant 8 : index
    %c0_789 = arith.constant 0 : index
    %675 = vector.load %arg5[%c8_788, %c0_789] : memref<9x256xbf16, #tpu.memory_space<vmem>>, vector<1x136xbf16>
    %676 = arith.mulf %674, %675 : vector<1x136xbf16>
    %c71_790 = arith.constant 71 : index
    %c0_791 = arith.constant 0 : index
    %677 = vector.load %arg7[%c71_790, %c0_791] : memref<81x256xbf16, #tpu.memory_space<vmem>>, vector<1x136xbf16>
    tpu.vector_store %arg7[%c71_790, %c0_791], %676 {strides = array<i32>} : memref<81x256xbf16, #tpu.memory_space<vmem>>, vector<1x136xbf16>,
    %c0_792 = arith.constant 0 : index
    %c0_793 = arith.constant 0 : index
    %c0_794 = arith.constant 0 : index
    %678 = vector.load %arg3[%c0_792, %c0_793, %c0_794] : memref<1x1x256xbf16, #tpu.memory_space<vmem>>, vector<1x1x120xbf16>
    %679 = vector.shape_cast %678 : vector<1x1x120xbf16> to vector<1x120xbf16>
    %c8_795 = arith.constant 8 : index
    %c136 = arith.constant 136 : index
    %680 = vector.load %arg5[%c8_795, %c136] : memref<9x256xbf16, #tpu.memory_space<vmem>>, vector<1x120xbf16>
    %681 = arith.mulf %679, %680 : vector<1x120xbf16>
    %c71_796 = arith.constant 71 : index
    %c136_797 = arith.constant 136 : index
    %682 = vector.load %arg7[%c71_796, %c136_797] : memref<81x256xbf16, #tpu.memory_space<vmem>>, vector<1x120xbf16>
    tpu.vector_store %arg7[%c71_796, %c136_797], %681 {strides = array<i32>} : memref<81x256xbf16, #tpu.memory_space<vmem>>, vector<1x120xbf16>,
    %c0_798 = arith.constant 0 : index
    %c0_799 = arith.constant 0 : index
    %c128 = arith.constant 128 : index
    %683 = vector.load %arg2[%c0_798, %c0_799, %c128] : memref<1x1x256xbf16, #tpu.memory_space<vmem>>, vector<1x1x128xbf16>
    %684 = vector.shape_cast %683 : vector<1x1x128xbf16> to vector<1x128xbf16>
    %c0_800 = arith.constant 0 : index
    %c0_801 = arith.constant 0 : index
    %685 = vector.load %arg5[%c0_800, %c0_801] : memref<9x256xbf16, #tpu.memory_space<vmem>>, vector<1x128xbf16>
    %686 = arith.mulf %684, %685 : vector<1x128xbf16>
    %c72_802 = arith.constant 72 : index
    %c0_803 = arith.constant 0 : index
    %687 = vector.load %arg7[%c72_802, %c0_803] : memref<81x256xbf16, #tpu.memory_space<vmem>>, vector<1x128xbf16>
    tpu.vector_store %arg7[%c72_802, %c0_803], %686 {strides = array<i32>} : memref<81x256xbf16, #tpu.memory_space<vmem>>, vector<1x128xbf16>,
    %c0_804 = arith.constant 0 : index
    %c0_805 = arith.constant 0 : index
    %c0_806 = arith.constant 0 : index
    %688 = vector.load %arg3[%c0_804, %c0_805, %c0_806] : memref<1x1x256xbf16, #tpu.memory_space<vmem>>, vector<1x1x128xbf16>
    %689 = vector.shape_cast %688 : vector<1x1x128xbf16> to vector<1x128xbf16>
    %c0_807 = arith.constant 0 : index
    %c128_808 = arith.constant 128 : index
    %690 = vector.load %arg5[%c0_807, %c128_808] : memref<9x256xbf16, #tpu.memory_space<vmem>>, vector<1x128xbf16>
    %691 = arith.mulf %689, %690 : vector<1x128xbf16>
    %c72_809 = arith.constant 72 : index
    %c128_810 = arith.constant 128 : index
    %692 = vector.load %arg7[%c72_809, %c128_810] : memref<81x256xbf16, #tpu.memory_space<vmem>>, vector<1x128xbf16>
    tpu.vector_store %arg7[%c72_809, %c128_810], %691 {strides = array<i32>} : memref<81x256xbf16, #tpu.memory_space<vmem>>, vector<1x128xbf16>,
    %c0_811 = arith.constant 0 : index
    %c0_812 = arith.constant 0 : index
    %c129 = arith.constant 129 : index
    %693 = vector.load %arg2[%c0_811, %c0_812, %c129] : memref<1x1x256xbf16, #tpu.memory_space<vmem>>, vector<1x1x127xbf16>
    %694 = vector.shape_cast %693 : vector<1x1x127xbf16> to vector<1x127xbf16>
    %c1_813 = arith.constant 1 : index
    %c0_814 = arith.constant 0 : index
    %695 = vector.load %arg5[%c1_813, %c0_814] : memref<9x256xbf16, #tpu.memory_space<vmem>>, vector<1x127xbf16>
    %696 = arith.mulf %694, %695 : vector<1x127xbf16>
    %c73 = arith.constant 73 : index
    %c0_815 = arith.constant 0 : index
    %697 = vector.load %arg7[%c73, %c0_815] : memref<81x256xbf16, #tpu.memory_space<vmem>>, vector<1x127xbf16>
    tpu.vector_store %arg7[%c73, %c0_815], %696 {strides = array<i32>} : memref<81x256xbf16, #tpu.memory_space<vmem>>, vector<1x127xbf16>,
    %c0_816 = arith.constant 0 : index
    %c0_817 = arith.constant 0 : index
    %c0_818 = arith.constant 0 : index
    %698 = vector.load %arg3[%c0_816, %c0_817, %c0_818] : memref<1x1x256xbf16, #tpu.memory_space<vmem>>, vector<1x1x129xbf16>
    %699 = vector.shape_cast %698 : vector<1x1x129xbf16> to vector<1x129xbf16>
    %c1_819 = arith.constant 1 : index
    %c127 = arith.constant 127 : index
    %700 = vector.load %arg5[%c1_819, %c127] : memref<9x256xbf16, #tpu.memory_space<vmem>>, vector<1x129xbf16>
    %701 = arith.mulf %699, %700 : vector<1x129xbf16>
    %c73_820 = arith.constant 73 : index
    %c127_821 = arith.constant 127 : index
    %702 = vector.load %arg7[%c73_820, %c127_821] : memref<81x256xbf16, #tpu.memory_space<vmem>>, vector<1x129xbf16>
    tpu.vector_store %arg7[%c73_820, %c127_821], %701 {strides = array<i32>} : memref<81x256xbf16, #tpu.memory_space<vmem>>, vector<1x129xbf16>,
    %c0_822 = arith.constant 0 : index
    %c0_823 = arith.constant 0 : index
    %c130 = arith.constant 130 : index
    %703 = vector.load %arg2[%c0_822, %c0_823, %c130] : memref<1x1x256xbf16, #tpu.memory_space<vmem>>, vector<1x1x126xbf16>
    %704 = vector.shape_cast %703 : vector<1x1x126xbf16> to vector<1x126xbf16>
    %c2_824 = arith.constant 2 : index
    %c0_825 = arith.constant 0 : index
    %705 = vector.load %arg5[%c2_824, %c0_825] : memref<9x256xbf16, #tpu.memory_space<vmem>>, vector<1x126xbf16>
    %706 = arith.mulf %704, %705 : vector<1x126xbf16>
    %c74 = arith.constant 74 : index
    %c0_826 = arith.constant 0 : index
    %707 = vector.load %arg7[%c74, %c0_826] : memref<81x256xbf16, #tpu.memory_space<vmem>>, vector<1x126xbf16>
    tpu.vector_store %arg7[%c74, %c0_826], %706 {strides = array<i32>} : memref<81x256xbf16, #tpu.memory_space<vmem>>, vector<1x126xbf16>,
    %c0_827 = arith.constant 0 : index
    %c0_828 = arith.constant 0 : index
    %c0_829 = arith.constant 0 : index
    %708 = vector.load %arg3[%c0_827, %c0_828, %c0_829] : memref<1x1x256xbf16, #tpu.memory_space<vmem>>, vector<1x1x130xbf16>
    %709 = vector.shape_cast %708 : vector<1x1x130xbf16> to vector<1x130xbf16>
    %c2_830 = arith.constant 2 : index
    %c126 = arith.constant 126 : index
    %710 = vector.load %arg5[%c2_830, %c126] : memref<9x256xbf16, #tpu.memory_space<vmem>>, vector<1x130xbf16>
    %711 = arith.mulf %709, %710 : vector<1x130xbf16>
    %c74_831 = arith.constant 74 : index
    %c126_832 = arith.constant 126 : index
    %712 = vector.load %arg7[%c74_831, %c126_832] : memref<81x256xbf16, #tpu.memory_space<vmem>>, vector<1x130xbf16>
    tpu.vector_store %arg7[%c74_831, %c126_832], %711 {strides = array<i32>} : memref<81x256xbf16, #tpu.memory_space<vmem>>, vector<1x130xbf16>,
    %c0_833 = arith.constant 0 : index
    %c0_834 = arith.constant 0 : index
    %c131 = arith.constant 131 : index
    %713 = vector.load %arg2[%c0_833, %c0_834, %c131] : memref<1x1x256xbf16, #tpu.memory_space<vmem>>, vector<1x1x125xbf16>
    %714 = vector.shape_cast %713 : vector<1x1x125xbf16> to vector<1x125xbf16>
    %c3_835 = arith.constant 3 : index
    %c0_836 = arith.constant 0 : index
    %715 = vector.load %arg5[%c3_835, %c0_836] : memref<9x256xbf16, #tpu.memory_space<vmem>>, vector<1x125xbf16>
    %716 = arith.mulf %714, %715 : vector<1x125xbf16>
    %c75 = arith.constant 75 : index
    %c0_837 = arith.constant 0 : index
    %717 = vector.load %arg7[%c75, %c0_837] : memref<81x256xbf16, #tpu.memory_space<vmem>>, vector<1x125xbf16>
    tpu.vector_store %arg7[%c75, %c0_837], %716 {strides = array<i32>} : memref<81x256xbf16, #tpu.memory_space<vmem>>, vector<1x125xbf16>,
    %c0_838 = arith.constant 0 : index
    %c0_839 = arith.constant 0 : index
    %c0_840 = arith.constant 0 : index
    %718 = vector.load %arg3[%c0_838, %c0_839, %c0_840] : memref<1x1x256xbf16, #tpu.memory_space<vmem>>, vector<1x1x131xbf16>
    %719 = vector.shape_cast %718 : vector<1x1x131xbf16> to vector<1x131xbf16>
    %c3_841 = arith.constant 3 : index
    %c125 = arith.constant 125 : index
    %720 = vector.load %arg5[%c3_841, %c125] : memref<9x256xbf16, #tpu.memory_space<vmem>>, vector<1x131xbf16>
    %721 = arith.mulf %719, %720 : vector<1x131xbf16>
    %c75_842 = arith.constant 75 : index
    %c125_843 = arith.constant 125 : index
    %722 = vector.load %arg7[%c75_842, %c125_843] : memref<81x256xbf16, #tpu.memory_space<vmem>>, vector<1x131xbf16>
    tpu.vector_store %arg7[%c75_842, %c125_843], %721 {strides = array<i32>} : memref<81x256xbf16, #tpu.memory_space<vmem>>, vector<1x131xbf16>,
    %c0_844 = arith.constant 0 : index
    %c0_845 = arith.constant 0 : index
    %c132 = arith.constant 132 : index
    %723 = vector.load %arg2[%c0_844, %c0_845, %c132] : memref<1x1x256xbf16, #tpu.memory_space<vmem>>, vector<1x1x124xbf16>
    %724 = vector.shape_cast %723 : vector<1x1x124xbf16> to vector<1x124xbf16>
    %c76 = arith.constant 76 : index
    %c0_846 = arith.constant 0 : index
    %725 = vector.load %arg7[%c76, %c0_846] : memref<81x256xbf16, #tpu.memory_space<vmem>>, vector<1x124xbf16>
    tpu.vector_store %arg7[%c76, %c0_846], %724 {strides = array<i32>} : memref<81x256xbf16, #tpu.memory_space<vmem>>, vector<1x124xbf16>,
    %c0_847 = arith.constant 0 : index
    %c0_848 = arith.constant 0 : index
    %c0_849 = arith.constant 0 : index
    %726 = vector.load %arg3[%c0_847, %c0_848, %c0_849] : memref<1x1x256xbf16, #tpu.memory_space<vmem>>, vector<1x1x132xbf16>
    %727 = vector.shape_cast %726 : vector<1x1x132xbf16> to vector<1x132xbf16>
    %c76_850 = arith.constant 76 : index
    %c124 = arith.constant 124 : index
    %728 = vector.load %arg7[%c76_850, %c124] : memref<81x256xbf16, #tpu.memory_space<vmem>>, vector<1x132xbf16>
    tpu.vector_store %arg7[%c76_850, %c124], %727 {strides = array<i32>} : memref<81x256xbf16, #tpu.memory_space<vmem>>, vector<1x132xbf16>,
    %c0_851 = arith.constant 0 : index
    %c0_852 = arith.constant 0 : index
    %c133 = arith.constant 133 : index
    %729 = vector.load %arg2[%c0_851, %c0_852, %c133] : memref<1x1x256xbf16, #tpu.memory_space<vmem>>, vector<1x1x123xbf16>
    %730 = vector.shape_cast %729 : vector<1x1x123xbf16> to vector<1x123xbf16>
    %c5_853 = arith.constant 5 : index
    %c0_854 = arith.constant 0 : index
    %731 = vector.load %arg5[%c5_853, %c0_854] : memref<9x256xbf16, #tpu.memory_space<vmem>>, vector<1x123xbf16>
    %732 = arith.mulf %730, %731 : vector<1x123xbf16>
    %c77 = arith.constant 77 : index
    %c0_855 = arith.constant 0 : index
    %733 = vector.load %arg7[%c77, %c0_855] : memref<81x256xbf16, #tpu.memory_space<vmem>>, vector<1x123xbf16>
    tpu.vector_store %arg7[%c77, %c0_855], %732 {strides = array<i32>} : memref<81x256xbf16, #tpu.memory_space<vmem>>, vector<1x123xbf16>,
    %c0_856 = arith.constant 0 : index
    %c0_857 = arith.constant 0 : index
    %c0_858 = arith.constant 0 : index
    %734 = vector.load %arg3[%c0_856, %c0_857, %c0_858] : memref<1x1x256xbf16, #tpu.memory_space<vmem>>, vector<1x1x133xbf16>
    %735 = vector.shape_cast %734 : vector<1x1x133xbf16> to vector<1x133xbf16>
    %c5_859 = arith.constant 5 : index
    %c123 = arith.constant 123 : index
    %736 = vector.load %arg5[%c5_859, %c123] : memref<9x256xbf16, #tpu.memory_space<vmem>>, vector<1x133xbf16>
    %737 = arith.mulf %735, %736 : vector<1x133xbf16>
    %c77_860 = arith.constant 77 : index
    %c123_861 = arith.constant 123 : index
    %738 = vector.load %arg7[%c77_860, %c123_861] : memref<81x256xbf16, #tpu.memory_space<vmem>>, vector<1x133xbf16>
    tpu.vector_store %arg7[%c77_860, %c123_861], %737 {strides = array<i32>} : memref<81x256xbf16, #tpu.memory_space<vmem>>, vector<1x133xbf16>,
    %c0_862 = arith.constant 0 : index
    %c0_863 = arith.constant 0 : index
    %c134 = arith.constant 134 : index
    %739 = vector.load %arg2[%c0_862, %c0_863, %c134] : memref<1x1x256xbf16, #tpu.memory_space<vmem>>, vector<1x1x122xbf16>
    %740 = vector.shape_cast %739 : vector<1x1x122xbf16> to vector<1x122xbf16>
    %c6_864 = arith.constant 6 : index
    %c0_865 = arith.constant 0 : index
    %741 = vector.load %arg5[%c6_864, %c0_865] : memref<9x256xbf16, #tpu.memory_space<vmem>>, vector<1x122xbf16>
    %742 = arith.mulf %740, %741 : vector<1x122xbf16>
    %c78 = arith.constant 78 : index
    %c0_866 = arith.constant 0 : index
    %743 = vector.load %arg7[%c78, %c0_866] : memref<81x256xbf16, #tpu.memory_space<vmem>>, vector<1x122xbf16>
    tpu.vector_store %arg7[%c78, %c0_866], %742 {strides = array<i32>} : memref<81x256xbf16, #tpu.memory_space<vmem>>, vector<1x122xbf16>,
    %c0_867 = arith.constant 0 : index
    %c0_868 = arith.constant 0 : index
    %c0_869 = arith.constant 0 : index
    %744 = vector.load %arg3[%c0_867, %c0_868, %c0_869] : memref<1x1x256xbf16, #tpu.memory_space<vmem>>, vector<1x1x134xbf16>
    %745 = vector.shape_cast %744 : vector<1x1x134xbf16> to vector<1x134xbf16>
    %c6_870 = arith.constant 6 : index
    %c122 = arith.constant 122 : index
    %746 = vector.load %arg5[%c6_870, %c122] : memref<9x256xbf16, #tpu.memory_space<vmem>>, vector<1x134xbf16>
    %747 = arith.mulf %745, %746 : vector<1x134xbf16>
    %c78_871 = arith.constant 78 : index
    %c122_872 = arith.constant 122 : index
    %748 = vector.load %arg7[%c78_871, %c122_872] : memref<81x256xbf16, #tpu.memory_space<vmem>>, vector<1x134xbf16>
    tpu.vector_store %arg7[%c78_871, %c122_872], %747 {strides = array<i32>} : memref<81x256xbf16, #tpu.memory_space<vmem>>, vector<1x134xbf16>,
    %c0_873 = arith.constant 0 : index
    %c0_874 = arith.constant 0 : index
    %c135 = arith.constant 135 : index
    %749 = vector.load %arg2[%c0_873, %c0_874, %c135] : memref<1x1x256xbf16, #tpu.memory_space<vmem>>, vector<1x1x121xbf16>
    %750 = vector.shape_cast %749 : vector<1x1x121xbf16> to vector<1x121xbf16>
    %c7_875 = arith.constant 7 : index
    %c0_876 = arith.constant 0 : index
    %751 = vector.load %arg5[%c7_875, %c0_876] : memref<9x256xbf16, #tpu.memory_space<vmem>>, vector<1x121xbf16>
    %752 = arith.mulf %750, %751 : vector<1x121xbf16>
    %c79 = arith.constant 79 : index
    %c0_877 = arith.constant 0 : index
    %753 = vector.load %arg7[%c79, %c0_877] : memref<81x256xbf16, #tpu.memory_space<vmem>>, vector<1x121xbf16>
    tpu.vector_store %arg7[%c79, %c0_877], %752 {strides = array<i32>} : memref<81x256xbf16, #tpu.memory_space<vmem>>, vector<1x121xbf16>,
    %c0_878 = arith.constant 0 : index
    %c0_879 = arith.constant 0 : index
    %c0_880 = arith.constant 0 : index
    %754 = vector.load %arg3[%c0_878, %c0_879, %c0_880] : memref<1x1x256xbf16, #tpu.memory_space<vmem>>, vector<1x1x135xbf16>
    %755 = vector.shape_cast %754 : vector<1x1x135xbf16> to vector<1x135xbf16>
    %c7_881 = arith.constant 7 : index
    %c121 = arith.constant 121 : index
    %756 = vector.load %arg5[%c7_881, %c121] : memref<9x256xbf16, #tpu.memory_space<vmem>>, vector<1x135xbf16>
    %757 = arith.mulf %755, %756 : vector<1x135xbf16>
    %c79_882 = arith.constant 79 : index
    %c121_883 = arith.constant 121 : index
    %758 = vector.load %arg7[%c79_882, %c121_883] : memref<81x256xbf16, #tpu.memory_space<vmem>>, vector<1x135xbf16>
    tpu.vector_store %arg7[%c79_882, %c121_883], %757 {strides = array<i32>} : memref<81x256xbf16, #tpu.memory_space<vmem>>, vector<1x135xbf16>,
    %c0_884 = arith.constant 0 : index
    %c0_885 = arith.constant 0 : index
    %c136_886 = arith.constant 136 : index
    %759 = vector.load %arg2[%c0_884, %c0_885, %c136_886] : memref<1x1x256xbf16, #tpu.memory_space<vmem>>, vector<1x1x120xbf16>
    %760 = vector.shape_cast %759 : vector<1x1x120xbf16> to vector<1x120xbf16>
    %c8_887 = arith.constant 8 : index
    %c0_888 = arith.constant 0 : index
    %761 = vector.load %arg5[%c8_887, %c0_888] : memref<9x256xbf16, #tpu.memory_space<vmem>>, vector<1x120xbf16>
    %762 = arith.mulf %760, %761 : vector<1x120xbf16>
    %c80_889 = arith.constant 80 : index
    %c0_890 = arith.constant 0 : index
    %763 = vector.load %arg7[%c80_889, %c0_890] : memref<81x256xbf16, #tpu.memory_space<vmem>>, vector<1x120xbf16>
    tpu.vector_store %arg7[%c80_889, %c0_890], %762 {strides = array<i32>} : memref<81x256xbf16, #tpu.memory_space<vmem>>, vector<1x120xbf16>,
    %c0_891 = arith.constant 0 : index
    %c0_892 = arith.constant 0 : index
    %c0_893 = arith.constant 0 : index
    %764 = vector.load %arg3[%c0_891, %c0_892, %c0_893] : memref<1x1x256xbf16, #tpu.memory_space<vmem>>, vector<1x1x136xbf16>
    %765 = vector.shape_cast %764 : vector<1x1x136xbf16> to vector<1x136xbf16>
    %c8_894 = arith.constant 8 : index
    %c120_895 = arith.constant 120 : index
    %766 = vector.load %arg5[%c8_894, %c120_895] : memref<9x256xbf16, #tpu.memory_space<vmem>>, vector<1x136xbf16>
    %767 = arith.mulf %765, %766 : vector<1x136xbf16>
    %c80_896 = arith.constant 80 : index
    %c120_897 = arith.constant 120 : index
    %768 = vector.load %arg7[%c80_896, %c120_897] : memref<81x256xbf16, #tpu.memory_space<vmem>>, vector<1x136xbf16>
    tpu.vector_store %arg7[%c80_896, %c120_897], %767 {strides = array<i32>} : memref<81x256xbf16, #tpu.memory_space<vmem>>, vector<1x136xbf16>,
    %c0_898 = arith.constant 0 : index
    %c0_899 = arith.constant 0 : index
    %769 = vector.load %arg4[%c0_898, %c0_899] : memref<32x81xbf16, #tpu.memory_space<vmem>>, vector<32x81xbf16>
    %c0_900 = arith.constant 0 : index
    %c0_901 = arith.constant 0 : index
    %770 = vector.load %arg7[%c0_900, %c0_901] : memref<81x256xbf16, #tpu.memory_space<vmem>>, vector<81x256xbf16>
    %cst = arith.constant dense<0.000000e+00> : vector<32x256xf32>
    %771 = tpu.matmul %769, %770, %cst {dimension_numbers = #tpu.dot_dimension_numbers<[1], [0], [0], [1], [0, 0, 1, 1], [], []>} : vector<32x81xbf16>, vector<81x256xbf16>, vector<32x256xf32> -> vector<32x256xf32>
    %c0_902 = arith.constant 0 : index
    %c0_903 = arith.constant 0 : index
    %c0_904 = arith.constant 0 : index
    %772 = vector.load %arg6[%c0_902, %c0_903, %c0_904] : memref<1x32x256xf32, #tpu.memory_space<vmem>>, vector<1x32x256xf32>
    %773 = vector.shape_cast %772 : vector<1x32x256xf32> to vector<32x256xf32>
    %774 = vector.shape_cast %771 : vector<32x256xf32> to vector<1x32x256xf32>
    tpu.vector_store %arg6[%c0_902, %c0_903, %c0_904], %774 {strides = array<i32>} : memref<1x32x256xf32, #tpu.memory_space<vmem>>, vector<1x32x256xf32>,
    return
  }
  func.func @transform_0(%arg0: i32, %arg1: i32) -> (i32, i32, i32) {
    %c0_i32 = arith.constant 0 : i32
    %c0_i32_0 = arith.constant 0 : i32
    return %arg0, %c0_i32, %arg1 : i32, i32, i32
  }
  func.func @transform_1(%arg0: i32, %arg1: i32) -> (i32, i32, i32) {
    %c1_i32 = arith.constant 1 : i32
    %0 = arith.addi %arg1, %c1_i32 : i32
    %c0_i32 = arith.constant 0 : i32
    %c0_i32_0 = arith.constant 0 : i32
    return %arg0, %c0_i32, %0 : i32, i32, i32
  }
  func.func @transform_2(%arg0: i32, %arg1: i32) -> (i32, i32) {
    %c0_i32 = arith.constant 0 : i32
    %c0_i32_0 = arith.constant 0 : i32
    %c0_i32_1 = arith.constant 0 : i32
    return %c0_i32, %c0_i32_0 : i32, i32
  }
  func.func @transform_3(%arg0: i32, %arg1: i32) -> (i32, i32) {
    %c0_i32 = arith.constant 0 : i32
    %c0_i32_0 = arith.constant 0 : i32
    %c0_i32_1 = arith.constant 0 : i32
    return %c0_i32, %c0_i32_0 : i32, i32
  }
  func.func @transform_4(%arg0: i32, %arg1: i32) -> (i32, i32, i32) {
    %c0_i32 = arith.constant 0 : i32
    %c0_i32_0 = arith.constant 0 : i32
    return %arg0, %c0_i32, %arg1 : i32, i32, i32
  }
}

</mosaic_0001>

<bundles_post_ra>
// kernel: tpu_custom_call.1
= control target key start
LH: loop header
LB: loop body
LE: loop exit
PB: predicated region body
PF: predicated region fallthrough
CT: control target
= control target key end

     0   :  { %9 = vsyncpa [#allocation4], 0  ;;  %s12923_s0 = inlined_call_operand.vmem [shape: bf16[2,1,512], index: 0, kind: input, shape index: {}]   ;;  %s12924_s1 = inlined_call_operand.vmem [shape: bf16[2,1,512], index: 1, kind: input, shape index: {}]   ;;  %s12925_s2 = inlined_call_operand.vmem [shape: bf16[32,81], index: 2, kind: input, shape index: {}]   ;;  %s12926_s3 = inlined_call_operand.vmem [shape: bf16[9,256], index: 3, kind: input, shape index: {}]   ;;  %s12927_s4 = inlined_call_operand.hbm [shape: f32[2,32,256], index: 4, kind: output, shape index: {}]  }
   0x1   :  { %11 = vsyncpa [#allocation4 + $0x1], 0  ;;  %s9377_s15 = smov 0   ;;  %s9379_s16 = smov 0  }
   0x2   :  { %s9381_s17 = smov 0   ;;  %s9383_s18 = smov 0  }
   0x3   :  { %s9385_s19 = smov 0   ;;  %s9387_s20 = smov 0  }
   0x4 LB: > { %s8558_s21 = sadd.s32 4294967295, %s9226_s20   ;;  %s8559_s22 = sadd.s32 4294967294, %s9226_s20   ;;  %s9226_s20 = sphi %s9387_s20, %s17_s20   ;;  %s9222_s19 = sphi %s9385_s19, %s13816_s19   ;;  %s9218_s18 = sphi %s9383_s18, %s13815_s18   ;;  %s9214_s17 = sphi %s9381_s17, %s13814_s17   ;;  %s9210_s16 = sphi %s9379_s16, %s13813_s16   ;;  %s9206_s15 = sphi %s9377_s15, %s13812_s15  }
   0x5   : > { %s29_s23 = sadd.s32 1, %s9222_s19  ;;  %s138_s24 = sadd.s32 1, %s9214_s17 }
   0x6   : > { %p31_p0 = scmp.ge.s32.totalorder %s29_s23, 2  ;;  %p148_p1 = scmp.ne.s32.totalorder %s9214_s17, %s9210_s16 }
   0x7   : > { %p149_p2 = scmp.eq.s32.totalorder %s8558_s21, 1  ;;  %p154_p3 = scmp.ne.s32.totalorder %s9210_s16, %s9206_s15 }
   0x8   : > { %s13818_s23 = smov (%p31_p0, %s29_s23), 0  ;;  %p155_p5 = scmp.eq.s32.totalorder %s8559_s22, 1 }
   0x9   : > { %p9417_p4 = por %p149_p2, %p148_p1  ;;  %s133_s26 = ssub.s32 %s9222_s19, %s13818_s23 }
   0xa   : > { %p8562_p6 = scmp.ge.s32.totalorder %s9226_s20, 1  ;;  %p136_p7 = scmp.eq.s32.totalorder %s133_s26, 0 }
   0xb   : > { %p9424_p8 = por %p155_p5, %p154_p3  ;;  %p205_p9 = scmp.lt.s32.totalorder %s9226_s20, 3 }
   0xc   : > { %s9430_s28 = scalar_select %p136_p7, %s9214_s17, %s138_s24  }
   0xd   : > { %p206_p10 = pnand %p8562_p6, %p205_p9 }
   0xf   : > { %209 = sbr.rel (%p206_p10) target bundleno = 1201 (0x4b1), region = 36 }
  0x16   : > { %v278_v0 = vlaneseq  ;;  %v9228_v1 = vmov 1966171168   ;;  %v9229_v3 = vmov 1935823168   ;;  %p244_p11 = scmp.lt.s32.totalorder %s9218_s18, 1  ;;  %s13028_s8 = smov 2  }
  0x17   : > { %v276_v2 = vunpack.c.l.s4 %v9228_v1  ;;  %v286_v4 = vunpack.c.l.s4 %v9229_v3  ;;  %v8571_v5 = vld.sshfl [vmem:[%s12926_s3] sm:$0x50 pattern:$0x75316420]  ;;  %s12939_s9 = smov 1   ;;  %s12928_s12 = smov 124  }
  0x18   : > { %v279_v6 = vshrl.u32 %v278_v0, 7  ;;  %v434_v9 = vcombine.high %v8571_v5, %v8571_v5  ;;  %v8572_v10 = vld.sshfl [vmem:[%s12926_s3 + $0x4] sm:$0x10 pattern:$0x75316420]  ;;  %s245_s7 = scalar_select %p244_p11, %s9218_s18, 1 }
  0x19   : > { %v277_v7 = vunpack.c.0.s8 %v276_v2  ;;  %v287_v8 = vunpack.c.0.s8 %v286_v4  ;;  %v8569_v11 = vld.sshfl [vmem:[%s12926_s3 + $0x4] sm:$0x1 pattern:$0x75316420]  ;;  %v491_v13 = vcombine.high %v8572_v10, %v8572_v10  ;;  %s9233_s21 = smov 21   ;;  %s9234_s24 = smov 3  }
  0x1a   : > { %s8564_s10 = sshll.u32 %s245_s7, 2  ;;  %v8603_v14 = vld.sshfl [vmem:[%s12926_s3] sm:$0xa pattern:$0x75316420]  ;;  %s9235_s26 = smov 22  }
  0x1b   : > { %v9443_v12 = vsub.s32 %v277_v7, %v279_v6  ;;  %v9448_v15 = vsub.s32 %v287_v8, %v279_v6  ;;  %s259_s13 = sadd.s32 2, %s8564_s10  ;;  %s9453_s22 = scalar_lea.vmem %s12923_s0, %s8564_s10  ;;  %v8567_v16 = vld.sshfl [vmem:[%s12926_s3] sm:$0x5 pattern:$0x75316420]  ;;  %vm12966_vm0 = vcmask 1042434  }
  0x1c   : > { %s9467_s5 = scalar_lea.vmem %s12924_s1, %s259_s13  ;;  %v8605_v19 = vld.sshfl [vmem:[%s12926_s3 + $0x4] sm:$0x2 pattern:$0x75316420]  ;;  %s12941_s29 = smov 5   ;;  %vm671_vm2 = vcmask 1013766  }
  0x1d   : > { %v9459_v17 = vrot.slane %v434_v9, %v9443_v12  ;;  %v9462_v18 = vrot.slane %v8569_v11, %v9443_v12  ;;  %v9123_v20 = vld [vmem:[%s9467_s5] ss:$0 sps:$4 sm:$0x11]   ;;  %v1641_v21 = vrot.slane %v8603_v14, %v9443_v12  ;;  %v9480_v23 = vrot.slane %v491_v13, %v9443_v12  ;;  %s9237_s30 = smov 23   ;;  %s9238_s13 = smov 6  }
  0x1e   : > { %v9483_v24 = vrot.slane %v8567_v16, %v9443_v12  ;;  %v687_v25 = vrot.slane %v9123_v20, %v9448_v15  ;;  %v1700_v27 = vrot.slane %v8605_v19, %v9443_v12  ;;  %v8607_v29 = vld.sshfl [vmem:[%s12926_s3] sm:$0xa0 pattern:$0x75316420]  ;;  %s12932_s14 = smov 24   ;;  %s9243_s6 = smov 33  }
  0x1f   : > { %442 = vrot.lane.b32.xlu0 %v9459_v17, %s13028_s8  ;;  %v9477_v22 = vshrl.u32 %v9462_v18, 16  ;;  %v1642_v26 = vcombine.high %v1641_v21, %v1641_v21  ;;  %v1746_v33 = vcombine.high %v8607_v29, %v8607_v29  ;;  %v8608_v34 = vld.sshfl [vmem:[%s12926_s3 + $0x4] sm:$0x20 pattern:$0x75316420]  ;;  %v546_v35 = vshrl.u32 %v9459_v17, 16 }
  0x20   : > { %v694_v28 = vrot.slane %v687_v25, %v9448_v15  ;;  %v9496_v30 = vshrl.u32 %v9483_v24, 16  ;;  %v1701_v32 = vcombine.high %v1700_v27, %v1700_v27  ;;  %v9124_v36 = vld [vmem:[%s9453_s22] ss:$0 sps:$4 sm:$0x33]   ;;  %v1803_v39 = vcombine.high %v8608_v34, %v8608_v34  ;;  %s12930_s7 = smov 16   ;;  %s9245_s10 = smov 34  }
  0x21   : > { %394 = vrot.lane.b32.xlu1 %v9477_v22, %s12939_s9  ;;  %v1644_v31 = vshrl.u32 %v1642_v26, 16  ;;  %v1753_v38 = vrot.slane %v1746_v33, %v9443_v12  ;;  %v610_v40 = vshrl.u32 %v9480_v23, 16  ;;  %v654_v41 = vrot.slane %v9124_v36, %v9448_v15  ;;  %v8613_v48 = vld.sshfl [vmem:[%s12926_s3 + $0x8] sm:$0x5 pattern:$0x75316420] }
  0x22   : > { %v1703_v37 = vshrl.u32 %v1701_v32, 16  ;;  %v1810_v43 = vrot.slane %v1803_v39, %v9443_v12  ;;  %v1968_v49 = vrot.slane %v8613_v48, %v9443_v12  ;;  %v8614_v50 = vld.sshfl [vmem:[%s12926_s3 + $0xc] sm:$0x1 pattern:$0x75316420]  ;;  %s9246_s11 = smov 17  }
  0x23   : > { %499 = vrot.lane.b32.xlu0 %v9480_v23, %s13028_s8  ;;  %v1754_v42 = vcombine.high %v1753_v38, %v1753_v38  ;;  %v661_v44 = vrot.slane %v654_v41, %v9448_v15  ;;  %v2022_v51 = vrot.slane %v8614_v50, %v9443_v12  ;;  %v8601_v52 = vld.sshfl [vmem:[%s9453_s22] sm:$0x5 pattern:$0x73625140]  ;;  %vm12967_vm1 = vsmask.f32 2304 }
  0x24   : > { %v1811_v45 = vcombine.high %v1810_v43, %v1810_v43  ;;  %v8602_v53 = vld.sshfl [vmem:[%s9467_s5] sm:$0x1 pattern:$0x73625140]  ;;  %v1580_v54 = vrot.slane %v8601_v52, %v9448_v15  ;;  %vm12968_vm3 = vsmask.f32 6400  ;;  %vm9574_vm4 = vmand %vm12966_vm0, %vm12967_vm1 }
  0x25   : > { %695 = vrot.lane.b32.xlu1 %v694_v28, %s12928_s12  ;;  %v1863_v46 = vshrl.u32 %v1754_v42, 16  ;;  %v1612_v55 = vrot.slane %v8602_v53, %v9448_v15  ;;  %v13108_v6 = vmov 0  ;;  %vm673_vm5 = vmand %vm671_vm2, %vm12968_vm3  ;;  %vm12934_vm6 = vcmask 1014784   ;;  %v675_v9 = vld [vmem:[#allocation2] sm:$0x44] }
  0x26   : > { %v1921_v47 = vshrl.u32 %v1811_v45, 16  ;;  %v1582_v56 = vshll.u32 %v1580_v54, 16  ;;  %v13109_v6 = vsel %vm9574_vm4, 4294967295, %v13108_v6  ;;  %vm674_vm7 = vmor %vm673_vm5, %vm9574_vm4  ;;  %vm698_vm8 = vcmask 1043426   ;;  %v2006_v26 = vld [vmem:[%s9467_s5] sm:$0x1] }
  0x27   : > { %332 = vrot.lane.b32.xlu0 %v9496_v30, %s12939_s9  ;;  %v1614_v57 = vshll.u32 %v1612_v55, 16  ;;  %13110 = vst [vmem:[#allocation6_spill] sm:$0xff] %v13109_v6  ;;  %vm9591_vm9 = vmand %vm698_vm8, %vm12967_vm1  ;;  %v13111_v19 = vmov 0  ;;  %vm12962_vm10 = vcmask 195584   ;;  %v1901_v33 = vld [vmem:[%s9467_s5] sm:$0x1] }
  0x28   : > { %v1584_v58 = vrot.slane %v1582_v56, 6  ;;  %v13112_v19 = vsel %vm9591_vm9, 4294967295, %v13111_v19  ;;  %v1952_v34 = vld [vmem:[%s9453_s22] sm:$0x3]  ;;  %vm12963_vm11 = vcmask 261120   ;;  %vm12935_vm12 = vcmask 64512  }
  0x29   : > { %1648 = vrot.lane.b32.xlu1 %v1644_v31, %s9233_s21  ;;  %v1616_v59 = vrot.slane %v1614_v57, 6  ;;  %13113 = vst [vmem:[#allocation7_spill] sm:$0xff] %v13112_v19  ;;  %v2105_v39 = vld [vmem:[%s9467_s5] sm:$0x1]  ;;  %vm12951_vm13 = vcmask 7168   ;;  %vm1758_vm14 = vcmask 179200  }
  0x2a   : > { %v481_v41 = vld [vmem:[%s9467_s5] sm:$0x1]  ;;  %vm12975_vm15 = vcmask 1040384   ;;  %vm12972_vm2 = vsmask.f32 256  ;;  %s9256_s9 = smov 106  }
  0x2b   : > { %550 = vrot.lane.b32.xlu0 %v546_v35, %s9234_s24  ;;  %v9003_v60 = vpack.i.bf16 %v1616_v59, %v1584_v58  ;;  %v1099_v54 = vld [vmem:[%s9467_s5] sm:$0x1]  ;;  %vm12974_vm5 = vsmask.f32 4352  ;;  %vm9667_vm8 = vmand %vm12975_vm15, %vm12972_vm2  ;;  %vm12971_vm0 = vcmask 785408   ;;  %vm1093_vm3 = vcmask 978948  }
  0x2d   : > { %1707 = vrot.lane.b32.xlu1 %v1703_v37, %s9233_s21  ;;  %s12957_s21 = smov 7  }
  0x2f   : > { %614 = vrot.lane.b32.xlu0 %v610_v40, %s9234_s24 }
  0x31   : > { %1755 = vrot.lane.b32.xlu1 %v1754_v42, %s9235_s26 }
  0x33   : > { %662 = vrot.lane.b32.xlu0 %v661_v44, %s12928_s12  ;;  %s9247_s12 = smov 18  }
  0x35   : > { %1812 = vrot.lane.b32.xlu1 %v1811_v45, %s9235_s26  ;;  %s12937_s26 = smov 32  }
  0x37   : > { %726 = vrot.lane.b32.xlu0 %v1644_v31, %s12941_s29 }
  0x39   : > { %1867 = vrot.lane.b32.xlu1 %v1863_v46, %s9237_s30 }
  0x3b   : > { %790 = vrot.lane.b32.xlu0 %v1703_v37, %s12941_s29  ;;  %s9257_s29 = smov 95  }
  0x3d   : > { %1925 = vrot.lane.b32.xlu1 %v1921_v47, %s9237_s30  ;;  %s12945_s30 = smov 8  }
  0x3f   : > { %840 = vrot.lane.b32.xlu0 %v1754_v42, %s9238_s13 }
  0x41   : > { %1969 = vrot.lane.b32.xlu1 %v1968_v49, %s12932_s14 }
  0x43   : > { %899 = vrot.lane.b32.xlu0 %v1811_v45, %s9238_s13  ;;  %v1793_v45 = vld [vmem:[%s9467_s5] sm:$0x1] }
  0x45   : > { %2023 = vrot.lane.b32.xlu1 %v2022_v51, %s12932_s14  ;;  %s12953_s14 = smov 126  }
  0x47   : > { %952 = vrot.lane.b32.xlu0 %v1863_v46, %s12957_s21 }
  0x49   : > { %2070 = vrot.lane.b32.xlu1 %v9483_v24, %s12937_s26 }
  0x4b   : > { %1017 = vrot.lane.b32.xlu0 %v1921_v47, %s12957_s21  ;;  %v2053_v47 = vld [vmem:[%s9453_s22] sm:$0x3]  ;;  %s9269_s21 = smov 92  }
  0x4d   : > { %2122 = vrot.lane.b32.xlu1 %v9462_v18, %s12937_s26  ;;  %s12955_s26 = smov 112  }
  0x4f   : > { %1065 = vrot.lane.b32.xlu0 %v1968_v49, %s12945_s30 }
  0x51   : > { %2172 = vrot.lane.b32.xlu1 %v9496_v30, %s9243_s6 }
  0x53   : > { %1116 = vrot.lane.b32.xlu0 %v2022_v51, %s12945_s30  ;;  %s9259_s30 = smov 111  }
  0x55   : > { %2232 = vrot.lane.b32.xlu1 %v9477_v22, %s9243_s6  ;;  %s9248_s6 = smov 19  }
  0x57   : > { %1160 = vrot.lane.b32.xlu0 %v9483_v24, %s12930_s7 }
  0x59   : > { %2281 = vrot.lane.b32.xlu1 %v9459_v17, %s9245_s10 }
  0x5b   : > { %1214 = vrot.lane.b32.xlu0 %v9462_v18, %s12930_s7  ;;  %s9252_s7 = smov 105  }
  0x5f   : > { %1266 = vrot.lane.b32.xlu0 %v9496_v30, %s9246_s11 }
  0x63   : > { %1323 = vrot.lane.b32.xlu0 %v9477_v22, %s9246_s11  ;;  %s9249_s11 = smov 108  }
  0x67   : > { %1369 = vrot.lane.b32.xlu0 %v9459_v17, %s9247_s12 }
  0x6b   : > { %1425 = vrot.lane.b32.xlu0 %v9480_v23, %s9247_s12  ;;  %s12949_s12 = smov 104  }
  0x6f   : > { %1479 = vrot.lane.b32.xlu0 %v546_v35, %s9248_s6 }
  0x73   : > { %1537 = vrot.lane.b32.xlu0 %v610_v40, %s9248_s6  ;;  %s9251_s6 = smov 96  }
  0x77   : > { %9004 = vrot.lane.b32.xlu0 %v9003_v60, %s9249_s11  ;;  %v2210_v60 = vld [vmem:[%s9467_s5] sm:$0x1]  ;;  %s12943_s11 = smov 120  }
  0x91   : > { %v9556_v61 = vpop.permute.xlu0 %442 }
  0x93   : > { %v9558_v62 = vpop.permute.xlu1 %394 }
  0x95   : > { %v9560_v63 = vpop.permute.xlu0 %499 }
  0x96   : > { %v502_v50 = vmul.bf16 %v9560_v63, %v481_v41  ;;  %v265_v41 = vld [vmem:[%s9453_s22] sm:$0x3] }
  0x97   : > { %v696_v0 = vpop.permute.xlu1 %695 }
  0x99   : > { %v9562_v1 = vpop.permute.xlu0 %332 }
  0x9b   : > { %v9564_v2 = vpop.permute.xlu1 %1648 }
  0x9d   : > { %v9566_v3 = vpop.permute.xlu0 %550 }
  0x9f   : > { %v9568_v4 = vpop.permute.xlu1 %1707 }
  0xa1   : > { %v9570_v5 = vpop.permute.xlu0 %614 }
  0xa3   : > { %v9578_v7 = vpop.permute.xlu1 %1755 }
  0xa5   : > { %v663_v8 = vpop.permute.xlu0 %662 }
  0xa6   : > { %v664_v10 = vrot.slane %v663_v8, 4 }
  0xa7   : > { %v1813_v11 = vpop.permute.xlu1 %1812 }
  0xa8   : > { %v666_v13 = vsel %vm12934_vm6, %v663_v8, %v664_v10  ;;  %v1815_v52 = vmul.bf16 %v1813_v11, %v1793_v45 }
  0xa9   : > { %v676_v14 = vsel %vm674_vm7, %v666_v13, %v675_v9  ;;  %v9584_v16 = vpop.permute.xlu0 %726  ;;  %vm12936_vm7 = vcmask 1044484  }
  0xaa   : > { %677 = vst [vmem:[#allocation2] sm:$0x44] %v676_v14  ;;  %v1823_v9 = vrot.slane %v1815_v52, %v9448_v15  ;;  %vm9676_vm6 = vmand %vm12936_vm7, %vm12974_vm5 }
  0xab   : > { %v9586_v17 = vpop.permute.xlu1 %1867  ;;  %vm306_vm7 = vmor %vm9676_vm6, %vm9667_vm8 }
  0xad   : > { %v9588_v18 = vpop.permute.xlu0 %790 }
  0xaf   : > { %v1926_v20 = vpop.permute.xlu1 %1925 }
  0xb0   : > { %v1928_v42 = vmul.bf16 %v1926_v20, %v1901_v33  ;;  %v1830_v33 = vrot.slane %v1823_v9, %v9448_v15  ;;  %v1736_v9 = vld [vmem:[%s9453_s22] sm:$0x3] }
  0xb1   : > { %v700_v21 = vld [vmem:[#allocation2 + $0x4] sm:$0x4]  ;;  %v9595_v22 = vpop.permute.xlu0 %840 }
  0xb2   : > { %v701_v23 = vsel %vm9591_vm9, %v696_v0, %v700_v21  ;;  %v1936_v53 = vrot.slane %v1928_v42, %v9448_v15  ;;  %v510_v0 = vrot.slane %v502_v50, %v9448_v15  ;;  %vm13153_vm9 = vcmask 1043459  }
  0xb3   : > { %702 = vst [vmem:[#allocation2 + $0x4] sm:$0x4] %v701_v23  ;;  %v1970_v24 = vpop.permute.xlu1 %1969 }
  0xb4   : > { %v1971_v28 = vrot.slane %v1970_v24, 7  ;;  %v1943_v10 = vrot.slane %v1936_v53, %v9448_v15  ;;  %v1832_v53 = vshll.u32 %v1830_v33, 16  ;;  %v1650_v33 = vrot.slane %v9564_v2, 7 }
  0xb5   : > { %v9599_v25 = vpop.permute.xlu0 %899 }
  0xb6   : > { %v1973_v35 = vsel %vm12962_vm10, %v1971_v28, %v1970_v24  ;;  %v8566_v24 = vld.sshfl [vmem:[%s12926_s3] sm:$0x5 pattern:$0x75316420]  ;;  %v511_v28 = vcombine.low %v510_v0, %v510_v0  ;;  %vm12973_vm10 = vsmask.f32 1280 }
  0xb7   : > { %v2024_v27 = vpop.permute.xlu1 %2023  ;;  %v1975_v43 = vmul.bf16 %v1973_v35, %v1952_v34  ;;  %v9644_v34 = vrot.slane %v8566_v24, %v9443_v12  ;;  %v1048_v35 = vld [vmem:[%s9453_s22] sm:$0x3] }
  0xb8   : > { %v2026_v29 = vmul.bf16 %v2024_v27, %v2006_v26  ;;  %v372_v27 = vld [vmem:[%s9467_s5] sm:$0x1]  ;;  %v518_v45 = vrot.slane %v511_v28, %v9448_v15 }
  0xb9   : > { %v9602_v30 = vpop.permute.xlu0 %952  ;;  %v1983_v56 = vrot.slane %v1975_v43, %v9448_v15  ;;  %v397_v42 = vmul.bf16 %v9558_v62, %v372_v27  ;;  %v283_v50 = vmul.bf16 %v9644_v34, %v265_v41  ;;  %v1843_v24 = vld [vmem:[%s9453_s22] sm:$0x3] }
  0xba   : > { %v2034_v31 = vrot.slane %v2026_v29, %v9448_v15 }
  0xbb   : > { %v2071_v32 = vpop.permute.xlu1 %2070  ;;  %v1990_v11 = vrot.slane %v1983_v56, %v9448_v15  ;;  %v1869_v56 = vrot.slane %v9586_v17, 7 }
  0xbc   : > { %v2041_v36 = vrot.slane %v2034_v31, %v9448_v15  ;;  %v2072_v37 = vrot.slane %v2071_v32, 7  ;;  %v334_v31 = vrot.slane %v9562_v1, 7 }
  0xbd   : > { %v9609_v38 = vpop.permute.xlu0 %1017 }
  0xbe   : > { %v2043_v40 = vshll.u32 %v2041_v36, 16  ;;  %v2074_v48 = vsel %vm12963_vm11, %v2072_v37, %v2071_v32  ;;  %v1197_v32 = vld [vmem:[%s9467_s5] sm:$0x1]  ;;  %v1992_v37 = vshll.u32 %v1990_v11, 16  ;;  %vm12970_vm11 = vsmask.f32 5376 }
  0xbf   : > { %v2123_v44 = vpop.permute.xlu1 %2122  ;;  %v2076_v57 = vmul.bf16 %v2074_v48, %v2053_v47  ;;  %v336_v47 = vsel %vm12951_vm13, %v334_v31, %v9562_v1  ;;  %v1757_v48 = vrot.slane %v9578_v7, 7  ;;  %v1301_v11 = vld [vmem:[%s9467_s5] sm:$0x1]  ;;  %vm1482_vm13 = vcmask 154624  }
  0xc0   : > { %v2125_v46 = vmul.bf16 %v2123_v44, %v2105_v39  ;;  %2045 = vrot.lane.b32.xlu0 %v2043_v40, %s12949_s12 }
  0xc1   : > { %v1066_v49 = vpop.permute.xlu0 %1065  ;;  %v2084_v23 = vrot.slane %v2076_v57, %v9448_v15 }
  0xc2   : > { %v2133_v51 = vrot.slane %v2125_v46, %v9448_v15  ;;  %v1067_v14 = vrot.slane %v1066_v49, 7  ;;  %v310_v46 = vld [vmem:[%s9453_s22] sm:$0x3] }
  0xc3   : > { %v9621_v55 = vpop.permute.xlu1 %2172  ;;  %v2085_v40 = vcombine.low %v2084_v23, %v2084_v23  ;;  %v338_v0 = vmul.bf16 %v336_v47, %v310_v46  ;;  %v307_v23 = vld [vmem:[#allocation2] sm:$0x11]  ;;  %v444_v47 = vrot.slane %v9556_v61, 7 }
  0xc4   : > { %v2134_v58 = vcombine.low %v2133_v51, %v2133_v51  ;;  %v1069_v36 = vsel %vm12935_vm12, %v1067_v14, %v1066_v49  ;;  %v1684_v51 = vld [vmem:[%s9467_s5] sm:$0x1]  ;;  %vm1870_vm12 = vcmask 187392   ;;  %v1834_v14 = vrot.slane %v1832_v53, 5 }
  0xc5   : > { %v1117_v59 = vpop.permute.xlu0 %1116  ;;  %v1071_v49 = vmul.bf16 %v1069_v36, %v1048_v35  ;;  %v2092_v52 = vrot.slane %v2085_v40, %v9448_v15  ;;  %v2174_v27 = vrot.slane %v9621_v55, 7 }
  0xc6   : > { %v1119_v8 = vmul.bf16 %v1117_v59, %v1099_v54  ;;  %v2141_v63 = vrot.slane %v2134_v58, %v9448_v15  ;;  %v13114_v54 = vmov 0  ;;  %v13117_v58 = vmov 0 }
  0xc7   : > { %v2233_v13 = vpop.permute.xlu1 %2232  ;;  %v13115_v54 = vsel %vm9667_vm8, 4294967295, %v13114_v54  ;;  %v13118_v58 = vsel %vm9676_vm6, 4294967295, %v13117_v58  ;;  %v291_v59 = vrot.slane %v283_v50, %v9448_v15  ;;  %v1407_v50 = vld [vmem:[%s9467_s5] sm:$0x1] }
  0xc8   : > { %v1127_v20 = vrot.slane %v1119_v8, %v9448_v15  ;;  %2142 = vrot.lane.b32.xlu0 %v2141_v63, %s9251_s6  ;;  %v2235_v21 = vmul.bf16 %v2233_v13, %v2210_v60  ;;  %13116 = vst [vmem:[#allocation8_spill] sm:$0xff] %v13115_v54  ;;  %13119 = vst [vmem:[#allocation9_spill] sm:$0xff] %v13118_v58  ;;  %v405_v60 = vrot.slane %v397_v42, %v9448_v15  ;;  %v2150_v42 = vld [vmem:[%s9453_s22] sm:$0x3] }
  0xc9   : > { %v9636_v26 = vpop.permute.xlu0 %1160  ;;  %v1710_v63 = vmul.bf16 %v9568_v4, %v1684_v51  ;;  %v1871_v4 = vsel %vm1870_vm12, %v1869_v56, %v9586_v17  ;;  %v298_v28 = vrot.slane %v291_v59, %v9448_v15  ;;  %vm1651_vm12 = vcmask 171008   ;;  %v1625_v51 = vld [vmem:[%s9453_s22] sm:$0x3] }
  0xca   : > { %v1134_v29 = vrot.slane %v1127_v20, %v9448_v15  ;;  %v2243_v39 = vrot.slane %v2235_v21, %v9448_v15  ;;  %v1079_v20 = vrot.slane %v1071_v49, %v9448_v15  ;;  %v412_v31 = vrot.slane %v405_v60, %v9448_v15 }
  0xcb   : > { %v1712_v35 = vcombine.low %v1710_v63, %v1710_v63  ;;  %v308_v17 = vsel %vm306_vm7, %v298_v28, %v307_v23  ;;  %vm12964_vm7 = vcmask 15360   ;;  %v424_v63 = vld [vmem:[%s9453_s22] sm:$0x3] }
  0xcc   : > { %1944 = vrot.lane.b32.xlu0 %v1943_v10, %s9252_s7  ;;  %1135 = vrot.lane.b32.xlu1 %v1134_v29, %s12943_s11  ;;  %v2250_v1 = vrot.slane %v2243_v39, %v9448_v15  ;;  %v1759_v10 = vsel %vm1758_vm14, %v1757_v48, %v9578_v7  ;;  %vm2175_vm14 = vcmask 269312   ;;  %v1086_v40 = vrot.slane %v1079_v20, %v9448_v15  ;;  %v591_v28 = vld [vmem:[%s9467_s5] sm:$0x1] }
  0xcd   : > { %v1215_v43 = vpop.permute.xlu0 %1214  ;;  %v1761_v36 = vmul.bf16 %v1759_v10, %v1736_v9  ;;  %309 = vst [vmem:[#allocation2] sm:$0x11] %v308_v17  ;;  %v1719_v48 = vrot.slane %v1712_v35, %v9448_v15  ;;  %v446_v60 = vsel %vm12964_vm7, %v444_v47, %v9556_v61  ;;  %v1162_v61 = vrot.slane %v9636_v26, 7  ;;  %v2263_v17 = vld [vmem:[%s9453_s22] sm:$0x3] }
  0xce   : > { %v1217_v44 = vmul.bf16 %v1215_v43, %v1197_v32  ;;  %v2252_v21 = vshll.u32 %v2250_v1, 16  ;;  %v346_v32 = vrot.slane %v338_v0, %v9448_v15  ;;  %v2176_v43 = vsel %vm2175_vm14, %v2174_v27, %v9621_v55  ;;  %v1514_v27 = vld [vmem:[%s9467_s5] sm:$0x1] }
  0xcf   : > { %v1769_v49 = vrot.slane %v1761_v36, %v9448_v15  ;;  %v2178_v55 = vmul.bf16 %v2176_v43, %v2150_v42  ;;  %vm12948_vm14 = vcmask 130048  }
  0xd0   : > { %v1225_v62 = vrot.slane %v1217_v44, %v9448_v15  ;;  %1994 = vrot.lane.b32.xlu0 %v1992_v37, %s12949_s12  ;;  %519 = vrot.lane.b32.xlu1 %v518_v45, %s12953_s14  ;;  %v1873_v37 = vmul.bf16 %v1871_v4, %v1843_v24  ;;  %v2254_v41 = vrot.slane %v2252_v21, 7  ;;  %v414_v45 = vshll.u32 %v412_v31, 16  ;;  %s9262_s12 = smov 109  }
  0xd1   : > { %v9672_v57 = vpop.permute.xlu0 %1266  ;;  %v353_v46 = vrot.slane %v346_v32, %v9448_v15  ;;  %v2186_v9 = vrot.slane %v2178_v55, %v9448_v15  ;;  %v448_v24 = vmul.bf16 %v446_v60, %v424_v63  ;;  %v1164_v35 = vsel %vm12948_vm14, %v1162_v61, %v9636_v26 }
  0xd2   : > { %v1232_v8 = vrot.slane %v1225_v62, %v9448_v15  ;;  %v1652_v62 = vsel %vm1651_vm12, %v1650_v33, %v9564_v2  ;;  %v1881_v53 = vrot.slane %v1873_v37, %v9448_v15  ;;  %v1776_v2 = vrot.slane %v1769_v49, %v9448_v15  ;;  %v1143_v33 = vld [vmem:[%s9453_s22] sm:$0x3] }
  0xd3   : > { %v355_v59 = vshll.u32 %v353_v46, 16  ;;  %v1654_v0 = vmul.bf16 %v1652_v62, %v1625_v51  ;;  %vm2284_vm12 = vcmask 277504   ;;  %v2193_v32 = vrot.slane %v2186_v9, %v9448_v15  ;;  %v880_v46 = vld [vmem:[%s9467_s5] sm:$0x1] }
  0xd4   : > { %2093 = vrot.lane.b32.xlu0 %v2092_v52, %s9251_s6  ;;  %v1234_v13 = vshll.u32 %v1232_v8, 16  ;;  %v1720_v8 = vcombine.low %v1719_v48, %v1719_v48  ;;  %v456_v42 = vrot.slane %v448_v24, %v9448_v15  ;;  %v1166_v47 = vmul.bf16 %v1164_v35, %v1143_v33 }
  0xd5   : > { %v1324_v7 = vpop.permute.xlu0 %1323  ;;  %v1656_v4 = vcombine.low %v1654_v0, %v1654_v0  ;;  %v2195_v26 = vshll.u32 %v2193_v32, 16  ;;  %v902_v51 = vmul.bf16 %v9599_v25, %v880_v46  ;;  %vm1372_vm14 = vcmask 146432   ;;  %v1456_v32 = vld [vmem:[%s9453_s22] sm:$0x3] }
  0xd6   : > { %v1326_v29 = vmul.bf16 %v1324_v7, %v1301_v11  ;;  %1236 = vrot.lane.b32.xlu1 %v1234_v13, %s12955_s26  ;;  %v1888_v13 = vrot.slane %v1881_v53, %v9448_v15  ;;  %v1778_v7 = vshll.u32 %v1776_v2, 16  ;;  %v1727_v31 = vrot.slane %v1720_v8, %v9448_v15 }
  0xd7   : > { %v457_v62 = vcombine.low %v456_v42, %v456_v42  ;;  %v1174_v53 = vrot.slane %v1166_v47, %v9448_v15  ;;  %v904_v25 = vcombine.low %v902_v51, %v902_v51  ;;  %v552_v35 = vrot.slane %v9566_v3, 7  ;;  %v821_v51 = vld [vmem:[%s9453_s22] sm:$0x3] }
  0xd8   : > { %v1334_v39 = vrot.slane %v1326_v29, %v9448_v15  ;;  %1835 = vrot.lane.b32.xlu0 %v1834_v14, %s9256_s9  ;;  %v2282_v14 = vpop.permute.xlu1 %2281  ;;  %v1780_v43 = vrot.slane %v1778_v7, 5 }
  0xd9   : > { %v9713_v44 = vpop.permute.xlu0 %1369  ;;  %v2283_v21 = vrot.slane %v2282_v14, 7  ;;  %v464_v8 = vrot.slane %v457_v62, %v9448_v15  ;;  %v1181_v2 = vrot.slane %v1174_v53, %v9448_v15  ;;  %v911_v61 = vrot.slane %v904_v25, %v9448_v15 }
  0xda   : > { %1087 = vrot.lane.b32.xlu1 %v1086_v40, %s12943_s11  ;;  %v1335_v52 = vcombine.low %v1334_v39, %v1334_v39  ;;  %s12947_s11 = smov 127   ;;  %v1371_v60 = vrot.slane %v9713_v44, 7  ;;  %v954_v25 = vrot.slane %v9602_v30, 7 }
  0xdb   : > { %v2285_v37 = vsel %vm2284_vm12, %v2283_v21, %v2282_v14  ;;  %vm1269_vm12 = vcmask 138240  }
  0xdc   : > { %2255 = vrot.lane.b32.xlu0 %v2254_v41, %s9257_s29  ;;  %v1342_v11 = vrot.slane %v1335_v52, %v9448_v15  ;;  %v617_v41 = vmul.bf16 %v9570_v5, %v591_v28  ;;  %v2287_v49 = vmul.bf16 %v2285_v37, %v2263_v17  ;;  %v1373_v14 = vsel %vm1372_vm14, %v1371_v60, %v9713_v44 }
  0xdd   : > { %v1426_v1 = vpop.permute.xlu0 %1425  ;;  %v912_v44 = vcombine.low %v911_v61, %v911_v61  ;;  %vm12952_vm14 = vcmask 23552  }
  0xde   : > { %v1428_v56 = vmul.bf16 %v1426_v1, %v1407_v50  ;;  %416 = vrot.lane.b32.xlu1 %v414_v45, %s12947_s11  ;;  %v1663_v45 = vrot.slane %v1656_v4, %v9448_v15  ;;  %v625_v5 = vrot.slane %v617_v41, %v9448_v15  ;;  %v2197_v1 = vrot.slane %v2195_v26, 7  ;;  %v993_v41 = vld [vmem:[%s9467_s5] sm:$0x1] }
  0xdf   : > { %v1183_v4 = vshll.u32 %v1181_v2, 16  ;;  %v919_v37 = vrot.slane %v912_v44, %v9448_v15  ;;  %v8623_v44 = vld.sshfl [vmem:[%s12926_s3] sm:$0x50 pattern:$0x75316420] }
  0xe0   : > { %v1436_v10 = vrot.slane %v1428_v56, %v9448_v15  ;;  %357 = vrot.lane.b32.xlu0 %v355_v59, %s12947_s11  ;;  %s9261_s11 = smov 107   ;;  %v1664_v55 = vcombine.low %v1663_v45, %v1663_v45  ;;  %v2289_v56 = vcombine.low %v2287_v49, %v2287_v49  ;;  %v1268_v59 = vrot.slane %v9672_v57, 7 }
  0xe1   : > { %v9736_v20 = vpop.permute.xlu0 %1479  ;;  %v632_v0 = vrot.slane %v625_v5, %v9448_v15  ;;  %v1020_v45 = vmul.bf16 %v9609_v38, %v993_v41  ;;  %v728_v38 = vrot.slane %v9584_v16, 7 }
  0xe2   : > { %1343 = vrot.lane.b32.xlu1 %v1342_v11, %s9259_s30  ;;  %v1443_v23 = vrot.slane %v1436_v10, %v9448_v15  ;;  %v1671_v63 = vrot.slane %v1664_v55, %v9448_v15  ;;  %v2296_v9 = vrot.slane %v2289_v56, %v9448_v15  ;;  %v1244_v10 = vld [vmem:[%s9453_s22] sm:$0x3]  ;;  %v1270_v11 = vsel %vm1269_vm12, %v1268_v59, %v9672_v57 }
  0xe3   : > { %v634_v21 = vshll.u32 %v632_v0, 16  ;;  %v1481_v7 = vrot.slane %v9736_v20, 7  ;;  %v767_v57 = vld [vmem:[%s9467_s5] sm:$0x1]  ;;  %v1028_v49 = vrot.slane %v1020_v45, %v9448_v15  ;;  %vm12960_vm12 = vcmask 39936  }
  0xe4   : > { %v1445_v29 = vshll.u32 %v1443_v23, 16  ;;  %1889 = vrot.lane.b32.xlu0 %v1888_v13, %s9252_s7  ;;  %s9260_s7 = smov 110   ;;  %v1351_v13 = vld [vmem:[%s9453_s22] sm:$0x3]  ;;  %v1272_v23 = vmul.bf16 %v1270_v11, %v1244_v10  ;;  %v730_v60 = vsel %vm12960_vm12, %v728_v38, %v9584_v16  ;;  %vm2099_vm12 = vcmask 783365  }
  0xe5   : > { %v1538_v36 = vpop.permute.xlu0 %1537  ;;  %v1375_v24 = vmul.bf16 %v1373_v14, %v1351_v13  ;;  %v1483_v33 = vsel %vm1482_vm13, %v1481_v7, %v9736_v20  ;;  %v554_v20 = vsel %vm12952_vm14, %v552_v35, %v9566_v3  ;;  %vm12965_vm13 = vcmask 48128   ;;  %v703_v59 = vld [vmem:[%s9453_s22] sm:$0x3]  ;;  %vm2100_vm7 = vmand %vm2099_vm12, %vm12970_vm11 }
  0xe6   : > { %v1540_v39 = vmul.bf16 %v1538_v36, %v1514_v27  ;;  %v1447_v40 = vrot.slane %v1445_v29, 7  ;;  %v2303_v27 = vrot.slane %v2296_v9, %v9448_v15  ;;  %v636_v29 = vrot.slane %v634_v21, 7  ;;  %v928_v9 = vld [vmem:[%s9453_s22] sm:$0x3]  ;;  %vm9916_vm12 = vmand %vm1093_vm3, %vm12974_vm5 }
  0xe7   : > { %v1383_v28 = vrot.slane %v1375_v24, %v9448_v15  ;;  %v793_v36 = vmul.bf16 %v9588_v18, %v767_v57  ;;  %v1485_v17 = vmul.bf16 %v1483_v33, %v1456_v32  ;;  %v1035_v56 = vrot.slane %v1028_v49, %v9448_v15  ;;  %v8622_v57 = vld.sshfl [vmem:[%s12926_s3 + $0x4] sm:$0x10 pattern:$0x75316420] }
  0xe8   : > { %v1542_v48 = vcombine.low %v1540_v39, %v1540_v39  ;;  %1448 = vrot.lane.b32.xlu1 %v1447_v40, %s9260_s7  ;;  %1728 = vrot.lane.b32.xlu0 %v1727_v31, %s9261_s11  ;;  %v1280_v31 = vrot.slane %v1272_v23, %v9448_v15  ;;  %vm12961_vm14 = vcmask 56320   ;;  %v732_v0 = vmul.bf16 %v730_v60, %v703_v59 }
  0xe9   : > { %v1390_v40 = vrot.slane %v1383_v28, %v9448_v15  ;;  %v801_v42 = vrot.slane %v793_v36, %v9448_v15  ;;  %v1487_v18 = vcombine.low %v1485_v17, %v1485_v17  ;;  %v956_v10 = vsel %vm12961_vm14, %v954_v25, %v9602_v30  ;;  %v9125_v17 = vld [vmem:[%s9453_s22] ss:$0 sps:$4 sm:$0x33]   ;;  %v9862_v45 = vpop.permute.xlu0 %9004 }
  0xea   : > { %v1549_v50 = vrot.slane %v1542_v48, %v9448_v15  ;;  %v1281_v39 = vcombine.low %v1280_v31, %v1280_v31  ;;  %v842_v48 = vrot.slane %v9595_v22, 7  ;;  %v740_v16 = vrot.slane %v732_v0, %v9448_v15 }
  0xeb   : > { %v1392_v47 = vshll.u32 %v1390_v40, 16  ;;  %v808_v5 = vrot.slane %v801_v42, %v9448_v15  ;;  %v958_v13 = vmul.bf16 %v956_v10, %v928_v9  ;;  %v2326_v31 = vcombine.high %v8622_v57, %v8622_v57  ;;  %v8627_v40 = vld.sshfl [vmem:[%s12926_s3] sm:$0xa pattern:$0x75316420] }
  0xec   : > { %v1556_v52 = vrot.slane %v1549_v50, %v9448_v15  ;;  %1781 = vrot.lane.b32.xlu0 %v1780_v43, %s9256_s9  ;;  %s9263_s9 = smov 94   ;;  %v527_v43 = vld [vmem:[%s9453_s22] sm:$0x3]  ;;  %v1288_v46 = vrot.slane %v1281_v39, %v9448_v15  ;;  %v1494_v50 = vrot.slane %v1487_v18, %v9448_v15  ;;  %v844_v62 = vsel %vm12965_vm13, %v842_v48, %v9595_v22 }
  0xed   : > { %v556_v26 = vmul.bf16 %v554_v20, %v527_v43  ;;  %v1394_v3 = vrot.slane %v1392_v47, 7  ;;  %v966_v21 = vrot.slane %v958_v13, %v9448_v15  ;;  %v2372_v32 = vcombine.high %v8623_v44, %v8623_v44  ;;  %v8629_v43 = vld.sshfl [vmem:[%s12926_s3 + $0x4] sm:$0x2 pattern:$0x75316420] }
  0xee   : > { %1557 = vrot.lane.b32.xlu1 %v1556_v52, %s9262_s12  ;;  %v846_v52 = vmul.bf16 %v844_v62, %v821_v51  ;;  %v1501_v53 = vrot.slane %v1494_v50, %v9448_v15  ;;  %v9840_v35 = vrot.slane %v2326_v31, %v9443_v12  ;;  %v2486_v39 = vrot.slane %v9125_v17, %v9448_v15  ;;  %v8631_v48 = vld.sshfl [vmem:[%s12926_s3] sm:$0xa0 pattern:$0x75316420] }
  0xef   : > { %v564_v55 = vrot.slane %v556_v26, %v9448_v15  ;;  %v973_v7 = vrot.slane %v966_v21, %v9448_v15  ;;  %v9843_v36 = vrot.slane %v2372_v32, %v9443_v12  ;;  %v2549_v42 = vrot.slane %v8627_v40, %v9443_v12  ;;  %v8632_v50 = vld.sshfl [vmem:[%s12926_s3 + $0x4] sm:$0x20 pattern:$0x75316420]  ;;  %v369_v40 = vld [vmem:[#allocation2] sm:$0x11] }
  0xf0   : > { %2198 = vrot.lane.b32.xlu0 %v2197_v1, %s9257_s29  ;;  %s12997_s29 = smov 125   ;;  %v810_v1 = vshll.u32 %v808_v5, 16  ;;  %v2442_v41 = vshrl.u32 %v9840_v35, 16  ;;  %v2487_v20 = vcombine.low %v2486_v39, %v2486_v39  ;;  %v2610_v47 = vrot.slane %v8629_v43, %v9443_v12 }
  0xf1   : > { %v571_v22 = vrot.slane %v564_v55, %v9448_v15  ;;  %v2711_v62 = vcombine.high %v8632_v50, %v8632_v50  ;;  %vm12969_vm14 = vcmask 1041409   ;;  %v13120_v0 = vmov 0  ;;  %v8637_v10 = vld.sshfl [vmem:[%s12926_s3 + $0x8] sm:$0x5 pattern:$0x75316420] }
  0xf2   : > { %465 = vrot.lane.b32.xlu1 %v464_v8, %s12953_s14  ;;  %v848_v8 = vcombine.low %v846_v52, %v846_v52  ;;  %v812_v2 = vrot.slane %v810_v1, 6  ;;  %v2494_v18 = vrot.slane %v2487_v20, %v9448_v15  ;;  %v2611_v49 = vcombine.high %v2610_v47, %v2610_v47  ;;  %vm9900_vm13 = vmand %vm12969_vm14, %vm12973_vm10  ;;  %s9272_s14 = smov 39   ;;  %v1898_v47 = vld [vmem:[#allocation2 + $0x10] sm:$0x11] }
  0xf3   : > { %v573_v11 = vshll.u32 %v571_v22, 16  ;;  %v13121_v0 = vsel %vm9900_vm13, 4294967295, %v13120_v0  ;;  %vm2101_vm1 = vmor %vm2100_vm7, %vm9900_vm13  ;;  %v9923_v21 = vrot.slane %v8637_v10, %v9443_v12  ;;  %vm2145_vm7 = vcmask 1042177  }
  0xf4   : > { %1672 = vrot.lane.b32.xlu0 %v1671_v63, %s9261_s11  ;;  %s13000_s11 = smov 122   ;;  %v1037_v63 = vshll.u32 %v1035_v56, 16  ;;  %v855_v61 = vrot.slane %v848_v8, %v9448_v15  ;;  %v2613_v38 = vshrl.u32 %v2611_v49, 16  ;;  %v2102_v8 = vld [vmem:[#allocation2 + $0x10] sm:$0x22]  ;;  %vm12976_vm14 = vcmask 982016   ;;  %vm9930_vm2 = vmand %vm2145_vm7, %vm12973_vm10 }
  0xf5   : > { %v575_v23 = vrot.slane %v573_v11, 7  ;;  %vm12978_vm11 = vsmask.f32 7938  ;;  %vm365_vm3 = vcmask 1036292   ;;  %v13126_v44 = vmov 0 }
  0xf6   : > { %1185 = vrot.lane.b32.xlu1 %v1183_v4, %s12955_s26  ;;  %v1039_v14 = vrot.slane %v1037_v63, 5  ;;  %v856_v24 = vcombine.low %v855_v61, %v855_v61  ;;  %v747_v4 = vrot.slane %v740_v16, %v9448_v15  ;;  %s9268_s26 = smov 35   ;;  %vm1895_vm10 = vcmask 856068  }
  0xf7   : > { %vm12979_vm5 = vcmask 1039360   ;;  %v13135_v43 = vmov 0  ;;  %v13154_v61 = vmov 0  ;;  %vm2201_vm13 = vcmask 777216  }
  0xf8   : > { %2304 = vrot.lane.b32.xlu0 %v2303_v27, %s9263_s9  ;;  %v863_v30 = vrot.slane %v856_v24, %v9448_v15  ;;  %v749_v27 = vshll.u32 %v747_v4, 16  ;;  %v1096_v24 = vld [vmem:[#allocation2 + $0x8] sm:$0x11] }
  0xfa   : > { %637 = vrot.lane.b32.xlu1 %v636_v29, %s12997_s29  ;;  %v751_v28 = vrot.slane %v749_v27, 6  ;;  %v975_v29 = vshll.u32 %v973_v7, 16  ;;  %v9939_v7 = vshrl.u32 %v9644_v34, 16 }
  0xfc   : > { %v977_v33 = vrot.slane %v975_v29, 5 }
  0xfe   : > { %920 = vrot.lane.b32.xlu1 %v919_v37, %s13000_s11  ;;  %v2381_v37 = vshrl.u32 %v9843_v36, 16 }
 0x102   : > { %1289 = vrot.lane.b32.xlu1 %v1288_v46, %s9259_s30  ;;  %s12959_s30 = smov 123   ;;  %v2550_v46 = vcombine.high %v2549_v42, %v2549_v42 }
 0x104   : > { %v9870_v26 = vshrl.u32 %v2550_v46, 16 }
 0x106   : > { %1395 = vrot.lane.b32.xlu1 %v1394_v3, %s9260_s7  ;;  %v2658_v3 = vcombine.high %v8631_v48, %v8631_v48  ;;  %s9270_s7 = smov 37  }
 0x108   : > { %v2665_v51 = vrot.slane %v2658_v3, %v9443_v12 }
 0x10a   : > { %1502 = vrot.lane.b32.xlu1 %v1501_v53, %s9262_s12  ;;  %s12996_s12 = smov 121   ;;  %v9881_v52 = vcombine.high %v2665_v51, %v2665_v51  ;;  %v2718_v53 = vrot.slane %v2711_v62, %v9443_v12 }
 0x10c   : > { %v9889_v59 = vcombine.high %v2718_v53, %v2718_v53  ;;  %v2767_v25 = vshrl.u32 %v9881_v52, 16  ;;  %v13142_v53 = vmov 0 }
 0x10e   : > { %813 = vrot.lane.b32.xlu1 %v812_v2, %s12959_s30  ;;  %v2828_v63 = vshrl.u32 %v9889_v59, 16 }
 0x112   : > { %1040 = vrot.lane.b32.xlu1 %v1039_v14, %s12996_s12 }
 0x116   : > { %576 = vrot.lane.b32.xlu1 %v575_v23, %s12997_s29  ;;  %s13007_s29 = smov 102  }
 0x11a   : > { %864 = vrot.lane.b32.xlu1 %v863_v30, %s13000_s11  ;;  %s13006_s11 = smov 98  }
 0x11e   : > { %752 = vrot.lane.b32.xlu1 %v751_v28, %s12959_s30  ;;  %s13011_s30 = smov 64  }
 0x122   : > { %978 = vrot.lane.b32.xlu1 %v977_v33, %s12996_s12  ;;  %s13008_s12 = smov 85  }
 0x126   : > { %2334 = vrot.lane.b32.xlu1 %v9840_v35, %s9245_s10  ;;  %s9271_s10 = smov 38   ;;  %v877_v35 = vld [vmem:[#allocation2] sm:$0x88] }
 0x12a   : > { %2385 = vrot.lane.b32.xlu1 %v2381_v37, %s9268_s26 }
 0x12e   : > { %2446 = vrot.lane.b32.xlu1 %v2442_v41, %s9268_s26  ;;  %s13009_s26 = smov 72  }
 0x132   : > { %2495 = vrot.lane.b32.xlu1 %v2494_v18, %s9269_s21  ;;  %v9875_v5 = vpop.permute.xlu0 %2045 }
 0x136   : > { %2556 = vrot.lane.b32.xlu1 %v9870_v26, %s9270_s7 }
 0x13a   : > { %v9879_v55 = vpop.permute.xlu0 %2142  ;;  %2617 = vrot.lane.b32.xlu1 %v2613_v38, %s9270_s7  ;;  %s13020_s7 = smov 40  }
 0x13e   : > { %v9884_v1 = vpop.permute.xlu1 %1135  ;;  %v9886_v56 = vpop.permute.xlu0 %1944  ;;  %2667 = vrot.lane.b32.xlu1 %v9881_v52, %s9271_s10 }
 0x142   : > { %v9891_v60 = vpop.permute.xlu0 %1994  ;;  %2720 = vrot.lane.b32.xlu1 %v9889_v59, %s9271_s10  ;;  %v9895_v22 = vpop.permute.xlu1 %519  ;;  %s13021_s10 = smov 49  }
 0x146   : > { %v2094_v2 = vpop.permute.xlu0 %2093  ;;  %2771 = vrot.lane.b32.xlu1 %v2767_v25, %s9272_s14 }
 0x147   : > { %v2095_v9 = vrot.slane %v2094_v2, 4 }
 0x148   : > { %v9910_v11 = vpop.permute.xlu1 %1236 }
 0x149   : > { %v2097_v16 = vsel %vm12971_vm0, %v2094_v2, %v2095_v9  ;;  %vm12977_vm0 = vsmask.f32 7954 }
 0x14a   : > { %v2103_v13 = vsel %vm2101_vm1, %v2097_v16, %v2102_v8  ;;  %v9913_v14 = vpop.permute.xlu0 %1835  ;;  %2832 = vrot.lane.b32.xlu1 %v2828_v63, %s9272_s14  ;;  %vm1095_vm1 = vmor %vm9916_vm12, %vm9667_vm8  ;;  %s9275_s14 = smov 81  }
 0x14b   : > { %2104 = vst [vmem:[#allocation2 + $0x10] sm:$0x22] %v2103_v13  ;;  %vm9944_vm12 = vmand %vm12975_vm15, %vm12978_vm11  ;;  %vm13131_vm15 = vsmask.f32 4352 }
 0x14c   : > { %v1088_v23 = vpop.permute.xlu1 %1087  ;;  %v13127_v44 = vsel %vm9944_vm12, 4294967295, %v13126_v44  ;;  %vm9949_vm7 = vmand %vm365_vm3, %vm12977_vm0  ;;  %vm13134_vm0 = vsmask.f32 256 }
 0x14d   : > { %v1089_v4 = vrot.slane %v1088_v23, 4  ;;  %13128 = vst [vmem:[#allocation10_spill] sm:$0xff] %v13127_v44  ;;  %vm368_vm3 = vmor %vm9949_vm7, %vm9944_vm12  ;;  %vm474_vm7 = vcmask 1029125  }
 0x14e   : > { %v9934_v27 = vpop.permute.xlu0 %2255  ;;  %2879 = vrot.lane.b32.xlu1 %v9923_v21, %s13020_s7 }
 0x14f   : > { %v1091_v57 = vsel %vm12976_vm14, %v1088_v23, %v1089_v4  ;;  %vm9963_vm14 = vmand %vm1895_vm10, %vm13131_vm15  ;;  %vm13138_vm15 = vsmask.f32 5376 }
 0x150   : > { %v1097_v28 = vsel %vm1095_vm1, %v1091_v57, %v1096_v24  ;;  %v417_v32 = vpop.permute.xlu1 %416  ;;  %vm1138_vm1 = vcmask 1041344   ;;  %vm1897_vm10 = vmor %vm9963_vm14, %vm9667_vm8  ;;  %vm1191_vm14 = vcmask 913412   ;;  %v13157_v24 = vmov 0 }
 0x151   : > { %1098 = vst [vmem:[#allocation2 + $0x8] sm:$0x11] %v1097_v28  ;;  %vm9969_vm11 = vmand %vm1138_vm1, %vm13134_vm0  ;;  %vm419_vm0 = vcmask 1041400  }
 0x152   : > { %v2147_v31 = vld [vmem:[#allocation2 + $0x14] sm:$0x2]  ;;  %v358_v33 = vpop.permute.xlu0 %357  ;;  %3084 = vrot.lane.b32.xlu1 %v9939_v7, %s13021_s10  ;;  %v13136_v43 = vsel %vm9969_vm11, 4294967295, %v13135_v43  ;;  %vm9985_vm1 = vmand %vm474_vm7, %vm13138_vm15  ;;  %vm13145_vm15 = vsmask.f32 7954  ;;  %s9288_s10 = smov 82  }
 0x153   : > { %v2148_v17 = vsel %vm9930_vm2, %v9879_v55, %v2147_v31  ;;  %v359_v39 = vrot.slane %v358_v33, 4  ;;  %13137 = vst [vmem:[#allocation11_spill] sm:$0xff] %v13136_v43  ;;  %vm1892_vm2 = vcmask 859136   ;;  %vm10005_vm6 = vmand %vm1191_vm14, %vm13145_vm15  ;;  %vm12994_vm14 = vsmask.f32 7942 }
 0x154   : > { %2149 = vst [vmem:[#allocation2 + $0x14] sm:$0x2] %v2148_v17  ;;  %v9979_v3 = vpop.permute.xlu1 %1343  ;;  %vm12992_vm15 = vsmask.f32 7958 }
 0x155   : > { %v361_v42 = vsel %vm12979_vm5, %v358_v33, %v359_v39  ;;  %v478_v33 = vld [vmem:[#allocation2] sm:$0x22] }
 0x156   : > { %v370_v18 = vsel %vm368_vm3, %v361_v42, %v369_v40  ;;  %v1890_v46 = vpop.permute.xlu0 %1889  ;;  %4897 = vrot.lane.b32.xlu1 %v9939_v7, %s9275_s14  ;;  %vm13141_vm3 = vsmask.f32 7938 }
 0x157   : > { %371 = vst [vmem:[#allocation2] sm:$0x11] %v370_v18  ;;  %v1891_v48 = vrot.slane %v1890_v46, 4  ;;  %vm9994_vm5 = vmand %vm419_vm0, %vm13141_vm3  ;;  %vm12993_vm3 = vsmask.f32 3328 }
 0x158   : > { %v1140_v49 = vld [vmem:[#allocation2 + $0xc] sm:$0x1]  ;;  %v13143_v53 = vsel %vm9994_vm5, 4294967295, %v13142_v53  ;;  %vm10029_vm8 = vmand %vm13153_vm9, %vm12993_vm3  ;;  %vm2310_vm3 = vcmask 768006   ;;  %v1681_v18 = vld [vmem:[#allocation2 + $0x8] sm:$0x88] }
 0x159   : > { %v1141_v50 = vsel %vm9969_vm11, %v9884_v1, %v1140_v49  ;;  %v1893_v38 = vsel %vm1892_vm2, %v1890_v46, %v1891_v48  ;;  %13144 = vst [vmem:[#allocation12_spill] sm:$0xff] %v13143_v53  ;;  %vm1947_vm2 = vcmask 1041224   ;;  %vm13148_vm11 = vsmask.f32 256 }
 0x15a   : > { %1142 = vst [vmem:[#allocation2 + $0xc] sm:$0x1] %v1141_v50  ;;  %v1899_v62 = vsel %vm1897_vm10, %v1893_v38, %v1898_v47  ;;  %v9989_v55 = vpop.permute.xlu0 %1728  ;;  %3888 = vrot.lane.b32.xlu1 %v9644_v34, %s13011_s30  ;;  %v9998_v1 = vpop.permute.xlu1 %1448  ;;  %vm2204_vm10 = vcmask 775173   ;;  %vm10016_vm7 = vmand %vm1947_vm2, %vm13148_vm11  ;;  %v13155_v61 = vsel %vm10029_vm8, 4294967295, %v13154_v61  ;;  %vm12995_vm11 = vsmask.f32 7424 }
 0x15b   : > { %1900 = vst [vmem:[#allocation2 + $0x10] sm:$0x11] %v1899_v62  ;;  %vm10023_vm0 = vmand %vm2204_vm10, %vm12992_vm15  ;;  %vm1678_vm2 = vcmask 875527   ;;  %vm2000_vm10 = vcmask 847876   ;;  %v2207_v57 = vld [vmem:[#allocation2 + $0x10] sm:$0x22] }
 0x15c   : > { %vm10049_vm15 = vmand %vm1678_vm2, %vm12995_vm11  ;;  %v2313_v62 = vld [vmem:[#allocation2 + $0x10] sm:$0x44]  ;;  %s9291_s30 = smov 87  }
 0x15e   : > { %v421_v25 = vld [vmem:[#allocation2 + $0x4] sm:$0x1]  ;;  %v10009_v2 = vpop.permute.xlu0 %1781  ;;  %4696 = vrot.lane.b32.xlu1 %v9923_v21, %s13009_s26  ;;  %s13029_s26 = smov 48  }
 0x15f   : > { %v422_v9 = vsel %vm9994_vm5, %v417_v32, %v421_v25  ;;  %vm13156_vm5 = vcmask 1041409   ;;  %v1996_v32 = vrot.slane %v9891_v60, 4 }
 0x160   : > { %423 = vst [vmem:[#allocation2 + $0x4] sm:$0x1] %v422_v9  ;;  %v10020_v16 = vpop.permute.xlu1 %1557  ;;  %vm10035_vm4 = vmand %vm13156_vm5, %vm12994_vm14  ;;  %vm12998_vm14 = vcmask 850944   ;;  %vm13162_vm5 = vsmask.f32 7954 }
 0x161   : > { %v13158_v24 = vsel %vm10035_vm4, 4294967295, %v13157_v24  ;;  %vm10061_vm9 = vmand %vm2000_vm10, %vm13162_vm5  ;;  %v1998_v49 = vsel %vm12998_vm14, %v9891_v60, %v1996_v32  ;;  %v1194_v60 = vld [vmem:[#allocation2 + $0x8] sm:$0x11] }
 0x162   : > { %v1949_v23 = vld [vmem:[#allocation2 + $0x14] sm:$0x1]  ;;  %13159 = vst [vmem:[#allocation13_spill] sm:$0xff] %v13158_v24  ;;  %v2199_v4 = vpop.permute.xlu0 %2198  ;;  %5699 = vrot.lane.b32.xlu1 %v9644_v34, %s9251_s6  ;;  %vm13165_vm2 = vmor %vm10023_vm0, %vm10035_vm4  ;;  %vm13167_vm0 = vnez %v13121_v0 }
 0x163   : > { %v1950_v30 = vsel %vm10016_vm7, %v9886_v56, %v1949_v23  ;;  %v2200_v28 = vrot.slane %v2199_v4, 4  ;;  %vm1680_vm10 = vmor %vm10049_vm15, %vm10029_vm8  ;;  %vm13169_vm7 = vsmask.f32 6400 }
 0x164   : > { %v466_v29 = vpop.permute.xlu1 %465  ;;  %1951 = vst [vmem:[#allocation2 + $0x14] sm:$0x1] %v1950_v30  ;;  %vm13168_vm5 = vmor %vm9985_vm1, %vm13167_vm0  ;;  %vm2258_vm1 = vcmask 1042169  }
 0x165   : > { %v467_v17 = vrot.slane %v466_v29, 4  ;;  %v2202_v56 = vsel %vm2201_vm13, %v2199_v4, %v2200_v28  ;;  %vm13166_vm13 = vcmask 1031168   ;;  %vm10084_vm11 = vmand %vm2310_vm3, %vm13169_vm7  ;;  %vm2307_vm3 = vcmask 769024  }
 0x166   : > { %v2208_v40 = vsel %vm13165_vm2, %v2202_v56, %v2207_v57  ;;  %v1673_v20 = vpop.permute.xlu0 %1672  ;;  %5277 = vrot.lane.b32.xlu1 %v9870_v26, %s13008_s12  ;;  %vm12999_vm2 = vcmask 916480   ;;  %vm2002_vm15 = vmor %vm10061_vm9, %vm9944_vm12  ;;  %vm13173_vm7 = vnez %v13109_v6  ;;  %v13180_v57 = vmov 0  ;;  %v1298_v26 = vld [vmem:[#allocation2 + $0x8] sm:$0x22]  ;;  %s13023_s12 = smov 70  }
 0x167   : > { %v469_v42 = vsel %vm13166_vm13, %v466_v29, %v467_v17  ;;  %2209 = vst [vmem:[#allocation2 + $0x10] sm:$0x22] %v2208_v40  ;;  %v1674_v46 = vrot.slane %v1673_v20, 4  ;;  %vm13172_vm13 = vcmask 875520   ;;  %vm1295_vm9 = vcmask 906245  }
 0x168   : > { %v479_v47 = vsel %vm13168_vm5, %v469_v42, %v478_v33  ;;  %v1186_v48 = vpop.permute.xlu1 %1185  ;;  %v8784_v56 = vld.sshfl [vmem:[%s12926_s3] sm:$0xa0 pattern:$0x75316420] }
 0x169   : > { %480 = vst [vmem:[#allocation2] sm:$0x22] %v479_v47  ;;  %v1187_v50 = vrot.slane %v1186_v48, 4  ;;  %v1676_v38 = vsel %vm13172_vm13, %v1673_v20, %v1674_v46  ;;  %vm1731_vm13 = vcmask 1044315  }
 0x16a   : > { %v1682_v51 = vsel %vm1680_vm10, %v1676_v38, %v1681_v18  ;;  %6290 = vrot.lane.b32.xlu1 %v9881_v52, %s13007_s29  ;;  %v2305_v25 = vpop.permute.xlu0 %2304  ;;  %vm13174_vm10 = vmor %vm10005_vm6, %vm9944_vm12  ;;  %vm13178_vm6 = vsmask.f32 1280  ;;  %vm13194_vm12 = vsmask.f32 7938  ;;  %s9282_s29 = smov 51  }
 0x16b   : > { %v1189_v9 = vsel %vm12999_vm2, %v1186_v48, %v1187_v50  ;;  %v2003_v10 = vld [vmem:[#allocation2 + $0x10] sm:$0x11]  ;;  %1683 = vst [vmem:[#allocation2 + $0x8] sm:$0x88] %v1682_v51  ;;  %v2306_v13 = vrot.slane %v2305_v25, 4  ;;  %v1783_v48 = vrot.slane %v10009_v2, 4 }
 0x16c   : > { %v1195_v52 = vsel %vm13174_vm10, %v1189_v9, %v1194_v60  ;;  %v2004_v23 = vsel %vm2002_vm15, %v1998_v49, %v2003_v10  ;;  %v10112_v4 = vpop.permute.xlu1 %637  ;;  %vm13175_vm2 = vsmask.f32 7942  ;;  %vm13179_vm10 = vcmask 1042417  }
 0x16d   : > { %vm10116_vm5 = vmand %vm2258_vm1, %vm13175_vm2  ;;  %1196 = vst [vmem:[#allocation2 + $0x8] sm:$0x11] %v1195_v52  ;;  %v2308_v8 = vsel %vm2307_vm3, %v2305_v25, %v2306_v13  ;;  %vm13184_vm15 = vsmask.f32 7938  ;;  %vm13185_vm1 = vcmask 1041280   ;;  %v13198_v50 = vmov 0 }
 0x16e   : > { %2005 = vst [vmem:[#allocation2 + $0x10] sm:$0x11] %v2004_v23  ;;  %vm10123_vm14 = vmand %vm13179_vm10, %vm13178_vm6  ;;  %v2260_v28 = vld [vmem:[#allocation2 + $0x14] sm:$0x2]  ;;  %5910 = vrot.lane.b32.xlu1 %v9843_v36, %s13006_s11  ;;  %vm2048_vm6 = vcmask 1041216   ;;  %s9281_s11 = smov 115  }
 0x16f   : > { %v13181_v57 = vsel %vm10123_vm14, 4294967295, %v13180_v57  ;;  %vm13183_vm2 = vmor %vm10084_vm11, %vm13173_vm7  ;;  %v2261_v32 = vsel %vm10116_vm5, %v9934_v27, %v2260_v28  ;;  %vm13188_vm10 = vsmask.f32 3328  ;;  %vm13014_vm5 = vsmask.f32 7950 }
 0x170   : > { %13182 = vst [vmem:[#allocation14_spill] sm:$0xff] %v13181_v57  ;;  %v2314_v29 = vsel %vm13183_vm2, %v2308_v8, %v2313_v62  ;;  %vm10136_vm3 = vmand %vm13185_vm1, %vm13184_vm15  ;;  %v524_v33 = vld [vmem:[#allocation2 + $0x4] sm:$0x2]  ;;  %v10143_v17 = vpop.permute.xlu1 %920  ;;  %vm13191_vm2 = vsmask.f32 5376 }
 0x171   : > { %2315 = vst [vmem:[#allocation2 + $0x10] sm:$0x44] %v2314_v29  ;;  %2262 = vst [vmem:[#allocation2 + $0x14] sm:$0x2] %v2261_v32  ;;  %v525_v39 = vsel %vm10123_vm14, %v9895_v22, %v524_v33  ;;  %vm13013_vm1 = vsmask.f32 7966 }
 0x172   : > { %vm10147_vm11 = vmand %vm1731_vm13, %vm13188_vm10  ;;  %526 = vst [vmem:[#allocation2 + $0x4] sm:$0x2] %v525_v39  ;;  %v1733_v20 = vld [vmem:[#allocation2 + $0xc] sm:$0x8]  ;;  %6918 = vrot.lane.b32.xlu1 %v2381_v37, %s9281_s11  ;;  %vm1787_vm13 = vcmask 867335  }
 0x173   : > { %vm10155_vm15 = vmand %vm1295_vm9, %vm13191_vm2  ;;  %v8638_v22 = vld.sshfl [vmem:[%s12926_s3 + $0xc] sm:$0x1 pattern:$0x75316420]  ;;  %v1734_v42 = vsel %vm10147_vm11, %v9989_v55, %v1733_v20  ;;  %vm1784_vm11 = vcmask 867328  }
 0x174   : > { %vm10160_vm8 = vmand %vm2048_vm6, %vm13194_vm12  ;;  %v8783_v18 = vld.sshfl [vmem:[%s12926_s3] sm:$0x20 pattern:$0x75316420]  ;;  %v1241_v46 = vld [vmem:[#allocation2 + $0xc] sm:$0x1]  ;;  %v1290_v36 = vpop.permute.xlu1 %1289  ;;  %v1785_v60 = vsel %vm1784_vm11, %v10009_v2, %v1783_v48 }
 0x175   : > { %v2050_v47 = vld [vmem:[#allocation2 + $0x14] sm:$0x1]  ;;  %vm1292_vm12 = vcmask 908288   ;;  %vm1297_vm9 = vmor %vm10155_vm15, %vm13167_vm0  ;;  %1735 = vst [vmem:[#allocation2 + $0xc] sm:$0x8] %v1734_v42  ;;  %v1242_v37 = vsel %vm10136_vm3, %v9910_v11, %v1241_v46  ;;  %v1291_v49 = vrot.slane %v1290_v36, 4  ;;  %v7998_v38 = vcombine.high %v8783_v18, %v8783_v18 }
 0x176   : > { %v2051_v55 = vsel %vm10160_vm8, %v9875_v5, %v2050_v47  ;;  %vm13197_vm6 = vcmask 1043459   ;;  %1243 = vst [vmem:[#allocation2 + $0xc] sm:$0x1] %v1242_v37  ;;  %vm10195_vm3 = vmand %vm1787_vm13, %vm13013_vm1  ;;  %3356 = vrot.lane.b32.xlu1 %v2442_v41, %s9282_s29  ;;  %v10203_v5 = vrot.slane %v8638_v22, %v9443_v12  ;;  %vm1508_vm8 = vcmask 890886   ;;  %v1511_v52 = vld [vmem:[#allocation2 + $0x8] sm:$0x44] }
 0x177   : > { %vm10189_vm10 = vmand %vm13197_vm6, %vm13014_vm5  ;;  %2052 = vst [vmem:[#allocation2 + $0x14] sm:$0x1] %v2051_v55  ;;  %v1293_v51 = vsel %vm1292_vm12, %v1290_v36, %v1291_v49  ;;  %vm1346_vm13 = vcmask 1042297   ;;  %vm13203_vm6 = vsmask.f32 6400  ;;  %v8005_v41 = vrot.slane %v7998_v38, %v9443_v12 }
 0x178   : > { %v13199_v50 = vsel %vm10189_vm10, 4294967295, %v13198_v50  ;;  %v1299_v62 = vsel %vm1297_vm9, %v1293_v51, %v1298_v26  ;;  %v1396_v25 = vpop.permute.xlu1 %1395  ;;  %vm1789_vm2 = vmor %vm10195_vm3, %vm10189_vm10  ;;  %v8695_v2 = vld.sshfl [vmem:[%s12926_s3 + $0x4] sm:$0x1 pattern:$0x75316420]  ;;  %vm1505_vm15 = vcmask 891904   ;;  %v8046_v18 = vcombine.high %v8784_v56, %v8784_v56 }
 0x179   : > { %13200 = vst [vmem:[#allocation15_spill] sm:$0xff] %v13199_v50  ;;  %1300 = vst [vmem:[#allocation2 + $0x8] sm:$0x22] %v1299_v62  ;;  %vm13206_vm9 = vsmask.f32 1280  ;;  %v10234_v30 = vcombine.high %v8005_v41, %v8005_v41  ;;  %v10237_v8 = vrot.slane %v8695_v2, %v9443_v12  ;;  %vm1838_vm3 = vcmask 1044307  }
 0x17a   : > { %vm10217_vm1 = vmand %vm1508_vm8, %vm13203_vm6  ;;  %2931 = vrot.lane.b32.xlu1 %v10203_v5, %s13020_s7  ;;  %vm13207_vm6 = vsmask.f32 7958  ;;  %v1397_v27 = vrot.slane %v1396_v25, 4  ;;  %v9006_v46 = vunpack.i.l.bf16 %v9862_v45  ;;  %v13220_v38 = vmov 0  ;;  %v588_v51 = vld [vmem:[#allocation2] sm:$0x22] }
 0x17b   : > { %vm1510_vm12 = vmor %vm10217_vm1, %vm13173_vm7  ;;  %vm1401_vm1 = vcmask 898053   ;;  %v13234_v56 = vmov 0  ;;  %s9287_s7 = smov 71  }
 0x17c   : > { %v1790_v9 = vld [vmem:[#allocation2 + $0x8] sm:$0x88]  ;;  %v1503_v13 = vpop.permute.xlu1 %1502  ;;  %vm1347_vm11 = vmand %vm1346_vm13, %vm13206_vm9  ;;  %vm584_vm13 = vcmask 1020933   ;;  %v1587_v11 = vrot.slane %v9006_v46, 4 }
 0x17d   : > { %v1791_v10 = vsel %vm1789_vm2, %v1785_v60, %v1790_v9  ;;  %v1504_v23 = vrot.slane %v1503_v13, 4  ;;  %vm1839_vm8 = vmand %vm1838_vm3, %vm13014_vm5  ;;  %vm1560_vm2 = vcmask 1043306   ;;  %v2362_v9 = vld [vmem:[%s9453_s22] sm:$0x3] }
 0x17e   : > { %1792 = vst [vmem:[#allocation2 + $0x8] sm:$0x88] %v1791_v10  ;;  %2976 = vrot.lane.b32.xlu1 %v9644_v34, %s13029_s26  ;;  %v10246_v34 = vshrl.u32 %v10237_v8, 16  ;;  %vm13213_vm3 = vmmov %vm13207_vm6 }
 0x17f   : > { %v1506_v28 = vsel %vm1505_vm15, %v1503_v13, %v1504_v23  ;;  %vm10252_vm15 = vmand %vm1401_vm1, %vm13207_vm6  ;;  %vm13016_vm6 = vsmask.f32 7946 }
 0x180   : > { %v1348_v29 = vld [vmem:[#allocation2 + $0xc] sm:$0x2]  ;;  %v1512_v31 = vsel %vm1510_vm12, %v1506_v28, %v1511_v52  ;;  %v10239_v32 = vpop.permute.xlu1 %813  ;;  %vm13210_vm12 = vsmask.f32 2304  ;;  %vm10265_vm5 = vmand %vm584_vm13, %vm13213_vm3  ;;  %vm1591_vm13 = vcmask 882694  }
 0x181   : > { %v1349_v33 = vsel %vm1347_vm11, %v9979_v3, %v1348_v29  ;;  %1513 = vst [vmem:[#allocation2 + $0x8] sm:$0x44] %v1512_v31  ;;  %vm10260_vm9 = vmand %vm1560_vm2, %vm13210_vm12  ;;  %vm1398_vm11 = vcmask 900096   ;;  %vm873_vm2 = vcmask 998407   ;;  %vm13018_vm12 = vsmask.f32 7962 }
 0x182   : > { %1350 = vst [vmem:[#allocation2 + $0xc] sm:$0x2] %v1349_v33  ;;  %8007 = vrot.lane.b32.xlu1 %v10234_v30, %s9238_s13  ;;  %vm1403_vm1 = vmor %vm10252_vm15, %vm10035_vm4  ;;  %v1399_v37 = vsel %vm1398_vm11, %v1396_v25, %v1397_v27  ;;  %vm13216_vm15 = vsmask.f32 7424  ;;  %v764_v3 = vld [vmem:[#allocation2] sm:$0x44] }
 0x183   : > { %vm10301_vm3 = vmand %vm1591_vm13, %vm13018_vm12 }
 0x184   : > { %v10256_v40 = vpop.permute.xlu1 %1040  ;;  %vm13226_vm14 = vmor %vm10265_vm5, %vm10035_vm4  ;;  %vm640_vm5 = vcmask 1042409  }
 0x185   : > { %v1840_v39 = vld [vmem:[#allocation2 + $0xc] sm:$0x8] }
 0x186   : > { %v1841_v20 = vsel %vm1839_vm8, %v9913_v14, %v1840_v39  ;;  %4955 = vrot.lane.b32.xlu1 %v10246_v34, %s9275_s14  ;;  %vm10284_vm8 = vmand %vm873_vm2, %vm13216_vm15  ;;  %s9284_s14 = smov 55   ;;  %vm760_vm2 = vcmask 1005574   ;;  %vm1588_vm15 = vcmask 883712  }
 0x187   : > { %1842 = vst [vmem:[#allocation2 + $0xc] sm:$0x8] %v1841_v20  ;;  %vm10315_vm13 = vmand %vm760_vm2, %vm13018_vm12  ;;  %v1589_v10 = vsel %vm1588_vm15, %v9006_v46, %v1587_v11  ;;  %vm13030_vm12 = vcmask 1006592  }
 0x188   : > { %v1562_v14 = vld [vmem:[#allocation2 + $0xc] sm:$0x4]  ;;  %v577_v47 = vpop.permute.xlu1 %576  ;;  %v8697_v20 = vld.sshfl [vmem:[%s12926_s3] sm:$0x50 pattern:$0x75316420] }
 0x189   : > { %v1404_v36 = vld [vmem:[#allocation2 + $0x8] sm:$0x22]  ;;  %v1563_v55 = vsel %vm10260_vm9, %v10020_v16, %v1562_v14  ;;  %v578_v48 = vrot.slane %v577_v47, 4  ;;  %v8053_v16 = vrot.slane %v8046_v18, %v9443_v12  ;;  %vm13219_vm9 = vcmask 1042434   ;;  %v2316_v14 = vld [vmem:[%s9467_s5] sm:$0x1] }
 0x18a   : > { %v1405_v26 = vsel %vm1403_vm1, %v1399_v37, %v1404_v36  ;;  %1564 = vst [vmem:[#allocation2 + $0xc] sm:$0x4] %v1563_v55  ;;  %3740 = vrot.lane.b32.xlu1 %v2828_v63, %s9284_s14  ;;  %vm10294_vm11 = vmand %vm13219_vm9, %vm13016_vm6  ;;  %vm13223_vm1 = vcmask 1022976   ;;  %vm13019_vm9 = vcmask 998400   ;;  %vm1451_vm6 = vcmask 1042289  }
 0x18b   : > { %1406 = vst [vmem:[#allocation2 + $0x8] sm:$0x22] %v1405_v26  ;;  %v13221_v38 = vsel %vm10294_vm11, 4294967295, %v13220_v38  ;;  %v580_v62 = vsel %vm13223_vm1, %v577_v47, %v578_v48  ;;  %vm13227_vm1 = vnez %v13155_v61  ;;  %v10321_v2 = vcombine.high %v8053_v16, %v8053_v16  ;;  %vm763_vm15 = vmor %vm10315_vm13, %vm10294_vm11 }
 0x18c   : > { %13222 = vst [vmem:[#allocation16_spill] sm:$0xff] %v13221_v38  ;;  %v589_v63 = vsel %vm13226_vm14, %v580_v62, %v588_v51  ;;  %v865_v60 = vpop.permute.xlu1 %864  ;;  %vm876_vm7 = vmor %vm10284_vm8, %vm13227_vm1  ;;  %vm13230_vm8 = vsmask.f32 7942  ;;  %vm13237_vm13 = vsmask.f32 3328  ;;  %v4994_v36 = vcombine.high %v8697_v20, %v8697_v20 }
 0x18d   : > { %590 = vst [vmem:[#allocation2] sm:$0x22] %v589_v63  ;;  %v866_v41 = vrot.slane %v865_v60, 4  ;;  %vm1593_vm14 = vmor %vm10301_vm3, %vm10294_vm11  ;;  %v10363_v47 = vshrl.u32 %v10321_v2, 16  ;;  %v9007_v37 = vunpack.i.h.bf16 %v9862_v45 }
 0x18e   : > { %4534 = vrot.lane.b32.xlu1 %v9889_v59, %s13023_s12  ;;  %vm10329_vm2 = vmand %vm1451_vm6, %vm13230_vm8  ;;  %vm1620_vm6 = vcmask 1043298   ;;  %v10378_v45 = vrot.slane %v4994_v36, %v9443_v12  ;;  %v8713_v51 = vld.sshfl [vmem:[%s12926_s3 + $0x4] sm:$0x20 pattern:$0x75316420]  ;;  %s13024_s12 = smov 97  }
 0x18f   : > { %v868_v13 = vsel %vm13019_vm9, %v865_v60, %v866_v41  ;;  %vm13233_vm3 = vmmov %vm13230_vm8  ;;  %vm13241_vm8 = vsmask.f32 7946 }
 0x190   : > { %v878_v23 = vsel %vm876_vm7, %v868_v13, %v877_v35  ;;  %v753_v28 = vpop.permute.xlu1 %752  ;;  %vm10338_vm9 = vmand %vm640_vm5, %vm13233_vm3  ;;  %vm923_vm7 = vcmask 1044435   ;;  %vm816_vm5 = vcmask 1043418   ;;  %v2423_v13 = vld [vmem:[%s9467_s5] sm:$0x1] }
 0x191   : > { %v1594_v59 = vld [vmem:[#allocation2 + $0x8] sm:$0x44]  ;;  %879 = vst [vmem:[#allocation2] sm:$0x88] %v878_v23  ;;  %v754_v29 = vrot.slane %v753_v28, 4  ;;  %v13235_v56 = vsel %vm10338_vm9, 4294967295, %v13234_v56  ;;  %vm13242_vm3 = vmmov %vm13241_vm8  ;;  %v5539_v23 = vcombine.high %v8713_v51, %v8713_v51 }
 0x192   : > { %v1453_v31 = vld [vmem:[#allocation2 + $0xc] sm:$0x2]  ;;  %v1595_v33 = vsel %vm1593_vm14, %v1589_v10, %v1594_v59  ;;  %13236 = vst [vmem:[#allocation17_spill] sm:$0xff] %v13235_v56  ;;  %8055 = vrot.lane.b32.xlu1 %v10321_v2, %s9238_s13  ;;  %vm10355_vm14 = vmand %vm923_vm7, %vm13237_vm13  ;;  %s13022_s13 = smov 65   ;;  %v4080_v56 = vld [vmem:[%s9453_s22] sm:$0x3] }
 0x193   : > { %v1454_v39 = vsel %vm10329_vm2, %v9998_v1, %v1453_v31  ;;  %1596 = vst [vmem:[#allocation2 + $0x8] sm:$0x44] %v1595_v33  ;;  %v756_v27 = vsel %vm13030_vm12, %v753_v28, %v754_v29  ;;  %v13238_v1 = vmov 0  ;;  %vm1621_vm2 = vmand %vm1620_vm6, %vm13241_vm8  ;;  %vm13246_vm6 = vsmask.f32 7966 }
 0x194   : > { %1455 = vst [vmem:[#allocation2 + $0xc] sm:$0x2] %v1454_v39  ;;  %v642_v22 = vld [vmem:[#allocation2 + $0x4] sm:$0x2]  ;;  %v765_v42 = vsel %vm763_vm15, %v756_v27, %v764_v3  ;;  %v979_v18 = vpop.permute.xlu1 %978  ;;  %v13239_v1 = vsel %vm10355_vm14, 4294967295, %v13238_v1  ;;  %vm986_vm15 = vcmask 990215   ;;  %vm10371_vm7 = vmand %vm816_vm5, %vm13242_vm3 }
 0x195   : > { %v643_v46 = vsel %vm10338_vm9, %v10112_v4, %v642_v22  ;;  %766 = vst [vmem:[#allocation2] sm:$0x44] %v765_v42  ;;  %13240 = vst [vmem:[#allocation18_spill] sm:$0xff] %v13239_v1  ;;  %vm2388_vm5 = vcmask 285696   ;;  %v980_v35 = vrot.slane %v979_v18, 4  ;;  %vm13031_vm8 = vcmask 990208  }
 0x196   : > { %644 = vst [vmem:[#allocation2 + $0x4] sm:$0x2] %v643_v46  ;;  %3989 = vrot.lane.b32.xlu1 %v9939_v7, %s13022_s13  ;;  %v13243_v7 = vmov 0  ;;  %vm10387_vm13 = vmand %vm986_vm15, %vm13246_vm6  ;;  %vm2501_vm15 = vcmask 752647   ;;  %vm13249_vm3 = vsmask.f32 7424  ;;  %v5546_v46 = vrot.slane %v5539_v23, %v9443_v12 }
 0x197   : > { %v13244_v7 = vsel %vm10371_vm7, 4294967295, %v13243_v7  ;;  %v982_v33 = vsel %vm13031_vm8, %v979_v18, %v980_v35  ;;  %vm10410_vm6 = vmand %vm2501_vm15, %vm13249_vm3  ;;  %v9126_v22 = vld [vmem:[%s9467_s5] ss:$0 sps:$4 sm:$0x11]   ;;  %vm13252_vm15 = vsmask.f32 7950 }
 0x198   : > { %v925_v4 = vld [vmem:[#allocation2 + $0x4] sm:$0x8]  ;;  %v2335_v55 = vpop.permute.xlu1 %2334  ;;  %13245 = vst [vmem:[#allocation19_spill] sm:$0xff] %v13244_v7  ;;  %s13025_s13 = smov 103   ;;  %vm2414_vm12 = vcmask 760832   ;;  %vm2528_vm8 = vcmask 1044195  }
 0x199   : > { %v926_v48 = vsel %vm10355_vm14, %v10143_v17, %v925_v4  ;;  %v2337_v26 = vmul.bf16 %v2335_v55, %v2316_v14  ;;  %v8679_v17 = vld.sshfl [vmem:[%s12926_s3] sm:$0xa pattern:$0x75316420]  ;;  %vm13410_vm14 = vcmask 809984  }
 0x19a   : > { %v1622_v49 = vld [vmem:[#allocation2 + $0xc] sm:$0x4]  ;;  %927 = vst [vmem:[#allocation2 + $0x4] sm:$0x8] %v926_v48  ;;  %4586 = vrot.lane.b32.xlu1 %v10363_v47, %s9287_s7  ;;  %v4364_v52 = vrot.slane %v8679_v17, %v9443_v12  ;;  %v10430_v17 = vcombine.high %v5546_v46, %v5546_v46 }
 0x19b   : > { %v1623_v16 = vsel %vm1621_vm2, %v9007_v37, %v1622_v49  ;;  %v2339_v11 = vcombine.low %v2337_v26, %v2337_v26  ;;  %vm989_vm2 = vmor %vm10387_vm13, %vm10189_vm10  ;;  %vm2498_vm13 = vcmask 752640   ;;  %v2504_v37 = vld [vmem:[#allocation2 + $0x10] sm:$0x88]  ;;  %v2516_v26 = vrot.slane %v9126_v22, %v9448_v15 }
 0x19c   : > { %1624 = vst [vmem:[#allocation2 + $0xc] sm:$0x4] %v1623_v16  ;;  %v818_v62 = vld [vmem:[#allocation2 + $0x4] sm:$0x4]  ;;  %v2386_v63 = vpop.permute.xlu1 %2385  ;;  %v4365_v42 = vcombine.high %v4364_v52, %v4364_v52 }
 0x19d   : > { %v819_v60 = vsel %vm10371_vm7, %v10239_v32, %v818_v62  ;;  %v2346_v41 = vrot.slane %v2339_v11, %v9448_v15  ;;  %v2387_v10 = vrot.slane %v2386_v63, 7  ;;  %v13253_v11 = vmov 0  ;;  %v8701_v22 = vld.sshfl [vmem:[%s12926_s3 + $0x4] sm:$0x10 pattern:$0x75316420] }
 0x19e   : > { %820 = vst [vmem:[#allocation2 + $0x4] sm:$0x4] %v819_v60  ;;  %5002 = vrot.lane.b32.xlu1 %v10378_v45, %s9288_s10  ;;  %v10428_v49 = vshrl.u32 %v4365_v42, 16  ;;  %v2533_v60 = vld [vmem:[%s9453_s22] sm:$0x3] }
 0x19f   : > { %v2389_v32 = vsel %vm2388_vm5, %v2387_v10, %v2386_v63  ;;  %v2353_v28 = vrot.slane %v2346_v41, %v9448_v15  ;;  %vm1043_vm5 = vcmask 1044427   ;;  %v2517_v10 = vcombine.low %v2516_v26, %v2516_v26  ;;  %v2648_v42 = vld [vmem:[%s9453_s22] sm:$0x3] }
 0x1a0   : > { %v2391_v59 = vmul.bf16 %v2389_v32, %v2362_v9  ;;  %v2447_v29 = vpop.permute.xlu1 %2446  ;;  %vm10433_vm3 = vmand %vm1043_vm5, %vm13252_vm15  ;;  %v2594_v9 = vld [vmem:[%s9467_s5] sm:$0x1]  ;;  %v5156_v26 = vcombine.high %v8701_v22, %v8701_v22  ;;  %vm2774_vm5 = vcmask 318464   ;;  %vm2357_vm15 = vcmask 1043186  }
 0x1a1   : > { %v990_v31 = vld [vmem:[#allocation2] sm:$0x88]  ;;  %v2449_v3 = vmul.bf16 %v2447_v29, %v2423_v13  ;;  %2354 = vrot.lane.b32.xlu0 %v2353_v28, %s9263_s9  ;;  %v13254_v11 = vsel %vm10433_vm3, 4294967295, %v13253_v11  ;;  %s13027_s9 = smov 69   ;;  %v10442_v13 = vshrl.u32 %v10430_v17, 16 }
 0x1a2   : > { %v991_v39 = vsel %vm989_vm2, %v982_v33, %v990_v31  ;;  %v2399_v27 = vrot.slane %v2391_v59, %v9448_v15  ;;  %5750 = vrot.lane.b32.xlu1 %v10237_v8, %s9251_s6  ;;  %vm2503_vm2 = vmor %vm10410_vm6, %vm13227_vm1  ;;  %13255 = vst [vmem:[#allocation20_spill] sm:$0xff] %v13254_v11  ;;  %vm2559_vm6 = vcmask 302080   ;;  %s9289_s6 = smov 93   ;;  %vm13269_vm7 = vsmask.f32 7946 }
 0x1a3   : > { %992 = vst [vmem:[#allocation2] sm:$0x88] %v991_v39  ;;  %v2457_v18 = vrot.slane %v2449_v3, %v9448_v15  ;;  %v8719_v32 = vld.sshfl [vmem:[%s12926_s3] sm:$0x5 pattern:$0x75316420]  ;;  %v2524_v3 = vrot.slane %v2517_v10, %v9448_v15 }
 0x1a4   : > { %v2496_v14 = vpop.permute.xlu1 %2495  ;;  %v2406_v36 = vrot.slane %v2399_v27, %v9448_v15  ;;  %v2747_v10 = vld [vmem:[%s9453_s22] sm:$0x3] }
 0x1a5   : > { %v2497_v4 = vrot.slane %v2496_v14, 4  ;;  %v2464_v55 = vrot.slane %v2457_v18, %v9448_v15 }
 0x1a6   : > { %v2408_v48 = vshll.u32 %v2406_v36, 16  ;;  %7678 = vrot.lane.b32.xlu1 %v10378_v45, %s13028_s8  ;;  %s9300_s8 = smov 118  }
 0x1a7   : > { %v2499_v16 = vsel %vm2498_vm13, %v2496_v14, %v2497_v4  ;;  %v2466_v63 = vshll.u32 %v2464_v55, 16  ;;  %vm2670_vm13 = vcmask 310272  }
 0x1a8   : > { %v2505_v51 = vsel %vm2503_vm2, %v2499_v16, %v2504_v37  ;;  %v2557_v62 = vpop.permute.xlu1 %2556  ;;  %v2410_v25 = vrot.slane %v2408_v48, 6  ;;  %vm13032_vm2 = vcmask 326656  }
 0x1a9   : > { %2506 = vst [vmem:[#allocation2 + $0x10] sm:$0x88] %v2505_v51  ;;  %v2558_v35 = vrot.slane %v2557_v62, 7  ;;  %v2468_v29 = vrot.slane %v2466_v63, 6 }
 0x1aa   : > { %v1045_v41 = vld [vmem:[#allocation2 + $0x4] sm:$0x8]  ;;  %2411 = vrot.lane.b32.xlu0 %v2410_v25, %s9289_s6  ;;  %4371 = vrot.lane.b32.xlu1 %v10428_v49, %s13027_s9  ;;  %v9129_v55 = vld [vmem:[#allocation2] ss:$8 sps:$4 sm:$0xff]   ;;  %v2701_v25 = vld [vmem:[%s9467_s5] sm:$0x1] }
 0x1ab   : > { %v1046_v52 = vsel %vm10433_vm3, %v10256_v40, %v1045_v41  ;;  %v2560_v23 = vsel %vm2559_vm6, %v2558_v35, %v2557_v62  ;;  %v10456_v40 = vrot.slane %v8719_v32, %v9443_v12  ;;  %s9302_s9 = smov 66   ;;  %vm13266_vm6 = vsmask.f32 2304 }
 0x1ac   : > { %1047 = vst [vmem:[#allocation2 + $0x4] sm:$0x8] %v1046_v52  ;;  %v2562_v28 = vmul.bf16 %v2560_v23, %v2533_v60  ;;  %v2618_v59 = vpop.permute.xlu1 %2617  ;;  %v10474_v60 = vrot.slane %v5156_v26, %v9443_v12  ;;  %v2808_v23 = vld [vmem:[%s9467_s5] sm:$0x1] }
 0x1ad   : > { %v2620_v31 = vmul.bf16 %v2618_v59, %v2594_v9  ;;  %v5797_v36 = vshrl.u32 %v10456_v40, 16 }
 0x1ae   : > { %v2570_v33 = vrot.slane %v2562_v28, %v9448_v15  ;;  %2469 = vrot.lane.b32.xlu0 %v2468_v29, %s9289_s6  ;;  %5553 = vrot.lane.b32.xlu1 %v10442_v13, %s9291_s30  ;;  %s13026_s6 = smov 86   ;;  %v5165_v28 = vshrl.u32 %v10474_v60, 16 }
 0x1af   : > { %v2628_v39 = vrot.slane %v2620_v31, %v9448_v15 }
 0x1b0   : > { %v2668_v27 = vpop.permute.xlu1 %2667  ;;  %v2577_v20 = vrot.slane %v2570_v33, %v9448_v15 }
 0x1b1   : > { %v2669_v46 = vrot.slane %v2668_v27, 7  ;;  %v2635_v18 = vrot.slane %v2628_v39, %v9448_v15 }
 0x1b2   : > { %2525 = vrot.lane.b32.xlu0 %v2524_v3, %s9269_s21  ;;  %v2579_v14 = vshll.u32 %v2577_v20, 16  ;;  %5382 = vrot.lane.b32.xlu1 %v10321_v2, %s13026_s6  ;;  %s9293_s21 = smov 91   ;;  %s9299_s6 = smov 89  }
 0x1b3   : > { %v2671_v37 = vsel %vm2670_vm13, %v2669_v46, %v2668_v27  ;;  %v9127_v4 = vld [vmem:[#allocation2 + $0x4] ss:$8 sps:$4 sm:$0xff]   ;;  %v2637_v48 = vshll.u32 %v2635_v18, 16  ;;  %vm2358_vm13 = vmand %vm2357_vm15, %vm13266_vm6  ;;  %vm13267_vm15 = vsmask.f32 7962 }
 0x1b4   : > { %v2673_v16 = vmul.bf16 %v2671_v37, %v2648_v42  ;;  %v2721_v51 = vpop.permute.xlu1 %2720  ;;  %v2581_v62 = vrot.slane %v2579_v14, 5  ;;  %8390 = vmatprep.subr.bf16.mxu0 %v9127_v4  ;;  %8813 = vmatprep.subr.bf16.mxu1 %v9127_v4 }
 0x1b5   : > { %8391 = vmatpush1.bf16.msra.mxu0 %v9129_v55  ;;  %v2639_v63 = vrot.slane %v2637_v48, 5  ;;  %8819 = vmatpush1.bf16.msra.mxu1 %v9129_v55  ;;  %v2723_v35 = vmul.bf16 %v2721_v51, %v2701_v25  ;;  %v10500_v55 = vshrl.u32 %v10378_v45, 16  ;;  %v8773_v48 = vld.sshfl [vmem:[%s12926_s3] sm:$0x10 pattern:$0x75316420] }
 0x1b6   : > { %2582 = vrot.lane.b32.xlu0 %v2581_v62, %s9293_s21  ;;  %5801 = vrot.lane.b32.xlu1 %v5797_v36, %s13024_s12  ;;  %v2681_v9 = vrot.slane %v2673_v16, %v9448_v15  ;;  %s9296_s12 = smov 90   ;;  %v7624_v16 = vcombine.high %v8773_v48, %v8773_v48 }
 0x1b7   : > { %v2731_v59 = vrot.slane %v2723_v35, %v9448_v15  ;;  %v8109_v35 = vshrl.u32 %v10234_v30, 16 }
 0x1b8   : > { %v2772_v41 = vpop.permute.xlu1 %2771  ;;  %v2688_v31 = vrot.slane %v2681_v9, %v9448_v15  ;;  %v10516_v62 = vrot.slane %v7624_v16, %v9443_v12 }
 0x1b9   : > { %v2773_v52 = vrot.slane %v2772_v41, 7  ;;  %v2738_v20 = vrot.slane %v2731_v59, %v9448_v15 }
 0x1ba   : > { %2640 = vrot.lane.b32.xlu0 %v2639_v63, %s9293_s21  ;;  %6396 = vrot.lane.b32.xlu1 %v10363_v47, %s13025_s13  ;;  %s9297_s21 = smov 83   ;;  %s9298_s13 = smov 119   ;;  %v7730_v25 = vshrl.u32 %v10516_v62, 16 }
 0x1bb   : > { %v2775_v32 = vsel %vm2774_vm5, %v2773_v52, %v2772_v41  ;;  %vm2417_vm5 = vcmask 759814  }
 0x1bc   : > { %v2777_v29 = vmul.bf16 %v2775_v32, %v2747_v10  ;;  %v2833_v33 = vpop.permute.xlu1 %2832  ;;  %v8716_v32 = vld.sshfl [vmem:[%s12926_s3 + $0xc] sm:$0x1 pattern:$0x75316420]  ;;  %vm2418_vm6 = vmand %vm2417_vm5, %vm13267_vm15  ;;  %vm13268_vm5 = vsmask.f32 3328 }
 0x1bd   : > { %v2835_v3 = vmul.bf16 %v2833_v33, %v2808_v23  ;;  %v10578_v59 = vrot.slane %v8716_v32, %v9443_v12  ;;  %vm2529_vm15 = vmand %vm2528_vm8, %vm13268_vm5  ;;  %vm2585_vm8 = vcmask 744448   ;;  %vm13273_vm5 = vsmask.f32 4352 }
 0x1be   : > { %2689 = vrot.lane.b32.xlu0 %v2688_v31, %s9296_s12  ;;  %v2785_v39 = vrot.slane %v2777_v29, %v9448_v15  ;;  %5169 = vrot.lane.b32.xlu1 %v5165_v28, %s9297_s21 }
 0x1bf   : > { %v2843_v27 = vrot.slane %v2835_v3, %v9448_v15 }
 0x1c0   : > { %v2792_v22 = vrot.slane %v2785_v39, %v9448_v15  ;;  %v10489_v42 = vpop.permute.xlu1 %2879 }
 0x1c1   : > { %v2850_v46 = vrot.slane %v2843_v27, %v9448_v15  ;;  %v2881_v33 = vrot.slane %v10489_v42, 7  ;;  %v2862_v27 = vld [vmem:[%s9453_s22] sm:$0x3] }
 0x1c2   : > { %2739 = vrot.lane.b32.xlu0 %v2738_v20, %s9296_s12  ;;  %7364 = vrot.lane.b32.xlu1 %v10442_v13, %s9298_s13  ;;  %v2794_v18 = vshll.u32 %v2792_v22, 16  ;;  %s9303_s12 = smov 53  }
 0x1c3   : > { %v2852_v37 = vshll.u32 %v2850_v46, 16  ;;  %v2883_v20 = vsel %vm13032_vm2, %v2881_v33, %v10489_v42  ;;  %v8789_v46 = vld.sshfl [vmem:[%s12926_s3 + $0x8] sm:$0x1 pattern:$0x75316420]  ;;  %vm2472_vm2 = vcmask 1043178  }
 0x1c4   : > { %v10494_v14 = vpop.permute.xlu1 %3084 }
 0x1c6   : > { %2796 = vrot.lane.b32.xlu0 %v2794_v18, %s9299_s6  ;;  %6976 = vrot.lane.b32.xlu1 %v5165_v28, %s9281_s11  ;;  %s9301_s11 = smov 113   ;;  %v8219_v18 = vrot.slane %v8789_v46, %v9443_v12 }
 0x1c8   : > { %v10497_v4 = vpop.permute.xlu1 %4897 }
 0x1c9   : > { %v4899_v57 = vrot.slane %v10497_v4, 7 }
 0x1ca   : > { %2854 = vrot.lane.b32.xlu0 %v2852_v37, %s9299_s6  ;;  %7192 = vrot.lane.b32.xlu1 %v10321_v2, %s9300_s8  ;;  %s13257_s6 = smov 7  }
 0x1cc   : > { %v10507_v26 = vpop.permute.xlu1 %3888 }
 0x1ce   : > { %3297 = vrot.lane.b32.xlu0 %v10500_v55, %s9282_s29  ;;  %6765 = vrot.lane.b32.xlu1 %v10246_v34, %s9301_s11  ;;  %s13256_s29 = smov 70  }
 0x1d0   : > { %v10513_v51 = vpop.permute.xlu1 %4696 }
 0x1d2   : > { %4098 = vrot.lane.b32.xlu0 %v10378_v45, %s9302_s9  ;;  %3031 = vrot.lane.b32.xlu1 %v10237_v8, %s13029_s26  ;;  %s13258_s26 = smov 65  }
 0x1d4   : > { %v10523_v63 = vpop.permute.xlu1 %5699 }
 0x1d6   : > { %3681 = vrot.lane.b32.xlu0 %v10363_v47, %s9284_s14  ;;  %7734 = vrot.lane.b32.xlu1 %v7730_v25, %s9234_s24  ;;  %s13259_s14 = smov 104  }
 0x1d8   : > { %v10529_v41 = vpop.permute.xlu1 %5277 }
 0x1da   : > { %4480 = vrot.lane.b32.xlu0 %v10321_v2, %s13256_s29  ;;  %8113 = vrot.lane.b32.xlu1 %v8109_v35, %s13257_s6  ;;  %s9307_s29 = smov 101  }
 0x1dc   : > { %v10534_v9 = vpop.permute.xlu1 %6290 }
 0x1de   : > { %3468 = vrot.lane.b32.xlu0 %v10428_v49, %s9303_s12  ;;  %4049 = vrot.lane.b32.xlu1 %v10246_v34, %s13258_s26  ;;  %s9304_s26 = smov 54  }
 0x1e0   : > { %v10540_v10 = vpop.permute.xlu1 %5910 }
 0x1e2   : > { %6506 = vrot.lane.b32.xlu0 %v9923_v21, %s13259_s14  ;;  %4648 = vrot.lane.b32.xlu1 %v10442_v13, %s9287_s7  ;;  %v8655_v13 = vld.sshfl [vmem:[%s12926_s3 + $0x4] sm:$0x2 pattern:$0x75316420]  ;;  %s13260_s7 = smov 49  }
 0x1e3   : > { %v3518_v28 = vrot.slane %v8655_v13, %v9443_v12 }
 0x1e4   : > { %v10546_v30 = vpop.permute.xlu1 %6918 }
 0x1e5   : > { %v3519_v31 = vcombine.high %v3518_v28, %v3518_v28 }
 0x1e6   : > { %5494 = vrot.lane.b32.xlu0 %v10363_v47, %s9291_s30  ;;  %5058 = vrot.lane.b32.xlu1 %v10474_v60, %s9288_s10  ;;  %s9308_s30 = smov 50   ;;  %s13069_s10 = smov 80  }
 0x1e7   : > { %v10593_v39 = vshrl.u32 %v3519_v31, 16 }
 0x1e8   : > { %v10552_v52 = vpop.permute.xlu1 %3356 }
 0x1ea   : > { %5112 = vrot.lane.b32.xlu0 %v10500_v55, %s9297_s21  ;;  %3627 = vrot.lane.b32.xlu1 %v10430_v17, %s9304_s26  ;;  %s9305_s21 = smov 117  }
 0x1ec   : > { %v10558_v21 = vpop.permute.xlu1 %2931 }
 0x1ee   : > { %7304 = vrot.lane.b32.xlu0 %v10363_v47, %s9298_s13  ;;  %7788 = vrot.lane.b32.xlu1 %v10500_v55, %s9234_s24  ;;  %s13065_s24 = smov 88   ;;  %s13261_s13 = smov 112  }
 0x1f0   : > { %v10567_v23 = vpop.permute.xlu1 %2976 }
 0x1f2   : > { %7087 = vrot.lane.b32.xlu0 %v10428_v49, %s9305_s21  ;;  %8168 = vrot.lane.b32.xlu1 %v10363_v47, %s13257_s6  ;;  %v8744_v47 = vld.sshfl [vmem:[%s12926_s3 + $0x4] sm:$0x1 pattern:$0x75316420]  ;;  %s13262_s6 = smov 8  }
 0x1f4   : > { %v10580_v29 = vpop.permute.xlu1 %8007 }
 0x1f6   : > { %6709 = vrot.lane.b32.xlu0 %v5797_v36, %s9301_s11  ;;  %5651 = vrot.lane.b32.xlu1 %v10578_v59, %s13065_s24  ;;  %v10600_v36 = vrot.slane %v8744_v47, %v9443_v12  ;;  %s9310_s11 = smov 67  }
 0x1f8   : > { %v10588_v3 = vpop.permute.xlu1 %4955 }
 0x1fa   : > { %3141 = vrot.lane.b32.xlu0 %v10246_v34, %s13260_s7  ;;  %6240 = vrot.lane.b32.xlu1 %v10593_v39, %s9307_s29  ;;  %v2885_v34 = vmul.bf16 %v2883_v20, %v2862_v27  ;;  %s13263_s7 = smov 2  }
 0x1fc   : > { %v10605_v22 = vpop.permute.xlu1 %3740  ;;  %v2893_v42 = vrot.slane %v2885_v34, %v9448_v15 }
 0x1fe   : > { %3187 = vrot.lane.b32.xlu0 %v10378_v45, %s9308_s30  ;;  %6656 = vrot.lane.b32.xlu1 %v10600_v36, %s13261_s13  ;;  %v8663_v45 = vld.sshfl [vmem:[%s12926_s3 + $0x8] sm:$0x5 pattern:$0x75316420]  ;;  %v2894_v16 = vcombine.low %v2893_v42, %v2893_v42 }
 0x1ff   : > { %v10633_v35 = vrot.slane %v8663_v45, %v9443_v12 }
 0x200   : > { %v10615_v37 = vpop.permute.xlu1 %4534 }
 0x202   : > { %4152 = vrot.lane.b32.xlu0 %v10474_v60, %s9302_s9  ;;  %8220 = vrot.lane.b32.xlu1 %v8219_v18, %s13262_s6  ;;  %s13264_s9 = smov 64  }
 0x204   : > { %v10621_v48 = vpop.permute.xlu1 %8055 }
 0x206   : > { %7632 = vrot.lane.b32.xlu0 %v10516_v62, %s13263_s7  ;;  %7249 = vrot.lane.b32.xlu1 %v10430_v17, %s9300_s8  ;;  %v2901_v62 = vrot.slane %v2894_v16, %v9448_v15  ;;  %s13265_s7 = smov 72   ;;  %s13067_s8 = smov 56   ;;  %v2530_v16 = vld [vmem:[#allocation2 + $0x14] sm:$0x8] }
 0x208   : > { %v10630_v25 = vpop.permute.xlu1 %3989 }
 0x20a   : > { %3939 = vrot.lane.b32.xlu0 %v10237_v8, %s13264_s9  ;;  %8264 = vrot.lane.b32.xlu1 %v10633_v35, %s13262_s6  ;;  %v2359_v8 = vld [vmem:[#allocation2 + $0x14] sm:$0x4] }
 0x20c   : > { %v10640_v13 = vpop.permute.xlu1 %4586 }
 0x20e   : > { %4746 = vrot.lane.b32.xlu0 %v10203_v5, %s13265_s7  ;;  %2902 = vrot.lane.b32.xlu1 %v2901_v62, %s13065_s24 }
 0x210   : > { %v10645_v32 = vpop.permute.xlu1 %5002 }
 0x212   : > { %3785 = vrot.lane.b32.xlu0 %v10633_v35, %s13067_s8 }
 0x213   : > { %v2355_v28 = vpop.permute.xlu0 %2354 }
 0x214   : > { %v2360_v31 = vsel %vm2358_vm13, %v2355_v28, %v2359_v8  ;;  %v10650_v33 = vpop.permute.xlu1 %5750  ;;  %vm2419_vm13 = vmor %vm2418_vm6, %vm10294_vm11  ;;  %vm2588_vm6 = vcmask 744455  }
 0x215   : > { %2361 = vst [vmem:[#allocation2 + $0x14] sm:$0x4] %v2360_v31 }
 0x216   : > { %4204 = vrot.lane.b32.xlu0 %v10500_v55, %s9310_s11 }
 0x218   : > { %v10654_v47 = vpop.permute.xlu1 %7678 }
 0x21a   : > { %4791 = vrot.lane.b32.xlu0 %v10456_v40, %s13069_s10 }
 0x21c   : > { %v2412_v27 = vpop.permute.xlu0 %2411  ;;  %v10659_v20 = vpop.permute.xlu1 %4371  ;;  %v2420_v55 = vld [vmem:[#allocation2 + $0x10] sm:$0x44] }
 0x21d   : > { %v2413_v46 = vrot.slane %v2412_v27, 4 }
 0x21e   : > { %3525 = vrot.lane.b32.xlu0 %v10593_v39, %s9303_s12  ;;  %s13271_s12 = smov 85  }
 0x21f   : > { %v2415_v34 = vsel %vm2414_vm12, %v2412_v27, %v2413_v46  ;;  %vm2473_vm12 = vmand %vm2472_vm2, %vm13269_vm7  ;;  %vm2695_vm2 = vcmask 733188  }
 0x220   : > { %v2421_v18 = vsel %vm2419_vm13, %v2415_v34, %v2420_v55  ;;  %v2470_v42 = vpop.permute.xlu0 %2469  ;;  %v10665_v45 = vpop.permute.xlu1 %5553  ;;  %vm13270_vm13 = vsmask.f32 7966 }
 0x221   : > { %2422 = vst [vmem:[#allocation2 + $0x10] sm:$0x44] %v2421_v18  ;;  %vm2589_vm3 = vmand %vm2588_vm6, %vm13270_vm13  ;;  %vm2692_vm6 = vcmask 736256   ;;  %vm13274_vm13 = vnez %v13115_v54 }
 0x222   : > { %6557 = vrot.lane.b32.xlu0 %v10203_v5, %s13259_s14  ;;  %vm2590_vm7 = vmor %vm2589_vm3, %vm10189_vm10  ;;  %s13272_s14 = smov 102   ;;  %vm13275_vm3 = vsmask.f32 7950 }
 0x224   : > { %v2526_v62 = vpop.permute.xlu0 %2525  ;;  %v10670_v8 = vpop.permute.xlu1 %5382 }
 0x225   : > { %v2531_v28 = vsel %vm2529_vm15, %v2526_v62, %v2530_v16  ;;  %vm2696_vm15 = vmand %vm2695_vm2, %vm13273_vm5  ;;  %vm13276_vm2 = vsmask.f32 256 }
 0x226   : > { %2532 = vst [vmem:[#allocation2 + $0x14] sm:$0x8] %v2531_v28  ;;  %3571 = vrot.lane.b32.xlu0 %v10321_v2, %s9304_s26  ;;  %vm2697_vm9 = vmor %vm2696_vm15, %vm13274_vm13  ;;  %v2698_v28 = vld [vmem:[#allocation2 + $0x18] sm:$0x11]  ;;  %vm13278_vm15 = vsmask.f32 7954 }
 0x227   : > { %s13064_s26 = smov 77  }
 0x228   : > { %v2474_v31 = vld [vmem:[#allocation2 + $0x14] sm:$0x4]  ;;  %v2583_v27 = vpop.permute.xlu0 %2582  ;;  %v10676_v55 = vpop.permute.xlu1 %5801 }
 0x229   : > { %v2475_v5 = vsel %vm2473_vm12, %v2470_v42, %v2474_v31  ;;  %v2584_v46 = vrot.slane %v2583_v27, 4  ;;  %vm2643_vm12 = vcmask 1044187  }
 0x22a   : > { %2476 = vst [vmem:[#allocation2 + $0x14] sm:$0x4] %v2475_v5  ;;  %5335 = vrot.lane.b32.xlu0 %v10593_v39, %s13271_s12  ;;  %s9315_s12 = smov 73  }
 0x22b   : > { %v2586_v2 = vsel %vm2585_vm8, %v2583_v27, %v2584_v46  ;;  %vm2644_vm8 = vmand %vm2643_vm12, %vm13275_vm3  ;;  %vm3300_vm12 = vcmask 416768   ;;  %vm2799_vm3 = vcmask 728064  }
 0x22c   : > { %v2641_v34 = vpop.permute.xlu0 %2640  ;;  %v10682_v16 = vpop.permute.xlu1 %6396 }
 0x22d   : > { %v2591_v18 = vld [vmem:[#allocation2 + $0x10] sm:$0x88] }
 0x22e   : > { %v2592_v62 = vsel %vm2590_vm7, %v2586_v2, %v2591_v18  ;;  %6344 = vrot.lane.b32.xlu0 %v10430_v17, %s13272_s14  ;;  %v8725_v17 = vld.sshfl [vmem:[%s12926_s3] sm:$0x50 pattern:$0x75316420]  ;;  %vm2742_vm7 = vcmask 1041104   ;;  %s9313_s14 = smov 114  }
 0x22f   : > { %2593 = vst [vmem:[#allocation2 + $0x10] sm:$0x88] %v2592_v62  ;;  %v5999_v58 = vcombine.high %v8725_v17, %v8725_v17  ;;  %vm2743_vm5 = vmand %vm2742_vm7, %vm13276_vm2  ;;  %vm4101_vm2 = vcmask 539648  }
 0x230   : > { %v2690_v42 = vpop.permute.xlu0 %2689  ;;  %v10689_v5 = vpop.permute.xlu1 %5169  ;;  %v8646_v17 = vld.sshfl [vmem:[%s12926_s3 + $0x4] sm:$0x10 pattern:$0x75316420] }
 0x231   : > { %v2691_v31 = vrot.slane %v2690_v42, 4 }
 0x232   : > { %5598 = vrot.lane.b32.xlu0 %v10633_v35, %s13065_s24  ;;  %s13300_s24 = smov 69  }
 0x233   : > { %v2693_v27 = vsel %vm2692_vm6, %v2690_v42, %v2691_v31 }
 0x234   : > { %v2699_v46 = vsel %vm2697_vm9, %v2693_v27, %v2698_v28  ;;  %v2740_v18 = vpop.permute.xlu0 %2739  ;;  %v10697_v2 = vpop.permute.xlu1 %7364  ;;  %v10707_v28 = vrot.slane %v5999_v58, %v9443_v12  ;;  %vm2802_vm9 = vcmask 724996  }
 0x235   : > { %2700 = vst [vmem:[#allocation2 + $0x18] sm:$0x11] %v2699_v46  ;;  %vm10717_vm6 = vmand %vm2802_vm9, %vm13278_vm15  ;;  %vm3684_vm9 = vcmask 449536   ;;  %vm2857_vm15 = vcmask 1041096  }
 0x236   : > { %v2645_v62 = vld [vmem:[#allocation2 + $0x14] sm:$0x8]  ;;  %6179 = vrot.lane.b32.xlu0 %v10428_v49, %s9307_s29  ;;  %s13277_s29 = smov 98  }
 0x237   : > { %v2646_v43 = vsel %vm2644_vm8, %v2641_v34, %v2645_v62  ;;  %v3274_v62 = vld [vmem:[%s9453_s22] sm:$0x3]  ;;  %vm13282_vm8 = vnez %v13127_v44 }
 0x238   : > { %2647 = vst [vmem:[#allocation2 + $0x14] sm:$0x8] %v2646_v43  ;;  %v2797_v42 = vpop.permute.xlu0 %2796  ;;  %v10701_v31 = vpop.permute.xlu1 %6976  ;;  %v6008_v43 = vshrl.u32 %v10707_v28, 16  ;;  %vm2804_vm7 = vmor %vm10717_vm6, %vm13282_vm8  ;;  %v4875_v44 = vld [vmem:[%s9453_s22] sm:$0x3] }
 0x239   : > { %vm13285_vm6 = vsmask.f32 7938 }
 0x23a   : > { %6603 = vrot.lane.b32.xlu0 %v10456_v40, %s13261_s13  ;;  %v2798_v40 = vrot.slane %v2797_v42, 4  ;;  %s9312_s13 = smov 99  }
 0x23c   : > { %v2744_v27 = vld [vmem:[#allocation2 + $0x1c] sm:$0x1]  ;;  %v10709_v46 = vpop.permute.xlu0 %2854  ;;  %v10711_v34 = vpop.permute.xlu1 %7192  ;;  %v2800_v11 = vsel %vm2799_vm3, %v2797_v42, %v2798_v40  ;;  %vm4483_vm3 = vcmask 572416  }
 0x23d   : > { %v2745_v49 = vsel %vm2743_vm5, %v2740_v18, %v2744_v27  ;;  %vm13077_vm5 = vcmask 662528  }
 0x23e   : > { %2746 = vst [vmem:[#allocation2 + $0x1c] sm:$0x1] %v2745_v49  ;;  %5962 = vrot.lane.b32.xlu0 %v10474_v60, %s13277_s29  ;;  %s13292_s29 = smov 5  }
 0x240   : > { %v3298_v58 = vpop.permute.xlu0 %3297  ;;  %v10722_v27 = vpop.permute.xlu1 %6765 }
 0x241   : > { %v3299_v18 = vrot.slane %v3298_v58, 7  ;;  %13281 = vst [vmem:[#allocation21_spill] sm:$0xff] %v10722_v27 }
 0x242   : > { %6012 = vrot.lane.b32.xlu0 %v6008_v43, %s9312_s13 }
 0x243   : > { %v3301_v60 = vsel %vm3300_vm12, %v3299_v18, %v3298_v58  ;;  %v8779_v58 = vld.sshfl [vmem:[%s12926_s3] sm:$0x2 pattern:$0x75316420]  ;;  %vm10752_vm12 = vmand %vm2857_vm15, %vm13285_vm6  ;;  %vm7090_vm15 = vcmask 957440   ;;  %vm6712_vm6 = vcmask 924672  }
 0x244   : > { %v3303_v49 = vmul.bf16 %v3301_v60, %v3274_v62  ;;  %v4099_v7 = vpop.permute.xlu0 %4098  ;;  %v10730_v1 = vpop.permute.xlu1 %3031  ;;  %v3235_v60 = vcombine.high %v8646_v17, %v8646_v17 }
 0x245   : > { %v2805_v53 = vld [vmem:[#allocation2 + $0x18] sm:$0x11]  ;;  %v4100_v19 = vrot.slane %v4099_v7, 7 }
 0x246   : > { %v2806_v50 = vsel %vm2804_vm7, %v2800_v11, %v2805_v53  ;;  %v3305_v43 = vcombine.low %v3303_v49, %v3303_v49  ;;  %7145 = vrot.lane.b32.xlu0 %v10593_v39, %s9305_s21  ;;  %v3657_v11 = vld [vmem:[%s9453_s22] sm:$0x3]  ;;  %s13284_s21 = smov 120   ;;  %vm5280_vm7 = vcmask 695296  }
 0x247   : > { %2807 = vst [vmem:[#allocation2 + $0x18] sm:$0x11] %v2806_v50  ;;  %v4102_v42 = vsel %vm4101_vm2, %v4100_v19, %v4099_v7  ;;  %v4901_v19 = vsel %vm13077_vm5, %v4899_v57, %v10497_v4  ;;  %v5701_v57 = vrot.slane %v10523_v63, 7  ;;  %v4461_v4 = vld [vmem:[%s9453_s22] sm:$0x3]  ;;  %vm13289_vm2 = vcmask 785408  }
 0x248   : > { %v3312_v40 = vrot.slane %v3305_v43, %v9448_v15  ;;  %v4104_v62 = vmul.bf16 %v4102_v42, %v4080_v56  ;;  %v3682_v53 = vpop.permute.xlu0 %3681  ;;  %v10743_v49 = vpop.permute.xlu1 %7734  ;;  %v7892_v56 = vrot.slane %v8779_v58, %v9443_v12  ;;  %v4903_v6 = vmul.bf16 %v4901_v19, %v4875_v44 }
 0x249   : > { %v3683_v18 = vrot.slane %v3682_v53, 7  ;;  %13283 = vst [vmem:[#allocation22_spill] sm:$0xff] %v10743_v49  ;;  %v7988_v49 = vld [vmem:[%s9453_s22 + $0x1] sm:$0x1]  ;;  %vm5385_vm5 = vcmask 703488  }
 0x24a   : > { %v3313_v50 = vcombine.low %v3312_v40, %v3312_v40  ;;  %v4106_v7 = vcombine.low %v4104_v62, %v4104_v62  ;;  %7410 = vrot.lane.b32.xlu0 %v10633_v35, %s13284_s21  ;;  %v10760_v35 = vrot.slane %v3235_v60, %v9443_v12  ;;  %v7893_v44 = vcombine.high %v7892_v56, %v7892_v56 }
 0x24b   : > { %v3685_v43 = vsel %vm3684_vm9, %v3683_v18, %v3682_v53  ;;  %vm13294_vm9 = vcmask 850944  }
 0x24c   : > { %v3687_v17 = vmul.bf16 %v3685_v43, %v3657_v11  ;;  %v4481_v24 = vpop.permute.xlu0 %4480  ;;  %v3320_v38 = vrot.slane %v3313_v50, %v9448_v15  ;;  %v10762_v58 = vpop.permute.xlu1 %8113  ;;  %v4113_v53 = vrot.slane %v4106_v7, %v9448_v15  ;;  %v5279_v11 = vrot.slane %v10529_v41, 7 }
 0x24d   : > { %v4482_v40 = vrot.slane %v4481_v24, 7  ;;  %13288 = vst [vmem:[#allocation23_spill] sm:$0xff] %v10762_v58 }
 0x24e   : > { %v2859_v62 = vld [vmem:[#allocation2 + $0x1c] sm:$0x1]  ;;  %v3695_v18 = vrot.slane %v3687_v17, %v9448_v15  ;;  %6810 = vrot.lane.b32.xlu0 %v10707_v28, %s9313_s14  ;;  %3321 = vrot.lane.b32.xlu1 %v3320_v38, %s13064_s26  ;;  %v4905_v28 = vcombine.low %v4903_v6, %v4903_v6  ;;  %v5702_v38 = vsel %vm13289_vm2, %v5701_v57, %v10523_v63  ;;  %v5682_v17 = vld [vmem:[%s9453_s22] sm:$0x3]  ;;  %s13073_s26 = smov 43  }
 0x24f   : > { %v2860_v60 = vsel %vm10752_vm12, %v10709_v46, %v2859_v62  ;;  %v4484_v19 = vsel %vm4483_vm3, %v4482_v40, %v4481_v24  ;;  %v4114_v54 = vcombine.low %v4113_v53, %v4113_v53  ;;  %v7895_v46 = vshrl.u32 %v7893_v44, 16  ;;  %v5254_v40 = vld [vmem:[%s9453_s22] sm:$0x3] }
 0x250   : > { %2861 = vst [vmem:[#allocation2 + $0x1c] sm:$0x1] %v2860_v60  ;;  %v3696_v50 = vcombine.low %v3695_v18, %v3695_v18  ;;  %v4486_v7 = vmul.bf16 %v4484_v19, %v4461_v4  ;;  %v10774_v43 = vpop.permute.xlu0 %3468  ;;  %v10778_v56 = vpop.permute.xlu1 %4049  ;;  %v5281_v4 = vsel %vm5280_vm7, %v5279_v11, %v10529_v41  ;;  %v5704_v63 = vmul.bf16 %v5702_v38, %v5682_v17 }
 0x251   : > { %13290 = vst [vmem:[#allocation24_spill] sm:$0xff] %v10778_v56  ;;  %v4912_v62 = vrot.slane %v4905_v28, %v9448_v15  ;;  %v5283_v53 = vmul.bf16 %v5281_v4, %v5254_v40  ;;  %v4121_v60 = vrot.slane %v4114_v54, %v9448_v15  ;;  %v13070_v38 = vshrl.u32 %v10760_v35, 16  ;;  %v6489_v54 = vld [vmem:[%s9453_s22] sm:$0x3] }
 0x252   : > { %v4494_v42 = vrot.slane %v4486_v7, %v9448_v15  ;;  %3243 = vrot.lane.b32.xlu0 %v10760_v35, %s9308_s30  ;;  %v3703_v24 = vrot.slane %v3696_v50, %v9448_v15  ;;  %s13066_s30 = smov 62   ;;  %v5706_v11 = vcombine.low %v5704_v63, %v5704_v63  ;;  %vm3087_vm12 = vcmask 400384  }
 0x253   : > { %v4913_v50 = vcombine.low %v4912_v62, %v4912_v62  ;;  %v5291_v7 = vrot.slane %v5283_v53, %v9448_v15  ;;  %v8781_v53 = vld.sshfl [vmem:[%s12926_s3] sm:$0xa pattern:$0x75316420]  ;;  %vm2908_vm3 = vcmask 717829  }
 0x254   : > { %3704 = vrot.lane.b32.xlu1 %v3703_v24, %s9315_s12  ;;  %v6507_v6 = vpop.permute.xlu0 %6506  ;;  %v10788_v57 = vpop.permute.xlu1 %4648  ;;  %v4495_v18 = vcombine.low %v4494_v42, %v4494_v42  ;;  %v8769_v42 = vld.sshfl [vmem:[%s12926_s3] sm:$0x1 pattern:$0x75316420]  ;;  %vm13308_vm7 = vsmask.f32 5376 }
 0x255   : > { %13291 = vst [vmem:[#allocation25_spill] sm:$0xff] %v10788_v57  ;;  %v6508_v44 = vrot.slane %v6507_v6, 7  ;;  %v5292_v4 = vcombine.low %v5291_v7, %v5291_v7  ;;  %v7522_v62 = vrot.slane %v8769_v42, %v9443_v12  ;;  %vm10906_vm2 = vmand %vm2908_vm3, %vm13308_vm7  ;;  %vm13078_vm3 = vcmask 588800  }
 0x256   : > { %7899 = vrot.lane.b32.xlu0 %v7895_v46, %s13292_s29  ;;  %v4502_v28 = vrot.slane %v4495_v18, %v9448_v15  ;;  %v5713_v46 = vrot.slane %v5706_v11, %v9448_v15  ;;  %vm6293_vm7 = vcmask 834560  }
 0x257   : > { %v6509_v17 = vsel %vm13294_vm9, %v6508_v44, %v6507_v6  ;;  %v4920_v6 = vrot.slane %v4913_v50, %v9448_v15  ;;  %v10826_v44 = vld.sshfl [vmem:[%s9453_s22] sm:$0x5 pattern:$0x73625140]  ;;  %v5299_v50 = vrot.slane %v5292_v4, %v9448_v15  ;;  %vm13080_vm9 = vcmask 523264  }
 0x258   : > { %4122 = vrot.lane.b32.xlu1 %v4121_v60, %s13066_s30  ;;  %v10794_v41 = vpop.permute.xlu0 %5494  ;;  %v10796_v19 = vpop.permute.xlu1 %5058  ;;  %s13076_s30 = smov 58   ;;  %v6511_v63 = vmul.bf16 %v6509_v17, %v6489_v54  ;;  %v5714_v60 = vcombine.low %v5713_v46, %v5713_v46  ;;  %v7946_v54 = vrot.slane %v8781_v53, %v9443_v12  ;;  %v8710_v17 = vld.sshfl [vmem:[%s12926_s3 + $0x4] sm:$0x20 pattern:$0x75316420]  ;;  %v6111_v46 = vcombine.low %v10826_v44, %v10826_v44 }
 0x259   : > { %13293 = vst [vmem:[#allocation26_spill] sm:$0xff] %v10796_v19  ;;  %v5430_v53 = vcombine.high %v8710_v17, %v8710_v17  ;;  %v7064_v17 = vld [vmem:[%s9453_s22] sm:$0x3] }
 0x25a   : > { %3840 = vrot.lane.b32.xlu0 %v10578_v59, %s13067_s8  ;;  %s13075_s8 = smov 47   ;;  %v6513_v7 = vcombine.low %v6511_v63, %v6511_v63  ;;  %v5721_v4 = vrot.slane %v5714_v60, %v9448_v15  ;;  %v3119_v60 = vld [vmem:[%s9467_s5] sm:$0x1] }
 0x25c   : > { %4503 = vrot.lane.b32.xlu1 %v4502_v28, %s13076_s30  ;;  %v10809_v24 = vpop.permute.xlu0 %5112  ;;  %v10812_v40 = vpop.permute.xlu1 %3627  ;;  %v7524_v28 = vshrl.u32 %v7522_v62, 16  ;;  %v7947_v62 = vcombine.high %v7946_v54, %v7946_v54  ;;  %v5437_v54 = vrot.slane %v5430_v53, %v9443_v12  ;;  %s9321_s30 = smov 79  }
 0x25d   : > { %13295 = vst [vmem:[#allocation27_spill] sm:$0xff] %v10812_v40 }
 0x25e   : > { %4265 = vrot.lane.b32.xlu0 %v13070_v38, %s9310_s11  ;;  %s13299_s11 = smov 32  }
 0x260   : > { %4921 = vrot.lane.b32.xlu1 %v4920_v6, %s13075_s8  ;;  %v10823_v18 = vpop.permute.xlu0 %7304  ;;  %v10828_v11 = vpop.permute.xlu1 %7788  ;;  %v6520_v6 = vrot.slane %v6513_v7, %v9448_v15  ;;  %s13083_s8 = smov 15  }
 0x261   : > { %13296 = vst [vmem:[#allocation28_spill] sm:$0xff] %v10828_v11  ;;  %v6118_v11 = vrot.slane %v6111_v46, %v9448_v15 }
 0x262   : > { %4844 = vrot.lane.b32.xlu0 %v10600_v36, %s13069_s10  ;;  %s13298_s10 = smov 1   ;;  %v6521_v7 = vcombine.low %v6520_v6, %v6520_v6  ;;  %v5438_v6 = vcombine.high %v5437_v54, %v5437_v54 }
 0x264   : > { %5300 = vrot.lane.b32.xlu1 %v5299_v50, %s13073_s26  ;;  %v7088_v42 = vpop.permute.xlu0 %7087  ;;  %v10840_v63 = vpop.permute.xlu1 %8168  ;;  %s13074_s26 = smov 28  }
 0x265   : > { %13297 = vst [vmem:[#allocation29_spill] sm:$0xff] %v10840_v63  ;;  %v7089_v38 = vrot.slane %v7088_v42, 7 }
 0x266   : > { %7528 = vrot.lane.b32.xlu0 %v7524_v28, %s13298_s10  ;;  %v7949_v28 = vshrl.u32 %v7947_v62, 16 }
 0x267   : > { %v7091_v19 = vsel %vm7090_vm15, %v7089_v38, %v7088_v42  ;;  %vm3471_vm15 = vcmask 433152  }
 0x268   : > { %5722 = vrot.lane.b32.xlu1 %v5721_v4, %s13299_s11  ;;  %v6710_v50 = vpop.permute.xlu0 %6709  ;;  %v10847_v40 = vpop.permute.xlu1 %5651  ;;  %v6687_v4 = vld [vmem:[%s9453_s22] sm:$0x3]  ;;  %v7093_v62 = vmul.bf16 %v7091_v19, %v7064_v17 }
 0x269   : > { %v6711_v63 = vrot.slane %v6710_v50, 7  ;;  %v8771_v19 = vld.sshfl [vmem:[%s12926_s3] sm:$0x5 pattern:$0x75316420] }
 0x26a   : > { %4431 = vrot.lane.b32.xlu0 %v10593_v39, %s13300_s24  ;;  %v6528_v39 = vrot.slane %v6521_v7, %v9448_v15  ;;  %s13301_s24 = smov 24   ;;  %v7095_v7 = vcombine.low %v7093_v62, %v7093_v62  ;;  %v7574_v54 = vrot.slane %v8771_v19, %v9443_v12  ;;  %v3086_v62 = vrot.slane %v10494_v14, 7  ;;  %v3062_v19 = vld [vmem:[%s9453_s22] sm:$0x3] }
 0x26b   : > { %v6713_v57 = vsel %vm6712_vm6, %v6711_v63, %v6710_v50  ;;  %v8010_v63 = vmul.bf16 %v10580_v29, %v7988_v49  ;;  %v5857_v50 = vshrl.u32 %v10600_v36, 16  ;;  %v7614_v36 = vld [vmem:[%s9453_s22 + $0x1] sm:$0x1]  ;;  %vm2910_vm6 = vmor %vm10906_vm2, %vm13167_vm0  ;;  %vm5497_vm2 = vcmask 711680  }
 0x26c   : > { %6119 = vrot.lane.b32.xlu1 %v6118_v11, %s13074_s26  ;;  %v3142_v46 = vpop.permute.xlu0 %3141  ;;  %v10856_v56 = vpop.permute.xlu1 %6240  ;;  %v6715_v27 = vmul.bf16 %v6713_v57, %v6687_v4  ;;  %s13302_s26 = smov 86   ;;  %v3716_v4 = vld [vmem:[%s9467_s5] sm:$0x1]  ;;  %v7576_v12 = vshrl.u32 %v7574_v54, 16 }
 0x26d   : > { %v3144_v58 = vmul.bf16 %v3142_v46, %v3119_v60  ;;  %v8012_v49 = vcombine.low %v8010_v63, %v8010_v63  ;;  %v4134_v46 = vld [vmem:[%s9467_s5] sm:$0x1]  ;;  %v3743_v63 = vmul.bf16 %v10605_v22, %v3716_v4 }
 0x26e   : > { %7953 = vrot.lane.b32.xlu0 %v7949_v28, %s13292_s29  ;;  %v6454_v28 = vshrl.u32 %v5438_v6, 16  ;;  %s13306_s29 = smov 103   ;;  %v4933_v22 = vld [vmem:[%s9467_s5] sm:$0x1] }
 0x26f   : > { %v3146_v53 = vcombine.low %v3144_v58, %v3144_v58  ;;  %v6723_v58 = vrot.slane %v6715_v27, %v9448_v15  ;;  %v7102_v27 = vrot.slane %v7095_v7, %v9448_v15 }
 0x270   : > { %6529 = vrot.lane.b32.xlu1 %v6528_v39, %s13301_s24  ;;  %v10862_v38 = vpop.permute.xlu0 %3187  ;;  %v10865_v42 = vpop.permute.xlu1 %6656 }
 0x271   : > { %v3153_v11 = vrot.slane %v3146_v53, %v9448_v15  ;;  %v6730_v17 = vrot.slane %v6723_v58, %v9448_v15  ;;  %v7109_v58 = vrot.slane %v7102_v27, %v9448_v15 }
 0x272   : > { %5439 = vrot.lane.b32.xlu0 %v5438_v6, %s13302_s26  ;;  %s13304_s26 = smov 97   ;;  %v8019_v6 = vrot.slane %v8012_v49, %v9448_v15 }
 0x273   : > { %v3160_v57 = vrot.slane %v3153_v11, %v9448_v15 }
 0x274   : > { %v4153_v60 = vpop.permute.xlu0 %4152  ;;  %v10876_v29 = vpop.permute.xlu1 %8220 }
 0x275   : > { %3161 = vrot.lane.b32.xlu1 %v3160_v57, %s9321_s30  ;;  %13303 = vst [vmem:[#allocation30_spill] sm:$0xff] %v10876_v29 }
 0x276   : > { %5861 = vrot.lane.b32.xlu0 %v5857_v50, %s13304_s26  ;;  %v4155_v50 = vmul.bf16 %v4153_v60, %v4134_v46  ;;  %s13082_s26 = smov 11   ;;  %v3751_v60 = vrot.slane %v3743_v63, %v9448_v15  ;;  %v4515_v46 = vld [vmem:[%s9467_s5] sm:$0x1]  ;;  %v4958_v63 = vmul.bf16 %v10588_v3, %v4933_v22 }
 0x278   : > { %v7633_v39 = vpop.permute.xlu0 %7632  ;;  %v10887_v11 = vpop.permute.xlu1 %7249  ;;  %v4157_v54 = vcombine.low %v4155_v50, %v4155_v50  ;;  %v13312_v50 = vshrl.u32 %v10760_v35, 16 }
 0x279   : > { %v7635_v53 = vmul.bf16 %v7633_v39, %v7614_v36  ;;  %6731 = vrot.lane.b32.xlu1 %v6730_v17, %s13083_s8  ;;  %13305 = vst [vmem:[#allocation31_spill] sm:$0xff] %v10887_v11  ;;  %v3088_v36 = vsel %vm3087_vm12, %v3086_v62, %v10494_v14  ;;  %v3890_v62 = vrot.slane %v10507_v26, 7  ;;  %vm13081_vm12 = vcmask 719872   ;;  %v3445_v11 = vld [vmem:[%s9453_s22] sm:$0x3]  ;;  %s13084_s8 = smov 30  }
 0x27a   : > { %6458 = vrot.lane.b32.xlu0 %v6454_v28, %s13306_s29  ;;  %v8020_v28 = vcombine.low %v8019_v6, %v8019_v6  ;;  %v3090_v14 = vmul.bf16 %v3088_v36, %v3062_v19  ;;  %v3752_v19 = vcombine.low %v3751_v60, %v3751_v60  ;;  %v4537_v36 = vmul.bf16 %v10615_v37, %v4515_v46  ;;  %s13316_s29 = smov 47  }
 0x27b   : > { %v7643_v7 = vrot.slane %v7635_v53, %v9448_v15  ;;  %v3470_v53 = vrot.slane %v10774_v43, 7  ;;  %v4960_v37 = vcombine.low %v4958_v63, %v4958_v63 }
 0x27c   : > { %v10894_v57 = vpop.permute.xlu0 %3939  ;;  %v10899_v49 = vpop.permute.xlu1 %8264 }
 0x27d   : > { %v7644_v17 = vcombine.low %v7643_v7, %v7643_v7  ;;  %7110 = vrot.lane.b32.xlu1 %v7109_v58, %s13082_s26  ;;  %13307 = vst [vmem:[#allocation32_spill] sm:$0xff] %v10899_v49  ;;  %v2911_v7 = vld [vmem:[#allocation2 + $0x18] sm:$0x22]  ;;  %v3472_v4 = vsel %vm3471_vm15, %v3470_v53, %v10774_v43  ;;  %v4698_v43 = vrot.slane %v10513_v51, 7  ;;  %vm5115_vm15 = vcmask 678912   ;;  %s9327_s26 = smov 41  }
 0x27e   : > { %7580 = vrot.lane.b32.xlu0 %v7576_v12, %s13298_s10  ;;  %s13311_s10 = smov 126   ;;  %v8027_v12 = vrot.slane %v8020_v28, %v9448_v15  ;;  %v3092_v28 = vcombine.low %v3090_v14, %v3090_v14  ;;  %v4545_v14 = vrot.slane %v4537_v36, %v9448_v15  ;;  %v4679_v36 = vld [vmem:[%s9453_s22] sm:$0x3] }
 0x27f   : > { %v7651_v27 = vrot.slane %v7644_v17, %v9448_v15  ;;  %v4164_v17 = vrot.slane %v4157_v54, %v9448_v15  ;;  %v3759_v54 = vrot.slane %v3752_v19, %v9448_v15 }
 0x280   : > { %v10911_v39 = vpop.permute.xlu0 %4746  ;;  %v2903_v6 = vpop.permute.xlu1 %2902  ;;  %v4546_v53 = vcombine.low %v4545_v14, %v4545_v14 }
 0x281   : > { %7652 = vrot.lane.b32.xlu1 %v7651_v27, %s13311_s10  ;;  %v2904_v58 = vrot.slane %v2903_v6, 4  ;;  %v3871_v27 = vld [vmem:[%s9453_s22] sm:$0x3]  ;;  %v4165_v46 = vcombine.low %v4164_v17, %v4164_v17  ;;  %v4699_v17 = vsel %vm13078_vm3, %v4698_v43, %v10513_v51  ;;  %v5496_v51 = vrot.slane %v10794_v41, 7 }
 0x282   : > { %6072 = vrot.lane.b32.xlu0 %v13312_v50, %s9312_s13  ;;  %v3892_v50 = vsel %vm13080_vm9, %v3890_v62, %v10507_v26  ;;  %s13313_s13 = smov 122   ;;  %v3474_v62 = vmul.bf16 %v3472_v4, %v3445_v11  ;;  %vm13318_vm3 = vcmask 48128   ;;  %vm5804_vm9 = vcmask 793600  }
 0x283   : > { %v2906_v22 = vsel %vm13081_vm12, %v2903_v6, %v2904_v58  ;;  %v3099_v6 = vrot.slane %v3092_v28, %v9448_v15  ;;  %v3894_v26 = vmul.bf16 %v3892_v50, %v3871_v27  ;;  %v4553_v28 = vrot.slane %v4546_v53, %v9448_v15 }
 0x284   : > { %v10927_v3 = vpop.permute.xlu0 %3785  ;;  %v2912_v60 = vsel %vm2910_vm6, %v2906_v22, %v2911_v7  ;;  %v3482_v7 = vrot.slane %v3474_v62, %v9448_v15  ;;  %v4701_v27 = vmul.bf16 %v4699_v17, %v4679_v36  ;;  %v6292_v50 = vrot.slane %v10534_v9, 7  ;;  %v6895_v36 = vld [vmem:[%s9453_s22] sm:$0x3] }
 0x285   : > { %8028 = vrot.lane.b32.xlu1 %v8027_v12, %s13313_s13  ;;  %2913 = vst [vmem:[#allocation2 + $0x18] sm:$0x22] %v2912_v60  ;;  %v4172_v12 = vrot.slane %v4165_v46, %v9448_v15  ;;  %v3896_v63 = vcombine.low %v3894_v26, %v3894_v26  ;;  %v3106_v11 = vrot.slane %v3099_v6, %v9448_v15  ;;  %v6271_v6 = vld [vmem:[%s9453_s22] sm:$0x3]  ;;  %vm6921_vm6 = vcmask 941056  }
 0x286   : > { %7463 = vrot.lane.b32.xlu0 %v10578_v59, %s13284_s21  ;;  %v4967_v59 = vrot.slane %v4960_v37, %v9448_v15  ;;  %v3489_v60 = vrot.slane %v3482_v7, %v9448_v15  ;;  %v5114_v37 = vrot.slane %v10809_v24, 7  ;;  %v4703_v46 = vcombine.low %v4701_v27, %v4701_v27 }
 0x287   : > { %v3903_v22 = vrot.slane %v3896_v63, %v9448_v15  ;;  %v6294_v26 = vsel %vm6293_vm7, %v6292_v50, %v10534_v9  ;;  %v5498_v53 = vsel %vm5497_vm2, %v5496_v51, %v10794_v41  ;;  %v5912_v7 = vrot.slane %v10540_v10, 7  ;;  %v5634_v51 = vld [vmem:[%s9467_s5] sm:$0x1] }
 0x288   : > { %v10941_v58 = vpop.permute.xlu0 %4204  ;;  %v5116_v63 = vsel %vm5115_vm15, %v5114_v37, %v10809_v24  ;;  %v10984_v9 = vrot.slane %v10826_v44, %v9448_v15  ;;  %vm5913_vm7 = vcmask 801792   ;;  %v4710_v17 = vrot.slane %v4703_v46, %v9448_v15 }
 0x289   : > { %3760 = vrot.lane.b32.xlu1 %v3759_v54, %s9315_s12  ;;  %s13314_s12 = smov 62   ;;  %v6920_v54 = vrot.slane %v10546_v30, 7  ;;  %v3910_v43 = vrot.slane %v3903_v22, %v9448_v15  ;;  %v5892_v22 = vld [vmem:[%s9453_s22] sm:$0x3]  ;;  %v5914_v27 = vsel %vm5913_vm7, %v5912_v7, %v10540_v10  ;;  %vm13079_vm2 = vcmask 392192  }
 0x28a   : > { %6865 = vrot.lane.b32.xlu0 %v10760_v35, %s9313_s14  ;;  %v4968_v35 = vcombine.low %v4967_v59, %v4967_v59  ;;  %s13315_s14 = smov 58   ;;  %v5470_v59 = vld [vmem:[%s9453_s22] sm:$0x3]  ;;  %v5916_v46 = vmul.bf16 %v5914_v27, %v5892_v22  ;;  %v2978_v10 = vrot.slane %v10567_v23, 7  ;;  %vm3992_vm15 = vcmask 531456  }
 0x28b   : > { %v6922_v41 = vsel %vm6921_vm6, %v6920_v54, %v10546_v30  ;;  %v5500_v24 = vmul.bf16 %v5498_v53, %v5470_v59  ;;  %v5654_v59 = vmul.bf16 %v10847_v40, %v5634_v51  ;;  %vm4589_vm6 = vcmask 580608   ;;  %v8036_v27 = vld [vmem:[%s9467_s5] sm:$0x3] }
 0x28c   : > { %v10950_v19 = vpop.permute.xlu0 %4791  ;;  %v4975_v14 = vrot.slane %v4968_v35, %v9448_v15  ;;  %v6924_v50 = vmul.bf16 %v6922_v41, %v6895_v36  ;;  %vm5005_vm7 = vcmask 670720   ;;  %v4588_v7 = vrot.slane %v10640_v13, 7  ;;  %v2959_v41 = vld [vmem:[%s9453_s22] sm:$0x3] }
 0x28d   : > { %4173 = vrot.lane.b32.xlu1 %v4172_v12, %s13314_s12  ;;  %v5089_v12 = vld [vmem:[%s9453_s22] sm:$0x3]  ;;  %s9325_s12 = smov 60   ;;  %v5502_v37 = vcombine.low %v5500_v24, %v5500_v24  ;;  %v5924_v36 = vrot.slane %v5916_v46, %v9448_v15  ;;  %v5004_v24 = vrot.slane %v10645_v32, 7  ;;  %vm7307_vm12 = vcmask 973824  }
 0x28e   : > { %3107 = vrot.lane.b32.xlu0 %v3106_v11, %s9321_s30  ;;  %s9324_s30 = smov 75   ;;  %v6296_v11 = vmul.bf16 %v6294_v26, %v6271_v6  ;;  %v5118_v35 = vmul.bf16 %v5116_v63, %v5089_v12  ;;  %v6932_v6 = vrot.slane %v6924_v50, %v9448_v15  ;;  %v2914_v12 = vld [vmem:[%s9467_s5] sm:$0x1]  ;;  %v3991_v63 = vrot.slane %v10630_v25, 7 }
 0x28f   : > { %v4206_v49 = vrot.slane %v10941_v58, 7 }
 0x290   : > { %v10961_v4 = vpop.permute.xlu0 %3525  ;;  %v6298_v44 = vcombine.low %v6296_v11, %v6296_v11  ;;  %v5126_v30 = vrot.slane %v5118_v35, %v9448_v15  ;;  %v6933_v35 = vcombine.low %v6932_v6, %v6932_v6  ;;  %v4984_v6 = vld [vmem:[%s9453_s22] sm:$0x3] }
 0x291   : > { %4554 = vrot.lane.b32.xlu1 %v4553_v28, %s13315_s14  ;;  %s13317_s14 = smov 56  }
 0x292   : > { %3490 = vrot.lane.b32.xlu0 %v3489_v60, %s9324_s30  ;;  %v3333_v60 = vld [vmem:[%s9467_s5] sm:$0x1]  ;;  %v11008_v53 = vrot.slane %v6298_v44, %v9448_v15  ;;  %v5133_v40 = vrot.slane %v5126_v30, %v9448_v15  ;;  %v5662_v44 = vrot.slane %v5654_v59, %v9448_v15 }
 0x293   : > { %v3359_v26 = vmul.bf16 %v10552_v52, %v3333_v60  ;;  %v5509_v52 = vrot.slane %v5502_v37, %v9448_v15  ;;  %v2934_v60 = vmul.bf16 %v10558_v21, %v2914_v12  ;;  %v3967_v37 = vld [vmem:[%s9453_s22] sm:$0x3] }
 0x294   : > { %v10972_v62 = vpop.permute.xlu0 %6557  ;;  %v4562_v30 = vld [vmem:[%s9453_s22] sm:$0x3] }
 0x295   : > { %4976 = vrot.lane.b32.xlu1 %v4975_v14, %s13316_s29  ;;  %v4717_v14 = vrot.slane %v4710_v17, %v9448_v15  ;;  %v2980_v17 = vsel %vm13079_vm2, %v2978_v10, %v10567_v23  ;;  %v3361_v22 = vcombine.low %v3359_v26, %v3359_v26  ;;  %s9326_s29 = smov 45   ;;  %vm4374_vm2 = vcmask 564224   ;;  %v5581_v59 = vld [vmem:[%s9453_s22] sm:$0x3] }
 0x296   : > { %3911 = vrot.lane.b32.xlu0 %v3910_v43, %s13264_s9  ;;  %v8057_v43 = vrot.slane %v10621_v48, 1  ;;  %v6312_v23 = vrot.slane %v11008_v53, %v9448_v15  ;;  %v2982_v51 = vmul.bf16 %v2980_v17, %v2959_v41  ;;  %v5516_v21 = vrot.slane %v5509_v52, %v9448_v15 }
 0x297   : > { %v5006_v26 = vsel %vm5005_vm7, %v5004_v24, %v10645_v32  ;;  %v2942_v32 = vrot.slane %v2934_v60, %v9448_v15  ;;  %v7280_v60 = vld [vmem:[%s9453_s22] sm:$0x3] }
 0x298   : > { %v10989_v28 = vpop.permute.xlu0 %3571  ;;  %v8058_v50 = vsel %vm13318_vm3, %v10621_v48, %v8057_v43  ;;  %v3993_v48 = vsel %vm3992_vm15, %v3991_v63, %v10630_v25  ;;  %v7306_v43 = vrot.slane %v10823_v18, 7  ;;  %v5733_v25 = vld [vmem:[%s9467_s5] sm:$0x1]  ;;  %v5669_v63 = vrot.slane %v5662_v44, %v9448_v15 }
 0x299   : > { %v8060_v10 = vmul.bf16 %v8058_v50, %v8036_v27  ;;  %v3995_v52 = vmul.bf16 %v3993_v48, %v3967_v37  ;;  %vm13319_vm3 = vcmask 719872   ;;  %v2990_v24 = vrot.slane %v2982_v51, %v9448_v15 }
 0x29a   : > { %4312 = vrot.lane.b32.xlu0 %v10984_v9, %s9325_s12  ;;  %v5384_v27 = vrot.slane %v10670_v8, 7  ;;  %vm6399_vm15 = vcmask 842752   ;;  %v7308_v37 = vsel %vm7307_vm12, %v7306_v43, %v10823_v18  ;;  %v4373_v48 = vrot.slane %v10659_v20, 7 }
 0x29b   : > { %v5803_v51 = vrot.slane %v10676_v55, 7  ;;  %vm13320_vm12 = vcmask 15360  }
 0x29c   : > { %v10998_v54 = vpop.permute.xlu0 %5335  ;;  %v5386_v43 = vsel %vm5385_vm5, %v5384_v27, %v10670_v8  ;;  %v5779_v8 = vld [vmem:[%s9453_s22] sm:$0x3]  ;;  %vm7195_vm5 = vcmask 965632  }
 0x29e   : > { %4718 = vrot.lane.b32.xlu0 %v4717_v14, %s13317_s14  ;;  %v4590_v14 = vsel %vm4589_vm6, %v4588_v7, %v10640_v13  ;;  %v5931_v13 = vrot.slane %v5924_v36, %v9448_v15  ;;  %v11050_v7 = vrot.slane %v6933_v35, %v9448_v15  ;;  %v5753_v36 = vmul.bf16 %v10650_v33, %v5733_v25 }
 0x29f   : > { %v4592_v41 = vmul.bf16 %v4590_v14, %v4562_v30  ;;  %v7680_v35 = vrot.slane %v10654_v47, 1  ;;  %v5671_v30 = vshll.u32 %v5669_v63, 16  ;;  %v2997_v63 = vrot.slane %v2990_v24, %v9448_v15 }
 0x2a0   : > { %v11014_v11 = vpop.permute.xlu0 %6344  ;;  %vm13323_vm6 = vsmask.f32 7424 }
 0x2a1   : > { %v4600_v18 = vrot.slane %v4592_v41, %v9448_v15  ;;  %v4348_v41 = vld [vmem:[%s9453_s22] sm:$0x3]  ;;  %v5673_v27 = vrot.slane %v5671_v30, 6 }
 0x2a2   : > { %5134 = vrot.lane.b32.xlu0 %v5133_v40, %s9326_s29  ;;  %v11043_v40 = vrot.slane %v3361_v22, %v9448_v15  ;;  %v5008_v22 = vmul.bf16 %v5006_v26, %v4984_v6  ;;  %v5363_v26 = vld [vmem:[%s9453_s22] sm:$0x3] }
 0x2a4   : > { %v5599_v46 = vpop.permute.xlu0 %5598  ;;  %v3369_v33 = vcombine.low %v11043_v40, %v11043_v40  ;;  %v5016_v6 = vrot.slane %v5008_v22, %v9448_v15  ;;  %v5805_v22 = vsel %vm5804_vm9, %v5803_v51, %v10676_v55  ;;  %v5529_v55 = vld [vmem:[%s9467_s5] sm:$0x1]  ;;  %vm3190_vm9 = vcmask 408576  }
 0x2a5   : > { %v5600_v12 = vrot.slane %v5599_v46, 7  ;;  %v5807_v30 = vmul.bf16 %v5805_v22, %v5779_v8  ;;  %v3189_v22 = vrot.slane %v10862_v38, 7 }
 0x2a6   : > { %5517 = vrot.lane.b32.xlu0 %v5516_v21, %s9327_s26  ;;  %v8062_v21 = vcombine.low %v8060_v10, %v8060_v10  ;;  %v4003_v10 = vrot.slane %v3995_v52, %v9448_v15  ;;  %v7681_v52 = vsel %vm13320_vm12, %v10654_v47, %v7680_v35  ;;  %v5023_v35 = vrot.slane %v5016_v6, %v9448_v15 }
 0x2a7   : > { %v5601_v17 = vsel %vm13319_vm3, %v5600_v12, %v5599_v46  ;;  %v2943_v46 = vcombine.low %v2942_v32, %v2942_v32  ;;  %v7660_v32 = vld [vmem:[%s9467_s5] sm:$0x3]  ;;  %vm3324_vm3 = vcmask 629760   ;;  %vm3710_vm12 = vcmask 594949  }
 0x2a8   : > { %v5603_v50 = vmul.bf16 %v5601_v17, %v5581_v59  ;;  %v11056_v44 = vpop.permute.xlu0 %6179  ;;  %v7310_v59 = vmul.bf16 %v7308_v37, %v7280_v60  ;;  %v8069_v40 = vrot.slane %v8062_v21, %v9448_v15  ;;  %v4375_v17 = vsel %vm4374_vm2, %v4373_v48, %v10659_v20 }
 0x2a9   : > { %v2950_v24 = vrot.slane %v2943_v46, %v9448_v15  ;;  %v4010_v47 = vrot.slane %v4003_v10, %v9448_v15  ;;  %v5388_v21 = vmul.bf16 %v5386_v43, %v5363_v26  ;;  %v4607_v20 = vrot.slane %v4600_v18, %v9448_v15 }
 0x2aa   : > { %v5611_v14 = vrot.slane %v5603_v50, %v9448_v15  ;;  %5932 = vrot.lane.b32.xlu0 %v5931_v13, %s13084_s8  ;;  %v5755_v13 = vcombine.low %v5753_v36, %v5753_v36  ;;  %s13085_s8 = smov 26   ;;  %v6398_v36 = vrot.slane %v10682_v16, 7  ;;  %v7312_v60 = vcombine.low %v7310_v59, %v7310_v59  ;;  %v6372_v59 = vld [vmem:[%s9453_s22] sm:$0x3] }
 0x2ab   : > { %v4377_v51 = vmul.bf16 %v4375_v17, %v4348_v41  ;;  %v11103_v46 = vshll.u32 %v2997_v63, 16  ;;  %v8070_v10 = vcombine.low %v8069_v40, %v8069_v40  ;;  %v11108_v6 = vshll.u32 %v4010_v47, 16 }
 0x2ac   : > { %v5618_v12 = vrot.slane %v5611_v14, %v9448_v15  ;;  %v11076_v25 = vpop.permute.xlu0 %6603  ;;  %v5762_v53 = vrot.slane %v5755_v13, %v9448_v15  ;;  %v3376_v14 = vrot.slane %v3369_v33, %v9448_v15  ;;  %v5556_v26 = vmul.bf16 %v10665_v45, %v5529_v55  ;;  %v7340_v13 = vld [vmem:[%s9467_s5] sm:$0x1] }
 0x2ad   : > { %v5396_v43 = vrot.slane %v5388_v21, %v9448_v15  ;;  %v11116_v33 = vshll.u32 %v4607_v20, 16  ;;  %v11118_v63 = vshll.u32 %v5023_v35, 16  ;;  %v7319_v40 = vrot.slane %v7312_v60, %v9448_v15  ;;  %v6953_v20 = vld [vmem:[%s9467_s5] sm:$0x1] }
 0x2ae   : > { %v5620_v50 = vshll.u32 %v5618_v12, 16  ;;  %6313 = vrot.lane.b32.xlu0 %v6312_v23, %s13085_s8  ;;  %v7683_v23 = vmul.bf16 %v7681_v52, %v7660_v32  ;;  %s13321_s8 = smov 88   ;;  %v6400_v12 = vsel %vm6399_vm15, %v6398_v36, %v10682_v16  ;;  %v5763_v52 = vcombine.low %v5762_v53, %v5762_v53 }
 0x2af   : > { %v4385_v41 = vrot.slane %v4377_v51, %v9448_v15  ;;  %v5815_v17 = vrot.slane %v5807_v30, %v9448_v15  ;;  %v6402_v8 = vmul.bf16 %v6400_v12, %v6372_v59  ;;  %v7367_v16 = vmul.bf16 %v10697_v2, %v7340_v13  ;;  %v3169_v12 = vld [vmem:[%s9453_s22] sm:$0x3] }
 0x2b0   : > { %v11099_v37 = vpop.permute.xlu0 %5962  ;;  %v5622_v48 = vrot.slane %v5620_v50, 6  ;;  %v7691_v45 = vrot.slane %v7683_v23, %v9448_v15  ;;  %v5403_v47 = vrot.slane %v5396_v43, %v9448_v15  ;;  %v11133_v21 = vrot.slane %v8070_v10, %v9448_v15  ;;  %v3502_v10 = vld [vmem:[%s9467_s5] sm:$0x1] }
 0x2b1   : > { %v7320_v2 = vcombine.low %v7319_v40, %v7319_v40  ;;  %v7194_v35 = vrot.slane %v10711_v34, 7  ;;  %v11143_v53 = vrot.slane %v5763_v52, %v9448_v15  ;;  %v4392_v51 = vrot.slane %v4385_v41, %v9448_v15  ;;  %v5146_v43 = vld [vmem:[%s9467_s5] sm:$0x1] }
 0x2b2   : > { %2951 = vrot.lane.b32.xlu0 %v2950_v24, %s13321_s8  ;;  %v11106_v18 = vpack.i.bf16 %v5673_v27, %v5622_v48  ;;  %s13322_s8 = smov 77   ;;  %v9130_v27 = vld [vmem:[%s9453_s22 + $0x1] ss:$0 sps:$4 sm:$0x11]   ;;  %v5558_v24 = vcombine.low %v5556_v26, %v5556_v26  ;;  %v7692_v23 = vcombine.low %v7691_v45, %v7691_v45  ;;  %v5822_v30 = vrot.slane %v5815_v17, %v9448_v15  ;;  %v3014_v17 = vld [vmem:[%s9467_s5] sm:$0x1] }
 0x2b3   : > { %v6410_v26 = vrot.slane %v6402_v8, %v9448_v15  ;;  %v7369_v59 = vcombine.low %v7367_v16, %v7367_v16  ;;  %v3191_v13 = vsel %vm3190_vm9, %v3189_v22, %v10862_v38  ;;  %v7832_v40 = vrot.slane %v9130_v27, %v9448_v15  ;;  %v7173_v8 = vld [vmem:[%s9453_s22] sm:$0x3] }
 0x2b4   : > { %v11121_v32 = vpop.permute.xlu0 %6012  ;;  %v11158_v52 = vrot.slane %v5558_v24, %v9448_v15  ;;  %v11160_v45 = vshll.u32 %v5403_v47, 16  ;;  %v6979_v41 = vmul.bf16 %v10701_v31, %v6953_v20  ;;  %vm3327_vm2 = vcmask 629767  }
 0x2b5   : > { %v7196_v16 = vsel %vm7195_vm5, %v7194_v35, %v10711_v34  ;;  %v3528_v22 = vmul.bf16 %v10961_v4, %v3502_v10  ;;  %v7327_v27 = vrot.slane %v7320_v2, %v9448_v15  ;;  %v11172_v24 = vshll.u32 %v5822_v30, 16  ;;  %vm11184_vm7 = vmand %vm3327_vm2, %vm13323_vm6  ;;  %v6743_v30 = vld [vmem:[%s9467_s5] sm:$0x1] }
 0x2b6   : > { %3377 = vrot.lane.b32.xlu0 %v3376_v14, %s13322_s8  ;;  %v3922_v14 = vld [vmem:[%s9467_s5] sm:$0x1]  ;;  %s13086_s8 = smov 13   ;;  %v5172_v47 = vmul.bf16 %v10689_v5, %v5146_v43  ;;  %v3193_v31 = vmul.bf16 %v3191_v13, %v3169_v12  ;;  %v11176_v20 = vrot.slane %v7692_v23, %v9448_v15  ;;  %v6417_v48 = vrot.slane %v6410_v26, %v9448_v15  ;;  %vm3329_vm15 = vmor %vm11184_vm7, %vm13227_vm1 }
 0x2b7   : > { %v3942_v38 = vmul.bf16 %v10894_v57, %v3922_v14  ;;  %v7376_v34 = vrot.slane %v7369_v59, %v9448_v15  ;;  %v3034_v57 = vmul.bf16 %v10730_v1, %v3014_v17  ;;  %v7839_v5 = vrot.slane %v7832_v40, %v9448_v15  ;;  %v4729_v13 = vld [vmem:[%s9467_s5] sm:$0x1]  ;;  %v3330_v40 = vld [vmem:[#allocation2 + $0x18] sm:$0x88] }
 0x2b8   : > { %v11138_v55 = vpop.permute.xlu0 %7145  ;;  %v11189_v2 = vshll.u32 %v4392_v51, 16  ;;  %v6987_v23 = vrot.slane %v6979_v41, %v9448_v15  ;;  %v7198_v1 = vmul.bf16 %v7196_v16, %v7173_v8  ;;  %v3536_v10 = vrot.slane %v3528_v22, %v9448_v15  ;;  %v4624_v35 = vld [vmem:[%s9467_s5] sm:$0x1] }
 0x2b9   : > { %v3944_v14 = vcombine.low %v3942_v38, %v3942_v38  ;;  %v11200_v51 = vrot.slane %v5172_v47, %v9448_v15  ;;  %v3201_v12 = vrot.slane %v3193_v31, %v9448_v15  ;;  %v11208_v17 = vshll.u32 %v6417_v48, 16  ;;  %v3225_v38 = vld [vmem:[%s9467_s5] sm:$0x1]  ;;  %v13328_v31 = vld [vmem:[#allocation21_spill] sm:$0xff]  ;;  %v7711_v48 = vld [vmem:[%s9453_s22 + $0x1] sm:$0x1] }
 0x2ba   : > { %6941 = vrot.lane.b32.xlu0 %v11050_v7, %s13086_s8  ;;  %s13087_s8 = smov 9   ;;  %v7377_v8 = vcombine.low %v7376_v34, %v7376_v34  ;;  %v3042_v16 = vrot.slane %v3034_v57, %v9448_v15  ;;  %v11215_v47 = vrot.slane %v7198_v1, %v9448_v15  ;;  %v6768_v59 = vmul.bf16 %v13328_v31, %v6743_v30 }
 0x2bb   : > { %13326 = vst [vmem:[#allocation33_spill] sm:$0xff] %v11208_v17  ;;  %v3951_v36 = vrot.slane %v3944_v14, %v9448_v15  ;;  %v4749_v34 = vmul.bf16 %v10911_v39, %v4729_v13  ;;  %v3543_v57 = vrot.slane %v3536_v10, %v9448_v15  ;;  %vm13329_vm5 = vsmask.f32 5376  ;;  %v3713_v10 = vld [vmem:[#allocation2 + $0x20] sm:$0x22] }
 0x2bc   : > { %v11169_v7 = vpop.permute.xlu0 %7410  ;;  %vm11230_vm9 = vmand %vm3710_vm12, %vm13329_vm5  ;;  %v3208_v39 = vrot.slane %v3201_v12, %v9448_v15  ;;  %vm4128_vm2 = vcmask 506887   ;;  %v11238_v4 = vrot.slane %v7377_v8, %v9448_v15  ;;  %vm3707_vm6 = vcmask 596992   ;;  %v13332_v12 = vld [vmem:[#allocation22_spill] sm:$0xff] }
 0x2bd   : > { %vm3712_vm7 = vmor %vm11230_vm9, %vm13167_vm0  ;;  %vm4509_vm12 = vcmask 472069   ;;  %vm4125_vm5 = vcmask 506880   ;;  %vm5727_vm9 = vcmask 261127  }
 0x2be   : > { %7328 = vrot.lane.b32.xlu0 %v7327_v27, %s13087_s8  ;;  %s13327_s8 = smov 124   ;;  %v6988_v27 = vcombine.low %v6987_v23, %v6987_v23  ;;  %v3210_v1 = vshll.u32 %v3208_v39, 16 }
 0x2c0   : > { %v3322_v26 = vpop.permute.xlu1 %3321  ;;  %v11196_v43 = vpop.permute.xlu0 %6810  ;;  %v11256_v31 = vrot.slane %v6988_v27, %v9448_v15  ;;  %v3212_v50 = vrot.slane %v3210_v1, 6  ;;  %v13342_v1 = vld [vmem:[#allocation23_spill] sm:$0xff] }
 0x2c1   : > { %v3323_v41 = vrot.slane %v3322_v26, 4 }
 0x2c2   : > { %7840 = vrot.lane.b32.xlu0 %v7839_v5, %s13327_s8 }
 0x2c3   : > { %v3325_v60 = vsel %vm3324_vm3, %v3322_v26, %v3323_v41  ;;  %v7737_v41 = vmul.bf16 %v13332_v12, %v7711_v48  ;;  %vm13334_vm3 = vsmask.f32 7424  ;;  %v4512_v48 = vld [vmem:[#allocation2 + $0x28] sm:$0x22] }
 0x2c4   : > { %v3331_v5 = vsel %vm3329_vm15, %v3325_v60, %v3330_v40  ;;  %v3244_v23 = vpop.permute.xlu0 %3243  ;;  %v3049_v60 = vrot.slane %v3042_v16, %v9448_v15  ;;  %v11244_v40 = vrot.slane %v6768_v59, %v9448_v15  ;;  %v11253_v16 = vld.sshfl [vmem:[%s9467_s5] sm:$0x1 pattern:$0x73625140]  ;;  %vm11263_vm15 = vmand %vm4128_vm2, %vm13334_vm3  ;;  %vm4927_vm3 = vcmask 384007  }
 0x2c5   : > { %3332 = vst [vmem:[#allocation2 + $0x18] sm:$0x88] %v3331_v5  ;;  %v3246_v14 = vmul.bf16 %v3244_v23, %v3225_v38  ;;  %v4751_v5 = vcombine.low %v4749_v34, %v4749_v34  ;;  %v7213_v23 = vrot.slane %v11215_v47, %v9448_v15  ;;  %v4339_v22 = vrot.slane %v11253_v16, %v9448_v15  ;;  %vm4130_vm2 = vmor %vm11263_vm15, %vm13227_vm1 }
 0x2c6   : > { %v3705_v26 = vpop.permute.xlu1 %3704  ;;  %3544 = vrot.lane.b32.xlu0 %v3543_v57, %s9324_s30  ;;  %v3958_v57 = vrot.slane %v3951_v36, %v9448_v15  ;;  %v11272_v36 = vshll.u32 %v3049_v60, 16  ;;  %v7745_v39 = vrot.slane %v7737_v41, %v9448_v15  ;;  %v4131_v60 = vld [vmem:[#allocation2 + $0x20] sm:$0x88]  ;;  %s13353_s30 = smov 80  }
 0x2c7   : > { %v3254_v38 = vrot.slane %v3246_v14, %v9448_v15  ;;  %v3706_v8 = vrot.slane %v3705_v26, 4  ;;  %v4027_v14 = vld [vmem:[%s9467_s5] sm:$0x1]  ;;  %v11299_v29 = vshll.u32 %v4339_v22, 16 }
 0x2c8   : > { %v11259_v59 = vpop.permute.xlu0 %7899 }
 0x2c9   : > { %13333 = vst [vmem:[#allocation21_spill] sm:$0xff] %v11259_v59  ;;  %v3261_v12 = vrot.slane %v3254_v38, %v9448_v15  ;;  %v3708_v27 = vsel %vm3707_vm6, %v3705_v26, %v3706_v8  ;;  %v4758_v38 = vrot.slane %v4751_v5, %v9448_v15  ;;  %v8089_v8 = vld [vmem:[%s9453_s22 + $0x1] sm:$0x1]  ;;  %vm13338_vm6 = vsmask.f32 5376 }
 0x2ca   : > { %v3714_v34 = vsel %vm3712_vm7, %v3708_v27, %v3713_v10  ;;  %v4123_v13 = vpop.permute.xlu1 %4122  ;;  %3959 = vrot.lane.b32.xlu0 %v3958_v57, %s13264_s9  ;;  %v13337_v57 = vld [vmem:[#allocation24_spill] sm:$0xff]  ;;  %vm11292_vm7 = vmand %vm4509_vm12, %vm13338_vm6  ;;  %vm4506_vm12 = vcmask 474112   ;;  %s9332_s9 = smov 78  }
 0x2cb   : > { %v3263_v26 = vshll.u32 %v3261_v12, 16  ;;  %3715 = vst [vmem:[#allocation2 + $0x20] sm:$0x22] %v3714_v34  ;;  %v4124_v10 = vrot.slane %v4123_v13, 4  ;;  %v4052_v27 = vmul.bf16 %v13337_v57, %v4027_v14  ;;  %v3402_v12 = vshll.u32 %v10984_v9, 16  ;;  %vm4511_vm15 = vmor %vm11292_vm7, %vm13167_vm0 }
 0x2cc   : > { %v11288_v47 = vpop.permute.xlu0 %3840  ;;  %v5312_v34 = vld [vmem:[%s9467_s5] sm:$0x1]  ;;  %v3053_v14 = vrot.slane %v11272_v36, 7  ;;  %v11308_v9 = vshll.u32 %v7213_v23, 16  ;;  %v13343_v23 = vld [vmem:[#allocation25_spill] sm:$0xff] }
 0x2cd   : > { %v3265_v30 = vrot.slane %v3263_v26, 6  ;;  %v4126_v5 = vsel %vm4125_vm5, %v4123_v13, %v4124_v10  ;;  %v7752_v13 = vrot.slane %v7745_v39, %v9448_v15  ;;  %v8116_v26 = vmul.bf16 %v13342_v1, %v8089_v8  ;;  %v6325_v10 = vld [vmem:[%s9467_s5] sm:$0x1] }
 0x2ce   : > { %v4132_v57 = vsel %vm4130_vm2, %v4126_v5, %v4131_v60  ;;  %v4504_v17 = vpop.permute.xlu1 %4503  ;;  %4340 = vrot.lane.b32.xlu0 %v4339_v22, %s9325_s12  ;;  %13341 = vst [vmem:[#allocation22_spill] sm:$0xff] %v11308_v9  ;;  %v4765_v5 = vrot.slane %v4758_v38, %v9448_v15  ;;  %v4060_v22 = vrot.slane %v4052_v27, %v9448_v15  ;;  %v5944_v8 = vld [vmem:[%s9467_s5] sm:$0x1]  ;;  %vm13344_vm2 = vsmask.f32 7424  ;;  %s9333_s12 = smov 76  }
 0x2cf   : > { %4133 = vst [vmem:[#allocation2 + $0x20] sm:$0x88] %v4132_v57  ;;  %v4505_v36 = vrot.slane %v4504_v17, 4  ;;  %v9013_v60 = vpack.i.bf16 %v3265_v30, %v3212_v50  ;;  %v4651_v9 = vmul.bf16 %v13343_v23, %v4624_v35  ;;  %v5338_v39 = vmul.bf16 %v10998_v54, %v5312_v34  ;;  %vm11326_vm6 = vmand %vm4927_vm3, %vm13344_vm2  ;;  %v6540_v23 = vld [vmem:[%s9467_s5] sm:$0x1] }
 0x2d0   : > { %v11322_v1 = vpop.permute.xlu0 %4265  ;;  %vm5306_vm5 = vcmask 349189   ;;  %v3404_v50 = vrot.slane %v3402_v12, 5  ;;  %v3436_v30 = vrot.slane %v11299_v29, 5  ;;  %v3787_v35 = vrot.slane %v10927_v3, 7  ;;  %vm4929_vm7 = vmor %vm11326_vm6, %vm13227_vm1  ;;  %v5309_v57 = vld [vmem:[#allocation2 + $0x30] sm:$0x22] }
 0x2d1   : > { %v4507_v59 = vsel %vm4506_vm12, %v4504_v17, %v4505_v36  ;;  %9014 = vrot.lane.b32.xlu1 %v9013_v60, %s9332_s9  ;;  %v6347_v54 = vmul.bf16 %v11014_v11, %v6325_v10  ;;  %vm4924_vm3 = vcmask 384000   ;;  %v11340_v27 = vshll.u32 %v7752_v13, 16  ;;  %v4930_v11 = vld [vmem:[#allocation2 + $0x28] sm:$0x88]  ;;  %s9339_s9 = smov 59  }
 0x2d2   : > { %v4513_v38 = vsel %vm4511_vm15, %v4507_v59, %v4512_v48  ;;  %v4922_v17 = vpop.permute.xlu1 %4921  ;;  %4766 = vrot.lane.b32.xlu0 %v4765_v5, %s13317_s14  ;;  %v11343_v12 = vrot.slane %v8116_v26, %v9448_v15  ;;  %v5965_v34 = vmul.bf16 %v11099_v37, %v5944_v8  ;;  %v4067_v41 = vrot.slane %v4060_v22, %v9448_v15  ;;  %v3823_v26 = vld [vmem:[%s9467_s5] sm:$0x1]  ;;  %s13367_s14 = smov 43  }
 0x2d3   : > { %4514 = vst [vmem:[#allocation2 + $0x28] sm:$0x22] %v4513_v38  ;;  %v4923_v59 = vrot.slane %v4922_v17, 4  ;;  %v11352_v10 = vrot.slane %v4651_v9, %v9448_v15  ;;  %v5346_v13 = vrot.slane %v5338_v39, %v9448_v15  ;;  %vm13347_vm12 = vsmask.f32 5376 }
 0x2d4   : > { %v11356_v48 = vpop.permute.xlu0 %4844  ;;  %vm11360_vm15 = vmand %vm5306_vm5, %vm13347_vm12  ;;  %v13350_v36 = vrot.slane %v11103_v46, 7  ;;  %v5040_v5 = vld [vmem:[%s9467_s5] sm:$0x1]  ;;  %v13351_v9 = vrot.slane %v11200_v51, %v9448_v15  ;;  %vm5303_vm2 = vcmask 351232   ;;  %v9018_v39 = vpack.i.bf16 %v3436_v30, %v3404_v50 }
 0x2d5   : > { %v4925_v22 = vsel %vm4924_vm3, %v4922_v17, %v4923_v59  ;;  %v3768_v8 = vld [vmem:[%s9453_s22] sm:$0x3]  ;;  %vm13352_vm5 = vcmask 457728   ;;  %v6349_v46 = vcombine.low %v6347_v54, %v6347_v54  ;;  %v8131_v51 = vrot.slane %v11343_v12, %v9448_v15  ;;  %vm5308_vm3 = vmor %vm11360_vm15, %vm13167_vm0 }
 0x2d6   : > { %v9008_v60 = vpack.i.bf16 %v3053_v14, %v13350_v36  ;;  %5188 = vrot.lane.b32.xlu1 %v13351_v9, %s9326_s29  ;;  %v3789_v38 = vsel %vm13352_vm5, %v3787_v35, %v10927_v3  ;;  %v4931_v14 = vsel %vm4929_vm7, %v4925_v22, %v4930_v11  ;;  %v5301_v17 = vpop.permute.xlu1 %5300  ;;  %v5973_v50 = vrot.slane %v5965_v34, %v9448_v15  ;;  %v13354_v54 = vld [vmem:[#allocation26_spill] sm:$0xff]  ;;  %s13371_s29 = smov 26  }
 0x2d7   : > { %v3843_v3 = vmul.bf16 %v11288_v47, %v3823_v26  ;;  %4932 = vst [vmem:[#allocation2 + $0x28] sm:$0x88] %v4931_v14  ;;  %v5302_v30 = vrot.slane %v5301_v17, 4  ;;  %v11391_v35 = vshll.u32 %v4067_v41, 16  ;;  %v5061_v11 = vmul.bf16 %v13354_v54, %v5040_v5  ;;  %v6128_v47 = vld [vmem:[#allocation2 + $0x38] sm:$0x22] }
 0x2d8   : > { %9009 = vrot.lane.b32.xlu0 %v9008_v60, %s13353_s30  ;;  %v6560_v59 = vmul.bf16 %v10972_v62, %v6540_v23  ;;  %v5347_v36 = vcombine.low %v5346_v13, %v5346_v13  ;;  %v4242_v60 = vld [vmem:[%s9467_s5] sm:$0x1]  ;;  %v11396_v34 = vpop.permute.xlu0 %7528  ;;  %vm13355_vm6 = vsmask.f32 7424  ;;  %v3791_v26 = vmul.bf16 %v3789_v38, %v3768_v8  ;;  %s13405_s30 = smov 13  }
 0x2d9   : > { %vm11400_vm7 = vmand %vm5727_vm9, %vm13355_vm6  ;;  %v3573_v22 = vrot.slane %v10989_v28, 7  ;;  %v5304_v41 = vsel %vm5303_vm2, %v5301_v17, %v5302_v30  ;;  %v13358_v62 = vrot.slane %v11158_v52, %v9448_v15  ;;  %vm6125_vm12 = vcmask 226309   ;;  %v4181_v13 = vld [vmem:[%s9453_s22] sm:$0x3] }
 0x2da   : > { %vm13359_vm5 = vcmask 547840   ;;  %v4666_v23 = vrot.slane %v11352_v10, %v9448_v15  ;;  %v6356_v9 = vrot.slane %v6349_v46, %v9448_v15  ;;  %v5310_v8 = vsel %vm5308_vm3, %v5304_v41, %v5309_v57  ;;  %v5723_v38 = vpop.permute.xlu1 %5722  ;;  %v3608_v52 = vld [vmem:[%s9467_s5] sm:$0x1]  ;;  %vm5729_vm9 = vmor %vm11400_vm7, %vm13227_vm1  ;;  %v5730_v10 = vld [vmem:[#allocation2 + $0x30] sm:$0x88] }
 0x2db   : > { %5573 = vrot.lane.b32.xlu1 %v13358_v62, %s9327_s26  ;;  %v4208_v5 = vsel %vm13359_vm5, %v4206_v49, %v10941_v58  ;;  %v5980_v14 = vrot.slane %v5973_v50, %v9448_v15  ;;  %v3851_v49 = vrot.slane %v3843_v3, %v9448_v15  ;;  %v4268_v58 = vmul.bf16 %v11322_v1, %v4242_v60  ;;  %v3552_v30 = vld [vmem:[%s9453_s22] sm:$0x3]  ;;  %s13365_s26 = smov 30   ;;  %v6537_v1 = vld [vmem:[#allocation2 + $0x38] sm:$0x88] }
 0x2dc   : > { %9019 = vrot.lane.b32.xlu0 %v9018_v39, %s9333_s12  ;;  %5311 = vst [vmem:[#allocation2 + $0x30] sm:$0x22] %v5310_v8  ;;  %v5724_v37 = vrot.slane %v5723_v38, 4  ;;  %v5069_v46 = vrot.slane %v5061_v11, %v9448_v15  ;;  %v6562_v39 = vcombine.low %v6560_v59, %v6560_v59  ;;  %v5354_v17 = vrot.slane %v5347_v36, %v9448_v15  ;;  %v11431_v50 = vpop.permute.xlu0 %4431  ;;  %v13366_v59 = vld [vmem:[#allocation27_spill] sm:$0xff]  ;;  %s13409_s12 = smov 48  }
 0x2dd   : > { %vm13360_vm2 = vsmask.f32 5376  ;;  %vm6534_vm6 = vcmask 195591   ;;  %v3799_v3 = vrot.slane %v3791_v26, %v9448_v15  ;;  %v4210_v57 = vmul.bf16 %v4208_v5, %v4181_v13 }
 0x2de   : > { %vm11435_vm3 = vmand %vm6125_vm12, %vm13360_vm2  ;;  %vm13363_vm5 = vcmask 441344   ;;  %vm13364_vm15 = vcmask 261120   ;;  %v3630_v36 = vmul.bf16 %v13366_v59, %v3608_v52  ;;  %vm6122_vm12 = vcmask 228352   ;;  %v6120_v41 = vpop.permute.xlu1 %6119 }
 0x2df   : > { %v3575_v54 = vsel %vm13363_vm5, %v3573_v22, %v10989_v28  ;;  %v5725_v11 = vsel %vm13364_vm15, %v5723_v38, %v5724_v37  ;;  %5981 = vrot.lane.b32.xlu1 %v5980_v14, %s13365_s26  ;;  %v6140_v26 = vcombine.low %v11253_v16, %v11253_v16  ;;  %v6363_v28 = vrot.slane %v6356_v9, %v9448_v15  ;;  %vm6127_vm7 = vmor %vm11435_vm3, %vm13167_vm0  ;;  %s13414_s26 = smov 9  }
 0x2e0   : > { %v5731_v60 = vsel %vm5729_vm9, %v5725_v11, %v5730_v10  ;;  %5355 = vrot.lane.b32.xlu0 %v5354_v17, %s13367_s14  ;;  %v3858_v22 = vrot.slane %v3851_v49, %v9448_v15  ;;  %v4276_v62 = vrot.slane %v4268_v58, %v9448_v15  ;;  %v6121_v13 = vrot.slane %v6120_v41, 4  ;;  %v11463_v9 = vpop.permute.xlu0 %7953  ;;  %v9131_v17 = vld [vmem:[%s9467_s5] ss:$0 sps:$4 sm:$0x33]   ;;  %s13419_s14 = smov 15  }
 0x2e1   : > { %5732 = vst [vmem:[#allocation2 + $0x30] sm:$0x88] %v5731_v60  ;;  %v4071_v5 = vrot.slane %v11391_v35, 6  ;;  %v4668_v8 = vshll.u32 %v4666_v23, 16  ;;  %v6569_v16 = vrot.slane %v6562_v39, %v9448_v15  ;;  %v3577_v38 = vmul.bf16 %v3575_v54, %v3552_v30 }
 0x2e2   : > { %vm13368_vm9 = vsmask.f32 7424  ;;  %v3806_v14 = vrot.slane %v3799_v3, %v9448_v15  ;;  %v4218_v49 = vrot.slane %v4210_v57, %v9448_v15  ;;  %v5076_v58 = vrot.slane %v5069_v46, %v9448_v15  ;;  %v6530_v39 = vpop.permute.xlu1 %6529 }
 0x2e3   : > { %vm11467_vm15 = vmand %vm6534_vm6, %vm13368_vm9  ;;  %v6123_v35 = vsel %vm6122_vm12, %v6120_v41, %v6121_v13  ;;  %6364 = vrot.lane.b32.xlu1 %v6363_v28, %s13371_s29  ;;  %v7756_v23 = vrot.slane %v11340_v27, 7  ;;  %v3638_v10 = vrot.slane %v3630_v36, %v9448_v15  ;;  %v6147_v46 = vrot.slane %v6140_v26, %v9448_v15  ;;  %s9340_s29 = smov 42   ;;  %v5941_v27 = vld [vmem:[#allocation2 + $0x38] sm:$0x11] }
 0x2e4   : > { %v6129_v37 = vsel %vm6127_vm7, %v6123_v35, %v6128_v47  ;;  %5771 = vrot.lane.b32.xlu0 %v11143_v53, %s13299_s11  ;;  %v4793_v3 = vrot.slane %v10950_v19, 7  ;;  %v3860_v57 = vshll.u32 %v3858_v22, 16  ;;  %v4283_v30 = vrot.slane %v4276_v62, %v9448_v15  ;;  %vm6536_vm2 = vmor %vm11467_vm15, %vm13227_vm1  ;;  %v11494_v36 = vpop.permute.xlu0 %5439  ;;  %v4827_v62 = vld [vmem:[%s9467_s5] sm:$0x1]  ;;  %s13375_s11 = smov 28  }
 0x2e5   : > { %6130 = vst [vmem:[#allocation2 + $0x38] sm:$0x22] %v6129_v37  ;;  %v6531_v54 = vrot.slane %v6530_v39, 4  ;;  %v4670_v53 = vrot.slane %v4668_v8, 7  ;;  %v6570_v11 = vcombine.low %v6569_v16, %v6569_v16  ;;  %v3585_v59 = vrot.slane %v3577_v38, %v9448_v15  ;;  %v4408_v47 = vld [vmem:[%s9467_s5] sm:$0x1] }
 0x2e6   : > { %v13372_v60 = vrot.slane %v11108_v6, 6  ;;  %v3808_v26 = vshll.u32 %v3806_v14, 16  ;;  %v4225_v28 = vrot.slane %v4218_v49, %v9448_v15  ;;  %v11501_v22 = vshll.u32 %v5076_v58, 16  ;;  %v13374_v8 = vld [vmem:[#allocation28_spill] sm:$0xff]  ;;  %v6217_v38 = vld [vmem:[%s9467_s5] sm:$0x1] }
 0x2e7   : > { %vm13373_vm3 = vcmask 195584   ;;  %7700 = vrot.lane.b32.xlu1 %v11176_v20, %s13311_s10  ;;  %v7790_v16 = vrot.slane %v13374_v8, 1  ;;  %vm6737_vm6 = vcmask 118788   ;;  %v4774_v14 = vld [vmem:[%s9453_s22] sm:$0x3]  ;;  %vm13376_vm5 = vcmask 654336   ;;  %v11521_v52 = vpop.permute.xlu1 %3161 }
 0x2e8   : > { %v11498_v41 = vpack.i.bf16 %v4071_v5, %v13372_v60  ;;  %v6532_v13 = vsel %vm13373_vm3, %v6530_v39, %v6531_v54  ;;  %6148 = vrot.lane.b32.xlu0 %v6147_v46, %s13375_s11  ;;  %v7857_v5 = vrot.slane %v9131_v17, %v9448_v15  ;;  %v4794_v49 = vsel %vm13376_vm5, %v4793_v3, %v10950_v19  ;;  %v7765_v54 = vld [vmem:[%s9467_s5] sm:$0x3]  ;;  %s9336_s10 = smov 57   ;;  %s13426_s11 = smov 11  }
 0x2e9   : > { %v6538_v6 = vsel %vm6536_vm2, %v6532_v13, %v6537_v1  ;;  %v3645_v20 = vrot.slane %v3638_v10, %v9448_v15  ;;  %vm6182_vm12 = vcmask 826368   ;;  %v3862_v58 = vrot.slane %v3860_v57, 7  ;;  %v11527_v1 = vpop.permute.xlu0 %5861 }
 0x2ea   : > { %v4285_v35 = vshll.u32 %v4283_v30, 16  ;;  %6539 = vst [vmem:[#allocation2 + $0x38] sm:$0x88] %v6538_v6  ;;  %v6577_v37 = vrot.slane %v6570_v11, %v9448_v15  ;;  %v3592_v39 = vrot.slane %v3585_v59, %v9448_v15  ;;  %v4847_v46 = vmul.bf16 %v11356_v48, %v4827_v62  ;;  %v11546_v11 = vld [vmem:[%s9467_s5] sm:$0x1] }
 0x2eb   : > { %v4434_v17 = vmul.bf16 %v11431_v50, %v4408_v47  ;;  %v4227_v19 = vshll.u32 %v4225_v28, 16  ;;  %v6243_v10 = vmul.bf16 %v10856_v56, %v6217_v38  ;;  %8078 = vrot.lane.b32.xlu1 %v11133_v21, %s13313_s13  ;;  %vm13377_vm7 = vsmask.f32 4352  ;;  %v5420_v47 = vld [vmem:[%s9467_s5] sm:$0x1]  ;;  %s9337_s13 = smov 63  }
 0x2ec   : > { %vm11534_vm9 = vmand %vm6737_vm6, %vm13377_vm7  ;;  %v3810_v57 = vrot.slane %v3808_v26, 7  ;;  %v13380_v30 = vrot.slane %v11116_v33, 7  ;;  %v4796_v50 = vmul.bf16 %v4794_v49, %v4774_v14  ;;  %vm13381_vm15 = vcmask 23552   ;;  %6578 = vrot.lane.b32.xlu0 %v6577_v37, %s13301_s24  ;;  %v6732_v26 = vpop.permute.xlu1 %6731  ;;  %s9335_s24 = smov 74  }
 0x2ed   : > { %v7791_v56 = vsel %vm13381_vm15, %v13374_v8, %v7790_v16  ;;  %v7864_v21 = vrot.slane %v7857_v5, %v9448_v15  ;;  %vm7116_vm2 = vcmask 88070   ;;  %v3647_v59 = vshll.u32 %v3645_v20, 16  ;;  %vm6739_vm6 = vmor %vm11534_vm9, %vm13274_vm13  ;;  %v6740_v8 = vld [vmem:[#allocation2 + $0x40] sm:$0x11]  ;;  %v11557_v38 = vpop.permute.xlu0 %6458 }
 0x2ee   : > { %v11540_v48 = vpack.i.bf16 %v4670_v53, %v13380_v30  ;;  %v4287_v60 = vrot.slane %v4285_v35, 5  ;;  %vm6734_vm3 = vcmask 121856   ;;  %v9028_v33 = vpack.i.bf16 %v3862_v58, %v3810_v57  ;;  %v5839_v57 = vld [vmem:[%s9467_s5] sm:$0x1] }
 0x2ef   : > { %v3594_v53 = vshll.u32 %v3592_v39, 16  ;;  %v4855_v28 = vrot.slane %v4847_v46, %v9448_v15  ;;  %v4442_v62 = vrot.slane %v4434_v17, %v9448_v15  ;;  %v6733_v16 = vrot.slane %v6732_v26, 4  ;;  %v13386_v30 = vld [vmem:[#allocation6_spill] sm:$0xff] }
 0x2f0   : > { %v7793_v6 = vmul.bf16 %v7791_v56, %v7765_v54  ;;  %v11560_v5 = vrot.slane %v6243_v10, %v9448_v15  ;;  %v6659_v14 = vmul.bf16 %v10865_v42, %v11546_v11  ;;  %9029 = vrot.lane.b32.xlu1 %v9028_v33, %s13265_s7  ;;  %vm13383_vm5 = vsmask.f32 6400  ;;  %7865 = vrot.lane.b32.xlu0 %v7864_v21, %s13327_s8  ;;  %v7111_v46 = vpop.permute.xlu1 %7110  ;;  %v13388_v21 = vld [vmem:[#allocation29_spill] sm:$0xff]  ;;  %s9334_s7 = smov 61   ;;  %s9338_s8 = smov 46  }
 0x2f1   : > { %vm11567_vm7 = vmand %vm7116_vm2, %vm13383_vm5  ;;  %v4229_v20 = vrot.slane %v4227_v19, 5  ;;  %v4804_v58 = vrot.slane %v4796_v50, %v9448_v15  ;;  %v6181_v35 = vrot.slane %v11056_v44, 7  ;;  %v6735_v37 = vsel %vm6734_vm3, %v6732_v26, %v6733_v16  ;;  %v11588_v50 = vpop.permute.xlu0 %7580 }
 0x2f2   : > { %vm7655_vm15 = vcmask 1025025   ;;  %v5442_v42 = vmul.bf16 %v11494_v36, %v5420_v47  ;;  %v6741_v39 = vsel %vm6739_vm6, %v6735_v37, %v6740_v8  ;;  %vm7113_vm2 = vcmask 89088   ;;  %v7119_v36 = vld [vmem:[#allocation2 + $0x40] sm:$0x44]  ;;  %v7122_v8 = vld [vmem:[%s9467_s5] sm:$0x1] }
 0x2f3   : > { %v9038_v17 = vpack.i.bf16 %v4287_v60, %v4229_v20  ;;  %v4862_v19 = vrot.slane %v4855_v28, %v9448_v15  ;;  %v4449_v10 = vrot.slane %v4442_v62, %v9448_v15  ;;  %6742 = vst [vmem:[#allocation2 + $0x40] sm:$0x11] %v6741_v39  ;;  %vm13387_vm3 = vnez %v13386_v30  ;;  %v7657_v28 = vld [vmem:[#allocation2 + $0x48] sm:$0x2] }
 0x2f4   : > { %v7112_v3 = vrot.slane %v7111_v46, 4  ;;  %v9023_v54 = vpack.i.bf16 %v3647_v59, %v3594_v53  ;;  %v5080_v56 = vrot.slane %v11501_v22, 5  ;;  %v7801_v11 = vrot.slane %v7793_v6, %v9448_v15  ;;  %v6156_v22 = vld [vmem:[%s9453_s22] sm:$0x3]  ;;  %v7653_v20 = vpop.permute.xlu1 %7652 }
 0x2f5   : > { %v8170_v60 = vrot.slane %v13388_v21, 1  ;;  %v6258_v26 = vrot.slane %v11560_v5, %v9448_v15  ;;  %9039 = vrot.lane.b32.xlu1 %v9038_v17, %s9334_s7  ;;  %vm13389_vm9 = vsmask.f32 1280  ;;  %v4811_v59 = vrot.slane %v4804_v58, %v9448_v15  ;;  %s9341_s7 = smov 31  }
 0x2f6   : > { %vm11597_vm6 = vmand %vm7655_vm15, %vm13389_vm9  ;;  %v6183_v53 = vsel %vm6182_vm12, %v6181_v35, %v11056_v44  ;;  %v7114_v62 = vsel %vm7113_vm2, %v7111_v46, %v7112_v3  ;;  %9024 = vrot.lane.b32.xlu0 %v9023_v54, %s9335_s24  ;;  %vm8031_vm5 = vcmask 994307   ;;  %v6605_v47 = vrot.slane %v11076_v25, 7  ;;  %v8033_v46 = vld [vmem:[#allocation2 + $0x48] sm:$0x8]  ;;  %s9342_s24 = smov 44  }
 0x2f7   : > { %v5450_v16 = vrot.slane %v5442_v42, %v9448_v15  ;;  %v5864_v6 = vmul.bf16 %v11527_v1, %v5839_v57  ;;  %vm13392_vm15 = vmor %vm11567_vm7, %vm13387_vm3  ;;  %v6667_v44 = vrot.slane %v6659_v14, %v9448_v15  ;;  %v4864_v58 = vshll.u32 %v4862_v19, 16  ;;  %v11618_v42 = vpop.permute.xlu0 %6072  ;;  %v11636_v19 = vld [vmem:[%s9467_s5] sm:$0x3] }
 0x2f8   : > { %v7120_v5 = vsel %vm13392_vm15, %v7114_v62, %v7119_v36  ;;  %v4451_v35 = vshll.u32 %v4449_v10, 16  ;;  %v7658_v37 = vsel %vm11597_vm6, %v7653_v20, %v7657_v28  ;;  %v11623_v1 = vshll.u32 %v8131_v51, 16  ;;  %v6586_v36 = vld [vmem:[%s9453_s22] sm:$0x3] }
 0x2f9   : > { %7121 = vst [vmem:[#allocation2 + $0x40] sm:$0x44] %v7120_v5  ;;  %v7808_v49 = vrot.slane %v7801_v11, %v9448_v15  ;;  %v6185_v39 = vmul.bf16 %v6183_v53, %v6156_v22  ;;  %7659 = vst [vmem:[#allocation2 + $0x48] sm:$0x2] %v7658_v37  ;;  %9049 = vrot.lane.b32.xlu1 %v11540_v48, %s9336_s10  ;;  %vm13393_vm7 = vsmask.f32 3328  ;;  %v7148_v57 = vmul.bf16 %v11138_v55, %v7122_v8 }
 0x2fa   : > { %vm11629_vm2 = vmand %vm8031_vm5, %vm13393_vm7  ;;  %v13396_v17 = vrot.slane %v11118_v63, 5  ;;  %v4813_v51 = vshll.u32 %v4811_v59, 16  ;;  %vm13397_vm9 = vcmask 56320   ;;  %9034 = vrot.lane.b32.xlu0 %v11498_v41, %s9337_s13  ;;  %vm3763_vm5 = vcmask 1041993   ;;  %s9343_s10 = smov 27   ;;  %s13444_s13 = smov 40  }
 0x2fb   : > { %v11640_v10 = vsel %vm13397_vm9, %v13388_v21, %v8170_v60  ;;  %v11644_v48 = vshll.u32 %v6258_v26, 16  ;;  %vm13398_vm6 = vcmask 916480   ;;  %v5457_v3 = vrot.slane %v5450_v16, %v9448_v15  ;;  %v11654_v41 = vpop.permute.xlu0 %7463  ;;  %v8703_v59 = vld.sshfl [vmem:[%s9453_s22] sm:$0x5 pattern:$0x73625140] }
 0x2fc   : > { %v9058_v12 = vpack.i.bf16 %v5080_v56, %v13396_v17  ;;  %v6606_v63 = vsel %vm13398_vm6, %v6605_v47, %v11076_v25  ;;  %v5872_v54 = vrot.slane %v5864_v6, %v9448_v15  ;;  %v8029_v56 = vpop.permute.xlu1 %8028  ;;  %v6674_v11 = vrot.slane %v6667_v44, %v9448_v15  ;;  %v3765_v6 = vld [vmem:[#allocation2 + $0x24] sm:$0x2]  ;;  %v6434_v44 = vld [vmem:[%s9467_s5] sm:$0x1]  ;;  %v3499_v17 = vld [vmem:[#allocation2 + $0x20] sm:$0x11] }
 0x2fd   : > { %v4866_v21 = vrot.slane %v4864_v58, 6  ;;  %v8034_v55 = vsel %vm11629_vm2, %v8029_v56, %v8033_v46  ;;  %v9043_v60 = vpack.i.bf16 %v4451_v35, %v11189_v2  ;;  %v11657_v26 = vshll.u32 %v7808_v49, 16  ;;  %v6049_v46 = vld [vmem:[%s9467_s5] sm:$0x1] }
 0x2fe   : > { %v8173_v25 = vmul.bf16 %v11640_v10, %v11636_v19  ;;  %v6193_v33 = vrot.slane %v6185_v39, %v9448_v15  ;;  %8035 = vst [vmem:[#allocation2 + $0x48] sm:$0x8] %v8034_v55  ;;  %9059 = vrot.lane.b32.xlu1 %v9058_v12, %s9338_s8  ;;  %vm13399_vm15 = vsmask.f32 1280  ;;  %vm3113_vm2 = vcmask 645126  }
 0x2ff   : > { %vm11664_vm7 = vmand %vm3763_vm5, %vm13399_vm15  ;;  %v6608_v2 = vmul.bf16 %v6606_v63, %v6586_v36  ;;  %v7150_v22 = vcombine.low %v7148_v57, %v7148_v57  ;;  %9044 = vrot.lane.b32.xlu0 %v9043_v60, %s9339_s9  ;;  %v4815_v53 = vrot.slane %v4813_v51, 6  ;;  %vm4176_vm9 = vcmask 1043955   ;;  %v11677_v35 = vpop.permute.xlu0 %6865  ;;  %v5989_v51 = vld [vmem:[%s9453_s22] sm:$0x3] }
 0x300   : > { %v6262_v62 = vrot.slane %v11644_v48, 7  ;;  %v6014_v47 = vrot.slane %v11121_v32, 7  ;;  %v5459_v8 = vshll.u32 %v5457_v3, 16  ;;  %v5879_v16 = vrot.slane %v5872_v54, %v9448_v15  ;;  %v3761_v5 = vpop.permute.xlu1 %3760  ;;  %v4178_v54 = vld [vmem:[#allocation2 + $0x24] sm:$0x8] }
 0x301   : > { %v11672_v20 = vshll.u32 %v6674_v11, 16  ;;  %v3766_v58 = vsel %vm11664_vm7, %v3761_v5, %v3765_v6  ;;  %v9053_v37 = vpack.i.bf16 %v4866_v21, %v4815_v53  ;;  %vm13402_vm6 = vsmask.f32 6400 }
 0x302   : > { %vm11681_vm15 = vmand %vm3113_vm2, %vm13402_vm6  ;;  %v5211_v39 = vrot.slane %v8703_v59, %v9448_v15  ;;  %v6200_v14 = vrot.slane %v6193_v33, %v9448_v15  ;;  %3767 = vst [vmem:[#allocation2 + $0x24] sm:$0x2] %v3766_v58  ;;  %6996 = vrot.lane.b32.xlu1 %v11256_v31, %s13405_s30  ;;  %vm13406_vm5 = vsmask.f32 3328  ;;  %vm3110_vm12 = vcmask 646144   ;;  %s13448_s30 = smov 16  }
 0x303   : > { %vm11692_vm7 = vmand %vm4176_vm9, %vm13406_vm5  ;;  %vm4557_vm2 = vcmask 1041873   ;;  %vm3496_vm6 = vcmask 610308   ;;  %v6616_v12 = vrot.slane %v6608_v2, %v9448_v15  ;;  %v7157_v57 = vrot.slane %v7150_v22, %v9448_v15  ;;  %9054 = vrot.lane.b32.xlu0 %v9053_v37, %s13409_s12  ;;  %v3108_v60 = vpop.permute.xlu0 %3107  ;;  %v3116_v59 = vld [vmem:[#allocation2 + $0x18] sm:$0x44]  ;;  %s9344_s12 = smov 29  }
 0x304   : > { %v7412_v36 = vrot.slane %v11169_v7, 7  ;;  %v6016_v31 = vsel %vm13410_vm14, %v6014_v47, %v11121_v32  ;;  %v5461_v63 = vrot.slane %v5459_v8, 7  ;;  %v5881_v3 = vshll.u32 %v5879_v16, 16  ;;  %v4174_v56 = vpop.permute.xlu1 %4173  ;;  %vm3115_vm9 = vmor %vm11681_vm15, %vm13387_vm3 }
 0x305   : > { %v6461_v11 = vmul.bf16 %v11557_v38, %v6434_v44  ;;  %v6075_v21 = vmul.bf16 %v11618_v42, %v6049_v46  ;;  %v4179_v55 = vsel %vm11692_vm7, %v4174_v56, %v4178_v54  ;;  %vm13411_vm14 = vsmask.f32 1280  ;;  %v4559_v44 = vld [vmem:[#allocation2 + $0x2c] sm:$0x2]  ;;  %v3919_v42 = vld [vmem:[#allocation2 + $0x20] sm:$0x44] }
 0x306   : > { %vm11713_vm8 = vmand %vm4557_vm2, %vm13411_vm14  ;;  %v11717_v33 = vshll.u32 %v5211_v39, 16  ;;  %v11719_v28 = vshll.u32 %v6200_v14, 16  ;;  %4180 = vst [vmem:[#allocation2 + $0x24] sm:$0x8] %v4179_v55  ;;  %v3109_v38 = vrot.slane %v3108_v60, 4  ;;  %7385 = vrot.lane.b32.xlu1 %v11238_v4, %s13414_s26  ;;  %vm3916_vm2 = vcmask 522246  }
 0x307   : > { %vm13415_vm5 = vsmask.f32 4352  ;;  %v6623_v2 = vrot.slane %v6616_v12, %v9448_v15  ;;  %v6018_v22 = vmul.bf16 %v6016_v31, %v5989_v51  ;;  %v7164_v53 = vrot.slane %v7157_v57, %v9448_v15  ;;  %v7393_v4 = vld [vmem:[%s9453_s22] sm:$0x3]  ;;  %s9345_s26 = smov 12  }
 0x308   : > { %vm11725_vm7 = vmand %vm3496_vm6, %vm13415_vm5  ;;  %vm13418_vm14 = vcmask 982016   ;;  %v13420_v8 = vrot.slane %v11244_v40, %v9448_v15  ;;  %v6812_v16 = vrot.slane %v11196_v43, 7  ;;  %v5883_v6 = vrot.slane %v5881_v3, 5  ;;  %v4555_v58 = vpop.permute.xlu1 %4554 }
 0x309   : > { %v7413_v47 = vsel %vm13418_vm14, %v7412_v36, %v11169_v7  ;;  %v3111_v5 = vsel %vm3110_vm12, %v3108_v60, %v3109_v38  ;;  %v13421_v37 = vrot.slane %v11160_v45, 7  ;;  %v6469_v14 = vrot.slane %v6461_v11, %v9448_v15  ;;  %v3491_v45 = vpop.permute.xlu0 %3490 }
 0x30a   : > { %6784 = vrot.lane.b32.xlu0 %v13420_v8, %s13419_s14  ;;  %v6083_v7 = vrot.slane %v6075_v21, %v9448_v15  ;;  %v3117_v40 = vsel %vm3115_vm9, %v3111_v5, %v3116_v59  ;;  %v4560_v46 = vsel %vm11713_vm8, %v4555_v58, %v4559_v44  ;;  %vm3164_vm6 = vcmask 1043066   ;;  %v4981_v21 = vld [vmem:[#allocation2 + $0x2c] sm:$0x8]  ;;  %v6792_v59 = vld [vmem:[%s9453_s22] sm:$0x3]  ;;  %s9346_s14 = smov 25  }
 0x30b   : > { %v9068_v39 = vpack.i.bf16 %v5461_v63, %v13421_v37  ;;  %3118 = vst [vmem:[#allocation2 + $0x18] sm:$0x44] %v3117_v40  ;;  %4561 = vst [vmem:[#allocation2 + $0x2c] sm:$0x2] %v4560_v46  ;;  %v3492_v12 = vrot.slane %v3491_v45, 4  ;;  %vm13423_vm14 = vcmask 1043835   ;;  %v9063_v51 = vpack.i.bf16 %v11299_v29, %v11717_v33 }
 0x30c   : > { %vm13422_vm5 = vsmask.f32 3328  ;;  %vm4318_vm8 = vcmask 487428   ;;  %v11763_v57 = vshll.u32 %v6623_v2, 16  ;;  %v6026_v36 = vrot.slane %v6018_v22, %v9448_v15  ;;  %v4977_v55 = vpop.permute.xlu1 %4976  ;;  %v7506_v63 = vld [vmem:[%s9453_s22 + $0x1] sm:$0x1] }
 0x30d   : > { %9069 = vrot.lane.b32.xlu1 %v9068_v39, %s9340_s29  ;;  %vm11757_vm15 = vmand %vm13423_vm14, %vm13422_vm5  ;;  %v7415_v31 = vmul.bf16 %v7413_v47, %v7393_v4  ;;  %vm13427_vm9 = vsmask.f32 6400  ;;  %v6204_v3 = vrot.slane %v11719_v28, 7  ;;  %vm13430_vm5 = vcmask 932864   ;;  %v3912_v22 = vpop.permute.xlu0 %3911  ;;  %v7558_v39 = vld [vmem:[%s9467_s5] sm:$0x3] }
 0x30e   : > { %7165 = vrot.lane.b32.xlu0 %v7164_v53, %s13426_s11  ;;  %vm11769_vm12 = vmand %vm3916_vm2, %vm13427_vm9  ;;  %v6814_v54 = vsel %vm13430_vm5, %v6812_v16, %v11196_v43  ;;  %v7955_v56 = vrot.slane %v11463_v9, 1  ;;  %vm13431_vm14 = vcmask 613376   ;;  %v13432_v60 = vrot.slane %v11172_v24, 5  ;;  %s8812_s11 = sshll.u32 %s9218_s18, 10 }
 0x30f   : > { %v3494_v11 = vsel %vm13431_vm14, %v3491_v45, %v3492_v12  ;;  %v6476_v38 = vrot.slane %v6469_v14, %v9448_v15  ;;  %v6090_v2 = vrot.slane %v6083_v7, %v9448_v15  ;;  %vm13433_vm2 = vsmask.f32 2304  ;;  %vm13436_vm5 = vmor %vm11725_vm7, %vm13274_vm13  ;;  %v7494_v12 = vld [vmem:[%s9453_s22 + $0x1] sm:$0x1] }
 0x310   : > { %v9078_v32 = vpack.i.bf16 %v5883_v6, %v13432_v60  ;;  %vm11785_vm9 = vmand %vm3164_vm6, %vm13433_vm2  ;;  %v3500_v43 = vsel %vm13436_vm5, %v3494_v11, %v3499_v17  ;;  %v4982_v24 = vsel %vm11757_vm15, %v4977_v55, %v4981_v21  ;;  %v8181_v53 = vrot.slane %v8173_v25, %v9448_v15  ;;  %v7930_v6 = vld [vmem:[%s9467_s5] sm:$0x3] }
 0x311   : > { %v6678_v47 = vrot.slane %v11672_v20, 5  ;;  %v7582_v8 = vrot.slane %v11588_v50, 1  ;;  %3501 = vst [vmem:[#allocation2 + $0x20] sm:$0x11] %v3500_v43  ;;  %4983 = vst [vmem:[#allocation2 + $0x2c] sm:$0x8] %v4982_v24  ;;  %v6033_v19 = vrot.slane %v6026_v36, %v9448_v15  ;;  %v11808_v10 = vrot.slane %v7415_v31, %v9448_v15  ;;  %v4313_v46 = vpop.permute.xlu0 %4312 }
 0x312   : > { %v3913_v4 = vrot.slane %v3912_v22, 4  ;;  %9079 = vrot.lane.b32.xlu1 %v9078_v32, %s9341_s7  ;;  %9064 = vrot.lane.b32.xlu0 %v9063_v51, %s9342_s24  ;;  %vm4315_vm6 = vcmask 490496   ;;  %vm13437_vm15 = vsmask.f32 4352  ;;  %v6627_v20 = vrot.slane %v11763_v57, 5  ;;  %v13449_v24 = vld [vmem:[#allocation32_spill] sm:$0xff] }
 0x313   : > { %vm11812_vm14 = vmand %vm4318_vm8, %vm13437_vm15  ;;  %v6816_v16 = vmul.bf16 %v6814_v54, %v6792_v59  ;;  %vm13440_vm2 = vcmask 523264   ;;  %v9088_v44 = vpack.i.bf16 %v6262_v62, %v6204_v3  ;;  %vm4723_vm5 = vcmask 456710   ;;  %v3166_v7 = vld [vmem:[#allocation2 + $0x1c] sm:$0x4]  ;;  %v4321_v62 = vld [vmem:[#allocation2 + $0x28] sm:$0x11] }
 0x314   : > { %v3914_v5 = vsel %vm13440_vm2, %v3912_v22, %v3913_v4  ;;  %vm13441_vm7 = vcmask 39936   ;;  %v6478_v37 = vshll.u32 %v6476_v38, 16  ;;  %v6092_v14 = vshll.u32 %v6090_v2, 16  ;;  %vm13442_vm8 = vmor %vm11769_vm12, %vm13387_vm3  ;;  %v7495_v57 = vld [vmem:[%s12926_s3] sm:$0x1]  ;;  %s9347_s7 = smov 14  }
 0x315   : > { %v7956_v58 = vsel %vm13441_vm7, %v11463_v9, %v7955_v56  ;;  %v3920_v40 = vsel %vm13442_vm8, %v3914_v5, %v3919_v42  ;;  %v8188_v45 = vrot.slane %v8181_v53, %v9448_v15  ;;  %vm13443_vm15 = vcmask 7168   ;;  %vm4320_vm7 = vmor %vm11812_vm14, %vm13274_vm13  ;;  %v7497_v36 = vld [vmem:[#allocation2 + $0x48] sm:$0x1]  ;;  %v4719_v32 = vpop.permute.xlu0 %4718  ;;  %v4726_v38 = vld [vmem:[#allocation2 + $0x28] sm:$0x44]  ;;  %s9348_s24 = smov 10  }
 0x316   : > { %v7583_v48 = vsel %vm13443_vm15, %v11588_v50, %v7582_v8  ;;  %v3167_v9 = vsel %vm11785_vm9, %v11521_v52, %v3166_v7  ;;  %3921 = vst [vmem:[#allocation2 + $0x20] sm:$0x44] %v3920_v40  ;;  %v4314_v17 = vrot.slane %v4313_v46, 4  ;;  %9089 = vrot.lane.b32.xlu1 %v9088_v44, %s9343_s10  ;;  %v6035_v49 = vshll.u32 %v6033_v19, 16  ;;  %9074 = vrot.lane.b32.xlu0 %v11106_v18, %s13444_s13  ;;  %v7876_v18 = vld [vmem:[%s9453_s22 + $0x1] sm:$0x1] }
 0x317   : > { %3168 = vst [vmem:[#allocation2 + $0x1c] sm:$0x4] %v3167_v9  ;;  %vm13445_vm12 = vsmask.f32 6400  ;;  %v9098_v50 = vpack.i.bf16 %v6678_v47, %v6627_v20  ;;  %vm5140_vm2 = vcmask 364548   ;;  %v7430_v51 = vrot.slane %v11808_v10, %v9448_v15  ;;  %v13450_v53 = vld [vmem:[#allocation21_spill] sm:$0xff] }
 0x318   : > { %vm11844_vm9 = vmand %vm4723_vm5, %vm13445_vm12  ;;  %v11854_v31 = vrot.slane %v6816_v16, %v9448_v15  ;;  %v7958_v3 = vmul.bf16 %v7956_v58, %v7930_v6  ;;  %v4316_v54 = vsel %vm4315_vm6, %v4313_v46, %v4314_v17  ;;  %v7496_v56 = vmul.bf16 %v7495_v57, %v7494_v12  ;;  %v13455_v16 = vld [vmem:[#allocation33_spill] sm:$0xff]  ;;  %v7503_v17 = vld [vmem:[#allocation2 + $0x4c] sm:$0x1]  ;;  %s13471_s10 = smov 127   ;;  %s13473_s13 = smov 123  }
 0x319   : > { %v6480_v11 = vrot.slane %v6478_v37, 6  ;;  %v7585_v21 = vmul.bf16 %v7583_v48, %v7558_v39  ;;  %v9083_v55 = vpack.i.bf16 %v6092_v14, %v6035_v49  ;;  %v4322_v60 = vsel %vm4320_vm7, %v4316_v54, %v4321_v62  ;;  %vm4725_vm5 = vmor %vm11844_vm9, %vm13387_vm3  ;;  %v5135_v20 = vpop.permute.xlu0 %5134  ;;  %v5143_v44 = vld [vmem:[#allocation2 + $0x30] sm:$0x11]  ;;  %v7500_v39 = vld [vmem:[%s9467_s5] sm:$0x1] }
 0x31a   : > { %v11864_v59 = vshll.u32 %v8188_v45, 16  ;;  %4323 = vst [vmem:[#allocation2 + $0x28] sm:$0x11] %v4322_v60  ;;  %v4720_v2 = vrot.slane %v4719_v32, 4  ;;  %9099 = vrot.lane.b32.xlu1 %v9098_v50, %s13448_s30  ;;  %v7023_v28 = vrot.slane %v11717_v33, 7  ;;  %v7498_v43 = vsel %vm13274_vm13, %v7496_v56, %v7497_v36  ;;  %v13467_v42 = vld [vmem:[#allocation31_spill] sm:$0xff] }
 0x31b   : > { %v8266_v22 = vrot.slane %v13449_v24, 1  ;;  %v7902_v47 = vmul.bf16 %v13450_v53, %v7876_v18  ;;  %v7531_v8 = vmul.bf16 %v11396_v34, %v7506_v63  ;;  %9084 = vrot.lane.b32.xlu0 %v9083_v55, %s9344_s12  ;;  %vm5137_vm6 = vcmask 367616   ;;  %7499 = vst [vmem:[#allocation2 + $0x48] sm:$0x1] %v7498_v43  ;;  %v8247_v14 = vld [vmem:[%s9467_s5] sm:$0x3] }
 0x31c   : > { %vm13451_vm14 = vsmask.f32 4352  ;;  %vm13454_vm15 = vcmask 457728   ;;  %vm5523_vm7 = vcmask 333830   ;;  %v7432_v4 = vshll.u32 %v7430_v51, 16  ;;  %v13464_v55 = vld [vmem:[#allocation22_spill] sm:$0xff] }
 0x31d   : > { %vm11879_vm8 = vmand %vm5140_vm2, %vm13451_vm14  ;;  %v4721_v33 = vsel %vm13454_vm15, %v4719_v32, %v4720_v2  ;;  %v6831_v19 = vrot.slane %v11854_v31, %v9448_v15  ;;  %v7966_v34 = vrot.slane %v7958_v3, %v9448_v15  ;;  %v7593_v10 = vrot.slane %v7585_v21, %v9448_v15  ;;  %v7446_v52 = vld [vmem:[%s9467_s5] sm:$0x1]  ;;  %v5518_v51 = vpop.permute.xlu0 %5517  ;;  %v5526_v31 = vld [vmem:[#allocation2 + $0x30] sm:$0x44]  ;;  %s240_s12 = sand.u32 1, %s9210_s16  }
 0x31e   : > { %v4727_v25 = vsel %vm4725_vm5, %v4721_v33, %v4726_v38  ;;  %v13456_v6 = vrot.slane %v13455_v16, 6  ;;  %vm5142_vm12 = vmor %vm11879_vm8, %vm13274_vm13  ;;  %v5136_v58 = vrot.slane %v5135_v20, 4  ;;  %7024 = vrot.lane.b32.xlu1 %v7023_v28, %s9345_s26  ;;  %v7812_v37 = vrot.slane %v11657_v26, 7  ;;  %v7501_v26 = vld [vmem:[%s12926_s3 + $0x4] sm:$0x1]  ;;  %s12876_s18 = scalar_lea.sflag [#allocation4], %s240_s12 }
 0x31f   : > { %4728 = vst [vmem:[#allocation2 + $0x28] sm:$0x44] %v4727_v25  ;;  %vm13457_vm9 = vcmask 64512   ;;  %v7910_v40 = vrot.slane %v7902_v47, %v9448_v15  ;;  %v7539_v46 = vrot.slane %v7531_v8, %v9448_v15  ;;  %vm5520_vm2 = vcmask 334848   ;;  %v8203_v54 = vld [vmem:[%s9453_s22 + $0x1] sm:$0x1] }
 0x320   : > { %v9093_v5 = vpack.i.bf16 %v6480_v11, %v13456_v6  ;;  %v8267_v7 = vsel %vm13457_vm9, %v13449_v24, %v8266_v22  ;;  %vm13458_vm5 = vsmask.f32 6400  ;;  %v5138_v48 = vsel %vm5137_vm6, %v5135_v20, %v5136_v58  ;;  %v7230_v32 = vld [vmem:[%s9467_s5] sm:$0x1]  ;;  %s13466_s22 = smov 125  }
 0x321   : > { %vm11909_vm14 = vmand %vm5523_vm7, %vm13458_vm5  ;;  %v7434_v9 = vrot.slane %v7432_v4, 5  ;;  %vm5938_vm15 = vcmask 241668   ;;  %v7502_v62 = vmul.bf16 %v7501_v26, %v7500_v39  ;;  %v7973_v12 = vrot.slane %v7966_v34, %v9448_v15  ;;  %v5933_v22 = vpop.permute.xlu0 %5932  ;;  %v13465_v53 = vld [vmem:[#allocation30_spill] sm:$0xff] }
 0x322   : > { %9094 = vrot.lane.b32.xlu0 %v9093_v5, %s9346_s14  ;;  %v7600_v49 = vrot.slane %v7593_v10, %v9448_v15  ;;  %v5144_v50 = vsel %vm5142_vm12, %v5138_v48, %v5143_v44  ;;  %v6833_v57 = vshll.u32 %v6831_v19, 16  ;;  %v8135_v36 = vrot.slane %v11623_v1, 5  ;;  %vm5525_vm6 = vmor %vm11909_vm14, %vm13387_vm3  ;;  %v6847_v8 = vld [vmem:[%s9467_s5] sm:$0x1]  ;;  %s13470_s5 = smov 121  }
 0x323   : > { %5145 = vst [vmem:[#allocation2 + $0x30] sm:$0x11] %v5144_v50  ;;  %v5519_v18 = vrot.slane %v5518_v51, 4  ;;  %7435 = vrot.lane.b32.xlu1 %v7434_v9, %s13262_s6  ;;  %v8192_v63 = vrot.slane %v11864_v59, 5  ;;  %v7504_v3 = vsel %vm13274_vm13, %v7502_v62, %v7503_v17  ;;  %v8269_v56 = vmul.bf16 %v8267_v7, %v8247_v14  ;;  %v2956_v26 = vld [vmem:[#allocation2 + $0x1c] sm:$0x2] }
 0x324   : > { %v7917_v1 = vrot.slane %v7910_v40, %v9448_v15  ;;  %v7546_v11 = vrot.slane %v7539_v46, %v9448_v15  ;;  %vm13461_vm8 = vsmask.f32 4352  ;;  %v7217_v60 = vrot.slane %v13464_v55, 6  ;;  %7505 = vst [vmem:[#allocation2 + $0x4c] sm:$0x1] %v7504_v3 }
 0x325   : > { %vm11940_vm7 = vmand %vm5938_vm15, %vm13461_vm8  ;;  %v7466_v59 = vmul.bf16 %v11654_v41, %v7446_v52  ;;  %v5521_v38 = vsel %vm5520_vm2, %v5518_v51, %v5519_v18  ;;  %v9108_v2 = vpack.i.bf16 %v7812_v37, %v7756_v23  ;;  %vm6319_vm12 = vcmask 210950   ;;  %v6314_v5 = vpop.permute.xlu0 %6313  ;;  %v6322_v37 = vld [vmem:[#allocation2 + $0x38] sm:$0x44]  ;;  %v3382_v51 = vld [vmem:[#allocation2 + $0x1c] sm:$0x8] }
 0x326   : > { %6835 = vrot.lane.b32.xlu0 %v6833_v57, %s9347_s7  ;;  %v7975_v28 = vshll.u32 %v7973_v12, 16  ;;  %v7602_v43 = vshll.u32 %v7600_v49, 16  ;;  %v5527_v24 = vsel %vm5525_vm6, %v5521_v38, %v5526_v31  ;;  %vm5935_vm9 = vcmask 244736   ;;  %vm5940_vm2 = vmor %vm11940_vm7, %vm13274_vm13  ;;  %v7337_v55 = vld [vmem:[#allocation2 + $0x40] sm:$0x88] }
 0x327   : > { %v8223_v47 = vmul.bf16 %v13465_v53, %v8203_v54  ;;  %5528 = vst [vmem:[#allocation2 + $0x30] sm:$0x44] %v5527_v24  ;;  %v5934_v23 = vrot.slane %v5933_v22, 4  ;;  %9109 = vrot.lane.b32.xlu1 %v9108_v2, %s13466_s22  ;;  %v9118_v41 = vpack.i.bf16 %v8192_v63, %v8135_v36  ;;  %v7252_v33 = vmul.bf16 %v13467_v42, %v7230_v32  ;;  %vm11967_vm14 = vmand %vm6319_vm12, %vm13458_vm5  ;;  %v3964_v53 = vld [vmem:[#allocation2 + $0x24] sm:$0x4] }
 0x328   : > { %v8277_v4 = vrot.slane %v8269_v56, %v9448_v15  ;;  %v7919_v19 = vshll.u32 %v7917_v1, 16  ;;  %v7548_v34 = vshll.u32 %v7546_v11, 16  ;;  %v7474_v25 = vrot.slane %v7466_v59, %v9448_v15  ;;  %vm6321_vm8 = vmor %vm11967_vm14, %vm13387_vm3  ;;  %v7845_v59 = vld [vmem:[#allocation2 + $0x48] sm:$0x4] }
 0x329   : > { %v5936_v20 = vsel %vm5935_vm9, %v5933_v22, %v5934_v23  ;;  %vm6316_vm15 = vcmask 211968   ;;  %vm2954_vm6 = vcmask 1042113   ;;  %v6868_v16 = vmul.bf16 %v11677_v35, %v6847_v8  ;;  %v2952_v48 = vpop.permute.xlu0 %2951 }
 0x32a   : > { %7218 = vrot.lane.b32.xlu0 %v7217_v60, %s9348_s24  ;;  %v5942_v6 = vsel %vm5940_vm2, %v5936_v20, %v5941_v27  ;;  %v9103_v44 = vpack.i.bf16 %v7602_v43, %v7548_v34  ;;  %v7977_v58 = vrot.slane %v7975_v28, 6  ;;  %v6315_v39 = vrot.slane %v6314_v5, 4  ;;  %v3549_v43 = vld [vmem:[#allocation2 + $0x24] sm:$0x1]  ;;  %v4345_v27 = vld [vmem:[#allocation2 + $0x2c] sm:$0x1] }
 0x32b   : > { %5943 = vst [vmem:[#allocation2 + $0x38] sm:$0x11] %v5942_v6  ;;  %9119 = vrot.lane.b32.xlu1 %v9118_v41, %s13470_s5  ;;  %v8231_v35 = vrot.slane %v8223_v47, %v9448_v15  ;;  %v7921_v14 = vrot.slane %v7919_v19, 6  ;;  %vm13472_vm13 = vsmask.f32 1280  ;;  %v8284_v13 = vrot.slane %v8277_v4, %v9448_v15 }
 0x32c   : > { %vm2955_vm7 = vmand %vm2954_vm6, %vm13472_vm13  ;;  %v7481_v7 = vrot.slane %v7474_v25, %v9448_v15  ;;  %v6317_v30 = vsel %vm6316_vm15, %v6314_v5, %v6315_v39  ;;  %vm3380_vm12 = vcmask 1044075   ;;  %v7260_v40 = vrot.slane %v7252_v33, %v9448_v15  ;;  %v4771_v19 = vld [vmem:[#allocation2 + $0x2c] sm:$0x4]  ;;  %v5193_v6 = vld [vmem:[#allocation2 + $0x34] sm:$0x1] }
 0x32d   : > { %v6876_v46 = vrot.slane %v6868_v16, %v9448_v15  ;;  %v6323_v45 = vsel %vm6321_vm8, %v6317_v30, %v6322_v37  ;;  %v9113_v9 = vpack.i.bf16 %v7977_v58, %v7921_v14  ;;  %v2957_v62 = vsel %vm2955_vm7, %v2952_v48, %v2956_v26  ;;  %v3378_v57 = vpop.permute.xlu0 %3377  ;;  %v13490_v25 = vld [vmem:[#allocation16_spill] sm:$0xff] }
 0x32e   : > { %9104 = vrot.lane.b32.xlu0 %v9103_v44, %s13471_s10  ;;  %6324 = vst [vmem:[#allocation2 + $0x38] sm:$0x44] %v6323_v45  ;;  %v7055_v17 = vrot.slane %v11299_v29, 7  ;;  %2958 = vst [vmem:[#allocation2 + $0x1c] sm:$0x2] %v2957_v62  ;;  %v7483_v12 = vshll.u32 %v7481_v7, 16  ;;  %v8238_v49 = vrot.slane %v8231_v35, %v9448_v15  ;;  %v7267_v52 = vrot.slane %v7260_v40, %v9448_v15 }
 0x32f   : > { %8285 = vrot.lane.b32.xlu1 %v8284_v13, %s13284_s21  ;;  %vm13474_vm3 = vsmask.f32 3328  ;;  %vm6947_vm2 = vcmask 103429   ;;  %v6883_v50 = vrot.slane %v6876_v46, %v9448_v15  ;;  %vm13475_vm5 = vsmask.f32 5376  ;;  %v13498_v7 = vld [vmem:[#allocation13_spill] sm:$0xff] }
 0x330   : > { %vm3381_vm9 = vmand %vm3380_vm12, %vm13474_vm3  ;;  %v7485_v31 = vrot.slane %v7483_v12, 5  ;;  %vm7334_vm15 = vcmask 72711   ;;  %v7269_v18 = vshll.u32 %v7267_v52, 16  ;;  %vm6944_vm6 = vcmask 105472   ;;  %v6950_v15 = vld [vmem:[#allocation2 + $0x40] sm:$0x22] }
 0x331   : > { %v3383_v36 = vsel %vm3381_vm9, %v3378_v57, %v3382_v51  ;;  %vm12002_vm14 = vmand %vm6947_vm2, %vm13475_vm5  ;;  %v6885_v63 = vshll.u32 %v6883_v50, 16  ;;  %v6942_v3 = vpop.permute.xlu0 %6941  ;;  %vm13478_vm13 = vsmask.f32 7424  ;;  %vm7843_vm12 = vcmask 1009666   ;;  %v3222_v44 = vld [vmem:[#allocation2 + $0x18] sm:$0x44] }
 0x332   : > { %9114 = vrot.lane.b32.xlu0 %v9113_v9, %s13473_s13  ;;  %3384 = vst [vmem:[#allocation2 + $0x1c] sm:$0x8] %v3383_v36  ;;  %vm6949_vm8 = vmor %vm12002_vm14, %vm13167_vm0  ;;  %v6943_v54 = vrot.slane %v6942_v3, 4  ;;  %v7271_v11 = vrot.slane %v7269_v18, 6  ;;  %vm7331_vm3 = vcmask 72704   ;;  %v9349_v32 = vmov 0  }
 0x333   : > { %7056 = vrot.lane.b32.xlu1 %v7055_v17, %s9345_s26  ;;  %vm12013_vm7 = vmand %vm7334_vm15, %vm13478_vm13  ;;  %8422 = vmatprep.mubr.bf16.mxu0 %v9349_v32  ;;  %vm13481_vm9 = vsmask.f32 2304  ;;  %vm3547_vm5 = vcmask 1040984   ;;  %vm3962_vm15 = vcmask 1042946   ;;  %vm4343_vm13 = vcmask 1040864   ;;  %v13509_v50 = vld [vmem:[#allocation15_spill] sm:$0xff] }
 0x334   : > { %v6945_v1 = vsel %vm6944_vm6, %v6942_v3, %v6943_v54  ;;  %vm7336_vm0 = vmor %vm12013_vm7, %vm13227_vm1  ;;  %8432 = vmatprep.mubr.bf16.mxu1 %v9349_v32  ;;  %vm13482_vm1 = vsmask.f32 256  ;;  %v5578_v46 = vld [vmem:[#allocation2 + $0x34] sm:$0x4]  ;;  %v5986_v36 = vld [vmem:[#allocation2 + $0x3c] sm:$0x1] }
 0x335   : > { %v6951_v21 = vsel %vm6949_vm8, %v6945_v1, %v6950_v15  ;;  %v7329_v0 = vpop.permute.xlu0 %7328  ;;  %vm7844_vm2 = vmand %vm7843_vm12, %vm13481_vm9  ;;  %v3011_v9 = vld [vmem:[#allocation2 + $0x18] sm:$0x22]  ;;  %v5360_v18 = vld [vmem:[#allocation2 + $0x34] sm:$0x2]  ;;  %v13649_v13 = vmov 0  ;;  %s8563_s26 = sshll.u32 %s240_s12, 6 }
 0x336   : > { %8239 = vrot.lane.b32.xlu0 %v8238_v49, %s13284_s21  ;;  %6952 = vst [vmem:[#allocation2 + $0x40] sm:$0x22] %v6951_v21  ;;  %v7330_v60 = vrot.slane %v7329_v0, 4  ;;  %vm3548_vm14 = vmand %vm3547_vm5, %vm13482_vm1  ;;  %vm5191_vm5 = vcmask 1040744   ;;  %s242_s14 = scalar_lea.vmem [#allocation3], %s8563_s26  ;;  %s9350_s10 = smov [#allocation3]  }
 0x337   : > { %7486 = vrot.lane.b32.xlu1 %v7485_v31, %s13262_s6  ;;  %vm13483_vm6 = vmmov %vm13481_vm9  ;;  %s8467_s29 = sshll.u32 %s242_s14, 4  ;;  %s9152_s13 = sshll.u32 %s9350_s10, 4  ;;  %s12869_s29 = int_to_ptr.vmem [resolvable:$true] %s8467_s29  ;;  %s9153_s13 = int_to_ptr.vmem [resolvable:$false] %s9152_s13 }
 0x338   : > { %v7332_v38 = vsel %vm7331_vm3, %v7329_v0, %v7330_v60  ;;  %vm3963_vm8 = vmand %vm3962_vm15, %vm13483_vm6  ;;  %vm4769_vm3 = vcmask 1042882   ;;  %vm3216_vm15 = vcmask 637952   ;;  %s9148_s5 = scalar_lea.vmem %s12869_s29, 1024  ;;  %s9154_s6 = scalar_lea.vmem %s9153_s13, 2048 }
 0x339   : > { %v7338_v2 = vsel %vm7336_vm0, %v7332_v38, %v7337_v55  ;;  %v7841_v28 = vpop.permute.xlu0 %7840  ;;  %vm13484_vm7 = vmmov %vm13482_vm1  ;;  %vm3219_vm0 = vcmask 636934   ;;  %vm13486_vm1 = vsmask.f32 7962  ;;  %v3414_v15 = vld [vmem:[#allocation2 + $0x18] sm:$0x88]  ;;  %p9149_p12 = scmp.ne.s32.totalorder %s12869_s29, %s9148_s5  ;;  %p9155_p1 = scmp.lt.s32.totalorder %s12869_s29, %s9153_s13 }
 0x33a   : > { %6887 = vrot.lane.b32.xlu0 %v6885_v63, %s9347_s7  ;;  %7339 = vst [vmem:[#allocation2 + $0x40] sm:$0x88] %v7338_v2  ;;  %v7846_v61 = vsel %vm7844_vm2, %v7841_v28, %v7845_v59  ;;  %vm4344_vm12 = vmand %vm4343_vm13, %vm13484_vm7  ;;  %vm3008_vm13 = vcmask 652293   ;;  %v6369_v59 = vld [vmem:[#allocation2 + $0x3c] sm:$0x4]  ;;  %p9156_p2 = scmp.lt.s32.totalorder %s9154_s6, %s9148_s5 }
 0x33b   : > { %7847 = vst [vmem:[#allocation2 + $0x48] sm:$0x4] %v7846_v61  ;;  %vm13485_vm9 = vmmov %vm13483_vm6  ;;  %v5776_v2 = vld [vmem:[#allocation2 + $0x34] sm:$0x8]  ;;  %p9150_p13 = pnand %p9149_p12, %p9417_p4 }
 0x33c   : > { %vm4770_vm2 = vmand %vm4769_vm3, %vm13485_vm9  ;;  %vm3269_vm3 = vcmask 1043058   ;;  %p9157_p3 = por %p9156_p2, %p9155_p1 }
 0x33d   : > { %v3545_v24 = vpop.permute.xlu0 %3544  ;;  %vm13489_vm6 = vmmov %vm13484_vm7  ;;  %p9151_p0 = pneg %p9150_p13 }
 0x33e   : > { %7272 = vrot.lane.b32.xlu0 %v7271_v11, %s9348_s24  ;;  %v3550_v22 = vsel %vm3548_vm14, %v3545_v24, %v3549_v43  ;;  %vm12030_vm14 = vmand %vm3219_vm0, %vm13486_vm1  ;;  %vm13491_vm0 = vsmask.f32 7958  ;;  %vm3411_vm1 = vcmask 621575   ;;  %s12874_s24 = scalar_lea.hbm %s12927_s4, %s8812_s11 }
 0x33f   : > { %3551 = vst [vmem:[#allocation2 + $0x24] sm:$0x1] %v3550_v22  ;;  %vm3221_vm7 = vmor %vm12030_vm14, %vm10294_vm11  ;;  %vm13495_vm14 = vsmask.f32 7946  ;;  %vm13556_vm11 = vsmask.f32 7942  ;;  %p9158_p5 = pnand %p9157_p3, %p9151_p0 }
 0x340   : > { %vm12043_vm9 = vmand %vm3008_vm13, %vm13491_vm0  ;;  %vm5358_vm13 = vcmask 1041753   ;;  %vm13503_vm0 = vsmask.f32 256 }
 0x341   : > { %v3960_v47 = vpop.permute.xlu0 %3959 }
 0x342   : > { %v3965_v8 = vsel %vm3963_vm8, %v3960_v47, %v3964_v53  ;;  %vm5192_vm8 = vmand %vm5191_vm5, %vm13489_vm6  ;;  %v13576_v47 = vmov 0 }
 0x343   : > { %3966 = vst [vmem:[#allocation2 + $0x24] sm:$0x4] %v3965_v8  ;;  %v12034_v33 = vpop.permute.xlu1 %9014  ;;  %vm12052_vm6 = vmand %vm3269_vm3, %vm13495_vm14  ;;  %vm13502_vm3 = vcmask 654336   ;;  %vm6367_vm14 = vcmask 1042642  }
 0x344   : > { %v9016_v4 = vunpack.i.l.bf16 %v12034_v33  ;;  %v9017_v29 = vunpack.i.h.bf16 %v12034_v33  ;;  %v6153_v33 = vld [vmem:[#allocation2 + $0x3c] sm:$0x2] }
 0x345   : > { %v4341_v23 = vpop.permute.xlu0 %4340 }
 0x346   : > { %v4346_v41 = vsel %vm4344_vm12, %v4341_v23, %v4345_v27  ;;  %v3215_v20 = vrot.slane %v9016_v4, 4  ;;  %vm5576_vm12 = vcmask 1042762  }
 0x347   : > { %4347 = vst [vmem:[#allocation2 + $0x2c] sm:$0x1] %v4346_v41  ;;  %v13531_v41 = vld [vmem:[#allocation14_spill] sm:$0xff] }
 0x348   : > { %v5189_v16 = vpop.permute.xlu1 %5188  ;;  %v3217_v5 = vsel %vm3216_vm15, %v9016_v4, %v3215_v20  ;;  %vm5984_vm15 = vcmask 1040624  }
 0x349   : > { %v4767_v34 = vpop.permute.xlu0 %4766  ;;  %v5194_v58 = vsel %vm5192_vm8, %v5189_v16, %v5193_v6  ;;  %v3223_v35 = vsel %vm3221_vm7, %v3217_v5, %v3222_v44  ;;  %vm3010_vm8 = vmor %vm12043_vm9, %vm10035_vm4  ;;  %vm13499_vm7 = vsmask.f32 7966  ;;  %v7708_v16 = vld [vmem:[#allocation2 + $0x48] sm:$0x22] }
 0x34a   : > { %v4772_v10 = vsel %vm4770_vm2, %v4767_v34, %v4771_v19  ;;  %5195 = vst [vmem:[#allocation2 + $0x34] sm:$0x1] %v5194_v58  ;;  %vm13494_vm2 = vsmask.f32 2304  ;;  %3224 = vst [vmem:[#allocation2 + $0x18] sm:$0x44] %v3223_v35 }
 0x34b   : > { %4773 = vst [vmem:[#allocation2 + $0x2c] sm:$0x4] %v4772_v10  ;;  %vm5577_vm5 = vmand %vm5576_vm12, %vm13494_vm2  ;;  %vm3408_vm2 = vcmask 621568   ;;  %v13533_v10 = vld [vmem:[#allocation18_spill] sm:$0xff] }
 0x34c   : > { %vm12061_vm12 = vmand %vm3411_vm1, %vm13499_vm7  ;;  %v6583_v35 = vld [vmem:[#allocation2 + $0x3c] sm:$0x8] }
 0x34d   : > { %v12047_v39 = vpop.permute.xlu0 %9009  ;;  %v5574_v40 = vpop.permute.xlu1 %5573  ;;  %vm12070_vm9 = vmand %vm5984_vm15, %vm13503_vm0  ;;  %vm5774_vm15 = vcmask 1043715   ;;  %vm6151_vm0 = vcmask 1041633  }
 0x34e   : > { %v9011_v14 = vunpack.i.l.bf16 %v12047_v39  ;;  %v5579_v45 = vsel %vm5577_vm5, %v5574_v40, %v5578_v46  ;;  %vm13506_vm5 = vsmask.f32 1280  ;;  %vm3413_vm7 = vmor %vm12061_vm12, %vm10189_vm10  ;;  %vm3440_vm12 = vcmask 1044067   ;;  %v8086_v40 = vld [vmem:[#allocation2 + $0x48] sm:$0x88] }
 0x34f   : > { %5580 = vst [vmem:[#allocation2 + $0x34] sm:$0x4] %v5579_v45  ;;  %vm12075_vm1 = vmand %vm5358_vm13, %vm13506_vm5  ;;  %vm13510_vm13 = vsmask.f32 2304  ;;  %vm13093_vm5 = vcmask 1045509   ;;  %v9012_v43 = vunpack.i.h.bf16 %v12047_v39 }
 0x350   : > { %v3004_v30 = vrot.slane %v9011_v14, 4 }
 0x351   : > { %v12065_v48 = vpop.permute.xlu0 %9019  ;;  %v5982_v57 = vpop.permute.xlu1 %5981  ;;  %v3271_v3 = vld [vmem:[#allocation2 + $0x1c] sm:$0x4] }
 0x352   : > { %v3006_v62 = vsel %vm13502_vm3, %v9011_v14, %v3004_v30  ;;  %v9021_v17 = vunpack.i.l.bf16 %v12065_v48  ;;  %v5987_v31 = vsel %vm12070_vm9, %v5982_v57, %v5986_v36  ;;  %vm12091_vm3 = vmand %vm6367_vm14, %vm13510_vm13  ;;  %v3272_v11 = vsel %vm12052_vm6, %v9017_v29, %v3271_v3  ;;  %v3820_v3 = vld [vmem:[#allocation2 + $0x20] sm:$0x22] }
 0x353   : > { %v3012_v49 = vsel %vm3010_vm8, %v3006_v62, %v3011_v9  ;;  %vm3057_vm8 = vcmask 1042049   ;;  %5988 = vst [vmem:[#allocation2 + $0x3c] sm:$0x1] %v5987_v31  ;;  %vm13513_vm9 = vsmask.f32 3328  ;;  %vm13092_vm6 = vcmask 1047559  }
 0x354   : > { %3013 = vst [vmem:[#allocation2 + $0x18] sm:$0x22] %v3012_v49  ;;  %v3407_v51 = vrot.slane %v9021_v17, 4  ;;  %3273 = vst [vmem:[#allocation2 + $0x1c] sm:$0x4] %v3272_v11  ;;  %v9022_v19 = vunpack.i.h.bf16 %v12065_v48  ;;  %v13545_v48 = vld [vmem:[#allocation7_spill] sm:$0xff] }
 0x355   : > { %v5356_v63 = vpop.permute.xlu0 %5355  ;;  %v6365_v60 = vpop.permute.xlu1 %6364  ;;  %v13557_v36 = vmov 0 }
 0x356   : > { %v3409_v54 = vsel %vm3408_vm2, %v9021_v17, %v3407_v51  ;;  %v5361_v56 = vsel %vm12075_vm1, %v5356_v63, %v5360_v18  ;;  %vm12104_vm2 = vmand %vm5774_vm15, %vm13513_vm9  ;;  %vm13516_vm1 = vsmask.f32 7942  ;;  %v6370_v38 = vsel %vm12091_vm3, %v6365_v60, %v6369_v59  ;;  %v7873_v51 = vld [vmem:[#allocation2 + $0x48] sm:$0x44]  ;;  %v5037_v17 = vld [vmem:[#allocation2 + $0x28] sm:$0x88] }
 0x357   : > { %v3415_v21 = vsel %vm3413_vm7, %v3409_v54, %v3414_v15  ;;  %5362 = vst [vmem:[#allocation2 + $0x34] sm:$0x2] %v5361_v56  ;;  %vm12110_vm14 = vmand %vm3057_vm8, %vm13516_vm1  ;;  %vm13519_vm7 = vsmask.f32 1280  ;;  %vm13522_vm8 = vsmask.f32 5376 }
 0x358   : > { %3416 = vst [vmem:[#allocation2 + $0x18] sm:$0x88] %v3415_v21  ;;  %vm12118_vm15 = vmand %vm6151_vm0, %vm13519_vm7  ;;  %vm13525_vm3 = vsmask.f32 7424  ;;  %vm13528_vm9 = vsmask.f32 7950  ;;  %vm13532_vm7 = vnez %v13531_v41 }
 0x359   : > { %v5772_v28 = vpop.permute.xlu0 %5771  ;;  %6371 = vst [vmem:[#allocation2 + $0x3c] sm:$0x4] %v6370_v38  ;;  %vm12127_vm13 = vmand %vm13093_vm5, %vm13522_vm8  ;;  %v7701_v23 = vpop.permute.xlu1 %7700  ;;  %v13564_v21 = vld [vmem:[#allocation10_spill] sm:$0xff] }
 0x35a   : > { %v5777_v24 = vsel %vm12104_vm2, %v5772_v28, %v5776_v2  ;;  %vm12133_vm0 = vmand %vm13092_vm6, %vm13525_vm3  ;;  %vm6581_vm2 = vcmask 1043651   ;;  %v7702_v42 = vrot.slane %v7701_v23, 4  ;;  %vm3817_vm3 = vcmask 586757   ;;  %v4239_v2 = vld [vmem:[#allocation2 + $0x20] sm:$0x88] }
 0x35b   : > { %v3059_v53 = vld [vmem:[#allocation2 + $0x1c] sm:$0x2]  ;;  %5778 = vst [vmem:[#allocation2 + $0x34] sm:$0x8] %v5777_v24  ;;  %vm12140_vm1 = vmand %vm3440_vm12, %vm13528_vm9  ;;  %vm13094_vm9 = vcmask 1046534   ;;  %vm13535_vm6 = vcmask 1031168  }
 0x35c   : > { %v3060_v8 = vsel %vm12110_vm14, %v9012_v43, %v3059_v53  ;;  %vm7707_vm8 = vmor %vm12127_vm13, %vm13532_vm7  ;;  %vm13534_vm14 = vnez %v13533_v10  ;;  %v7703_v6 = vsel %vm13535_vm6, %v7702_v42, %v7701_v23  ;;  %vm13536_vm13 = vsmask.f32 3328  ;;  %v3605_v53 = vld [vmem:[#allocation2 + $0x20] sm:$0x11]  ;;  %v4621_v10 = vld [vmem:[#allocation2 + $0x28] sm:$0x22] }
 0x35d   : > { %3061 = vst [vmem:[#allocation2 + $0x1c] sm:$0x2] %v3060_v8  ;;  %v6149_v4 = vpop.permute.xlu0 %6148  ;;  %vm6582_vm7 = vmand %vm6581_vm2, %vm13536_vm13  ;;  %v7709_v44 = vsel %vm7707_vm8, %v7703_v6, %v7708_v16  ;;  %v8079_v58 = vpop.permute.xlu1 %8078  ;;  %vm13540_vm6 = vsmask.f32 6400  ;;  %vm13543_vm2 = vcmask 998400   ;;  %v13570_v28 = vmov 0 }
 0x35e   : > { %v6154_v34 = vsel %vm12118_vm15, %v6149_v4, %v6153_v33  ;;  %vm13537_vm15 = vsmask.f32 7958  ;;  %7710 = vst [vmem:[#allocation2 + $0x48] sm:$0x22] %v7709_v44  ;;  %v8080_v39 = vrot.slane %v8079_v58, 4  ;;  %vm12167_vm12 = vmand %vm13094_vm9, %vm13540_vm6  ;;  %vm4618_vm6 = vcmask 463877  }
 0x35f   : > { %v3442_v20 = vld [vmem:[#allocation2 + $0x1c] sm:$0x8]  ;;  %6155 = vst [vmem:[#allocation2 + $0x3c] sm:$0x2] %v6154_v34  ;;  %vm12161_vm5 = vmand %vm3817_vm3, %vm13537_vm15  ;;  %vm3602_vm3 = vcmask 602116   ;;  %v13582_v42 = vmov 0 }
 0x360   : > { %v3443_v5 = vsel %vm12140_vm1, %v9022_v19, %v3442_v20  ;;  %vm4236_vm1 = vcmask 498695   ;;  %v8081_v46 = vsel %vm13543_vm2, %v8080_v39, %v8079_v58  ;;  %vm13544_vm13 = vmor %vm12133_vm0, %vm13534_vm14  ;;  %vm3866_vm2 = vcmask 1041985   ;;  %v9134_v63 = vld [vmem:[#allocation2 + $0x10] ss:$8 sps:$4 sm:$0xff]   ;;  %v4024_v39 = vld [vmem:[#allocation2 + $0x20] sm:$0x44] }
 0x361   : > { %3444 = vst [vmem:[#allocation2 + $0x1c] sm:$0x8] %v3443_v5  ;;  %v6579_v14 = vpop.permute.xlu0 %6578  ;;  %v8087_v45 = vsel %vm13544_vm13, %v8081_v46, %v8086_v40  ;;  %vm13547_vm9 = vsmask.f32 7966  ;;  %vm13550_vm0 = vsmask.f32 7954  ;;  %vm13553_vm13 = vmmov %vm13537_vm15 }
 0x362   : > { %v6584_v30 = vsel %vm6582_vm7, %v6579_v14, %v6583_v35  ;;  %v12181_v26 = vpop.permute.xlu1 %9029  ;;  %vm13546_vm7 = vnez %v13545_v48  ;;  %8088 = vst [vmem:[#allocation2 + $0x48] sm:$0x88] %v8087_v45  ;;  %vm12189_vm8 = vmand %vm4236_vm1, %vm13547_vm9  ;;  %vm13559_vm9 = vcmask 1014784   ;;  %vm13560_vm1 = vcmask 588800   ;;  %v5417_v45 = vld [vmem:[#allocation2 + $0x30] sm:$0x22] }
 0x363   : > { %6585 = vst [vmem:[#allocation2 + $0x3c] sm:$0x8] %v6584_v30  ;;  %v9031_v9 = vunpack.i.l.bf16 %v12181_v26  ;;  %vm12194_vm14 = vmand %vm3602_vm3, %vm13550_vm0  ;;  %v9032_v34 = vunpack.i.h.bf16 %v12181_v26 }
 0x364   : > { %vm12199_vm15 = vmand %vm4618_vm6, %vm13553_vm13  ;;  %vm4021_vm6 = vcmask 514054  }
 0x365   : > { %v7866_v62 = vpop.permute.xlu0 %7865  ;;  %v3813_v52 = vrot.slane %v9031_v9, 4  ;;  %vm12204_vm4 = vmand %vm3866_vm2, %vm13556_vm11  ;;  %vm13562_vm2 = vnez %v13498_v7 }
 0x366   : > { %v7867_v12 = vrot.slane %v7866_v62, 4  ;;  %v13558_v36 = vsel %vm12204_vm4, 4294967295, %v13557_v36  ;;  %vm13561_vm3 = vmor %vm12167_vm12, %vm13546_vm7  ;;  %vm4291_vm12 = vcmask 1043947   ;;  %vm13565_vm7 = vnez %v13564_v21 }
 0x367   : > { %v12209_v31 = vpop.permute.xlu1 %9039  ;;  %v3815_v15 = vsel %vm13560_vm1, %v9031_v9, %v3813_v52  ;;  %vm13563_vm0 = vmor %vm12161_vm5, %vm13562_vm2  ;;  %vm13569_vm1 = vsmask.f32 7950  ;;  %vm13572_vm5 = vcmask 498688   ;;  %vm4674_vm4 = vcmask 1041865   ;;  %v7001_v9 = vld [vmem:[#allocation2 + $0x44] sm:$0x2] }
 0x368   : > { %v7868_v29 = vsel %vm13559_vm9, %v7867_v12, %v7866_v62  ;;  %v9132_v18 = vld [vmem:[#allocation2 + $0x14] ss:$8 sps:$4 sm:$0xff]   ;;  %v9041_v56 = vunpack.i.l.bf16 %v12209_v31  ;;  %v3821_v11 = vsel %vm13563_vm0, %v3815_v15, %v3820_v3  ;;  %vm13566_vm9 = vsmask.f32 7962  ;;  %vm13579_vm0 = vmor %vm12194_vm14, %vm13565_vm7 }
 0x369   : > { %v7874_v54 = vsel %vm13561_vm3, %v7868_v29, %v7873_v51  ;;  %v12222_v1 = vpop.permute.xlu0 %9024  ;;  %8392 = vmatprep.subr.bf16.mxu0 %v9132_v18  ;;  %8814 = vmatprep.subr.bf16.mxu1 %v9132_v18  ;;  %3822 = vst [vmem:[#allocation2 + $0x20] sm:$0x22] %v3821_v11  ;;  %vm12242_vm11 = vmand %vm4021_vm6, %vm13566_vm9  ;;  %vm13574_vm9 = vsmask.f32 7938  ;;  %vm13585_vm14 = vcmask 375815   ;;  %v9042_v62 = vunpack.i.h.bf16 %v12209_v31 }
 0x36a   : > { %7875 = vst [vmem:[#allocation2 + $0x48] sm:$0x44] %v7874_v54  ;;  %v9026_v0 = vunpack.i.l.bf16 %v12222_v1  ;;  %v4232_v55 = vrot.slane %v9041_v56, 4  ;;  %8393 = vmatpush1.bf16.msra.mxu0 %v9134_v63  ;;  %8820 = vmatpush1.bf16.msra.mxu1 %v9134_v63  ;;  %vm12248_vm3 = vmand %vm4291_vm12, %vm13569_vm1  ;;  %vm13575_vm12 = vcmask 1040976   ;;  %v4405_v31 = vld [vmem:[#allocation2 + $0x28] sm:$0x11] }
 0x36b   : > { %v12238_v59 = vpop.permute.xlu1 %9049  ;;  %v13571_v28 = vsel %vm12248_vm3, 4294967295, %v13570_v28  ;;  %vm13573_vm6 = vmor %vm12189_vm8, %vm10189_vm10  ;;  %vm13584_vm3 = vsmask.f32 7966  ;;  %vm13600_vm8 = vcmask 1041513   ;;  %v13671_v3 = vmov 0 }
 0x36c   : > { %v3598_v60 = vrot.slane %v9026_v0, 4  ;;  %v4234_v61 = vsel %vm13572_vm5, %v9041_v56, %v4232_v55  ;;  %v9051_v43 = vunpack.i.l.bf16 %v12238_v59  ;;  %vm12263_vm1 = vmand %vm13575_vm12, %vm13574_vm9  ;;  %vm13578_vm5 = vcmask 605184  }
 0x36d   : > { %v12254_v24 = vpop.permute.xlu0 %9034  ;;  %v4240_v22 = vsel %vm13573_vm6, %v4234_v61, %v4239_v2  ;;  %v13577_v47 = vsel %vm12263_vm1, 4294967295, %v13576_v47  ;;  %vm13580_vm6 = vnez %v13490_v25  ;;  %vm13588_vm9 = vcmask 465920   ;;  %v6789_v61 = vld [vmem:[#allocation2 + $0x44] sm:$0x1] }
 0x36e   : > { %v3600_v8 = vsel %vm13578_vm5, %v9026_v0, %v3598_v60  ;;  %v9036_v27 = vunpack.i.l.bf16 %v12254_v24  ;;  %4241 = vst [vmem:[#allocation2 + $0x20] sm:$0x88] %v4240_v22  ;;  %v4614_v41 = vrot.slane %v9051_v43, 4  ;;  %vm13581_vm5 = vsmask.f32 7942 }
 0x36f   : > { %v3606_v23 = vsel %vm13579_vm0, %v3600_v8, %v3605_v53  ;;  %vm12280_vm13 = vmand %vm4674_vm4, %vm13581_vm5  ;;  %vm13589_vm4 = vsmask.f32 7946  ;;  %vm13590_vm5 = vcmask 1042938   ;;  %vm13603_vm1 = vnez %v13558_v36  ;;  %v7390_v60 = vld [vmem:[#allocation2 + $0x44] sm:$0x8] }
 0x370   : > { %3607 = vst [vmem:[#allocation2 + $0x20] sm:$0x11] %v3606_v23  ;;  %v13583_v42 = vsel %vm12280_vm13, 4294967295, %v13582_v42  ;;  %v4017_v33 = vrot.slane %v9036_v27, 4  ;;  %vm12286_vm0 = vmand %vm13585_vm14, %vm13584_vm3  ;;  %v12290_v19 = vpop.permute.xlu1 %9059  ;;  %v4616_v20 = vsel %vm13588_vm9, %v9051_v43, %v4614_v41  ;;  %vm13593_vm3 = vsmask.f32 7954 }
 0x371   : > { %vm12296_vm12 = vmand %vm13590_vm5, %vm13589_vm4  ;;  %v9061_v6 = vunpack.i.l.bf16 %v12290_v19  ;;  %vm13594_vm14 = vcmask 479236   ;;  %v12307_v44 = vpop.permute.xlu0 %9044  ;;  %v3868_v58 = vld [vmem:[#allocation2 + $0x24] sm:$0x2]  ;;  %vm13598_vm4 = vcmask 515072   ;;  %vm13599_vm5 = vsmask.f32 1280 }
 0x372   : > { %vm12303_vm13 = vmand %vm13594_vm14, %vm13593_vm3  ;;  %v4019_v35 = vsel %vm13598_vm4, %v9036_v27, %v4017_v33  ;;  %v9046_v14 = vunpack.i.l.bf16 %v12307_v44  ;;  %v3869_v30 = vsel %vm13603_vm1, %v9032_v34, %v3868_v58  ;;  %vm13605_vm4 = vsmask.f32 7950  ;;  %v5631_v33 = vld [vmem:[#allocation2 + $0x30] sm:$0x44] }
 0x373   : > { %vm13597_vm9 = vmor %vm12199_vm15, %vm13562_vm2  ;;  %v5030_v46 = vrot.slane %v9061_v6, 4  ;;  %3870 = vst [vmem:[#allocation2 + $0x24] sm:$0x2] %v3869_v30  ;;  %v9027_v36 = vunpack.i.h.bf16 %v12222_v1  ;;  %vm13620_vm1 = vnez %v13571_v28  ;;  %v9052_v38 = vunpack.i.h.bf16 %v12238_v59  ;;  %v5224_v1 = vld [vmem:[#allocation2 + $0x30] sm:$0x11] }
 0x374   : > { %v4622_v37 = vsel %vm13597_vm9, %v4616_v20, %v4621_v10  ;;  %vm12318_vm3 = vmand %vm13600_vm8, %vm13599_vm5  ;;  %vm13606_vm5 = vcmask 1043827   ;;  %v4398_v26 = vrot.slane %v9046_v14, 4  ;;  %v6997_v48 = vpop.permute.xlu1 %6996  ;;  %vm13615_vm8 = vcmask 482304  }
 0x375   : > { %4623 = vst [vmem:[#allocation2 + $0x28] sm:$0x22] %v4622_v37  ;;  %vm13604_vm15 = vmor %vm12242_vm11, %vm13580_vm6  ;;  %v7002_v49 = vsel %vm12318_vm3, %v6997_v48, %v7001_v9  ;;  %v12353_v51 = vpop.permute.xlu0 %9054  ;;  %v4293_v57 = vld [vmem:[#allocation2 + $0x24] sm:$0x8]  ;;  %vm13616_vm3 = vsmask.f32 3328  ;;  %v9037_v53 = vunpack.i.h.bf16 %v12254_v24  ;;  %v9062_v10 = vunpack.i.h.bf16 %v12290_v19 }
 0x376   : > { %v4025_v40 = vsel %vm13604_vm15, %v4019_v35, %v4024_v39  ;;  %vm12335_vm14 = vmand %vm13606_vm5, %vm13605_vm4  ;;  %vm13609_vm15 = vcmask 375808   ;;  %vm13610_vm4 = vsmask.f32 7962  ;;  %vm13611_vm5 = vcmask 391174   ;;  %7003 = vst [vmem:[#allocation2 + $0x44] sm:$0x2] %v7002_v49 }
 0x377   : > { %4026 = vst [vmem:[#allocation2 + $0x20] sm:$0x44] %v4025_v40  ;;  %vm4404_vm11 = vmor %vm12303_vm13, %vm13565_vm7  ;;  %v5032_v12 = vsel %vm13609_vm15, %v9061_v6, %v5030_v46  ;;  %v4400_v18 = vsel %vm13615_vm8, %v9046_v14, %v4398_v26  ;;  %v9056_v63 = vunpack.i.l.bf16 %v12353_v51  ;;  %v4294_v15 = vsel %vm13620_vm1, %v9042_v62, %v4293_v57  ;;  %v3654_v54 = vld [vmem:[#allocation2 + $0x24] sm:$0x1]  ;;  %v7170_v6 = vld [vmem:[#allocation2 + $0x44] sm:$0x4] }
 0x378   : > { %vm12349_vm9 = vmand %vm13611_vm5, %vm13610_vm4  ;;  %vm13617_vm4 = vcmask 1043531   ;;  %v4406_v56 = vsel %vm4404_vm11, %v4400_v18, %v4405_v31  ;;  %vm13622_vm8 = vcmask 1040504   ;;  %4295 = vst [vmem:[#allocation2 + $0x24] sm:$0x8] %v4294_v15  ;;  %v7386_v55 = vpop.permute.xlu1 %7385  ;;  %vm13626_vm11 = vsmask.f32 7938 }
 0x379   : > { %vm13614_vm15 = vmor %vm12286_vm0, %vm10189_vm10  ;;  %vm13621_vm0 = vsmask.f32 256  ;;  %4407 = vst [vmem:[#allocation2 + $0x28] sm:$0x11] %v4406_v56  ;;  %v4818_v0 = vrot.slane %v9056_v63, 4  ;;  %vm13630_vm1 = vcmask 392192   ;;  %v9047_v37 = vunpack.i.h.bf16 %v12307_v44 }
 0x37a   : > { %v5038_v29 = vsel %vm13614_vm15, %v5032_v12, %v5037_v17  ;;  %vm12365_vm5 = vmand %vm13617_vm4, %vm13616_vm3  ;;  %vm5414_vm3 = vcmask 340997   ;;  %vm13625_vm4 = vnez %v13577_v47  ;;  %v4824_v47 = vld [vmem:[#allocation2 + $0x28] sm:$0x44]  ;;  %v9057_v62 = vunpack.i.h.bf16 %v12353_v51 }
 0x37b   : > { %5039 = vst [vmem:[#allocation2 + $0x28] sm:$0x88] %v5038_v29  ;;  %vm12378_vm15 = vmand %vm13622_vm8, %vm13621_vm0  ;;  %v3655_v11 = vsel %vm13625_vm4, %v9027_v36, %v3654_v54  ;;  %vm13627_vm0 = vcmask 1040856   ;;  %v7391_v28 = vsel %vm12365_vm5, %v7386_v55, %v7390_v60  ;;  %v4819_v8 = vsel %vm13630_vm1, %v9056_v63, %v4818_v0  ;;  %v5836_v63 = vld [vmem:[#allocation2 + $0x30] sm:$0x88] }
 0x37c   : > { %3656 = vst [vmem:[#allocation2 + $0x24] sm:$0x1] %v3655_v11  ;;  %vm12391_vm8 = vmand %vm13627_vm0, %vm13626_vm11  ;;  %v6785_v43 = vpop.permute.xlu0 %6784  ;;  %v4676_v22 = vld [vmem:[#allocation2 + $0x2c] sm:$0x2]  ;;  %vm13631_vm11 = vsmask.f32 7958  ;;  %vm13634_vm5 = vnez %v13583_v42 }
 0x37d   : > { %7392 = vst [vmem:[#allocation2 + $0x44] sm:$0x8] %v7391_v28  ;;  %v6790_v59 = vsel %vm12378_vm15, %v6785_v43, %v6789_v61  ;;  %vm12403_vm0 = vmand %vm5414_vm3, %vm13631_vm11  ;;  %v4677_v23 = vsel %vm13634_vm5, %v9052_v38, %v4676_v22  ;;  %vm13636_vm1 = vsmask.f32 2304  ;;  %vm13637_vm4 = vcmask 1042522  }
 0x37e   : > { %v4077_v41 = vld [vmem:[#allocation2 + $0x24] sm:$0x4]  ;;  %vm13635_vm13 = vmor %vm12349_vm9, %vm13580_vm6  ;;  %6791 = vst [vmem:[#allocation2 + $0x44] sm:$0x1] %v6790_v59  ;;  %vm13640_vm3 = vsmask.f32 7966 }
 0x37f   : > { %v4825_v24 = vsel %vm13635_vm13, %v4819_v8, %v4824_v47  ;;  %vm12416_vm15 = vmand %vm13637_vm4, %vm13636_vm1  ;;  %4678 = vst [vmem:[#allocation2 + $0x2c] sm:$0x2] %v4677_v23  ;;  %v4078_v4 = vsel %vm12296_vm12, %v9037_v53, %v4077_v41  ;;  %v12422_v42 = vpop.permute.xlu1 %9069  ;;  %vm13641_vm11 = vcmask 252935   ;;  %vm13644_vm9 = vsmask.f32 7946 }
 0x380   : > { %4826 = vst [vmem:[#allocation2 + $0x28] sm:$0x44] %v4825_v24  ;;  %vm12426_vm5 = vmand %vm13641_vm11, %vm13640_vm3  ;;  %vm13645_vm13 = vcmask 1042818   ;;  %vm5465_vm1 = vcmask 1041745   ;;  %v9071_v16 = vunpack.i.l.bf16 %v12422_v42  ;;  %v7166_v5 = vpop.permute.xlu0 %7165  ;;  %vm5221_vm12 = vcmask 356356  }
 0x381   : > { %4079 = vst [vmem:[#allocation2 + $0x24] sm:$0x4] %v4078_v4  ;;  %vm12433_vm4 = vmand %vm13645_vm13, %vm13644_vm9  ;;  %v7171_v19 = vsel %vm12416_vm15, %v7166_v5, %v7170_v6  ;;  %v4458_v35 = vld [vmem:[#allocation2 + $0x2c] sm:$0x1]  ;;  %vm13648_vm11 = vsmask.f32 7942  ;;  %v9072_v53 = vunpack.i.h.bf16 %v12422_v42 }
 0x382   : > { %v5086_v58 = vld [vmem:[#allocation2 + $0x2c] sm:$0x8]  ;;  %v5410_v14 = vrot.slane %v9071_v16, 4  ;;  %7172 = vst [vmem:[#allocation2 + $0x44] sm:$0x4] %v7171_v19  ;;  %v4459_v44 = vsel %vm12391_vm8, %v9047_v37, %v4458_v35  ;;  %vm12455_vm15 = vmand %vm5465_vm1, %vm13648_vm11  ;;  %vm13654_vm13 = vcmask 343040  }
 0x383   : > { %v5087_v39 = vsel %vm12335_vm14, %v9062_v10, %v5086_v58  ;;  %v13650_v13 = vsel %vm12455_vm15, 4294967295, %v13649_v13  ;;  %vm13651_vm14 = vsmask.f32 7954  ;;  %4460 = vst [vmem:[#allocation2 + $0x2c] sm:$0x1] %v4459_v44  ;;  %vm13656_vm11 = vcmask 218117  }
 0x384   : > { %5088 = vst [vmem:[#allocation2 + $0x2c] sm:$0x8] %v5087_v39  ;;  %v12459_v30 = vpop.permute.xlu1 %9079  ;;  %vm12463_vm9 = vmand %vm5221_vm12, %vm13651_vm14  ;;  %v5412_v46 = vsel %vm13654_vm13, %v9071_v16, %v5410_v14  ;;  %v12469_v48 = vpop.permute.xlu0 %9064  ;;  %vm13655_vm1 = vsmask.f32 7958  ;;  %vm13660_vm14 = vsmask.f32 7962 }
 0x385   : > { %v9081_v26 = vunpack.i.l.bf16 %v12459_v30  ;;  %vm12473_vm15 = vmand %vm13656_vm11, %vm13655_vm1  ;;  %v9066_v12 = vunpack.i.l.bf16 %v12469_v48  ;;  %vm13661_vm3 = vcmask 325638   ;;  %v13662_v49 = vmov 0  ;;  %v6214_v8 = vld [vmem:[#allocation2 + $0x38] sm:$0x22]  ;;  %v6636_v35 = vld [vmem:[#allocation2 + $0x38] sm:$0x88] }
 0x386   : > { %vm13659_vm12 = vmor %vm12403_vm0, %vm13562_vm2  ;;  %vm13665_vm13 = vcmask 1043707   ;;  %v13666_v36 = vmov 0  ;;  %vm13668_vm0 = vcmask 252928   ;;  %vm13670_vm1 = vcmask 1040736  }
 0x387   : > { %v5418_v17 = vsel %vm13659_vm12, %v5412_v46, %v5417_v45  ;;  %vm12486_vm8 = vmand %vm13661_vm3, %vm13660_vm14  ;;  %v4872_v52 = vld [vmem:[#allocation2 + $0x2c] sm:$0x4]  ;;  %v5829_v57 = vrot.slane %v9081_v26, 4  ;;  %vm13664_vm12 = vsmask.f32 7950  ;;  %v5217_v29 = vrot.slane %v9066_v12, 4 }
 0x388   : > { %v13663_v49 = vsel %vm12486_vm8, 4294967295, %v13662_v49  ;;  %5419 = vst [vmem:[#allocation2 + $0x30] sm:$0x22] %v5418_v17  ;;  %v4873_v51 = vsel %vm12433_vm4, %v9057_v62, %v4872_v52  ;;  %vm12498_vm10 = vmand %vm13665_vm13, %vm13664_vm12  ;;  %v12506_v31 = vpop.permute.xlu1 %9089  ;;  %vm13669_vm4 = vsmask.f32 7938  ;;  %v12520_v54 = vpop.permute.xlu0 %9074  ;;  %v13687_v28 = vmov 0 }
 0x389   : > { %v13667_v36 = vsel %vm12498_vm10, 4294967295, %v13666_v36  ;;  %4874 = vst [vmem:[#allocation2 + $0x2c] sm:$0x4] %v4873_v51  ;;  %v5831_v18 = vsel %vm13668_vm0, %v9081_v26, %v5829_v57  ;;  %vm12511_vm13 = vmand %vm13670_vm1, %vm13669_vm4  ;;  %v9091_v15 = vunpack.i.l.bf16 %v12506_v31  ;;  %vm13673_vm0 = vnez %v13509_v50  ;;  %v9137_v37 = vld [vmem:[#allocation2 + $0x20] ss:$8 sps:$4 sm:$0xff]  }
 0x38a   : > { %v13672_v3 = vsel %vm12511_vm13, 4294967295, %v13671_v3  ;;  %vm13674_vm11 = vmor %vm12426_vm5, %vm13673_vm0  ;;  %vm13675_vm1 = vcmask 359424   ;;  %v9076_v0 = vunpack.i.l.bf16 %v12520_v54  ;;  %vm13676_vm12 = vsmask.f32 7966  ;;  %v6046_v45 = vld [vmem:[#allocation2 + $0x38] sm:$0x11] }
 0x38b   : > { %v5837_v56 = vsel %vm13674_vm11, %v5831_v18, %v5836_v63  ;;  %v5219_v11 = vsel %vm13675_vm1, %v9066_v12, %v5217_v29  ;;  %vm13677_vm13 = vcmask 130055   ;;  %vm13680_vm14 = vmor %vm12463_vm9, %vm13565_vm7  ;;  %v6207_v38 = vrot.slane %v9091_v15, 4  ;;  %v7033_v57 = vld [vmem:[#allocation2 + $0x40] sm:$0x22] }
 0x38c   : > { %vm12531_vm10 = vmand %vm13677_vm13, %vm13676_vm12  ;;  %5838 = vst [vmem:[#allocation2 + $0x30] sm:$0x88] %v5837_v56  ;;  %v5225_v60 = vsel %vm13680_vm14, %v5219_v11, %v5224_v1  ;;  %vm13681_vm5 = vsmask.f32 7954  ;;  %vm13682_vm11 = vcmask 233476   ;;  %vm13686_vm13 = vcmask 1041625   ;;  %v12552_v43 = vpop.permute.xlu1 %9099 }
 0x38d   : > { %vm12542_vm1 = vmand %vm13682_vm11, %vm13681_vm5  ;;  %5226 = vst [vmem:[#allocation2 + $0x30] sm:$0x11] %v5225_v60  ;;  %vm13685_vm4 = vsmask.f32 7942  ;;  %v5625_v61 = vrot.slane %v9076_v0, 4  ;;  %vm13690_vm6 = vcmask 95237   ;;  %v9101_v27 = vunpack.i.l.bf16 %v12552_v43  ;;  %v12573_v23 = vpop.permute.xlu0 %9084 }
 0x38e   : > { %vm12548_vm12 = vmand %vm13686_vm13, %vm13685_vm4  ;;  %vm13689_vm14 = vsmask.f32 7958  ;;  %vm13693_vm11 = vcmask 220160   ;;  %vm13694_vm4 = vsmask.f32 7946  ;;  %vm13695_vm13 = vcmask 1042754  }
 0x38f   : > { %v13688_v28 = vsel %vm12548_vm12, 4294967295, %v13687_v28  ;;  %vm12556_vm8 = vmand %vm13690_vm6, %vm13689_vm14  ;;  %v6209_v47 = vsel %vm13693_vm11, %v9091_v15, %v6207_v38  ;;  %v13696_v59 = vmov 0  ;;  %vm6682_vm14 = vcmask 1043587   ;;  %v5467_v41 = vld [vmem:[#allocation2 + $0x34] sm:$0x2] }
 0x390   : > { %vm12564_vm12 = vmand %vm13695_vm13, %vm13694_vm4  ;;  %vm13699_vm4 = vcmask 326656   ;;  %v9086_v42 = vunpack.i.l.bf16 %v12573_v23  ;;  %vm13700_vm3 = vnez %v13650_v13  ;;  %vm13701_vm6 = vnez %v13663_v49  ;;  %v7025_v5 = vpop.permute.xlu1 %7024  ;;  %v9135_v58 = vld [vmem:[#allocation2 + $0x24] ss:$8 sps:$4 sm:$0xff]  }
 0x391   : > { %v13697_v59 = vsel %vm12564_vm12, 4294967295, %v13696_v59  ;;  %vm13698_vm11 = vmor %vm12473_vm15, %vm13562_vm2  ;;  %v5626_v4 = vsel %vm13699_vm4, %v9076_v0, %v5625_v61  ;;  %v5468_v34 = vsel %vm13700_vm3, %v9072_v53, %v5467_v41  ;;  %vm13702_vm15 = vnez %v13490_v25  ;;  %8394 = vmatprep.subr.bf16.mxu0 %v9135_v58  ;;  %8815 = vmatprep.subr.bf16.mxu1 %v9135_v58  ;;  %v6431_v0 = vld [vmem:[#allocation2 + $0x38] sm:$0x44]  ;;  %v7443_v61 = vld [vmem:[#allocation2 + $0x40] sm:$0x88] }
 0x392   : > { %v6215_v24 = vsel %vm13698_vm11, %v6209_v47, %v6214_v8  ;;  %vm13703_vm11 = vmor %vm13701_vm6, %vm13702_vm15  ;;  %v6630_v20 = vrot.slane %v9101_v27, 4  ;;  %5469 = vst [vmem:[#allocation2 + $0x34] sm:$0x2] %v5468_v34  ;;  %vm13704_vm9 = vsmask.f32 7950  ;;  %v13705_v16 = vmov 0  ;;  %8395 = vmatpush1.bf16.msra.mxu0 %v9137_v37  ;;  %8821 = vmatpush1.bf16.msra.mxu1 %v9137_v37 }
 0x393   : > { %6216 = vst [vmem:[#allocation2 + $0x38] sm:$0x22] %v6215_v24  ;;  %v5632_v10 = vsel %vm13703_vm11, %v5626_v4, %v5631_v33  ;;  %vm12599_vm5 = vmand %vm6682_vm14, %vm13704_vm9  ;;  %v6039_v6 = vrot.slane %v9086_v42, 4  ;;  %v9082_v19 = vunpack.i.h.bf16 %v12459_v30  ;;  %vm13707_vm3 = vcmask 130048   ;;  %v5889_v40 = vld [vmem:[#allocation2 + $0x34] sm:$0x8] }
 0x394   : > { %5633 = vst [vmem:[#allocation2 + $0x30] sm:$0x44] %v5632_v10  ;;  %v13706_v16 = vsel %vm12599_vm5, 4294967295, %v13705_v16  ;;  %v6631_v39 = vsel %vm13707_vm3, %v9101_v27, %v6630_v20  ;;  %v7026_v14 = vrot.slane %v7025_v5, 4  ;;  %vm13708_vm6 = vsmask.f32 7962  ;;  %v12611_v13 = vpop.permute.xlu0 %9094  ;;  %vm13712_vm9 = vmor %vm12531_vm10, %vm13673_vm0 }
 0x395   : > { %vm13709_vm11 = vcmask 202758   ;;  %v9067_v46 = vunpack.i.h.bf16 %v12469_v48  ;;  %v6637_v30 = vsel %vm13712_vm9, %v6631_v39, %v6636_v35  ;;  %vm13713_vm14 = vcmask 236544   ;;  %v5251_v12 = vld [vmem:[#allocation2 + $0x34] sm:$0x1]  ;;  %vm13723_vm9 = vmor %vm12542_vm1, %vm13565_vm7  ;;  %v7436_v15 = vpop.permute.xlu1 %7435  ;;  %v6844_v47 = vld [vmem:[#allocation2 + $0x40] sm:$0x11] }
 0x396   : > { %vm12607_vm4 = vmand %vm13709_vm11, %vm13708_vm6  ;;  %v6041_v26 = vsel %vm13713_vm14, %v9086_v42, %v6039_v6  ;;  %v9096_v9 = vunpack.i.l.bf16 %v12611_v13  ;;  %vm13714_vm3 = vsmask.f32 7966  ;;  %vm13715_vm6 = vcmask 64519   ;;  %6638 = vst [vmem:[#allocation2 + $0x38] sm:$0x88] %v6637_v30  ;;  %v13763_v30 = vld [vmem:[#allocation17_spill] sm:$0xff] }
 0x397   : > { %vm12623_vm11 = vmand %vm13715_vm6, %vm13714_vm3  ;;  %v13716_v62 = vmov 0  ;;  %vm13718_vm13 = vsmask.f32 7958  ;;  %vm13719_vm5 = vcmask 1045509   ;;  %v13720_v48 = vmov 0 }
 0x398   : > { %v13717_v62 = vsel %vm12623_vm11, 4294967295, %v13716_v62  ;;  %vm12629_vm12 = vmand %vm13719_vm5, %vm13718_vm13  ;;  %vm13722_vm10 = vnez %v13667_v36  ;;  %v6047_v49 = vsel %vm13723_vm9, %v6041_v26, %v6046_v45  ;;  %vm13724_vm14 = vcmask 97280   ;;  %v7762_v34 = vld [vmem:[#allocation2 + $0x48] sm:$0x2]  ;;  %v7227_v37 = vld [vmem:[#allocation2 + $0x40] sm:$0x44] }
 0x399   : > { %v13721_v48 = vsel %vm12629_vm12, 4294967295, %v13720_v48  ;;  %v5890_v17 = vsel %vm13722_vm10, %v9082_v19, %v5889_v40  ;;  %v7028_v52 = vsel %vm13724_vm14, %v7025_v5, %v7026_v14  ;;  %vm6425_vm3 = vcmask 203776   ;;  %6048 = vst [vmem:[#allocation2 + $0x38] sm:$0x11] %v6047_v49  ;;  %vm13734_vm9 = vmor %vm12556_vm8, %vm13562_vm2  ;;  %v12703_v41 = vpop.permute.xlu1 %9109  ;;  %v7555_v40 = vld [vmem:[#allocation2 + $0x48] sm:$0x1] }
 0x39a   : > { %vm13725_vm5 = vsmask.f32 7954  ;;  %vm13726_vm13 = vcmask 110596   ;;  %vm13729_vm10 = vsmask.f32 7966  ;;  %vm13730_vm12 = vcmask 1047559   ;;  %vm6430_vm14 = vmor %vm12607_vm4, %vm13702_vm15 }
 0x39b   : > { %vm12643_vm6 = vmand %vm13726_vm13, %vm13725_vm5  ;;  %v13731_v36 = vmov 0  ;;  %5891 = vst [vmem:[#allocation2 + $0x34] sm:$0x8] %v5890_v17  ;;  %vm13733_vm1 = vnez %v13672_v3  ;;  %v7034_v18 = vsel %vm13734_vm9, %v7028_v52, %v7033_v57  ;;  %v6424_v63 = vrot.slane %v9096_v9, 4  ;;  %v6836_v3 = vpop.permute.xlu0 %6835  ;;  %v6268_v1 = vld [vmem:[#allocation2 + $0x3c] sm:$0x2] }
 0x39c   : > { %vm12649_vm11 = vmand %vm13730_vm12, %vm13729_vm10  ;;  %v5252_v29 = vsel %vm13733_vm1, %v9067_v46, %v5251_v12  ;;  %vm7224_vm12 = vcmask 79878   ;;  %v9092_v56 = vunpack.i.h.bf16 %v12506_v31  ;;  %7035 = vst [vmem:[#allocation2 + $0x40] sm:$0x22] %v7034_v18  ;;  %vm13735_vm5 = vnez %v13717_v62  ;;  %v5679_v38 = vld [vmem:[#allocation2 + $0x34] sm:$0x4]  ;;  %v13804_v19 = vld [vmem:[#allocation11_spill] sm:$0xff] }
 0x39d   : > { %v13732_v36 = vsel %vm12649_vm11, 4294967295, %v13731_v36  ;;  %5253 = vst [vmem:[#allocation2 + $0x34] sm:$0x1] %v5252_v29  ;;  %vm7442_vm13 = vmor %vm13735_vm5, %vm13673_vm0  ;;  %v7437_v7 = vrot.slane %v7436_v15, 4  ;;  %v9077_v11 = vunpack.i.h.bf16 %v12520_v54  ;;  %v6426_v55 = vsel %vm6425_vm3, %v9096_v9, %v6424_v63  ;;  %v6684_v42 = vld [vmem:[#allocation2 + $0x3c] sm:$0x8]  ;;  %v9120_v39 = vpop.permute.xlu1 %9119 }
 0x39e   : > { %v6837_v31 = vrot.slane %v6836_v3, 4  ;;  %vm13736_vm9 = vnez %v13688_v28  ;;  %v6432_v54 = vsel %vm6430_vm14, %v6426_v55, %v6431_v0  ;;  %vm13737_vm10 = vcmask 64512   ;;  %vm13751_vm0 = vmor %vm12643_vm6, %vm13565_vm7  ;;  %v8141_v25 = vld [vmem:[#allocation2 + $0x48] sm:$0x8]  ;;  %v7927_v0 = vld [vmem:[#allocation2 + $0x48] sm:$0x4] }
 0x39f   : > { %v6269_v60 = vsel %vm13736_vm9, %v9092_v56, %v6268_v1  ;;  %v7438_v2 = vsel %vm13737_vm10, %v7436_v15, %v7437_v7  ;;  %vm13738_vm8 = vsmask.f32 7962  ;;  %vm13741_vm9 = vnez %v13697_v59  ;;  %6433 = vst [vmem:[#allocation2 + $0x38] sm:$0x44] %v6432_v54  ;;  %v7219_v4 = vpop.permute.xlu0 %7218  ;;  %v13766_v9 = vld [vmem:[#allocation20_spill] sm:$0xff] }
 0x3a0   : > { %vm12685_vm2 = vmand %vm7224_vm12, %vm13738_vm8  ;;  %6270 = vst [vmem:[#allocation2 + $0x3c] sm:$0x2] %v6269_v60  ;;  %v5680_v28 = vsel %vm13741_vm9, %v9077_v11, %v5679_v38  ;;  %vm6484_vm1 = vcmask 1042634   ;;  %v7444_v53 = vsel %vm7442_vm13, %v7438_v2, %v7443_v61  ;;  %vm13742_vm4 = vcmask 113664   ;;  %v6099_v20 = vld [vmem:[#allocation2 + $0x3c] sm:$0x1] }
 0x3a1   : > { %v6839_v8 = vsel %vm13742_vm4, %v6836_v3, %v6837_v31  ;;  %vm13743_vm14 = vsmask.f32 7942  ;;  %vm13744_vm12 = vcmask 1016833   ;;  %5681 = vst [vmem:[#allocation2 + $0x34] sm:$0x4] %v5680_v28  ;;  %v9102_v59 = vunpack.i.h.bf16 %v12552_v43  ;;  %vm7226_vm13 = vmor %vm12685_vm2, %vm13702_vm15  ;;  %v12775_v29 = vpop.permute.xlu1 %8285  ;;  %v13787_v28 = vld [vmem:[#allocation12_spill] sm:$0xff] }
 0x3a2   : > { %vm12699_vm8 = vmand %vm13744_vm12, %vm13743_vm14  ;;  %vm13747_vm10 = vsmask.f32 7938  ;;  %vm13748_vm9 = vcmask 1040616   ;;  %7445 = vst [vmem:[#allocation2 + $0x40] sm:$0x88] %v7444_v53  ;;  %v6845_v24 = vsel %vm13751_vm0, %v6839_v8, %v6844_v47  ;;  %v9111_v33 = vunpack.i.l.bf16 %v12703_v41 }
 0x3a3   : > { %vm12708_vm3 = vmand %vm13748_vm9, %vm13747_vm10  ;;  %vm8139_vm5 = vcmask 986115   ;;  %v9087_v43 = vunpack.i.h.bf16 %v12573_v23  ;;  %6846 = vst [vmem:[#allocation2 + $0x40] sm:$0x11] %v6845_v24  ;;  %v7220_v10 = vrot.slane %v7219_v4, 4  ;;  %vm7553_vm4 = vcmask 1032192   ;;  %v9105_v46 = vpop.permute.xlu0 %9104 }
 0x3a4   : > { %vm13752_vm14 = vnez %v13706_v16  ;;  %vm13753_vm7 = vsmask.f32 7946  ;;  %v9112_v23 = vunpack.i.h.bf16 %v12703_v41  ;;  %v7763_v5 = vsel %vm12699_vm8, %v9111_v33, %v7762_v34  ;;  %v8244_v7 = vld [vmem:[#allocation2 + $0x50] sm:$0x1]  ;;  %v7061_v22 = vld [vmem:[#allocation2 + $0x44] sm:$0x2] }
 0x3a5   : > { %v6685_v21 = vsel %vm13752_vm14, %v9102_v59, %v6684_v42  ;;  %vm12727_vm6 = vmand %vm6484_vm1, %vm13753_vm7  ;;  %v6100_v58 = vsel %vm12708_vm3, %v9087_v43, %v6099_v20  ;;  %7764 = vst [vmem:[#allocation2 + $0x48] sm:$0x2] %v7763_v5  ;;  %vm13756_vm12 = vcmask 80896   ;;  %vm13757_vm10 = vsmask.f32 7950  ;;  %v7057_v61 = vpop.permute.xlu1 %7056 }
 0x3a6   : > { %6686 = vst [vmem:[#allocation2 + $0x3c] sm:$0x8] %v6685_v21  ;;  %v7222_v16 = vsel %vm13756_vm12, %v7219_v4, %v7220_v10  ;;  %vm12739_vm9 = vmand %vm8139_vm5, %vm13757_vm10  ;;  %v9121_v14 = vunpack.i.l.bf16 %v9120_v39  ;;  %vm13760_vm1 = vsmask.f32 7938  ;;  %vm13764_vm8 = vnez %v13763_v30  ;;  %v6486_v62 = vld [vmem:[#allocation2 + $0x3c] sm:$0x4] }
 0x3a7   : > { %6101 = vst [vmem:[#allocation2 + $0x3c] sm:$0x1] %v6100_v58  ;;  %v7228_v35 = vsel %vm7226_vm13, %v7222_v16, %v7227_v37  ;;  %vm12750_vm3 = vmand %vm7553_vm4, %vm13760_vm1  ;;  %vm13765_vm0 = vnez %v13721_v48  ;;  %v9097_v45 = vunpack.i.h.bf16 %v12611_v13  ;;  %v9106_v26 = vunpack.i.l.bf16 %v9105_v46  ;;  %v9115_v63 = vpop.permute.xlu0 %9114  ;;  %v9140_v6 = vld [vmem:[#allocation2 + $0x30] ss:$8 sps:$4 sm:$0xff]  }
 0x3a8   : > { %7229 = vst [vmem:[#allocation2 + $0x40] sm:$0x44] %v7228_v35  ;;  %vm7925_vm15 = vcmask 1001474   ;;  %v7815_v17 = vrot.slane %v9112_v23, 4  ;;  %v9122_v12 = vunpack.i.h.bf16 %v9120_v39  ;;  %v8142_v49 = vsel %vm12739_vm9, %v9121_v14, %v8141_v25  ;;  %v13806_v39 = vld [vmem:[#allocation9_spill] sm:$0xff]  ;;  %v9146_v13 = vld [vmem:[%s12925_s2] sm:$0xff]  }
 0x3a9   : > { %vm7059_vm4 = vcmask 1041505   ;;  %v6487_v52 = vsel %vm12727_vm6, %v9097_v45, %v6486_v62  ;;  %8143 = vst [vmem:[#allocation2 + $0x48] sm:$0x8] %v8142_v49  ;;  %vm13768_vm14 = vsmask.f32 7954  ;;  %vm13769_vm7 = vcmask 1044484   ;;  %v7487_v43 = vpop.permute.xlu1 %7486 }
 0x3aa   : > { %vm12769_vm12 = vmand %vm13769_vm7, %vm13768_vm14  ;;  %v9107_v57 = vunpack.i.h.bf16 %v9105_v46  ;;  %v7556_v51 = vsel %vm12750_vm3, %v9106_v26, %v7555_v40  ;;  %vm8242_vm10 = vcmask 974848   ;;  %6488 = vst [vmem:[#allocation2 + $0x3c] sm:$0x4] %v6487_v52  ;;  %vm13772_vm9 = vsmask.f32 7946 }
 0x3ab   : > { %7557 = vst [vmem:[#allocation2 + $0x48] sm:$0x1] %v7556_v51  ;;  %vm12779_vm1 = vmand %vm7925_vm15, %vm13772_vm9  ;;  %v9116_v15 = vunpack.i.l.bf16 %v9115_v63  ;;  %vm13775_vm6 = vsmask.f32 7942  ;;  %vm7489_vm3 = vcmask 1043523   ;;  %vm13778_vm7 = vcmask 1022976   ;;  %v8240_v53 = vpop.permute.xlu0 %8239 }
 0x3ac   : > { %vm12784_vm14 = vmand %vm7059_vm4, %vm13775_vm6  ;;  %v7816_v3 = vsel %vm13778_vm7, %v7815_v17, %v9112_v23  ;;  %v7820_v1 = vld [vmem:[#allocation2 + $0x48] sm:$0x22]  ;;  %v8195_v11 = vrot.slane %v9122_v12, 4  ;;  %vm13779_vm13 = vsmask.f32 256  ;;  %vm6890_vm15 = vcmask 1040496  }
 0x3ad   : > { %vm12790_vm5 = vmand %vm8242_vm10, %vm13779_vm13  ;;  %vm13782_vm9 = vsmask.f32 7962  ;;  %vm13783_vm2 = vcmask 1046534   ;;  %v7606_v38 = vrot.slane %v9107_v57, 4  ;;  %v9117_v54 = vunpack.i.h.bf16 %v9115_v63  ;;  %v7491_v59 = vld [vmem:[#allocation2 + $0x44] sm:$0x8] }
 0x3ae   : > { %vm12796_vm11 = vmand %vm13783_vm2, %vm13782_vm9  ;;  %v7928_v2 = vsel %vm12779_vm1, %v9116_v15, %v7927_v0  ;;  %vm13788_vm13 = vnez %v13787_v28  ;;  %v7062_v48 = vsel %vm12784_vm14, %v7057_v61, %v7061_v22  ;;  %v8245_v47 = vsel %vm12790_vm5, %v8240_v53, %v8244_v7  ;;  %v6892_v21 = vld [vmem:[#allocation2 + $0x44] sm:$0x1] }
 0x3af   : > { %vm13786_vm4 = vmor %vm13765_vm0, %vm13764_vm8  ;;  %7929 = vst [vmem:[#allocation2 + $0x48] sm:$0x4] %v7928_v2  ;;  %vm13789_vm8 = vsmask.f32 7950  ;;  %vm13792_vm10 = vcmask 990208   ;;  %vm7275_vm14 = vcmask 1042514   ;;  %vm13796_vm5 = vnez %v13732_v36  ;;  %v6888_v20 = vpop.permute.xlu0 %6887 }
 0x3b0   : > { %v7821_v60 = vsel %vm13786_vm4, %v7816_v3, %v7820_v1  ;;  %vm7610_vm2 = vmor %vm12769_vm12, %vm13788_vm13  ;;  %7063 = vst [vmem:[#allocation2 + $0x44] sm:$0x2] %v7062_v48  ;;  %v8196_v27 = vsel %vm13792_vm10, %v8195_v11, %v9122_v12  ;;  %v8200_v41 = vld [vmem:[#allocation2 + $0x48] sm:$0x88]  ;;  %vm13793_vm1 = vsmask.f32 7938  ;;  %vm13797_vm7 = vnez %v13766_v9 }
 0x3b1   : > { %7822 = vst [vmem:[#allocation2 + $0x48] sm:$0x22] %v7821_v60  ;;  %vm12817_vm0 = vmand %vm7489_vm3, %vm13789_vm8  ;;  %vm13799_vm9 = vcmask 1039360   ;;  %v7980_v42 = vrot.slane %v9117_v54, 4  ;;  %v9138_v34 = vld [vmem:[#allocation2 + $0x34] ss:$8 sps:$4 sm:$0xff]   ;;  %vm13807_vm8 = vnez %v13806_v39 }
 0x3b2   : > { %8246 = vst [vmem:[#allocation2 + $0x50] sm:$0x1] %v8245_v47  ;;  %vm12824_vm6 = vmand %vm6890_vm15, %vm13793_vm1  ;;  %v7607_v33 = vsel %vm13799_vm9, %v7606_v38, %v9107_v57  ;;  %v7611_v4 = vld [vmem:[#allocation2 + $0x48] sm:$0x11]  ;;  %v7492_v36 = vsel %vm12817_vm0, %v7487_v43, %v7491_v59  ;;  %v13800_v23 = vld [vmem:[#allocation19_spill] sm:$0xff]  ;;  %v8287_v5 = vrot.slane %v12775_v29, 4  ;;  %8396 = vmatprep.subr.bf16.mxu0 %v9138_v34  ;;  %8816 = vmatprep.subr.bf16.mxu1 %v9138_v34 }
 0x3b3   : > { %vm13798_vm3 = vmor %vm13796_vm5, %vm13797_vm7  ;;  %v7612_v10 = vsel %vm7610_vm2, %v7607_v33, %v7611_v4  ;;  %vm13801_vm15 = vnez %v13800_v23  ;;  %7493 = vst [vmem:[#allocation2 + $0x44] sm:$0x8] %v7492_v36  ;;  %v6893_v58 = vsel %vm12824_vm6, %v6888_v20, %v6892_v21  ;;  %8397 = vmatpush1.bf16.msra.mxu0 %v9140_v6  ;;  %8822 = vmatpush1.bf16.msra.mxu1 %v9140_v6  ;;  %vm13802_vm12 = vsmask.f32 7946  ;;  %v7277_v14 = vld [vmem:[#allocation2 + $0x44] sm:$0x4]  ;;  %v7273_v44 = vpop.permute.xlu0 %7272 }
 0x3b4   : > { %v8201_v24 = vsel %vm13798_vm3, %v8196_v27, %v8200_v41  ;;  %vm7984_vm4 = vmor %vm12796_vm11, %vm13801_vm15  ;;  %7613 = vst [vmem:[#allocation2 + $0x48] sm:$0x11] %v7612_v10  ;;  %vm13803_vm2 = vcmask 1006592   ;;  %vm13805_vm11 = vnez %v13804_v19  ;;  %vm13808_vm10 = vcmask 982016  }
 0x3b5   : > { %8202 = vst [vmem:[#allocation2 + $0x48] sm:$0x88] %v8201_v24  ;;  %6894 = vst [vmem:[#allocation2 + $0x44] sm:$0x1] %v6893_v58  ;;  %v7981_v37 = vsel %vm13803_vm2, %v7980_v42, %v9117_v54  ;;  %v8288_v40 = vsel %vm13808_vm10, %v8287_v5, %v12775_v29  ;;  %vm13809_vm1 = vcmask 1040384   ;;  %vm13810_vm6 = vcmask 662528  }
 0x3b6   : > { %vm7276_vm13 = vmand %vm7275_vm14, %vm13802_vm12  ;;  %v7985_v16 = vld [vmem:[#allocation2 + $0x48] sm:$0x44]  ;;  %v8383_v62 = vsel %vm13809_vm1, 65535, %v9349_v32  ;;  %v9147_v32 = vld [vmem:[%s12925_s2 + $0x8] sm:$0xff]  }
 0x3b7   : > { %vm8290_vm0 = vmor %vm13807_vm8, %vm13805_vm11  ;;  %v7986_v35 = vsel %vm7984_vm4, %v7981_v37, %v7985_v16  ;;  %v7278_v30 = vsel %vm7276_vm13, %v7273_v44, %v7277_v14 }
 0x3b8   : > { %7987 = vst [vmem:[#allocation2 + $0x48] sm:$0x44] %v7986_v35  ;;  %7279 = vst [vmem:[#allocation2 + $0x44] sm:$0x4] %v7278_v30 }
 0x3b9   : > { %v8291_v46 = vld [vmem:[#allocation2 + $0x50] sm:$0x11]  ;;  %vm13811_vm14 = vmmov %vm13810_vm6 }
 0x3ba   : > { %v8292_v45 = vsel %vm8290_vm0, %v8288_v40, %v8291_v46 }
 0x3bb   : > { %8293 = vst [vmem:[#allocation2 + $0x50] sm:$0x11] %v8292_v45 }
 0x3bf   : > { %v9141_v25 = vld [vmem:[#allocation2 + $0x44] ss:$8 sps:$4 sm:$0xff]   ;;  %v9143_v26 = vld [vmem:[#allocation2 + $0x40] ss:$8 sps:$4 sm:$0xff]  }
 0x3c0   : > { %8398 = vmatprep.subr.bf16.mxu0 %v9141_v25  ;;  %8817 = vmatprep.subr.bf16.mxu1 %v9141_v25 }
 0x3c1   : > { %8399 = vmatpush1.bf16.msra.mxu0 %v9143_v26  ;;  %8823 = vmatpush1.bf16.msra.mxu1 %v9143_v26 }
 0x3c2   : > { %v8308_v9 = vld [vmem:[#allocation2 + $0x50] sm:$0x11] }
 0x3c3   : > { %v8804_v17 = vcombine.high %v8308_v9, %v8308_v9  ;;  %v8803_v12 = vcombine.low %v8308_v9, %v8308_v9 }
 0x3c5   : > { %v8388_v49 = vand.u32 %v8804_v17, %v8383_v62  ;;  %v8385_v52 = vand.u32 %v8803_v12, %v8383_v62 }
 0x3c7   : > { %8400 = vmatprep.subr.bf16.mxu0 %v8388_v49  ;;  %8818 = vmatprep.subr.bf16.mxu1 %v8388_v49 }
 0x3c8   : > { %8401 = vmatpush1.bf16.msra.mxu0 %v8385_v52  ;;  %8824 = vmatpush1.bf16.msra.mxu1 %v8385_v52 }
 0x3cb   : > { %8805 = vmatmul.mubr.msk.bf16.vlgmr.msra.gmra.mrb[0].mxu0 %vm13810_vm6, %v9146_v13  ;;  %8806 = vmatmul.mubr.msk.bf16.vlgmr.msra.gmra.mrb[0].mxu1 %vm13811_vm14, %v9147_v32 }
 0x49e   : > { %v8424_v57 = vpop.f32.mrb[0].mxu0  ;;  %v8434_v51 = vpop.f32.mrb[0].mxu1 }
 0x49f   : > { %8443 = vst [vmem:[%s242_s14] sm:$0xff] %v8424_v57  ;;  %8447 = vst [vmem:[%s242_s14 + $0x20] sm:$0xff] %v8434_v51  ;;  %v8426_v29 = vpop.f32.mrb[1].mxu0  ;;  %v8436_v18 = vpop.f32.mrb[1].mxu1 }
 0x4a0   : > { %8444 = vst [vmem:[%s242_s14 + $0x8] sm:$0xff] %v8426_v29  ;;  %8448 = vst [vmem:[%s242_s14 + $0x28] sm:$0xff] %v8436_v18  ;;  %v8428_v63 = vpop.f32.mrb[2].mxu0  ;;  %v8438_v15 = vpop.f32.mrb[2].mxu1 }
 0x4a1   : > { %8445 = vst [vmem:[%s242_s14 + $0x10] sm:$0xff] %v8428_v63  ;;  %8449 = vst [vmem:[%s242_s14 + $0x30] sm:$0xff] %v8438_v15  ;;  %v8430_v56 = vpop.f32.mrb[3].mxu0  ;;  %v8440_v7 = vpop.f32.mrb[3].mxu1 }
 0x4a2   : > { %8446 = vst [vmem:[%s242_s14 + $0x18] sm:$0xff] %v8430_v56  ;;  %8450 = vst [vmem:[%s242_s14 + $0x38] sm:$0xff] %v8440_v7 }
 0x4a3   : > { %9161 = shalt.err (!%p9158_p5)
}
 0x4a4   : > { %s9162_s21 = scalar_lea.hbm %s12874_s24, 1024  ;;  %s9166_s12 = scalar_lea.hbm %s12927_s4, 2048 }
 0x4a5   : > { %p9163_p6 = scmp.ne.s32.totalorder %s12874_s24, %s9162_s21  ;;  %p9167_p10 = scmp.lt.u32.totalorder %s12874_s24, %s12927_s4 }
 0x4a6   : > { %p9168_p11 = scmp.lt.u32.totalorder %s9166_s12, %s9162_s21  ;;  %p9170_p13 = scmp.lt.u32.totalorder %s9162_s21, %s12874_s24 }
 0x4a7   : > { %p9164_p7 = pnand %p9163_p6, %p9417_p4 }
 0x4a8   : > { %p9169_p12 = por %p9168_p11, %p9167_p10 }
 0x4a9   : > { %p9165_p9 = pneg %p9164_p7 }
 0x4aa   : > { %p9171_p0 = por %p9170_p13, %p9169_p12 }
 0x4ac   : > { %p9172_p1 = pnand %p9171_p0, %p9165_p9 }
 0x4ae   : > { %9175 = shalt.err (!%p9172_p1)
}
 0x4af   : > { %s9351_s11 = smov 256  }
 0x4b0   : > { %8825 = dma.vmem_to_hbm [thread:$0]  (%p9417_p4), %s12869_s29, 1024, %s12874_s24, %s12876_s18, %s9351_s11, %s9351_s11, %s13448_s30  }
 0x4b1 PF: > { %p8831_p2 = scmp.ge.s32.totalorder %s9226_s20, 2  ;;  %s8482_s7 = sand.u32 1, %s9206_s15  }
 0x4b2   : > { %s8483_s22 = scalar_lea.sflag [#allocation4], %s8482_s7 }
 0x4b3   : > { %p8828_p3 = pnand %p8831_p2, %p9424_p8 }
 0x4b5   : > { %9201 = dma.done.wait (!%p8828_p3), %s8483_s22, 1024  }
 0x4b6   : > { %9203 = vsyncadd (!%p8828_p3), %s8483_s22, 4294966272  ;;  %s17_s20 = sadd.s32 1, %s9226_s20   ;;  %s13812_s15 = smov %s9210_s16 }
 0x4b7   : > { %p14_p5 = scmp.ge.s32.totalorder %s17_s20, 4   ;;  %s13813_s16 = smov %s9214_s17 }
 0x4b8   : > { %s13814_s17 = smov %s9430_s28  ;;  %s13815_s18 = smov %s9222_s19 }
 0x4b9   : > { %s13816_s19 = smov %s13818_s23  ;;  %16 = sbr.rel (!%p14_p5) target bundleno = 4 (0x4), region = 74 }
 0x4c0   :  { %8488 = vsyncpa [#allocation4], 1 }
 0x4c1   :  { %8490 = vsyncpa [#allocation4 + $0x1], 1 }

</bundles_post_ra>
